<compile_context>
chip_gen: v5e
topology: v5e:2x2
jax: 0.10.0
libtpu: 0.0.40
codegen_flags: <defaults>
</compile_context>

<pallas_src>
import functools
import math

import jax
import jax.numpy as jnp
from jax.experimental import pallas as pl
from jax.experimental.pallas import tpu as pltpu

LEAKY_SLOPE = 0.2
BN_EPS = 1e-5
VMEM_LIMIT = 48 * 1024 * 1024  # headroom below v7x's 64 MiB physical VMEM


# ---------------------------------------------------------------------------
# Tiling helpers (block dims must be (8,128)-aligned or equal the full dim)
# ---------------------------------------------------------------------------
def _round_up(x, m):
    return ((x + m - 1) // m) * m


def _choose_m_tile(M, target=256):
    tm = target if M >= target else _round_up(M, 8)
    return tm, _round_up(M, tm)


def _choose_k_tile(K):
    for tk in (1024, 512, 384, 256, 128):
        if K % tk == 0:
            return tk
    return K  # full-K block (block dim == array dim is always legal)


def _choose_n_tile(N):
    for tn in (256, 128):
        if N % tn == 0:
            return tn
    return N


# ---------------------------------------------------------------------------
# Pallas kernels
# ---------------------------------------------------------------------------
def _mm_bias_act_kernel(x_ref, w_ref, b_ref, o_ref, acc_ref, *, act):
    """Tiled matmul + bias + activation (no BatchNorm)."""
    k = pl.program_id(2)

    @pl.when(k == 0)
    def _():
        acc_ref[...] = jnp.zeros_like(acc_ref)

    acc_ref[...] += jnp.dot(x_ref[...], w_ref[...],
                            preferred_element_type=jnp.float32)

    @pl.when(k == pl.num_programs(2) - 1)
    def _():
        y = acc_ref[...] + b_ref[...]
        if act == "leaky":
            y = jnp.where(y > 0, y, LEAKY_SLOPE * y)
        elif act == "sigmoid":
            y = 1.0 / (1.0 + jnp.exp(-y))
        o_ref[...] = y.astype(o_ref.dtype)


def _mm_bias_stats_kernel(x_ref, w_ref, b_ref, o_ref, stats_ref, acc_ref, *,
                          tm, m_valid):
    """Tiled matmul + bias; accumulates per-channel [sum, sum_sq] over M."""
    i = pl.program_id(1)
    k = pl.program_id(2)

    @pl.when(k == 0)
    def _():
        acc_ref[...] = jnp.zeros_like(acc_ref)

    @pl.when((i == 0) & (k == 0))
    def _():
        stats_ref[...] = jnp.zeros_like(stats_ref)

    acc_ref[...] += jnp.dot(x_ref[...], w_ref[...],
                            preferred_element_type=jnp.float32)

    @pl.when(k == pl.num_programs(2) - 1)
    def _():
        y = acc_ref[...] + b_ref[...]
        o_ref[...] = y.astype(o_ref.dtype)
        if m_valid is not None:  # mask rows that are only M-padding
            rows = jax.lax.broadcasted_iota(jnp.int32, y.shape, 0) + i * tm
            keep = rows < m_valid
            ys = jnp.where(keep, y, 0.0)
            ysq = jnp.where(keep, y * y, 0.0)
        else:
            ys, ysq = y, y * y
        upd = jnp.concatenate(
            [jnp.sum(ys, axis=0, keepdims=True),
             jnp.sum(ysq, axis=0, keepdims=True)], axis=0)
        stats_ref[...] = stats_ref[...] + upd


def _bn_leaky_kernel(y_ref, s_ref, g_ref, beta_ref, o_ref, *, inv_m):
    """Apply train-mode BatchNorm (from accumulated stats) + LeakyReLU."""
    s = s_ref[...]
    mean = s[0:1, :] * inv_m
    var = jnp.maximum(s[1:2, :] * inv_m - mean * mean, 0.0)  # biased variance
    scale = g_ref[...] * jax.lax.rsqrt(var + BN_EPS)
    shift = beta_ref[...] - mean * scale
    y = y_ref[...] * scale + shift
    y = jnp.where(y > 0, y, LEAKY_SLOPE * y)
    o_ref[...] = y.astype(o_ref.dtype)


# ---------------------------------------------------------------------------
# Kernel wrappers
# ---------------------------------------------------------------------------
def fused_matmul(x, w, b, *, act="none", compute_stats=False,
                 out_dtype=jnp.bfloat16):
    """y(Mp,N) = x(M,K) @ w(K,N) + b with f32 accumulation on the MXU.

    Optionally returns per-column (2,N) [sum, sum_sq] stats for two-pass BN.
    Rows are padded to a multiple of the M tile; caller slices them back off.
    """
    M, K = x.shape
    K2, N = w.shape
    assert K == K2
    tm, mp = _choose_m_tile(M)
    tk = _choose_k_tile(K)
    tn = _choose_n_tile(N)
    if mp != M:
        x = jnp.pad(x, ((0, mp - M), (0, 0)))
    grid = (N // tn, mp // tm, K // tk)

    x_spec = pl.BlockSpec((tm, tk), lambda j, i, k: (i, k))
    w_spec = pl.BlockSpec((tk, tn), lambda j, i, k: (k, j))
    b_spec = pl.BlockSpec((1, tn), lambda j, i, k: (0, j))
    y_spec = pl.BlockSpec((tm, tn), lambda j, i, k: (i, j))

    bytes_accessed = (mp * K + K * N) * 2 + mp * N * jnp.dtype(out_dtype).itemsize
    cost = pl.CostEstimate(
        flops=2 * mp * N * K,
        transcendentals=mp * N if act == "sigmoid" else 0,
        bytes_accessed=int(bytes_accessed))

    x = x.astype(jnp.bfloat16)
    w = w.astype(jnp.bfloat16)
    b = b.reshape(1, N).astype(jnp.float32)

    if compute_stats:
        kern = functools.partial(_mm_bias_stats_kernel, tm=tm,
                                 m_valid=M if mp != M else None)
        return pl.pallas_call(
            kern,
            grid=grid,
            in_specs=[x_spec, w_spec, b_spec],
            out_specs=(y_spec, pl.BlockSpec((2, tn), lambda j, i, k: (0, j))),
            out_shape=(jax.ShapeDtypeStruct((mp, N), out_dtype),
                       jax.ShapeDtypeStruct((2, N), jnp.float32)),
            scratch_shapes=[pltpu.VMEM((tm, tn), jnp.float32)],
            compiler_params=pltpu.CompilerParams(
                dimension_semantics=("parallel", "arbitrary", "arbitrary"),
                vmem_limit_bytes=VMEM_LIMIT),
            cost_estimate=cost,
        )(x, w, b)

    kern = functools.partial(_mm_bias_act_kernel, act=act)
    return pl.pallas_call(
        kern,
        grid=grid,
        in_specs=[x_spec, w_spec, b_spec],
        out_specs=y_spec,
        out_shape=jax.ShapeDtypeStruct((mp, N), out_dtype),
        scratch_shapes=[pltpu.VMEM((tm, tn), jnp.float32)],
        compiler_params=pltpu.CompilerParams(
            dimension_semantics=("parallel", "parallel", "arbitrary"),
            vmem_limit_bytes=VMEM_LIMIT),
        cost_estimate=cost,
    )(x, w, b)


def bn_leaky_apply(y, stats, gamma, beta, *, m_true, out_dtype=jnp.bfloat16):
    """Second BN pass: tiled per-channel scale/shift + LeakyReLU."""
    mp, N = y.shape
    tm, _ = _choose_m_tile(mp)
    assert mp % tm == 0
    kern = functools.partial(_bn_leaky_kernel, inv_m=1.0 / float(m_true))
    return pl.pallas_call(
        kern,
        grid=(mp // tm,),
        in_specs=[pl.BlockSpec((tm, N), lambda i: (i, 0)),
                  pl.BlockSpec((2, N), lambda i: (0, 0)),
                  pl.BlockSpec((1, N), lambda i: (0, 0)),
                  pl.BlockSpec((1, N), lambda i: (0, 0))],
        out_specs=pl.BlockSpec((tm, N), lambda i: (i, 0)),
        out_shape=jax.ShapeDtypeStruct((mp, N), out_dtype),
        compiler_params=pltpu.CompilerParams(
            dimension_semantics=("parallel",),
            vmem_limit_bytes=VMEM_LIMIT),
    )(y, stats,
      gamma.reshape(1, N).astype(jnp.float32),
      beta.reshape(1, N).astype(jnp.float32))


# ---------------------------------------------------------------------------
# im2col glue (3x3 kernel, padding=1) -- plain JAX slice/stack on bf16
# ---------------------------------------------------------------------------
def im2col(x_nhwc, stride):
    N, H, W, C = x_nhwc.shape
    xp = jnp.pad(x_nhwc, ((0, 0), (1, 1), (1, 1), (0, 0)))
    Ho = (H + 2 - 3) // stride + 1
    Wo = (W + 2 - 3) // stride + 1
    taps = []
    for dh in range(3):
        for dw in range(3):
            taps.append(xp[:, dh: dh + stride * (Ho - 1) + 1: stride,
                              dw: dw + stride * (Wo - 1) + 1: stride, :])
    # (N, Ho, Wo, 9, C): kernel-position-major then channel -> matches the
    # (3, 3, Cin, Cout).reshape(9*Cin, Cout) weight layout.
    cols = jnp.stack(taps, axis=-2)
    return cols.reshape(N * Ho * Wo, 9 * C), (N, Ho, Wo)


# ---------------------------------------------------------------------------
# Parameters (synthetic) and forward pass
# ---------------------------------------------------------------------------
# (Cin, Cout, stride, has_bn) -- mirrors the nn.Sequential in Discriminator
def conv_configs(num_channels):
    return [
        (num_channels, 64, 1, False),
        (64, 64, 2, True),
        (64, 128, 1, True),
        (128, 128, 2, True),
        (128, 256, 1, True),
        (256, 256, 2, True),
        (256, 512, 1, True),
        (512, 512, 2, True),
    ]


def init_params(key, num_channels, H, W):
    params = {"convs": []}
    for cin, cout, _, _ in conv_configs(num_channels):
        key, k1, k2, k3, k4 = jax.random.split(key, 5)
        w = (jax.random.normal(k1, (3, 3, cin, cout), jnp.float32) * 0.05
             ).reshape(9 * cin, cout)
        b = jax.random.normal(k2, (cout,), jnp.float32) * 0.05
        g = 1.0 + 0.1 * jax.random.normal(k3, (cout,), jnp.float32)
        beta = 0.1 * jax.random.normal(k4, (cout,), jnp.float32)
        params["convs"].append((w, b, g, beta))

    fc_in = 512 * math.ceil(H / 16) * math.ceil(W / 16)
    key, k1, k2, k3, k4 = jax.random.split(key, 5)
    params["fc1"] = (jax.random.normal(k1, (fc_in, 1024), jnp.float32) * 0.02,
                     jax.random.normal(k2, (1024,), jnp.float32) * 0.02)
    params["fc2"] = (jax.random.normal(k3, (1024, 1), jnp.float32) * 0.02,
                     jax.random.normal(k4, (1,), jnp.float32) * 0.02)
    return params


def make_forward(num_channels):
    cfgs = conv_configs(num_channels)  # static (strides / has_bn) config

    @jax.jit
    def forward(x_nchw, params):
        x = jnp.transpose(x_nchw, (0, 2, 3, 1)).astype(jnp.bfloat16)  # -> NHWC

        for (_, _, stride, has_bn), (w, b, g, beta) in zip(cfgs,
                                                           params["convs"]):
            cols, (N, Ho, Wo) = im2col(x, stride)
            M = cols.shape[0]
            if has_bn:
                y, stats = fused_matmul(cols, w, b, act="none",
                                        compute_stats=True,
                                        out_dtype=jnp.float32)
                y = bn_leaky_apply(y, stats, g, beta, m_true=M)
            else:
                y = fused_matmul(cols, w, b, act="leaky",
                                 out_dtype=jnp.bfloat16)
            x = y[:M].reshape(N, Ho, Wo, -1)

        # Flatten exactly like the PyTorch Flatten (NCHW-ordered view).
        N, Ho, Wo, C = x.shape
        flat = jnp.transpose(x, (0, 3, 1, 2)).reshape(N, C * Ho * Wo)

        w1, b1 = params["fc1"]
        h = fused_matmul(flat, w1, b1, act="leaky",
                         out_dtype=jnp.bfloat16)[:N]

        # fc2 (1024 -> 1) + Sigmoid: lane-dense padded 128-wide matmul,
        # real result lives in column 0.
        w2, b2 = params["fc2"]
        w2p = jnp.zeros((w2.shape[0], 128), jnp.float32).at[:, :1].set(w2)
        b2p = jnp.zeros((128,), jnp.float32).at[:1].set(b2)
        out = fused_matmul(h, w2p, b2p, act="sigmoid", out_dtype=jnp.float32)
        return out[:N, :1]

    return forward


if __name__ == "__main__":
    # Small shapes: H=W=16 => after four stride-2 convs spatial is 1x1, so the
    # first Linear sees 512 * ceil(16/16) * ceil(16/16) = 512 features.
    B, C_IN, H, W = 2, 4, 16, 16
    key = jax.random.PRNGKey(0)
    k_x, k_p = jax.random.split(key)
    x = jax.random.normal(k_x, (B, C_IN, H, W), jnp.float32)
    params = init_params(k_p, C_IN, H, W)

    forward = make_forward(C_IN)
    out = forward(x, params)
    out = jax.block_until_ready(out)

    assert out.shape == (B, 1)
    assert bool(jnp.all((out > 0.0) & (out < 1.0)))
    print("KERNEL_OK")
</pallas_src>

<mosaic_0001>
module attributes {stable_mosaic.version = 11 : i64} {
  func.func @_mm_bias_act_kernel(%arg0: i32, %arg1: i32, %arg2: i32, %arg3: memref<256x36xbf16, #tpu.memory_space<vmem>>, %arg4: memref<36x64xbf16, #tpu.memory_space<vmem>>, %arg5: memref<1x64xf32, #tpu.memory_space<vmem>>, %arg6: memref<256x64xbf16, #tpu.memory_space<vmem>>, %arg7: memref<256x64xf32, #tpu.memory_space<vmem>>) attributes {dimension_semantics = [#tpu.dimension_semantics<parallel>, #tpu.dimension_semantics<parallel>, #tpu.dimension_semantics<arbitrary>], iteration_bounds = array<i64: 1, 2, 1>, scalar_prefetch = 0 : i64, scratch_operands = 1 : i64, tpu.core_type = #tpu.core_type<tc>, window_params = [{transform_indices = @transform_0, window_bounds = array<i64: 256, 36>}, {transform_indices = @transform_1, window_bounds = array<i64: 36, 64>}, {transform_indices = @transform_2, window_bounds = array<i64: 1, 64>}, {transform_indices = @transform_3, window_bounds = array<i64: 256, 64>}]} {
    %c0_i32 = arith.constant 0 : i32
    %0 = arith.cmpi eq, %arg2, %c0_i32 : i32
    %1 = arith.extui %0 : i1 to i32
    %c0_i32_0 = arith.constant 0 : i32
    %2 = arith.cmpi ne, %1, %c0_i32_0 : i32
    scf.if %2 {
      %cst_10 = arith.constant 0.000000e+00 : f32
      %12 = vector.broadcast %cst_10 : f32 to vector<256x64xf32>
      %c0_11 = arith.constant 0 : index
      %c0_12 = arith.constant 0 : index
      %13 = vector.load %arg7[%c0_11, %c0_12] : memref<256x64xf32, #tpu.memory_space<vmem>>, vector<256x64xf32>
      tpu.vector_store %arg7[%c0_11, %c0_12], %12 {strides = array<i32>} : memref<256x64xf32, #tpu.memory_space<vmem>>, vector<256x64xf32>,
    } else {
    }
    %c0 = arith.constant 0 : index
    %c0_1 = arith.constant 0 : index
    %3 = vector.load %arg7[%c0, %c0_1] : memref<256x64xf32, #tpu.memory_space<vmem>>, vector<256x64xf32>
    %c0_2 = arith.constant 0 : index
    %c0_3 = arith.constant 0 : index
    %4 = vector.load %arg3[%c0_2, %c0_3] : memref<256x36xbf16, #tpu.memory_space<vmem>>, vector<256x36xbf16>
    %c0_4 = arith.constant 0 : index
    %c0_5 = arith.constant 0 : index
    %5 = vector.load %arg4[%c0_4, %c0_5] : memref<36x64xbf16, #tpu.memory_space<vmem>>, vector<36x64xbf16>
    %cst = arith.constant dense<0.000000e+00> : vector<256x64xf32>
    %6 = tpu.matmul %4, %5, %cst {dimension_numbers = #tpu.dot_dimension_numbers<[1], [0], [0], [1], [0, 0, 1, 1], [], []>} : vector<256x36xbf16>, vector<36x64xbf16>, vector<256x64xf32> -> vector<256x64xf32>
    %7 = arith.addf %3, %6 : vector<256x64xf32>
    %c0_6 = arith.constant 0 : index
    %c0_7 = arith.constant 0 : index
    %8 = vector.load %arg7[%c0_6, %c0_7] : memref<256x64xf32, #tpu.memory_space<vmem>>, vector<256x64xf32>
    tpu.vector_store %arg7[%c0_6, %c0_7], %7 {strides = array<i32>} : memref<256x64xf32, #tpu.memory_space<vmem>>, vector<256x64xf32>,
    %c0_i32_8 = arith.constant 0 : i32
    %9 = arith.cmpi eq, %arg2, %c0_i32_8 : i32
    %10 = arith.extui %9 : i1 to i32
    %c0_i32_9 = arith.constant 0 : i32
    %11 = arith.cmpi ne, %10, %c0_i32_9 : i32
    scf.if %11 {
      %c0_10 = arith.constant 0 : index
      %c0_11 = arith.constant 0 : index
      %12 = vector.load %arg7[%c0_10, %c0_11] : memref<256x64xf32, #tpu.memory_space<vmem>>, vector<256x64xf32>
      %c0_12 = arith.constant 0 : index
      %c0_13 = arith.constant 0 : index
      %13 = vector.load %arg5[%c0_12, %c0_13] : memref<1x64xf32, #tpu.memory_space<vmem>>, vector<1x64xf32>
      %14 = vector.broadcast %13 : vector<1x64xf32> to vector<256x64xf32>
      %15 = arith.addf %12, %14 : vector<256x64xf32>
      %cst_14 = arith.constant 0.000000e+00 : f32
      %16 = vector.broadcast %cst_14 : f32 to vector<256x64xf32>
      %17 = arith.cmpf ogt, %15, %16 : vector<256x64xf32>
      %cst_15 = arith.constant 2.000000e-01 : f32
      %18 = vector.broadcast %cst_15 : f32 to vector<256x64xf32>
      %19 = arith.mulf %18, %15 : vector<256x64xf32>
      %20 = arith.select %17, %15, %19 : vector<256x64xi1>, vector<256x64xf32>
      %21 = arith.truncf %20 : vector<256x64xf32> to vector<256x64xbf16>
      %c0_16 = arith.constant 0 : index
      %c0_17 = arith.constant 0 : index
      %22 = vector.load %arg6[%c0_16, %c0_17] : memref<256x64xbf16, #tpu.memory_space<vmem>>, vector<256x64xbf16>
      tpu.vector_store %arg6[%c0_16, %c0_17], %21 {strides = array<i32>} : memref<256x64xbf16, #tpu.memory_space<vmem>>, vector<256x64xbf16>,
    } else {
    }
    return
  }
  func.func @transform_0(%arg0: i32, %arg1: i32, %arg2: i32) -> (i32, i32) {
    %c0_i32 = arith.constant 0 : i32
    return %arg1, %arg2 : i32, i32
  }
  func.func @transform_1(%arg0: i32, %arg1: i32, %arg2: i32) -> (i32, i32) {
    %c0_i32 = arith.constant 0 : i32
    return %arg2, %arg0 : i32, i32
  }
  func.func @transform_2(%arg0: i32, %arg1: i32, %arg2: i32) -> (i32, i32) {
    %c0_i32 = arith.constant 0 : i32
    %c0_i32_0 = arith.constant 0 : i32
    return %c0_i32, %arg0 : i32, i32
  }
  func.func @transform_3(%arg0: i32, %arg1: i32, %arg2: i32) -> (i32, i32) {
    %c0_i32 = arith.constant 0 : i32
    return %arg1, %arg0 : i32, i32
  }
}

module attributes {stable_mosaic.version = 11 : i64} {
  func.func @_mm_bias_stats_kernel(%arg0: i32, %arg1: i32, %arg2: i32, %arg3: memref<128x576xbf16, #tpu.memory_space<vmem>>, %arg4: memref<576x64xbf16, #tpu.memory_space<vmem>>, %arg5: memref<1x64xf32, #tpu.memory_space<vmem>>, %arg6: memref<128x64xf32, #tpu.memory_space<vmem>>, %arg7: memref<2x64xf32, #tpu.memory_space<vmem>>, %arg8: memref<128x64xf32, #tpu.memory_space<vmem>>) attributes {dimension_semantics = [#tpu.dimension_semantics<parallel>, #tpu.dimension_semantics<arbitrary>, #tpu.dimension_semantics<arbitrary>], iteration_bounds = array<i64: 1, 1, 1>, scalar_prefetch = 0 : i64, scratch_operands = 1 : i64, tpu.core_type = #tpu.core_type<tc>, window_params = [{transform_indices = @transform_0, window_bounds = array<i64: 128, 576>}, {transform_indices = @transform_1, window_bounds = array<i64: 576, 64>}, {transform_indices = @transform_2, window_bounds = array<i64: 1, 64>}, {transform_indices = @transform_3, window_bounds = array<i64: 128, 64>}, {transform_indices = @transform_4, window_bounds = array<i64: 2, 64>}]} {
    %c0_i32 = arith.constant 0 : i32
    %0 = arith.cmpi eq, %arg2, %c0_i32 : i32
    %1 = arith.extui %0 : i1 to i32
    %c0_i32_0 = arith.constant 0 : i32
    %2 = arith.cmpi ne, %1, %c0_i32_0 : i32
    scf.if %2 {
      %cst_13 = arith.constant 0.000000e+00 : f32
      %17 = vector.broadcast %cst_13 : f32 to vector<128x64xf32>
      %c0_14 = arith.constant 0 : index
      %c0_15 = arith.constant 0 : index
      %18 = vector.load %arg8[%c0_14, %c0_15] : memref<128x64xf32, #tpu.memory_space<vmem>>, vector<128x64xf32>
      tpu.vector_store %arg8[%c0_14, %c0_15], %17 {strides = array<i32>} : memref<128x64xf32, #tpu.memory_space<vmem>>, vector<128x64xf32>,
    } else {
    }
    %c0_i32_1 = arith.constant 0 : i32
    %3 = arith.cmpi eq, %arg1, %c0_i32_1 : i32
    %c0_i32_2 = arith.constant 0 : i32
    %4 = arith.cmpi eq, %arg2, %c0_i32_2 : i32
    %5 = arith.andi %3, %4 : i1
    %6 = arith.extui %5 : i1 to i32
    %c0_i32_3 = arith.constant 0 : i32
    %7 = arith.cmpi ne, %6, %c0_i32_3 : i32
    scf.if %7 {
      %cst_13 = arith.constant 0.000000e+00 : f32
      %17 = vector.broadcast %cst_13 : f32 to vector<2x64xf32>
      %c0_14 = arith.constant 0 : index
      %c0_15 = arith.constant 0 : index
      %18 = vector.load %arg7[%c0_14, %c0_15] : memref<2x64xf32, #tpu.memory_space<vmem>>, vector<2x64xf32>
      tpu.vector_store %arg7[%c0_14, %c0_15], %17 {strides = array<i32>} : memref<2x64xf32, #tpu.memory_space<vmem>>, vector<2x64xf32>,
    } else {
    }
    %c0 = arith.constant 0 : index
    %c0_4 = arith.constant 0 : index
    %8 = vector.load %arg8[%c0, %c0_4] : memref<128x64xf32, #tpu.memory_space<vmem>>, vector<128x64xf32>
    %c0_5 = arith.constant 0 : index
    %c0_6 = arith.constant 0 : index
    %9 = vector.load %arg3[%c0_5, %c0_6] : memref<128x576xbf16, #tpu.memory_space<vmem>>, vector<128x576xbf16>
    %c0_7 = arith.constant 0 : index
    %c0_8 = arith.constant 0 : index
    %10 = vector.load %arg4[%c0_7, %c0_8] : memref<576x64xbf16, #tpu.memory_space<vmem>>, vector<576x64xbf16>
    %cst = arith.constant dense<0.000000e+00> : vector<128x64xf32>
    %11 = tpu.matmul %9, %10, %cst {dimension_numbers = #tpu.dot_dimension_numbers<[1], [0], [0], [1], [0, 0, 1, 1], [], []>} : vector<128x576xbf16>, vector<576x64xbf16>, vector<128x64xf32> -> vector<128x64xf32>
    %12 = arith.addf %8, %11 : vector<128x64xf32>
    %c0_9 = arith.constant 0 : index
    %c0_10 = arith.constant 0 : index
    %13 = vector.load %arg8[%c0_9, %c0_10] : memref<128x64xf32, #tpu.memory_space<vmem>>, vector<128x64xf32>
    tpu.vector_store %arg8[%c0_9, %c0_10], %12 {strides = array<i32>} : memref<128x64xf32, #tpu.memory_space<vmem>>, vector<128x64xf32>,
    %c0_i32_11 = arith.constant 0 : i32
    %14 = arith.cmpi eq, %arg2, %c0_i32_11 : i32
    %15 = arith.extui %14 : i1 to i32
    %c0_i32_12 = arith.constant 0 : i32
    %16 = arith.cmpi ne, %15, %c0_i32_12 : i32
    scf.if %16 {
      %c0_13 = arith.constant 0 : index
      %c0_14 = arith.constant 0 : index
      %17 = vector.load %arg8[%c0_13, %c0_14] : memref<128x64xf32, #tpu.memory_space<vmem>>, vector<128x64xf32>
      %c0_15 = arith.constant 0 : index
      %c0_16 = arith.constant 0 : index
      %18 = vector.load %arg5[%c0_15, %c0_16] : memref<1x64xf32, #tpu.memory_space<vmem>>, vector<1x64xf32>
      %19 = vector.broadcast %18 : vector<1x64xf32> to vector<128x64xf32>
      %20 = arith.addf %17, %19 : vector<128x64xf32>
      %c0_17 = arith.constant 0 : index
      %c0_18 = arith.constant 0 : index
      %21 = vector.load %arg6[%c0_17, %c0_18] : memref<128x64xf32, #tpu.memory_space<vmem>>, vector<128x64xf32>
      tpu.vector_store %arg6[%c0_17, %c0_18], %20 {strides = array<i32>} : memref<128x64xf32, #tpu.memory_space<vmem>>, vector<128x64xf32>,
      %22 = arith.mulf %20, %20 : vector<128x64xf32>
      %cst_19 = arith.constant dense<0.000000e+00> : vector<64xf32>
      %23 = vector.multi_reduction <add>, %20, %cst_19 [0] : vector<128x64xf32> to vector<64xf32>
      %24 = vector.shape_cast %23 : vector<64xf32> to vector<1x64xf32>
      %cst_20 = arith.constant dense<0.000000e+00> : vector<64xf32>
      %25 = vector.multi_reduction <add>, %22, %cst_20 [0] : vector<128x64xf32> to vector<64xf32>
      %26 = vector.shape_cast %25 : vector<64xf32> to vector<1x64xf32>
      %27 = tpu.concatenate %24, %26 in 0 : vector<1x64xf32>, vector<1x64xf32> -> vector<2x64xf32>
      %c0_21 = arith.constant 0 : index
      %c0_22 = arith.constant 0 : index
      %28 = vector.load %arg7[%c0_21, %c0_22] : memref<2x64xf32, #tpu.memory_space<vmem>>, vector<2x64xf32>
      %29 = arith.addf %28, %27 : vector<2x64xf32>
      %c0_23 = arith.constant 0 : index
      %c0_24 = arith.constant 0 : index
      %30 = vector.load %arg7[%c0_23, %c0_24] : memref<2x64xf32, #tpu.memory_space<vmem>>, vector<2x64xf32>
      tpu.vector_store %arg7[%c0_23, %c0_24], %29 {strides = array<i32>} : memref<2x64xf32, #tpu.memory_space<vmem>>, vector<2x64xf32>,
    } else {
    }
    return
  }
  func.func @transform_0(%arg0: i32, %arg1: i32, %arg2: i32) -> (i32, i32) {
    %c0_i32 = arith.constant 0 : i32
    return %arg1, %arg2 : i32, i32
  }
  func.func @transform_1(%arg0: i32, %arg1: i32, %arg2: i32) -> (i32, i32) {
    %c0_i32 = arith.constant 0 : i32
    return %arg2, %arg0 : i32, i32
  }
  func.func @transform_2(%arg0: i32, %arg1: i32, %arg2: i32) -> (i32, i32) {
    %c0_i32 = arith.constant 0 : i32
    %c0_i32_0 = arith.constant 0 : i32
    return %c0_i32, %arg0 : i32, i32
  }
  func.func @transform_3(%arg0: i32, %arg1: i32, %arg2: i32) -> (i32, i32) {
    %c0_i32 = arith.constant 0 : i32
    return %arg1, %arg0 : i32, i32
  }
  func.func @transform_4(%arg0: i32, %arg1: i32, %arg2: i32) -> (i32, i32) {
    %c0_i32 = arith.constant 0 : i32
    %c0_i32_0 = arith.constant 0 : i32
    return %c0_i32, %arg0 : i32, i32
  }
}

module attributes {stable_mosaic.version = 11 : i64} {
  func.func @_bn_leaky_kernel(%arg0: i32, %arg1: memref<128x64xf32, #tpu.memory_space<vmem>>, %arg2: memref<2x64xf32, #tpu.memory_space<vmem>>, %arg3: memref<1x64xf32, #tpu.memory_space<vmem>>, %arg4: memref<1x64xf32, #tpu.memory_space<vmem>>, %arg5: memref<128x64xbf16, #tpu.memory_space<vmem>>) attributes {dimension_semantics = [#tpu.dimension_semantics<parallel>], iteration_bounds = array<i64: 1>, scalar_prefetch = 0 : i64, scratch_operands = 0 : i64, tpu.core_type = #tpu.core_type<tc>, window_params = [{transform_indices = @transform_0, window_bounds = array<i64: 128, 64>}, {pipeline_mode = #tpu.pipeline_mode<synchronous>, transform_indices = @transform_1, window_bounds = array<i64: 2, 64>}, {pipeline_mode = #tpu.pipeline_mode<synchronous>, transform_indices = @transform_2, window_bounds = array<i64: 1, 64>}, {pipeline_mode = #tpu.pipeline_mode<synchronous>, transform_indices = @transform_3, window_bounds = array<i64: 1, 64>}, {transform_indices = @transform_4, window_bounds = array<i64: 128, 64>}]} {
    %c0 = arith.constant 0 : index
    %c0_0 = arith.constant 0 : index
    %0 = vector.load %arg2[%c0, %c0_0] : memref<2x64xf32, #tpu.memory_space<vmem>>, vector<2x64xf32>
    %1 = vector.extract_strided_slice %0 {offsets = [0, 0], sizes = [1, 64], strides = [1, 1]} : vector<2x64xf32> to vector<1x64xf32>
    %cst = arith.constant 7.812500e-03 : f32
    %2 = vector.broadcast %cst : f32 to vector<1x64xf32>
    %3 = arith.mulf %1, %2 : vector<1x64xf32>
    %4 = vector.extract_strided_slice %0 {offsets = [1, 0], sizes = [1, 64], strides = [1, 1]} : vector<2x64xf32> to vector<1x64xf32>
    %cst_1 = arith.constant 7.812500e-03 : f32
    %5 = vector.broadcast %cst_1 : f32 to vector<1x64xf32>
    %6 = arith.mulf %4, %5 : vector<1x64xf32>
    %7 = arith.mulf %3, %3 : vector<1x64xf32>
    %8 = arith.subf %6, %7 : vector<1x64xf32>
    %cst_2 = arith.constant 0.000000e+00 : f32
    %9 = vector.broadcast %cst_2 : f32 to vector<1x64xf32>
    %10 = arith.maximumf %8, %9 : vector<1x64xf32>
    %c0_3 = arith.constant 0 : index
    %c0_4 = arith.constant 0 : index
    %11 = vector.load %arg3[%c0_3, %c0_4] : memref<1x64xf32, #tpu.memory_space<vmem>>, vector<1x64xf32>
    %cst_5 = arith.constant 9.99999974E-6 : f32
    %12 = vector.broadcast %cst_5 : f32 to vector<1x64xf32>
    %13 = arith.addf %10, %12 : vector<1x64xf32>
    %14 = math.rsqrt %13 : vector<1x64xf32>
    %15 = arith.mulf %11, %14 : vector<1x64xf32>
    %c0_6 = arith.constant 0 : index
    %c0_7 = arith.constant 0 : index
    %16 = vector.load %arg4[%c0_6, %c0_7] : memref<1x64xf32, #tpu.memory_space<vmem>>, vector<1x64xf32>
    %17 = arith.mulf %3, %15 : vector<1x64xf32>
    %18 = arith.subf %16, %17 : vector<1x64xf32>
    %c0_8 = arith.constant 0 : index
    %c0_9 = arith.constant 0 : index
    %19 = vector.load %arg1[%c0_8, %c0_9] : memref<128x64xf32, #tpu.memory_space<vmem>>, vector<128x64xf32>
    %20 = vector.broadcast %15 : vector<1x64xf32> to vector<128x64xf32>
    %21 = arith.mulf %19, %20 : vector<128x64xf32>
    %22 = vector.broadcast %18 : vector<1x64xf32> to vector<128x64xf32>
    %23 = arith.addf %21, %22 : vector<128x64xf32>
    %cst_10 = arith.constant 0.000000e+00 : f32
    %24 = vector.broadcast %cst_10 : f32 to vector<128x64xf32>
    %25 = arith.cmpf ogt, %23, %24 : vector<128x64xf32>
    %cst_11 = arith.constant 2.000000e-01 : f32
    %26 = vector.broadcast %cst_11 : f32 to vector<128x64xf32>
    %27 = arith.mulf %26, %23 : vector<128x64xf32>
    %28 = arith.select %25, %23, %27 : vector<128x64xi1>, vector<128x64xf32>
    %29 = arith.truncf %28 : vector<128x64xf32> to vector<128x64xbf16>
    %c0_12 = arith.constant 0 : index
    %c0_13 = arith.constant 0 : index
    %30 = vector.load %arg5[%c0_12, %c0_13] : memref<128x64xbf16, #tpu.memory_space<vmem>>, vector<128x64xbf16>
    tpu.vector_store %arg5[%c0_12, %c0_13], %29 {strides = array<i32>} : memref<128x64xbf16, #tpu.memory_space<vmem>>, vector<128x64xbf16>,
    return
  }
  func.func @transform_0(%arg0: i32) -> (i32, i32) {
    %c0_i32 = arith.constant 0 : i32
    %c0_i32_0 = arith.constant 0 : i32
    return %arg0, %c0_i32 : i32, i32
  }
  func.func @transform_1(%arg0: i32) -> (i32, i32) {
    %c0_i32 = arith.constant 0 : i32
    %c0_i32_0 = arith.constant 0 : i32
    %c0_i32_1 = arith.constant 0 : i32
    return %c0_i32, %c0_i32_0 : i32, i32
  }
  func.func @transform_2(%arg0: i32) -> (i32, i32) {
    %c0_i32 = arith.constant 0 : i32
    %c0_i32_0 = arith.constant 0 : i32
    %c0_i32_1 = arith.constant 0 : i32
    return %c0_i32, %c0_i32_0 : i32, i32
  }
  func.func @transform_3(%arg0: i32) -> (i32, i32) {
    %c0_i32 = arith.constant 0 : i32
    %c0_i32_0 = arith.constant 0 : i32
    %c0_i32_1 = arith.constant 0 : i32
    return %c0_i32, %c0_i32_0 : i32, i32
  }
  func.func @transform_4(%arg0: i32) -> (i32, i32) {
    %c0_i32 = arith.constant 0 : i32
    %c0_i32_0 = arith.constant 0 : i32
    return %arg0, %c0_i32 : i32, i32
  }
}

module attributes {stable_mosaic.version = 11 : i64} {
  func.func @_bn_leaky_kernel(%arg0: i32, %arg1: memref<128x128xf32, #tpu.memory_space<vmem>>, %arg2: memref<2x128xf32, #tpu.memory_space<vmem>>, %arg3: memref<1x128xf32, #tpu.memory_space<vmem>>, %arg4: memref<1x128xf32, #tpu.memory_space<vmem>>, %arg5: memref<128x128xbf16, #tpu.memory_space<vmem>>) attributes {dimension_semantics = [#tpu.dimension_semantics<parallel>], iteration_bounds = array<i64: 1>, scalar_prefetch = 0 : i64, scratch_operands = 0 : i64, tpu.core_type = #tpu.core_type<tc>, window_params = [{transform_indices = @transform_0, window_bounds = array<i64: 128, 128>}, {pipeline_mode = #tpu.pipeline_mode<synchronous>, transform_indices = @transform_1, window_bounds = array<i64: 2, 128>}, {pipeline_mode = #tpu.pipeline_mode<synchronous>, transform_indices = @transform_2, window_bounds = array<i64: 1, 128>}, {pipeline_mode = #tpu.pipeline_mode<synchronous>, transform_indices = @transform_3, window_bounds = array<i64: 1, 128>}, {transform_indices = @transform_4, window_bounds = array<i64: 128, 128>}]} {
    %c0 = arith.constant 0 : index
    %c0_0 = arith.constant 0 : index
    %0 = vector.load %arg2[%c0, %c0_0] : memref<2x128xf32, #tpu.memory_space<vmem>>, vector<2x128xf32>
    %1 = vector.extract_strided_slice %0 {offsets = [0, 0], sizes = [1, 128], strides = [1, 1]} : vector<2x128xf32> to vector<1x128xf32>
    %cst = arith.constant 7.812500e-03 : f32
    %2 = vector.broadcast %cst : f32 to vector<1x128xf32>
    %3 = arith.mulf %1, %2 : vector<1x128xf32>
    %4 = vector.extract_strided_slice %0 {offsets = [1, 0], sizes = [1, 128], strides = [1, 1]} : vector<2x128xf32> to vector<1x128xf32>
    %cst_1 = arith.constant 7.812500e-03 : f32
    %5 = vector.broadcast %cst_1 : f32 to vector<1x128xf32>
    %6 = arith.mulf %4, %5 : vector<1x128xf32>
    %7 = arith.mulf %3, %3 : vector<1x128xf32>
    %8 = arith.subf %6, %7 : vector<1x128xf32>
    %cst_2 = arith.constant 0.000000e+00 : f32
    %9 = vector.broadcast %cst_2 : f32 to vector<1x128xf32>
    %10 = arith.maximumf %8, %9 : vector<1x128xf32>
    %c0_3 = arith.constant 0 : index
    %c0_4 = arith.constant 0 : index
    %11 = vector.load %arg3[%c0_3, %c0_4] : memref<1x128xf32, #tpu.memory_space<vmem>>, vector<1x128xf32>
    %cst_5 = arith.constant 9.99999974E-6 : f32
    %12 = vector.broadcast %cst_5 : f32 to vector<1x128xf32>
    %13 = arith.addf %10, %12 : vector<1x128xf32>
    %14 = math.rsqrt %13 : vector<1x128xf32>
    %15 = arith.mulf %11, %14 : vector<1x128xf32>
    %c0_6 = arith.constant 0 : index
    %c0_7 = arith.constant 0 : index
    %16 = vector.load %arg4[%c0_6, %c0_7] : memref<1x128xf32, #tpu.memory_space<vmem>>, vector<1x128xf32>
    %17 = arith.mulf %3, %15 : vector<1x128xf32>
    %18 = arith.subf %16, %17 : vector<1x128xf32>
    %c0_8 = arith.constant 0 : index
    %c0_9 = arith.constant 0 : index
    %19 = vector.load %arg1[%c0_8, %c0_9] : memref<128x128xf32, #tpu.memory_space<vmem>>, vector<128x128xf32>
    %20 = vector.broadcast %15 : vector<1x128xf32> to vector<128x128xf32>
    %21 = arith.mulf %19, %20 : vector<128x128xf32>
    %22 = vector.broadcast %18 : vector<1x128xf32> to vector<128x128xf32>
    %23 = arith.addf %21, %22 : vector<128x128xf32>
    %cst_10 = arith.constant 0.000000e+00 : f32
    %24 = vector.broadcast %cst_10 : f32 to vector<128x128xf32>
    %25 = arith.cmpf ogt, %23, %24 : vector<128x128xf32>
    %cst_11 = arith.constant 2.000000e-01 : f32
    %26 = vector.broadcast %cst_11 : f32 to vector<128x128xf32>
    %27 = arith.mulf %26, %23 : vector<128x128xf32>
    %28 = arith.select %25, %23, %27 : vector<128x128xi1>, vector<128x128xf32>
    %29 = arith.truncf %28 : vector<128x128xf32> to vector<128x128xbf16>
    %c0_12 = arith.constant 0 : index
    %c0_13 = arith.constant 0 : index
    %30 = vector.load %arg5[%c0_12, %c0_13] : memref<128x128xbf16, #tpu.memory_space<vmem>>, vector<128x128xbf16>
    tpu.vector_store %arg5[%c0_12, %c0_13], %29 {strides = array<i32>} : memref<128x128xbf16, #tpu.memory_space<vmem>>, vector<128x128xbf16>,
    return
  }
  func.func @transform_0(%arg0: i32) -> (i32, i32) {
    %c0_i32 = arith.constant 0 : i32
    %c0_i32_0 = arith.constant 0 : i32
    return %arg0, %c0_i32 : i32, i32
  }
  func.func @transform_1(%arg0: i32) -> (i32, i32) {
    %c0_i32 = arith.constant 0 : i32
    %c0_i32_0 = arith.constant 0 : i32
    %c0_i32_1 = arith.constant 0 : i32
    return %c0_i32, %c0_i32_0 : i32, i32
  }
  func.func @transform_2(%arg0: i32) -> (i32, i32) {
    %c0_i32 = arith.constant 0 : i32
    %c0_i32_0 = arith.constant 0 : i32
    %c0_i32_1 = arith.constant 0 : i32
    return %c0_i32, %c0_i32_0 : i32, i32
  }
  func.func @transform_3(%arg0: i32) -> (i32, i32) {
    %c0_i32 = arith.constant 0 : i32
    %c0_i32_0 = arith.constant 0 : i32
    %c0_i32_1 = arith.constant 0 : i32
    return %c0_i32, %c0_i32_0 : i32, i32
  }
  func.func @transform_4(%arg0: i32) -> (i32, i32) {
    %c0_i32 = arith.constant 0 : i32
    %c0_i32_0 = arith.constant 0 : i32
    return %arg0, %c0_i32 : i32, i32
  }
}

module attributes {stable_mosaic.version = 11 : i64} {
  func.func @_mm_bias_stats_kernel(%arg0: i32, %arg1: i32, %arg2: i32, %arg3: memref<128x576xbf16, #tpu.memory_space<vmem>>, %arg4: memref<576x128xbf16, #tpu.memory_space<vmem>>, %arg5: memref<1x128xf32, #tpu.memory_space<vmem>>, %arg6: memref<128x128xf32, #tpu.memory_space<vmem>>, %arg7: memref<2x128xf32, #tpu.memory_space<vmem>>, %arg8: memref<128x128xf32, #tpu.memory_space<vmem>>) attributes {dimension_semantics = [#tpu.dimension_semantics<parallel>, #tpu.dimension_semantics<arbitrary>, #tpu.dimension_semantics<arbitrary>], iteration_bounds = array<i64: 1, 1, 1>, scalar_prefetch = 0 : i64, scratch_operands = 1 : i64, tpu.core_type = #tpu.core_type<tc>, window_params = [{transform_indices = @transform_0, window_bounds = array<i64: 128, 576>}, {transform_indices = @transform_1, window_bounds = array<i64: 576, 128>}, {transform_indices = @transform_2, window_bounds = array<i64: 1, 128>}, {transform_indices = @transform_3, window_bounds = array<i64: 128, 128>}, {transform_indices = @transform_4, window_bounds = array<i64: 2, 128>}]} {
    %c0_i32 = arith.constant 0 : i32
    %0 = arith.cmpi eq, %arg2, %c0_i32 : i32
    %1 = arith.extui %0 : i1 to i32
    %c0_i32_0 = arith.constant 0 : i32
    %2 = arith.cmpi ne, %1, %c0_i32_0 : i32
    scf.if %2 {
      %cst_13 = arith.constant 0.000000e+00 : f32
      %17 = vector.broadcast %cst_13 : f32 to vector<128x128xf32>
      %c0_14 = arith.constant 0 : index
      %c0_15 = arith.constant 0 : index
      %18 = vector.load %arg8[%c0_14, %c0_15] : memref<128x128xf32, #tpu.memory_space<vmem>>, vector<128x128xf32>
      tpu.vector_store %arg8[%c0_14, %c0_15], %17 {strides = array<i32>} : memref<128x128xf32, #tpu.memory_space<vmem>>, vector<128x128xf32>,
    } else {
    }
    %c0_i32_1 = arith.constant 0 : i32
    %3 = arith.cmpi eq, %arg1, %c0_i32_1 : i32
    %c0_i32_2 = arith.constant 0 : i32
    %4 = arith.cmpi eq, %arg2, %c0_i32_2 : i32
    %5 = arith.andi %3, %4 : i1
    %6 = arith.extui %5 : i1 to i32
    %c0_i32_3 = arith.constant 0 : i32
    %7 = arith.cmpi ne, %6, %c0_i32_3 : i32
    scf.if %7 {
      %cst_13 = arith.constant 0.000000e+00 : f32
      %17 = vector.broadcast %cst_13 : f32 to vector<2x128xf32>
      %c0_14 = arith.constant 0 : index
      %c0_15 = arith.constant 0 : index
      %18 = vector.load %arg7[%c0_14, %c0_15] : memref<2x128xf32, #tpu.memory_space<vmem>>, vector<2x128xf32>
      tpu.vector_store %arg7[%c0_14, %c0_15], %17 {strides = array<i32>} : memref<2x128xf32, #tpu.memory_space<vmem>>, vector<2x128xf32>,
    } else {
    }
    %c0 = arith.constant 0 : index
    %c0_4 = arith.constant 0 : index
    %8 = vector.load %arg8[%c0, %c0_4] : memref<128x128xf32, #tpu.memory_space<vmem>>, vector<128x128xf32>
    %c0_5 = arith.constant 0 : index
    %c0_6 = arith.constant 0 : index
    %9 = vector.load %arg3[%c0_5, %c0_6] : memref<128x576xbf16, #tpu.memory_space<vmem>>, vector<128x576xbf16>
    %c0_7 = arith.constant 0 : index
    %c0_8 = arith.constant 0 : index
    %10 = vector.load %arg4[%c0_7, %c0_8] : memref<576x128xbf16, #tpu.memory_space<vmem>>, vector<576x128xbf16>
    %cst = arith.constant dense<0.000000e+00> : vector<128x128xf32>
    %11 = tpu.matmul %9, %10, %cst {dimension_numbers = #tpu.dot_dimension_numbers<[1], [0], [0], [1], [0, 0, 1, 1], [], []>} : vector<128x576xbf16>, vector<576x128xbf16>, vector<128x128xf32> -> vector<128x128xf32>
    %12 = arith.addf %8, %11 : vector<128x128xf32>
    %c0_9 = arith.constant 0 : index
    %c0_10 = arith.constant 0 : index
    %13 = vector.load %arg8[%c0_9, %c0_10] : memref<128x128xf32, #tpu.memory_space<vmem>>, vector<128x128xf32>
    tpu.vector_store %arg8[%c0_9, %c0_10], %12 {strides = array<i32>} : memref<128x128xf32, #tpu.memory_space<vmem>>, vector<128x128xf32>,
    %c0_i32_11 = arith.constant 0 : i32
    %14 = arith.cmpi eq, %arg2, %c0_i32_11 : i32
    %15 = arith.extui %14 : i1 to i32
    %c0_i32_12 = arith.constant 0 : i32
    %16 = arith.cmpi ne, %15, %c0_i32_12 : i32
    scf.if %16 {
      %c0_13 = arith.constant 0 : index
      %c0_14 = arith.constant 0 : index
      %17 = vector.load %arg8[%c0_13, %c0_14] : memref<128x128xf32, #tpu.memory_space<vmem>>, vector<128x128xf32>
      %c0_15 = arith.constant 0 : index
      %c0_16 = arith.constant 0 : index
      %18 = vector.load %arg5[%c0_15, %c0_16] : memref<1x128xf32, #tpu.memory_space<vmem>>, vector<1x128xf32>
      %19 = vector.broadcast %18 : vector<1x128xf32> to vector<128x128xf32>
      %20 = arith.addf %17, %19 : vector<128x128xf32>
      %c0_17 = arith.constant 0 : index
      %c0_18 = arith.constant 0 : index
      %21 = vector.load %arg6[%c0_17, %c0_18] : memref<128x128xf32, #tpu.memory_space<vmem>>, vector<128x128xf32>
      tpu.vector_store %arg6[%c0_17, %c0_18], %20 {strides = array<i32>} : memref<128x128xf32, #tpu.memory_space<vmem>>, vector<128x128xf32>,
      %22 = arith.mulf %20, %20 : vector<128x128xf32>
      %cst_19 = arith.constant dense<0.000000e+00> : vector<128xf32>
      %23 = vector.multi_reduction <add>, %20, %cst_19 [0] : vector<128x128xf32> to vector<128xf32>
      %24 = vector.shape_cast %23 : vector<128xf32> to vector<1x128xf32>
      %cst_20 = arith.constant dense<0.000000e+00> : vector<128xf32>
      %25 = vector.multi_reduction <add>, %22, %cst_20 [0] : vector<128x128xf32> to vector<128xf32>
      %26 = vector.shape_cast %25 : vector<128xf32> to vector<1x128xf32>
      %27 = tpu.concatenate %24, %26 in 0 : vector<1x128xf32>, vector<1x128xf32> -> vector<2x128xf32>
      %c0_21 = arith.constant 0 : index
      %c0_22 = arith.constant 0 : index
      %28 = vector.load %arg7[%c0_21, %c0_22] : memref<2x128xf32, #tpu.memory_space<vmem>>, vector<2x128xf32>
      %29 = arith.addf %28, %27 : vector<2x128xf32>
      %c0_23 = arith.constant 0 : index
      %c0_24 = arith.constant 0 : index
      %30 = vector.load %arg7[%c0_23, %c0_24] : memref<2x128xf32, #tpu.memory_space<vmem>>, vector<2x128xf32>
      tpu.vector_store %arg7[%c0_23, %c0_24], %29 {strides = array<i32>} : memref<2x128xf32, #tpu.memory_space<vmem>>, vector<2x128xf32>,
    } else {
    }
    return
  }
  func.func @transform_0(%arg0: i32, %arg1: i32, %arg2: i32) -> (i32, i32) {
    %c0_i32 = arith.constant 0 : i32
    return %arg1, %arg2 : i32, i32
  }
  func.func @transform_1(%arg0: i32, %arg1: i32, %arg2: i32) -> (i32, i32) {
    %c0_i32 = arith.constant 0 : i32
    return %arg2, %arg0 : i32, i32
  }
  func.func @transform_2(%arg0: i32, %arg1: i32, %arg2: i32) -> (i32, i32) {
    %c0_i32 = arith.constant 0 : i32
    %c0_i32_0 = arith.constant 0 : i32
    return %c0_i32, %arg0 : i32, i32
  }
  func.func @transform_3(%arg0: i32, %arg1: i32, %arg2: i32) -> (i32, i32) {
    %c0_i32 = arith.constant 0 : i32
    return %arg1, %arg0 : i32, i32
  }
  func.func @transform_4(%arg0: i32, %arg1: i32, %arg2: i32) -> (i32, i32) {
    %c0_i32 = arith.constant 0 : i32
    %c0_i32_0 = arith.constant 0 : i32
    return %c0_i32, %arg0 : i32, i32
  }
}

module attributes {stable_mosaic.version = 11 : i64} {
  func.func @_mm_bias_stats_kernel(%arg0: i32, %arg1: i32, %arg2: i32, %arg3: memref<32x384xbf16, #tpu.memory_space<vmem>>, %arg4: memref<384x128xbf16, #tpu.memory_space<vmem>>, %arg5: memref<1x128xf32, #tpu.memory_space<vmem>>, %arg6: memref<32x128xf32, #tpu.memory_space<vmem>>, %arg7: memref<2x128xf32, #tpu.memory_space<vmem>>, %arg8: memref<32x128xf32, #tpu.memory_space<vmem>>) attributes {dimension_semantics = [#tpu.dimension_semantics<parallel>, #tpu.dimension_semantics<arbitrary>, #tpu.dimension_semantics<arbitrary>], iteration_bounds = array<i64: 1, 1, 3>, scalar_prefetch = 0 : i64, scratch_operands = 1 : i64, tpu.core_type = #tpu.core_type<tc>, window_params = [{transform_indices = @transform_0, window_bounds = array<i64: 32, 384>}, {transform_indices = @transform_1, window_bounds = array<i64: 384, 128>}, {transform_indices = @transform_2, window_bounds = array<i64: 1, 128>}, {transform_indices = @transform_3, window_bounds = array<i64: 32, 128>}, {transform_indices = @transform_4, window_bounds = array<i64: 2, 128>}]} {
    %c0_i32 = arith.constant 0 : i32
    %0 = arith.cmpi eq, %arg2, %c0_i32 : i32
    %1 = arith.extui %0 : i1 to i32
    %c0_i32_0 = arith.constant 0 : i32
    %2 = arith.cmpi ne, %1, %c0_i32_0 : i32
    scf.if %2 {
      %cst_12 = arith.constant 0.000000e+00 : f32
      %17 = vector.broadcast %cst_12 : f32 to vector<32x128xf32>
      %c0_13 = arith.constant 0 : index
      %c0_14 = arith.constant 0 : index
      %18 = vector.load %arg8[%c0_13, %c0_14] : memref<32x128xf32, #tpu.memory_space<vmem>>, vector<32x128xf32>
      tpu.vector_store %arg8[%c0_13, %c0_14], %17 {strides = array<i32>} : memref<32x128xf32, #tpu.memory_space<vmem>>, vector<32x128xf32>,
    } else {
    }
    %c0_i32_1 = arith.constant 0 : i32
    %3 = arith.cmpi eq, %arg1, %c0_i32_1 : i32
    %c0_i32_2 = arith.constant 0 : i32
    %4 = arith.cmpi eq, %arg2, %c0_i32_2 : i32
    %5 = arith.andi %3, %4 : i1
    %6 = arith.extui %5 : i1 to i32
    %c0_i32_3 = arith.constant 0 : i32
    %7 = arith.cmpi ne, %6, %c0_i32_3 : i32
    scf.if %7 {
      %cst_12 = arith.constant 0.000000e+00 : f32
      %17 = vector.broadcast %cst_12 : f32 to vector<2x128xf32>
      %c0_13 = arith.constant 0 : index
      %c0_14 = arith.constant 0 : index
      %18 = vector.load %arg7[%c0_13, %c0_14] : memref<2x128xf32, #tpu.memory_space<vmem>>, vector<2x128xf32>
      tpu.vector_store %arg7[%c0_13, %c0_14], %17 {strides = array<i32>} : memref<2x128xf32, #tpu.memory_space<vmem>>, vector<2x128xf32>,
    } else {
    }
    %c0 = arith.constant 0 : index
    %c0_4 = arith.constant 0 : index
    %8 = vector.load %arg8[%c0, %c0_4] : memref<32x128xf32, #tpu.memory_space<vmem>>, vector<32x128xf32>
    %c0_5 = arith.constant 0 : index
    %c0_6 = arith.constant 0 : index
    %9 = vector.load %arg3[%c0_5, %c0_6] : memref<32x384xbf16, #tpu.memory_space<vmem>>, vector<32x384xbf16>
    %c0_7 = arith.constant 0 : index
    %c0_8 = arith.constant 0 : index
    %10 = vector.load %arg4[%c0_7, %c0_8] : memref<384x128xbf16, #tpu.memory_space<vmem>>, vector<384x128xbf16>
    %cst = arith.constant dense<0.000000e+00> : vector<32x128xf32>
    %11 = tpu.matmul %9, %10, %cst {dimension_numbers = #tpu.dot_dimension_numbers<[1], [0], [0], [1], [0, 0, 1, 1], [], []>} : vector<32x384xbf16>, vector<384x128xbf16>, vector<32x128xf32> -> vector<32x128xf32>
    %12 = arith.addf %8, %11 : vector<32x128xf32>
    %c0_9 = arith.constant 0 : index
    %c0_10 = arith.constant 0 : index
    %13 = vector.load %arg8[%c0_9, %c0_10] : memref<32x128xf32, #tpu.memory_space<vmem>>, vector<32x128xf32>
    tpu.vector_store %arg8[%c0_9, %c0_10], %12 {strides = array<i32>} : memref<32x128xf32, #tpu.memory_space<vmem>>, vector<32x128xf32>,
    %c2_i32 = arith.constant 2 : i32
    %14 = arith.cmpi eq, %arg2, %c2_i32 : i32
    %15 = arith.extui %14 : i1 to i32
    %c0_i32_11 = arith.constant 0 : i32
    %16 = arith.cmpi ne, %15, %c0_i32_11 : i32
    scf.if %16 {
      %c0_12 = arith.constant 0 : index
      %c0_13 = arith.constant 0 : index
      %17 = vector.load %arg8[%c0_12, %c0_13] : memref<32x128xf32, #tpu.memory_space<vmem>>, vector<32x128xf32>
      %c0_14 = arith.constant 0 : index
      %c0_15 = arith.constant 0 : index
      %18 = vector.load %arg5[%c0_14, %c0_15] : memref<1x128xf32, #tpu.memory_space<vmem>>, vector<1x128xf32>
      %19 = vector.broadcast %18 : vector<1x128xf32> to vector<32x128xf32>
      %20 = arith.addf %17, %19 : vector<32x128xf32>
      %c0_16 = arith.constant 0 : index
      %c0_17 = arith.constant 0 : index
      %21 = vector.load %arg6[%c0_16, %c0_17] : memref<32x128xf32, #tpu.memory_space<vmem>>, vector<32x128xf32>
      tpu.vector_store %arg6[%c0_16, %c0_17], %20 {strides = array<i32>} : memref<32x128xf32, #tpu.memory_space<vmem>>, vector<32x128xf32>,
      %22 = arith.mulf %20, %20 : vector<32x128xf32>
      %cst_18 = arith.constant dense<0.000000e+00> : vector<128xf32>
      %23 = vector.multi_reduction <add>, %20, %cst_18 [0] : vector<32x128xf32> to vector<128xf32>
      %24 = vector.shape_cast %23 : vector<128xf32> to vector<1x128xf32>
      %cst_19 = arith.constant dense<0.000000e+00> : vector<128xf32>
      %25 = vector.multi_reduction <add>, %22, %cst_19 [0] : vector<32x128xf32> to vector<128xf32>
      %26 = vector.shape_cast %25 : vector<128xf32> to vector<1x128xf32>
      %27 = tpu.concatenate %24, %26 in 0 : vector<1x128xf32>, vector<1x128xf32> -> vector<2x128xf32>
      %c0_20 = arith.constant 0 : index
      %c0_21 = arith.constant 0 : index
      %28 = vector.load %arg7[%c0_20, %c0_21] : memref<2x128xf32, #tpu.memory_space<vmem>>, vector<2x128xf32>
      %29 = arith.addf %28, %27 : vector<2x128xf32>
      %c0_22 = arith.constant 0 : index
      %c0_23 = arith.constant 0 : index
      %30 = vector.load %arg7[%c0_22, %c0_23] : memref<2x128xf32, #tpu.memory_space<vmem>>, vector<2x128xf32>
      tpu.vector_store %arg7[%c0_22, %c0_23], %29 {strides = array<i32>} : memref<2x128xf32, #tpu.memory_space<vmem>>, vector<2x128xf32>,
    } else {
    }
    return
  }
  func.func @transform_0(%arg0: i32, %arg1: i32, %arg2: i32) -> (i32, i32) {
    %c0_i32 = arith.constant 0 : i32
    return %arg1, %arg2 : i32, i32
  }
  func.func @transform_1(%arg0: i32, %arg1: i32, %arg2: i32) -> (i32, i32) {
    %c0_i32 = arith.constant 0 : i32
    return %arg2, %arg0 : i32, i32
  }
  func.func @transform_2(%arg0: i32, %arg1: i32, %arg2: i32) -> (i32, i32) {
    %c0_i32 = arith.constant 0 : i32
    %c0_i32_0 = arith.constant 0 : i32
    return %c0_i32, %arg0 : i32, i32
  }
  func.func @transform_3(%arg0: i32, %arg1: i32, %arg2: i32) -> (i32, i32) {
    %c0_i32 = arith.constant 0 : i32
    return %arg1, %arg0 : i32, i32
  }
  func.func @transform_4(%arg0: i32, %arg1: i32, %arg2: i32) -> (i32, i32) {
    %c0_i32 = arith.constant 0 : i32
    %c0_i32_0 = arith.constant 0 : i32
    return %c0_i32, %arg0 : i32, i32
  }
}

module attributes {stable_mosaic.version = 11 : i64} {
  func.func @_bn_leaky_kernel(%arg0: i32, %arg1: memref<32x128xf32, #tpu.memory_space<vmem>>, %arg2: memref<2x128xf32, #tpu.memory_space<vmem>>, %arg3: memref<1x128xf32, #tpu.memory_space<vmem>>, %arg4: memref<1x128xf32, #tpu.memory_space<vmem>>, %arg5: memref<32x128xbf16, #tpu.memory_space<vmem>>) attributes {dimension_semantics = [#tpu.dimension_semantics<parallel>], iteration_bounds = array<i64: 1>, scalar_prefetch = 0 : i64, scratch_operands = 0 : i64, tpu.core_type = #tpu.core_type<tc>, window_params = [{transform_indices = @transform_0, window_bounds = array<i64: 32, 128>}, {pipeline_mode = #tpu.pipeline_mode<synchronous>, transform_indices = @transform_1, window_bounds = array<i64: 2, 128>}, {pipeline_mode = #tpu.pipeline_mode<synchronous>, transform_indices = @transform_2, window_bounds = array<i64: 1, 128>}, {pipeline_mode = #tpu.pipeline_mode<synchronous>, transform_indices = @transform_3, window_bounds = array<i64: 1, 128>}, {transform_indices = @transform_4, window_bounds = array<i64: 32, 128>}]} {
    %c0 = arith.constant 0 : index
    %c0_0 = arith.constant 0 : index
    %0 = vector.load %arg2[%c0, %c0_0] : memref<2x128xf32, #tpu.memory_space<vmem>>, vector<2x128xf32>
    %1 = vector.extract_strided_slice %0 {offsets = [0, 0], sizes = [1, 128], strides = [1, 1]} : vector<2x128xf32> to vector<1x128xf32>
    %cst = arith.constant 3.125000e-02 : f32
    %2 = vector.broadcast %cst : f32 to vector<1x128xf32>
    %3 = arith.mulf %1, %2 : vector<1x128xf32>
    %4 = vector.extract_strided_slice %0 {offsets = [1, 0], sizes = [1, 128], strides = [1, 1]} : vector<2x128xf32> to vector<1x128xf32>
    %cst_1 = arith.constant 3.125000e-02 : f32
    %5 = vector.broadcast %cst_1 : f32 to vector<1x128xf32>
    %6 = arith.mulf %4, %5 : vector<1x128xf32>
    %7 = arith.mulf %3, %3 : vector<1x128xf32>
    %8 = arith.subf %6, %7 : vector<1x128xf32>
    %cst_2 = arith.constant 0.000000e+00 : f32
    %9 = vector.broadcast %cst_2 : f32 to vector<1x128xf32>
    %10 = arith.maximumf %8, %9 : vector<1x128xf32>
    %c0_3 = arith.constant 0 : index
    %c0_4 = arith.constant 0 : index
    %11 = vector.load %arg3[%c0_3, %c0_4] : memref<1x128xf32, #tpu.memory_space<vmem>>, vector<1x128xf32>
    %cst_5 = arith.constant 9.99999974E-6 : f32
    %12 = vector.broadcast %cst_5 : f32 to vector<1x128xf32>
    %13 = arith.addf %10, %12 : vector<1x128xf32>
    %14 = math.rsqrt %13 : vector<1x128xf32>
    %15 = arith.mulf %11, %14 : vector<1x128xf32>
    %c0_6 = arith.constant 0 : index
    %c0_7 = arith.constant 0 : index
    %16 = vector.load %arg4[%c0_6, %c0_7] : memref<1x128xf32, #tpu.memory_space<vmem>>, vector<1x128xf32>
    %17 = arith.mulf %3, %15 : vector<1x128xf32>
    %18 = arith.subf %16, %17 : vector<1x128xf32>
    %c0_8 = arith.constant 0 : index
    %c0_9 = arith.constant 0 : index
    %19 = vector.load %arg1[%c0_8, %c0_9] : memref<32x128xf32, #tpu.memory_space<vmem>>, vector<32x128xf32>
    %20 = vector.broadcast %15 : vector<1x128xf32> to vector<32x128xf32>
    %21 = arith.mulf %19, %20 : vector<32x128xf32>
    %22 = vector.broadcast %18 : vector<1x128xf32> to vector<32x128xf32>
    %23 = arith.addf %21, %22 : vector<32x128xf32>
    %cst_10 = arith.constant 0.000000e+00 : f32
    %24 = vector.broadcast %cst_10 : f32 to vector<32x128xf32>
    %25 = arith.cmpf ogt, %23, %24 : vector<32x128xf32>
    %cst_11 = arith.constant 2.000000e-01 : f32
    %26 = vector.broadcast %cst_11 : f32 to vector<32x128xf32>
    %27 = arith.mulf %26, %23 : vector<32x128xf32>
    %28 = arith.select %25, %23, %27 : vector<32x128xi1>, vector<32x128xf32>
    %29 = arith.truncf %28 : vector<32x128xf32> to vector<32x128xbf16>
    %c0_12 = arith.constant 0 : index
    %c0_13 = arith.constant 0 : index
    %30 = vector.load %arg5[%c0_12, %c0_13] : memref<32x128xbf16, #tpu.memory_space<vmem>>, vector<32x128xbf16>
    tpu.vector_store %arg5[%c0_12, %c0_13], %29 {strides = array<i32>} : memref<32x128xbf16, #tpu.memory_space<vmem>>, vector<32x128xbf16>,
    return
  }
  func.func @transform_0(%arg0: i32) -> (i32, i32) {
    %c0_i32 = arith.constant 0 : i32
    %c0_i32_0 = arith.constant 0 : i32
    return %arg0, %c0_i32 : i32, i32
  }
  func.func @transform_1(%arg0: i32) -> (i32, i32) {
    %c0_i32 = arith.constant 0 : i32
    %c0_i32_0 = arith.constant 0 : i32
    %c0_i32_1 = arith.constant 0 : i32
    return %c0_i32, %c0_i32_0 : i32, i32
  }
  func.func @transform_2(%arg0: i32) -> (i32, i32) {
    %c0_i32 = arith.constant 0 : i32
    %c0_i32_0 = arith.constant 0 : i32
    %c0_i32_1 = arith.constant 0 : i32
    return %c0_i32, %c0_i32_0 : i32, i32
  }
  func.func @transform_3(%arg0: i32) -> (i32, i32) {
    %c0_i32 = arith.constant 0 : i32
    %c0_i32_0 = arith.constant 0 : i32
    %c0_i32_1 = arith.constant 0 : i32
    return %c0_i32, %c0_i32_0 : i32, i32
  }
  func.func @transform_4(%arg0: i32) -> (i32, i32) {
    %c0_i32 = arith.constant 0 : i32
    %c0_i32_0 = arith.constant 0 : i32
    return %arg0, %c0_i32 : i32, i32
  }
}

module attributes {stable_mosaic.version = 11 : i64} {
  func.func @_mm_bias_stats_kernel(%arg0: i32, %arg1: i32, %arg2: i32, %arg3: memref<32x384xbf16, #tpu.memory_space<vmem>>, %arg4: memref<384x256xbf16, #tpu.memory_space<vmem>>, %arg5: memref<1x256xf32, #tpu.memory_space<vmem>>, %arg6: memref<32x256xf32, #tpu.memory_space<vmem>>, %arg7: memref<2x256xf32, #tpu.memory_space<vmem>>, %arg8: memref<32x256xf32, #tpu.memory_space<vmem>>) attributes {dimension_semantics = [#tpu.dimension_semantics<parallel>, #tpu.dimension_semantics<arbitrary>, #tpu.dimension_semantics<arbitrary>], iteration_bounds = array<i64: 1, 1, 3>, scalar_prefetch = 0 : i64, scratch_operands = 1 : i64, tpu.core_type = #tpu.core_type<tc>, window_params = [{transform_indices = @transform_0, window_bounds = array<i64: 32, 384>}, {transform_indices = @transform_1, window_bounds = array<i64: 384, 256>}, {transform_indices = @transform_2, window_bounds = array<i64: 1, 256>}, {transform_indices = @transform_3, window_bounds = array<i64: 32, 256>}, {transform_indices = @transform_4, window_bounds = array<i64: 2, 256>}]} {
    %c0_i32 = arith.constant 0 : i32
    %0 = arith.cmpi eq, %arg2, %c0_i32 : i32
    %1 = arith.extui %0 : i1 to i32
    %c0_i32_0 = arith.constant 0 : i32
    %2 = arith.cmpi ne, %1, %c0_i32_0 : i32
    scf.if %2 {
      %cst_12 = arith.constant 0.000000e+00 : f32
      %17 = vector.broadcast %cst_12 : f32 to vector<32x256xf32>
      %c0_13 = arith.constant 0 : index
      %c0_14 = arith.constant 0 : index
      %18 = vector.load %arg8[%c0_13, %c0_14] : memref<32x256xf32, #tpu.memory_space<vmem>>, vector<32x256xf32>
      tpu.vector_store %arg8[%c0_13, %c0_14], %17 {strides = array<i32>} : memref<32x256xf32, #tpu.memory_space<vmem>>, vector<32x256xf32>,
    } else {
    }
    %c0_i32_1 = arith.constant 0 : i32
    %3 = arith.cmpi eq, %arg1, %c0_i32_1 : i32
    %c0_i32_2 = arith.constant 0 : i32
    %4 = arith.cmpi eq, %arg2, %c0_i32_2 : i32
    %5 = arith.andi %3, %4 : i1
    %6 = arith.extui %5 : i1 to i32
    %c0_i32_3 = arith.constant 0 : i32
    %7 = arith.cmpi ne, %6, %c0_i32_3 : i32
    scf.if %7 {
      %cst_12 = arith.constant 0.000000e+00 : f32
      %17 = vector.broadcast %cst_12 : f32 to vector<2x256xf32>
      %c0_13 = arith.constant 0 : index
      %c0_14 = arith.constant 0 : index
      %18 = vector.load %arg7[%c0_13, %c0_14] : memref<2x256xf32, #tpu.memory_space<vmem>>, vector<2x256xf32>
      tpu.vector_store %arg7[%c0_13, %c0_14], %17 {strides = array<i32>} : memref<2x256xf32, #tpu.memory_space<vmem>>, vector<2x256xf32>,
    } else {
    }
    %c0 = arith.constant 0 : index
    %c0_4 = arith.constant 0 : index
    %8 = vector.load %arg8[%c0, %c0_4] : memref<32x256xf32, #tpu.memory_space<vmem>>, vector<32x256xf32>
    %c0_5 = arith.constant 0 : index
    %c0_6 = arith.constant 0 : index
    %9 = vector.load %arg3[%c0_5, %c0_6] : memref<32x384xbf16, #tpu.memory_space<vmem>>, vector<32x384xbf16>
    %c0_7 = arith.constant 0 : index
    %c0_8 = arith.constant 0 : index
    %10 = vector.load %arg4[%c0_7, %c0_8] : memref<384x256xbf16, #tpu.memory_space<vmem>>, vector<384x256xbf16>
    %cst = arith.constant dense<0.000000e+00> : vector<32x256xf32>
    %11 = tpu.matmul %9, %10, %cst {dimension_numbers = #tpu.dot_dimension_numbers<[1], [0], [0], [1], [0, 0, 1, 1], [], []>} : vector<32x384xbf16>, vector<384x256xbf16>, vector<32x256xf32> -> vector<32x256xf32>
    %12 = arith.addf %8, %11 : vector<32x256xf32>
    %c0_9 = arith.constant 0 : index
    %c0_10 = arith.constant 0 : index
    %13 = vector.load %arg8[%c0_9, %c0_10] : memref<32x256xf32, #tpu.memory_space<vmem>>, vector<32x256xf32>
    tpu.vector_store %arg8[%c0_9, %c0_10], %12 {strides = array<i32>} : memref<32x256xf32, #tpu.memory_space<vmem>>, vector<32x256xf32>,
    %c2_i32 = arith.constant 2 : i32
    %14 = arith.cmpi eq, %arg2, %c2_i32 : i32
    %15 = arith.extui %14 : i1 to i32
    %c0_i32_11 = arith.constant 0 : i32
    %16 = arith.cmpi ne, %15, %c0_i32_11 : i32
    scf.if %16 {
      %c0_12 = arith.constant 0 : index
      %c0_13 = arith.constant 0 : index
      %17 = vector.load %arg8[%c0_12, %c0_13] : memref<32x256xf32, #tpu.memory_space<vmem>>, vector<32x256xf32>
      %c0_14 = arith.constant 0 : index
      %c0_15 = arith.constant 0 : index
      %18 = vector.load %arg5[%c0_14, %c0_15] : memref<1x256xf32, #tpu.memory_space<vmem>>, vector<1x256xf32>
      %19 = vector.broadcast %18 : vector<1x256xf32> to vector<32x256xf32>
      %20 = arith.addf %17, %19 : vector<32x256xf32>
      %c0_16 = arith.constant 0 : index
      %c0_17 = arith.constant 0 : index
      %21 = vector.load %arg6[%c0_16, %c0_17] : memref<32x256xf32, #tpu.memory_space<vmem>>, vector<32x256xf32>
      tpu.vector_store %arg6[%c0_16, %c0_17], %20 {strides = array<i32>} : memref<32x256xf32, #tpu.memory_space<vmem>>, vector<32x256xf32>,
      %22 = arith.mulf %20, %20 : vector<32x256xf32>
      %cst_18 = arith.constant dense<0.000000e+00> : vector<256xf32>
      %23 = vector.multi_reduction <add>, %20, %cst_18 [0] : vector<32x256xf32> to vector<256xf32>
      %24 = vector.shape_cast %23 : vector<256xf32> to vector<1x256xf32>
      %cst_19 = arith.constant dense<0.000000e+00> : vector<256xf32>
      %25 = vector.multi_reduction <add>, %22, %cst_19 [0] : vector<32x256xf32> to vector<256xf32>
      %26 = vector.shape_cast %25 : vector<256xf32> to vector<1x256xf32>
      %27 = tpu.concatenate %24, %26 in 0 : vector<1x256xf32>, vector<1x256xf32> -> vector<2x256xf32>
      %c0_20 = arith.constant 0 : index
      %c0_21 = arith.constant 0 : index
      %28 = vector.load %arg7[%c0_20, %c0_21] : memref<2x256xf32, #tpu.memory_space<vmem>>, vector<2x256xf32>
      %29 = arith.addf %28, %27 : vector<2x256xf32>
      %c0_22 = arith.constant 0 : index
      %c0_23 = arith.constant 0 : index
      %30 = vector.load %arg7[%c0_22, %c0_23] : memref<2x256xf32, #tpu.memory_space<vmem>>, vector<2x256xf32>
      tpu.vector_store %arg7[%c0_22, %c0_23], %29 {strides = array<i32>} : memref<2x256xf32, #tpu.memory_space<vmem>>, vector<2x256xf32>,
    } else {
    }
    return
  }
  func.func @transform_0(%arg0: i32, %arg1: i32, %arg2: i32) -> (i32, i32) {
    %c0_i32 = arith.constant 0 : i32
    return %arg1, %arg2 : i32, i32
  }
  func.func @transform_1(%arg0: i32, %arg1: i32, %arg2: i32) -> (i32, i32) {
    %c0_i32 = arith.constant 0 : i32
    return %arg2, %arg0 : i32, i32
  }
  func.func @transform_2(%arg0: i32, %arg1: i32, %arg2: i32) -> (i32, i32) {
    %c0_i32 = arith.constant 0 : i32
    %c0_i32_0 = arith.constant 0 : i32
    return %c0_i32, %arg0 : i32, i32
  }
  func.func @transform_3(%arg0: i32, %arg1: i32, %arg2: i32) -> (i32, i32) {
    %c0_i32 = arith.constant 0 : i32
    return %arg1, %arg0 : i32, i32
  }
  func.func @transform_4(%arg0: i32, %arg1: i32, %arg2: i32) -> (i32, i32) {
    %c0_i32 = arith.constant 0 : i32
    %c0_i32_0 = arith.constant 0 : i32
    return %c0_i32, %arg0 : i32, i32
  }
}

module attributes {stable_mosaic.version = 11 : i64} {
  func.func @_bn_leaky_kernel(%arg0: i32, %arg1: memref<32x256xf32, #tpu.memory_space<vmem>>, %arg2: memref<2x256xf32, #tpu.memory_space<vmem>>, %arg3: memref<1x256xf32, #tpu.memory_space<vmem>>, %arg4: memref<1x256xf32, #tpu.memory_space<vmem>>, %arg5: memref<32x256xbf16, #tpu.memory_space<vmem>>) attributes {dimension_semantics = [#tpu.dimension_semantics<parallel>], iteration_bounds = array<i64: 1>, scalar_prefetch = 0 : i64, scratch_operands = 0 : i64, tpu.core_type = #tpu.core_type<tc>, window_params = [{transform_indices = @transform_0, window_bounds = array<i64: 32, 256>}, {pipeline_mode = #tpu.pipeline_mode<synchronous>, transform_indices = @transform_1, window_bounds = array<i64: 2, 256>}, {pipeline_mode = #tpu.pipeline_mode<synchronous>, transform_indices = @transform_2, window_bounds = array<i64: 1, 256>}, {pipeline_mode = #tpu.pipeline_mode<synchronous>, transform_indices = @transform_3, window_bounds = array<i64: 1, 256>}, {transform_indices = @transform_4, window_bounds = array<i64: 32, 256>}]} {
    %c0 = arith.constant 0 : index
    %c0_0 = arith.constant 0 : index
    %0 = vector.load %arg2[%c0, %c0_0] : memref<2x256xf32, #tpu.memory_space<vmem>>, vector<2x256xf32>
    %1 = vector.extract_strided_slice %0 {offsets = [0, 0], sizes = [1, 256], strides = [1, 1]} : vector<2x256xf32> to vector<1x256xf32>
    %cst = arith.constant 3.125000e-02 : f32
    %2 = vector.broadcast %cst : f32 to vector<1x256xf32>
    %3 = arith.mulf %1, %2 : vector<1x256xf32>
    %4 = vector.extract_strided_slice %0 {offsets = [1, 0], sizes = [1, 256], strides = [1, 1]} : vector<2x256xf32> to vector<1x256xf32>
    %cst_1 = arith.constant 3.125000e-02 : f32
    %5 = vector.broadcast %cst_1 : f32 to vector<1x256xf32>
    %6 = arith.mulf %4, %5 : vector<1x256xf32>
    %7 = arith.mulf %3, %3 : vector<1x256xf32>
    %8 = arith.subf %6, %7 : vector<1x256xf32>
    %cst_2 = arith.constant 0.000000e+00 : f32
    %9 = vector.broadcast %cst_2 : f32 to vector<1x256xf32>
    %10 = arith.maximumf %8, %9 : vector<1x256xf32>
    %c0_3 = arith.constant 0 : index
    %c0_4 = arith.constant 0 : index
    %11 = vector.load %arg3[%c0_3, %c0_4] : memref<1x256xf32, #tpu.memory_space<vmem>>, vector<1x256xf32>
    %cst_5 = arith.constant 9.99999974E-6 : f32
    %12 = vector.broadcast %cst_5 : f32 to vector<1x256xf32>
    %13 = arith.addf %10, %12 : vector<1x256xf32>
    %14 = math.rsqrt %13 : vector<1x256xf32>
    %15 = arith.mulf %11, %14 : vector<1x256xf32>
    %c0_6 = arith.constant 0 : index
    %c0_7 = arith.constant 0 : index
    %16 = vector.load %arg4[%c0_6, %c0_7] : memref<1x256xf32, #tpu.memory_space<vmem>>, vector<1x256xf32>
    %17 = arith.mulf %3, %15 : vector<1x256xf32>
    %18 = arith.subf %16, %17 : vector<1x256xf32>
    %c0_8 = arith.constant 0 : index
    %c0_9 = arith.constant 0 : index
    %19 = vector.load %arg1[%c0_8, %c0_9] : memref<32x256xf32, #tpu.memory_space<vmem>>, vector<32x256xf32>
    %20 = vector.broadcast %15 : vector<1x256xf32> to vector<32x256xf32>
    %21 = arith.mulf %19, %20 : vector<32x256xf32>
    %22 = vector.broadcast %18 : vector<1x256xf32> to vector<32x256xf32>
    %23 = arith.addf %21, %22 : vector<32x256xf32>
    %cst_10 = arith.constant 0.000000e+00 : f32
    %24 = vector.broadcast %cst_10 : f32 to vector<32x256xf32>
    %25 = arith.cmpf ogt, %23, %24 : vector<32x256xf32>
    %cst_11 = arith.constant 2.000000e-01 : f32
    %26 = vector.broadcast %cst_11 : f32 to vector<32x256xf32>
    %27 = arith.mulf %26, %23 : vector<32x256xf32>
    %28 = arith.select %25, %23, %27 : vector<32x256xi1>, vector<32x256xf32>
    %29 = arith.truncf %28 : vector<32x256xf32> to vector<32x256xbf16>
    %c0_12 = arith.constant 0 : index
    %c0_13 = arith.constant 0 : index
    %30 = vector.load %arg5[%c0_12, %c0_13] : memref<32x256xbf16, #tpu.memory_space<vmem>>, vector<32x256xbf16>
    tpu.vector_store %arg5[%c0_12, %c0_13], %29 {strides = array<i32>} : memref<32x256xbf16, #tpu.memory_space<vmem>>, vector<32x256xbf16>,
    return
  }
  func.func @transform_0(%arg0: i32) -> (i32, i32) {
    %c0_i32 = arith.constant 0 : i32
    %c0_i32_0 = arith.constant 0 : i32
    return %arg0, %c0_i32 : i32, i32
  }
  func.func @transform_1(%arg0: i32) -> (i32, i32) {
    %c0_i32 = arith.constant 0 : i32
    %c0_i32_0 = arith.constant 0 : i32
    %c0_i32_1 = arith.constant 0 : i32
    return %c0_i32, %c0_i32_0 : i32, i32
  }
  func.func @transform_2(%arg0: i32) -> (i32, i32) {
    %c0_i32 = arith.constant 0 : i32
    %c0_i32_0 = arith.constant 0 : i32
    %c0_i32_1 = arith.constant 0 : i32
    return %c0_i32, %c0_i32_0 : i32, i32
  }
  func.func @transform_3(%arg0: i32) -> (i32, i32) {
    %c0_i32 = arith.constant 0 : i32
    %c0_i32_0 = arith.constant 0 : i32
    %c0_i32_1 = arith.constant 0 : i32
    return %c0_i32, %c0_i32_0 : i32, i32
  }
  func.func @transform_4(%arg0: i32) -> (i32, i32) {
    %c0_i32 = arith.constant 0 : i32
    %c0_i32_0 = arith.constant 0 : i32
    return %arg0, %c0_i32 : i32, i32
  }
}

module attributes {stable_mosaic.version = 11 : i64} {
  func.func @_bn_leaky_kernel(%arg0: i32, %arg1: memref<8x256xf32, #tpu.memory_space<vmem>>, %arg2: memref<2x256xf32, #tpu.memory_space<vmem>>, %arg3: memref<1x256xf32, #tpu.memory_space<vmem>>, %arg4: memref<1x256xf32, #tpu.memory_space<vmem>>, %arg5: memref<8x256xbf16, #tpu.memory_space<vmem>>) attributes {dimension_semantics = [#tpu.dimension_semantics<parallel>], iteration_bounds = array<i64: 1>, scalar_prefetch = 0 : i64, scratch_operands = 0 : i64, tpu.core_type = #tpu.core_type<tc>, window_params = [{transform_indices = @transform_0, window_bounds = array<i64: 8, 256>}, {pipeline_mode = #tpu.pipeline_mode<synchronous>, transform_indices = @transform_1, window_bounds = array<i64: 2, 256>}, {pipeline_mode = #tpu.pipeline_mode<synchronous>, transform_indices = @transform_2, window_bounds = array<i64: 1, 256>}, {pipeline_mode = #tpu.pipeline_mode<synchronous>, transform_indices = @transform_3, window_bounds = array<i64: 1, 256>}, {transform_indices = @transform_4, window_bounds = array<i64: 8, 256>}]} {
    %c0 = arith.constant 0 : index
    %c0_0 = arith.constant 0 : index
    %0 = vector.load %arg2[%c0, %c0_0] : memref<2x256xf32, #tpu.memory_space<vmem>>, vector<2x256xf32>
    %1 = vector.extract_strided_slice %0 {offsets = [0, 0], sizes = [1, 256], strides = [1, 1]} : vector<2x256xf32> to vector<1x256xf32>
    %cst = arith.constant 1.250000e-01 : f32
    %2 = vector.broadcast %cst : f32 to vector<1x256xf32>
    %3 = arith.mulf %1, %2 : vector<1x256xf32>
    %4 = vector.extract_strided_slice %0 {offsets = [1, 0], sizes = [1, 256], strides = [1, 1]} : vector<2x256xf32> to vector<1x256xf32>
    %cst_1 = arith.constant 1.250000e-01 : f32
    %5 = vector.broadcast %cst_1 : f32 to vector<1x256xf32>
    %6 = arith.mulf %4, %5 : vector<1x256xf32>
    %7 = arith.mulf %3, %3 : vector<1x256xf32>
    %8 = arith.subf %6, %7 : vector<1x256xf32>
    %cst_2 = arith.constant 0.000000e+00 : f32
    %9 = vector.broadcast %cst_2 : f32 to vector<1x256xf32>
    %10 = arith.maximumf %8, %9 : vector<1x256xf32>
    %c0_3 = arith.constant 0 : index
    %c0_4 = arith.constant 0 : index
    %11 = vector.load %arg3[%c0_3, %c0_4] : memref<1x256xf32, #tpu.memory_space<vmem>>, vector<1x256xf32>
    %cst_5 = arith.constant 9.99999974E-6 : f32
    %12 = vector.broadcast %cst_5 : f32 to vector<1x256xf32>
    %13 = arith.addf %10, %12 : vector<1x256xf32>
    %14 = math.rsqrt %13 : vector<1x256xf32>
    %15 = arith.mulf %11, %14 : vector<1x256xf32>
    %c0_6 = arith.constant 0 : index
    %c0_7 = arith.constant 0 : index
    %16 = vector.load %arg4[%c0_6, %c0_7] : memref<1x256xf32, #tpu.memory_space<vmem>>, vector<1x256xf32>
    %17 = arith.mulf %3, %15 : vector<1x256xf32>
    %18 = arith.subf %16, %17 : vector<1x256xf32>
    %c0_8 = arith.constant 0 : index
    %c0_9 = arith.constant 0 : index
    %19 = vector.load %arg1[%c0_8, %c0_9] : memref<8x256xf32, #tpu.memory_space<vmem>>, vector<8x256xf32>
    %20 = vector.broadcast %15 : vector<1x256xf32> to vector<8x256xf32>
    %21 = arith.mulf %19, %20 : vector<8x256xf32>
    %22 = vector.broadcast %18 : vector<1x256xf32> to vector<8x256xf32>
    %23 = arith.addf %21, %22 : vector<8x256xf32>
    %cst_10 = arith.constant 0.000000e+00 : f32
    %24 = vector.broadcast %cst_10 : f32 to vector<8x256xf32>
    %25 = arith.cmpf ogt, %23, %24 : vector<8x256xf32>
    %cst_11 = arith.constant 2.000000e-01 : f32
    %26 = vector.broadcast %cst_11 : f32 to vector<8x256xf32>
    %27 = arith.mulf %26, %23 : vector<8x256xf32>
    %28 = arith.select %25, %23, %27 : vector<8x256xi1>, vector<8x256xf32>
    %29 = arith.truncf %28 : vector<8x256xf32> to vector<8x256xbf16>
    %c0_12 = arith.constant 0 : index
    %c0_13 = arith.constant 0 : index
    %30 = vector.load %arg5[%c0_12, %c0_13] : memref<8x256xbf16, #tpu.memory_space<vmem>>, vector<8x256xbf16>
    tpu.vector_store %arg5[%c0_12, %c0_13], %29 {strides = array<i32>} : memref<8x256xbf16, #tpu.memory_space<vmem>>, vector<8x256xbf16>,
    return
  }
  func.func @transform_0(%arg0: i32) -> (i32, i32) {
    %c0_i32 = arith.constant 0 : i32
    %c0_i32_0 = arith.constant 0 : i32
    return %arg0, %c0_i32 : i32, i32
  }
  func.func @transform_1(%arg0: i32) -> (i32, i32) {
    %c0_i32 = arith.constant 0 : i32
    %c0_i32_0 = arith.constant 0 : i32
    %c0_i32_1 = arith.constant 0 : i32
    return %c0_i32, %c0_i32_0 : i32, i32
  }
  func.func @transform_2(%arg0: i32) -> (i32, i32) {
    %c0_i32 = arith.constant 0 : i32
    %c0_i32_0 = arith.constant 0 : i32
    %c0_i32_1 = arith.constant 0 : i32
    return %c0_i32, %c0_i32_0 : i32, i32
  }
  func.func @transform_3(%arg0: i32) -> (i32, i32) {
    %c0_i32 = arith.constant 0 : i32
    %c0_i32_0 = arith.constant 0 : i32
    %c0_i32_1 = arith.constant 0 : i32
    return %c0_i32, %c0_i32_0 : i32, i32
  }
  func.func @transform_4(%arg0: i32) -> (i32, i32) {
    %c0_i32 = arith.constant 0 : i32
    %c0_i32_0 = arith.constant 0 : i32
    return %arg0, %c0_i32 : i32, i32
  }
}

module attributes {stable_mosaic.version = 11 : i64} {
  func.func @_mm_bias_stats_kernel(%arg0: i32, %arg1: i32, %arg2: i32, %arg3: memref<8x384xbf16, #tpu.memory_space<vmem>>, %arg4: memref<384x256xbf16, #tpu.memory_space<vmem>>, %arg5: memref<1x256xf32, #tpu.memory_space<vmem>>, %arg6: memref<8x256xf32, #tpu.memory_space<vmem>>, %arg7: memref<2x256xf32, #tpu.memory_space<vmem>>, %arg8: memref<8x256xf32, #tpu.memory_space<vmem>>) attributes {dimension_semantics = [#tpu.dimension_semantics<parallel>, #tpu.dimension_semantics<arbitrary>, #tpu.dimension_semantics<arbitrary>], iteration_bounds = array<i64: 1, 1, 6>, scalar_prefetch = 0 : i64, scratch_operands = 1 : i64, tpu.core_type = #tpu.core_type<tc>, window_params = [{transform_indices = @transform_0, window_bounds = array<i64: 8, 384>}, {transform_indices = @transform_1, window_bounds = array<i64: 384, 256>}, {transform_indices = @transform_2, window_bounds = array<i64: 1, 256>}, {transform_indices = @transform_3, window_bounds = array<i64: 8, 256>}, {transform_indices = @transform_4, window_bounds = array<i64: 2, 256>}]} {
    %c0_i32 = arith.constant 0 : i32
    %0 = arith.cmpi eq, %arg2, %c0_i32 : i32
    %1 = arith.extui %0 : i1 to i32
    %c0_i32_0 = arith.constant 0 : i32
    %2 = arith.cmpi ne, %1, %c0_i32_0 : i32
    scf.if %2 {
      %cst_12 = arith.constant 0.000000e+00 : f32
      %17 = vector.broadcast %cst_12 : f32 to vector<8x256xf32>
      %c0_13 = arith.constant 0 : index
      %c0_14 = arith.constant 0 : index
      %18 = vector.load %arg8[%c0_13, %c0_14] : memref<8x256xf32, #tpu.memory_space<vmem>>, vector<8x256xf32>
      tpu.vector_store %arg8[%c0_13, %c0_14], %17 {strides = array<i32>} : memref<8x256xf32, #tpu.memory_space<vmem>>, vector<8x256xf32>,
    } else {
    }
    %c0_i32_1 = arith.constant 0 : i32
    %3 = arith.cmpi eq, %arg1, %c0_i32_1 : i32
    %c0_i32_2 = arith.constant 0 : i32
    %4 = arith.cmpi eq, %arg2, %c0_i32_2 : i32
    %5 = arith.andi %3, %4 : i1
    %6 = arith.extui %5 : i1 to i32
    %c0_i32_3 = arith.constant 0 : i32
    %7 = arith.cmpi ne, %6, %c0_i32_3 : i32
    scf.if %7 {
      %cst_12 = arith.constant 0.000000e+00 : f32
      %17 = vector.broadcast %cst_12 : f32 to vector<2x256xf32>
      %c0_13 = arith.constant 0 : index
      %c0_14 = arith.constant 0 : index
      %18 = vector.load %arg7[%c0_13, %c0_14] : memref<2x256xf32, #tpu.memory_space<vmem>>, vector<2x256xf32>
      tpu.vector_store %arg7[%c0_13, %c0_14], %17 {strides = array<i32>} : memref<2x256xf32, #tpu.memory_space<vmem>>, vector<2x256xf32>,
    } else {
    }
    %c0 = arith.constant 0 : index
    %c0_4 = arith.constant 0 : index
    %8 = vector.load %arg8[%c0, %c0_4] : memref<8x256xf32, #tpu.memory_space<vmem>>, vector<8x256xf32>
    %c0_5 = arith.constant 0 : index
    %c0_6 = arith.constant 0 : index
    %9 = vector.load %arg3[%c0_5, %c0_6] : memref<8x384xbf16, #tpu.memory_space<vmem>>, vector<8x384xbf16>
    %c0_7 = arith.constant 0 : index
    %c0_8 = arith.constant 0 : index
    %10 = vector.load %arg4[%c0_7, %c0_8] : memref<384x256xbf16, #tpu.memory_space<vmem>>, vector<384x256xbf16>
    %cst = arith.constant dense<0.000000e+00> : vector<8x256xf32>
    %11 = tpu.matmul %9, %10, %cst {dimension_numbers = #tpu.dot_dimension_numbers<[1], [0], [0], [1], [0, 0, 1, 1], [], []>} : vector<8x384xbf16>, vector<384x256xbf16>, vector<8x256xf32> -> vector<8x256xf32>
    %12 = arith.addf %8, %11 : vector<8x256xf32>
    %c0_9 = arith.constant 0 : index
    %c0_10 = arith.constant 0 : index
    %13 = vector.load %arg8[%c0_9, %c0_10] : memref<8x256xf32, #tpu.memory_space<vmem>>, vector<8x256xf32>
    tpu.vector_store %arg8[%c0_9, %c0_10], %12 {strides = array<i32>} : memref<8x256xf32, #tpu.memory_space<vmem>>, vector<8x256xf32>,
    %c5_i32 = arith.constant 5 : i32
    %14 = arith.cmpi eq, %arg2, %c5_i32 : i32
    %15 = arith.extui %14 : i1 to i32
    %c0_i32_11 = arith.constant 0 : i32
    %16 = arith.cmpi ne, %15, %c0_i32_11 : i32
    scf.if %16 {
      %c0_12 = arith.constant 0 : index
      %c0_13 = arith.constant 0 : index
      %17 = vector.load %arg8[%c0_12, %c0_13] : memref<8x256xf32, #tpu.memory_space<vmem>>, vector<8x256xf32>
      %c0_14 = arith.constant 0 : index
      %c0_15 = arith.constant 0 : index
      %18 = vector.load %arg5[%c0_14, %c0_15] : memref<1x256xf32, #tpu.memory_space<vmem>>, vector<1x256xf32>
      %19 = vector.broadcast %18 : vector<1x256xf32> to vector<8x256xf32>
      %20 = arith.addf %17, %19 : vector<8x256xf32>
      %c0_16 = arith.constant 0 : index
      %c0_17 = arith.constant 0 : index
      %21 = vector.load %arg6[%c0_16, %c0_17] : memref<8x256xf32, #tpu.memory_space<vmem>>, vector<8x256xf32>
      tpu.vector_store %arg6[%c0_16, %c0_17], %20 {strides = array<i32>} : memref<8x256xf32, #tpu.memory_space<vmem>>, vector<8x256xf32>,
      %22 = arith.mulf %20, %20 : vector<8x256xf32>
      %cst_18 = arith.constant dense<0.000000e+00> : vector<256xf32>
      %23 = vector.multi_reduction <add>, %20, %cst_18 [0] : vector<8x256xf32> to vector<256xf32>
      %24 = vector.shape_cast %23 : vector<256xf32> to vector<1x256xf32>
      %cst_19 = arith.constant dense<0.000000e+00> : vector<256xf32>
      %25 = vector.multi_reduction <add>, %22, %cst_19 [0] : vector<8x256xf32> to vector<256xf32>
      %26 = vector.shape_cast %25 : vector<256xf32> to vector<1x256xf32>
      %27 = tpu.concatenate %24, %26 in 0 : vector<1x256xf32>, vector<1x256xf32> -> vector<2x256xf32>
      %c0_20 = arith.constant 0 : index
      %c0_21 = arith.constant 0 : index
      %28 = vector.load %arg7[%c0_20, %c0_21] : memref<2x256xf32, #tpu.memory_space<vmem>>, vector<2x256xf32>
      %29 = arith.addf %28, %27 : vector<2x256xf32>
      %c0_22 = arith.constant 0 : index
      %c0_23 = arith.constant 0 : index
      %30 = vector.load %arg7[%c0_22, %c0_23] : memref<2x256xf32, #tpu.memory_space<vmem>>, vector<2x256xf32>
      tpu.vector_store %arg7[%c0_22, %c0_23], %29 {strides = array<i32>} : memref<2x256xf32, #tpu.memory_space<vmem>>, vector<2x256xf32>,
    } else {
    }
    return
  }
  func.func @transform_0(%arg0: i32, %arg1: i32, %arg2: i32) -> (i32, i32) {
    %c0_i32 = arith.constant 0 : i32
    return %arg1, %arg2 : i32, i32
  }
  func.func @transform_1(%arg0: i32, %arg1: i32, %arg2: i32) -> (i32, i32) {
    %c0_i32 = arith.constant 0 : i32
    return %arg2, %arg0 : i32, i32
  }
  func.func @transform_2(%arg0: i32, %arg1: i32, %arg2: i32) -> (i32, i32) {
    %c0_i32 = arith.constant 0 : i32
    %c0_i32_0 = arith.constant 0 : i32
    return %c0_i32, %arg0 : i32, i32
  }
  func.func @transform_3(%arg0: i32, %arg1: i32, %arg2: i32) -> (i32, i32) {
    %c0_i32 = arith.constant 0 : i32
    return %arg1, %arg0 : i32, i32
  }
  func.func @transform_4(%arg0: i32, %arg1: i32, %arg2: i32) -> (i32, i32) {
    %c0_i32 = arith.constant 0 : i32
    %c0_i32_0 = arith.constant 0 : i32
    return %c0_i32, %arg0 : i32, i32
  }
}

module attributes {stable_mosaic.version = 11 : i64} {
  func.func @_mm_bias_stats_kernel(%arg0: i32, %arg1: i32, %arg2: i32, %arg3: memref<8x384xbf16, #tpu.memory_space<vmem>>, %arg4: memref<384x256xbf16, #tpu.memory_space<vmem>>, %arg5: memref<1x256xf32, #tpu.memory_space<vmem>>, %arg6: memref<8x256xf32, #tpu.memory_space<vmem>>, %arg7: memref<2x256xf32, #tpu.memory_space<vmem>>, %arg8: memref<8x256xf32, #tpu.memory_space<vmem>>) attributes {dimension_semantics = [#tpu.dimension_semantics<parallel>, #tpu.dimension_semantics<arbitrary>, #tpu.dimension_semantics<arbitrary>], iteration_bounds = array<i64: 2, 1, 6>, scalar_prefetch = 0 : i64, scratch_operands = 1 : i64, tpu.core_type = #tpu.core_type<tc>, window_params = [{transform_indices = @transform_0, window_bounds = array<i64: 8, 384>}, {transform_indices = @transform_1, window_bounds = array<i64: 384, 256>}, {transform_indices = @transform_2, window_bounds = array<i64: 1, 256>}, {transform_indices = @transform_3, window_bounds = array<i64: 8, 256>}, {transform_indices = @transform_4, window_bounds = array<i64: 2, 256>}]} {
    %c0_i32 = arith.constant 0 : i32
    %0 = arith.cmpi eq, %arg2, %c0_i32 : i32
    %1 = arith.extui %0 : i1 to i32
    %c0_i32_0 = arith.constant 0 : i32
    %2 = arith.cmpi ne, %1, %c0_i32_0 : i32
    scf.if %2 {
      %cst_12 = arith.constant 0.000000e+00 : f32
      %17 = vector.broadcast %cst_12 : f32 to vector<8x256xf32>
      %c0_13 = arith.constant 0 : index
      %c0_14 = arith.constant 0 : index
      %18 = vector.load %arg8[%c0_13, %c0_14] : memref<8x256xf32, #tpu.memory_space<vmem>>, vector<8x256xf32>
      tpu.vector_store %arg8[%c0_13, %c0_14], %17 {strides = array<i32>} : memref<8x256xf32, #tpu.memory_space<vmem>>, vector<8x256xf32>,
    } else {
    }
    %c0_i32_1 = arith.constant 0 : i32
    %3 = arith.cmpi eq, %arg1, %c0_i32_1 : i32
    %c0_i32_2 = arith.constant 0 : i32
    %4 = arith.cmpi eq, %arg2, %c0_i32_2 : i32
    %5 = arith.andi %3, %4 : i1
    %6 = arith.extui %5 : i1 to i32
    %c0_i32_3 = arith.constant 0 : i32
    %7 = arith.cmpi ne, %6, %c0_i32_3 : i32
    scf.if %7 {
      %cst_12 = arith.constant 0.000000e+00 : f32
      %17 = vector.broadcast %cst_12 : f32 to vector<2x256xf32>
      %c0_13 = arith.constant 0 : index
      %c0_14 = arith.constant 0 : index
      %18 = vector.load %arg7[%c0_13, %c0_14] : memref<2x256xf32, #tpu.memory_space<vmem>>, vector<2x256xf32>
      tpu.vector_store %arg7[%c0_13, %c0_14], %17 {strides = array<i32>} : memref<2x256xf32, #tpu.memory_space<vmem>>, vector<2x256xf32>,
    } else {
    }
    %c0 = arith.constant 0 : index
    %c0_4 = arith.constant 0 : index
    %8 = vector.load %arg8[%c0, %c0_4] : memref<8x256xf32, #tpu.memory_space<vmem>>, vector<8x256xf32>
    %c0_5 = arith.constant 0 : index
    %c0_6 = arith.constant 0 : index
    %9 = vector.load %arg3[%c0_5, %c0_6] : memref<8x384xbf16, #tpu.memory_space<vmem>>, vector<8x384xbf16>
    %c0_7 = arith.constant 0 : index
    %c0_8 = arith.constant 0 : index
    %10 = vector.load %arg4[%c0_7, %c0_8] : memref<384x256xbf16, #tpu.memory_space<vmem>>, vector<384x256xbf16>
    %cst = arith.constant dense<0.000000e+00> : vector<8x256xf32>
    %11 = tpu.matmul %9, %10, %cst {dimension_numbers = #tpu.dot_dimension_numbers<[1], [0], [0], [1], [0, 0, 1, 1], [], []>} : vector<8x384xbf16>, vector<384x256xbf16>, vector<8x256xf32> -> vector<8x256xf32>
    %12 = arith.addf %8, %11 : vector<8x256xf32>
    %c0_9 = arith.constant 0 : index
    %c0_10 = arith.constant 0 : index
    %13 = vector.load %arg8[%c0_9, %c0_10] : memref<8x256xf32, #tpu.memory_space<vmem>>, vector<8x256xf32>
    tpu.vector_store %arg8[%c0_9, %c0_10], %12 {strides = array<i32>} : memref<8x256xf32, #tpu.memory_space<vmem>>, vector<8x256xf32>,
    %c5_i32 = arith.constant 5 : i32
    %14 = arith.cmpi eq, %arg2, %c5_i32 : i32
    %15 = arith.extui %14 : i1 to i32
    %c0_i32_11 = arith.constant 0 : i32
    %16 = arith.cmpi ne, %15, %c0_i32_11 : i32
    scf.if %16 {
      %c0_12 = arith.constant 0 : index
      %c0_13 = arith.constant 0 : index
      %17 = vector.load %arg8[%c0_12, %c0_13] : memref<8x256xf32, #tpu.memory_space<vmem>>, vector<8x256xf32>
      %c0_14 = arith.constant 0 : index
      %c0_15 = arith.constant 0 : index
      %18 = vector.load %arg5[%c0_14, %c0_15] : memref<1x256xf32, #tpu.memory_space<vmem>>, vector<1x256xf32>
      %19 = vector.broadcast %18 : vector<1x256xf32> to vector<8x256xf32>
      %20 = arith.addf %17, %19 : vector<8x256xf32>
      %c0_16 = arith.constant 0 : index
      %c0_17 = arith.constant 0 : index
      %21 = vector.load %arg6[%c0_16, %c0_17] : memref<8x256xf32, #tpu.memory_space<vmem>>, vector<8x256xf32>
      tpu.vector_store %arg6[%c0_16, %c0_17], %20 {strides = array<i32>} : memref<8x256xf32, #tpu.memory_space<vmem>>, vector<8x256xf32>,
      %22 = arith.mulf %20, %20 : vector<8x256xf32>
      %cst_18 = arith.constant dense<0.000000e+00> : vector<256xf32>
      %23 = vector.multi_reduction <add>, %20, %cst_18 [0] : vector<8x256xf32> to vector<256xf32>
      %24 = vector.shape_cast %23 : vector<256xf32> to vector<1x256xf32>
      %cst_19 = arith.constant dense<0.000000e+00> : vector<256xf32>
      %25 = vector.multi_reduction <add>, %22, %cst_19 [0] : vector<8x256xf32> to vector<256xf32>
      %26 = vector.shape_cast %25 : vector<256xf32> to vector<1x256xf32>
      %27 = tpu.concatenate %24, %26 in 0 : vector<1x256xf32>, vector<1x256xf32> -> vector<2x256xf32>
      %c0_20 = arith.constant 0 : index
      %c0_21 = arith.constant 0 : index
      %28 = vector.load %arg7[%c0_20, %c0_21] : memref<2x256xf32, #tpu.memory_space<vmem>>, vector<2x256xf32>
      %29 = arith.addf %28, %27 : vector<2x256xf32>
      %c0_22 = arith.constant 0 : index
      %c0_23 = arith.constant 0 : index
      %30 = vector.load %arg7[%c0_22, %c0_23] : memref<2x256xf32, #tpu.memory_space<vmem>>, vector<2x256xf32>
      tpu.vector_store %arg7[%c0_22, %c0_23], %29 {strides = array<i32>} : memref<2x256xf32, #tpu.memory_space<vmem>>, vector<2x256xf32>,
    } else {
    }
    return
  }
  func.func @transform_0(%arg0: i32, %arg1: i32, %arg2: i32) -> (i32, i32) {
    %c0_i32 = arith.constant 0 : i32
    return %arg1, %arg2 : i32, i32
  }
  func.func @transform_1(%arg0: i32, %arg1: i32, %arg2: i32) -> (i32, i32) {
    %c0_i32 = arith.constant 0 : i32
    return %arg2, %arg0 : i32, i32
  }
  func.func @transform_2(%arg0: i32, %arg1: i32, %arg2: i32) -> (i32, i32) {
    %c0_i32 = arith.constant 0 : i32
    %c0_i32_0 = arith.constant 0 : i32
    return %c0_i32, %arg0 : i32, i32
  }
  func.func @transform_3(%arg0: i32, %arg1: i32, %arg2: i32) -> (i32, i32) {
    %c0_i32 = arith.constant 0 : i32
    return %arg1, %arg0 : i32, i32
  }
  func.func @transform_4(%arg0: i32, %arg1: i32, %arg2: i32) -> (i32, i32) {
    %c0_i32 = arith.constant 0 : i32
    %c0_i32_0 = arith.constant 0 : i32
    return %c0_i32, %arg0 : i32, i32
  }
}

module attributes {stable_mosaic.version = 11 : i64} {
  func.func @_bn_leaky_kernel(%arg0: i32, %arg1: memref<8x512xf32, #tpu.memory_space<vmem>>, %arg2: memref<2x512xf32, #tpu.memory_space<vmem>>, %arg3: memref<1x512xf32, #tpu.memory_space<vmem>>, %arg4: memref<1x512xf32, #tpu.memory_space<vmem>>, %arg5: memref<8x512xbf16, #tpu.memory_space<vmem>>) attributes {dimension_semantics = [#tpu.dimension_semantics<parallel>], iteration_bounds = array<i64: 1>, scalar_prefetch = 0 : i64, scratch_operands = 0 : i64, tpu.core_type = #tpu.core_type<tc>, window_params = [{transform_indices = @transform_0, window_bounds = array<i64: 8, 512>}, {pipeline_mode = #tpu.pipeline_mode<synchronous>, transform_indices = @transform_1, window_bounds = array<i64: 2, 512>}, {pipeline_mode = #tpu.pipeline_mode<synchronous>, transform_indices = @transform_2, window_bounds = array<i64: 1, 512>}, {pipeline_mode = #tpu.pipeline_mode<synchronous>, transform_indices = @transform_3, window_bounds = array<i64: 1, 512>}, {transform_indices = @transform_4, window_bounds = array<i64: 8, 512>}]} {
    %c0 = arith.constant 0 : index
    %c0_0 = arith.constant 0 : index
    %0 = vector.load %arg2[%c0, %c0_0] : memref<2x512xf32, #tpu.memory_space<vmem>>, vector<2x512xf32>
    %1 = vector.extract_strided_slice %0 {offsets = [0, 0], sizes = [1, 512], strides = [1, 1]} : vector<2x512xf32> to vector<1x512xf32>
    %cst = arith.constant 1.250000e-01 : f32
    %2 = vector.broadcast %cst : f32 to vector<1x512xf32>
    %3 = arith.mulf %1, %2 : vector<1x512xf32>
    %4 = vector.extract_strided_slice %0 {offsets = [1, 0], sizes = [1, 512], strides = [1, 1]} : vector<2x512xf32> to vector<1x512xf32>
    %cst_1 = arith.constant 1.250000e-01 : f32
    %5 = vector.broadcast %cst_1 : f32 to vector<1x512xf32>
    %6 = arith.mulf %4, %5 : vector<1x512xf32>
    %7 = arith.mulf %3, %3 : vector<1x512xf32>
    %8 = arith.subf %6, %7 : vector<1x512xf32>
    %cst_2 = arith.constant 0.000000e+00 : f32
    %9 = vector.broadcast %cst_2 : f32 to vector<1x512xf32>
    %10 = arith.maximumf %8, %9 : vector<1x512xf32>
    %c0_3 = arith.constant 0 : index
    %c0_4 = arith.constant 0 : index
    %11 = vector.load %arg3[%c0_3, %c0_4] : memref<1x512xf32, #tpu.memory_space<vmem>>, vector<1x512xf32>
    %cst_5 = arith.constant 9.99999974E-6 : f32
    %12 = vector.broadcast %cst_5 : f32 to vector<1x512xf32>
    %13 = arith.addf %10, %12 : vector<1x512xf32>
    %14 = math.rsqrt %13 : vector<1x512xf32>
    %15 = arith.mulf %11, %14 : vector<1x512xf32>
    %c0_6 = arith.constant 0 : index
    %c0_7 = arith.constant 0 : index
    %16 = vector.load %arg4[%c0_6, %c0_7] : memref<1x512xf32, #tpu.memory_space<vmem>>, vector<1x512xf32>
    %17 = arith.mulf %3, %15 : vector<1x512xf32>
    %18 = arith.subf %16, %17 : vector<1x512xf32>
    %c0_8 = arith.constant 0 : index
    %c0_9 = arith.constant 0 : index
    %19 = vector.load %arg1[%c0_8, %c0_9] : memref<8x512xf32, #tpu.memory_space<vmem>>, vector<8x512xf32>
    %20 = vector.broadcast %15 : vector<1x512xf32> to vector<8x512xf32>
    %21 = arith.mulf %19, %20 : vector<8x512xf32>
    %22 = vector.broadcast %18 : vector<1x512xf32> to vector<8x512xf32>
    %23 = arith.addf %21, %22 : vector<8x512xf32>
    %cst_10 = arith.constant 0.000000e+00 : f32
    %24 = vector.broadcast %cst_10 : f32 to vector<8x512xf32>
    %25 = arith.cmpf ogt, %23, %24 : vector<8x512xf32>
    %cst_11 = arith.constant 2.000000e-01 : f32
    %26 = vector.broadcast %cst_11 : f32 to vector<8x512xf32>
    %27 = arith.mulf %26, %23 : vector<8x512xf32>
    %28 = arith.select %25, %23, %27 : vector<8x512xi1>, vector<8x512xf32>
    %29 = arith.truncf %28 : vector<8x512xf32> to vector<8x512xbf16>
    %c0_12 = arith.constant 0 : index
    %c0_13 = arith.constant 0 : index
    %30 = vector.load %arg5[%c0_12, %c0_13] : memref<8x512xbf16, #tpu.memory_space<vmem>>, vector<8x512xbf16>
    tpu.vector_store %arg5[%c0_12, %c0_13], %29 {strides = array<i32>} : memref<8x512xbf16, #tpu.memory_space<vmem>>, vector<8x512xbf16>,
    return
  }
  func.func @transform_0(%arg0: i32) -> (i32, i32) {
    %c0_i32 = arith.constant 0 : i32
    %c0_i32_0 = arith.constant 0 : i32
    return %arg0, %c0_i32 : i32, i32
  }
  func.func @transform_1(%arg0: i32) -> (i32, i32) {
    %c0_i32 = arith.constant 0 : i32
    %c0_i32_0 = arith.constant 0 : i32
    %c0_i32_1 = arith.constant 0 : i32
    return %c0_i32, %c0_i32_0 : i32, i32
  }
  func.func @transform_2(%arg0: i32) -> (i32, i32) {
    %c0_i32 = arith.constant 0 : i32
    %c0_i32_0 = arith.constant 0 : i32
    %c0_i32_1 = arith.constant 0 : i32
    return %c0_i32, %c0_i32_0 : i32, i32
  }
  func.func @transform_3(%arg0: i32) -> (i32, i32) {
    %c0_i32 = arith.constant 0 : i32
    %c0_i32_0 = arith.constant 0 : i32
    %c0_i32_1 = arith.constant 0 : i32
    return %c0_i32, %c0_i32_0 : i32, i32
  }
  func.func @transform_4(%arg0: i32) -> (i32, i32) {
    %c0_i32 = arith.constant 0 : i32
    %c0_i32_0 = arith.constant 0 : i32
    return %arg0, %c0_i32 : i32, i32
  }
}

module attributes {stable_mosaic.version = 11 : i64} {
  func.func @_bn_leaky_kernel(%arg0: i32, %arg1: memref<8x512xf32, #tpu.memory_space<vmem>>, %arg2: memref<2x512xf32, #tpu.memory_space<vmem>>, %arg3: memref<1x512xf32, #tpu.memory_space<vmem>>, %arg4: memref<1x512xf32, #tpu.memory_space<vmem>>, %arg5: memref<8x512xbf16, #tpu.memory_space<vmem>>) attributes {dimension_semantics = [#tpu.dimension_semantics<parallel>], iteration_bounds = array<i64: 1>, scalar_prefetch = 0 : i64, scratch_operands = 0 : i64, tpu.core_type = #tpu.core_type<tc>, window_params = [{transform_indices = @transform_0, window_bounds = array<i64: 8, 512>}, {pipeline_mode = #tpu.pipeline_mode<synchronous>, transform_indices = @transform_1, window_bounds = array<i64: 2, 512>}, {pipeline_mode = #tpu.pipeline_mode<synchronous>, transform_indices = @transform_2, window_bounds = array<i64: 1, 512>}, {pipeline_mode = #tpu.pipeline_mode<synchronous>, transform_indices = @transform_3, window_bounds = array<i64: 1, 512>}, {transform_indices = @transform_4, window_bounds = array<i64: 8, 512>}]} {
    %c0 = arith.constant 0 : index
    %c0_0 = arith.constant 0 : index
    %0 = vector.load %arg2[%c0, %c0_0] : memref<2x512xf32, #tpu.memory_space<vmem>>, vector<2x512xf32>
    %1 = vector.extract_strided_slice %0 {offsets = [0, 0], sizes = [1, 512], strides = [1, 1]} : vector<2x512xf32> to vector<1x512xf32>
    %cst = arith.constant 5.000000e-01 : f32
    %2 = vector.broadcast %cst : f32 to vector<1x512xf32>
    %3 = arith.mulf %1, %2 : vector<1x512xf32>
    %4 = vector.extract_strided_slice %0 {offsets = [1, 0], sizes = [1, 512], strides = [1, 1]} : vector<2x512xf32> to vector<1x512xf32>
    %cst_1 = arith.constant 5.000000e-01 : f32
    %5 = vector.broadcast %cst_1 : f32 to vector<1x512xf32>
    %6 = arith.mulf %4, %5 : vector<1x512xf32>
    %7 = arith.mulf %3, %3 : vector<1x512xf32>
    %8 = arith.subf %6, %7 : vector<1x512xf32>
    %cst_2 = arith.constant 0.000000e+00 : f32
    %9 = vector.broadcast %cst_2 : f32 to vector<1x512xf32>
    %10 = arith.maximumf %8, %9 : vector<1x512xf32>
    %c0_3 = arith.constant 0 : index
    %c0_4 = arith.constant 0 : index
    %11 = vector.load %arg3[%c0_3, %c0_4] : memref<1x512xf32, #tpu.memory_space<vmem>>, vector<1x512xf32>
    %cst_5 = arith.constant 9.99999974E-6 : f32
    %12 = vector.broadcast %cst_5 : f32 to vector<1x512xf32>
    %13 = arith.addf %10, %12 : vector<1x512xf32>
    %14 = math.rsqrt %13 : vector<1x512xf32>
    %15 = arith.mulf %11, %14 : vector<1x512xf32>
    %c0_6 = arith.constant 0 : index
    %c0_7 = arith.constant 0 : index
    %16 = vector.load %arg4[%c0_6, %c0_7] : memref<1x512xf32, #tpu.memory_space<vmem>>, vector<1x512xf32>
    %17 = arith.mulf %3, %15 : vector<1x512xf32>
    %18 = arith.subf %16, %17 : vector<1x512xf32>
    %c0_8 = arith.constant 0 : index
    %c0_9 = arith.constant 0 : index
    %19 = vector.load %arg1[%c0_8, %c0_9] : memref<8x512xf32, #tpu.memory_space<vmem>>, vector<8x512xf32>
    %20 = vector.broadcast %15 : vector<1x512xf32> to vector<8x512xf32>
    %21 = arith.mulf %19, %20 : vector<8x512xf32>
    %22 = vector.broadcast %18 : vector<1x512xf32> to vector<8x512xf32>
    %23 = arith.addf %21, %22 : vector<8x512xf32>
    %cst_10 = arith.constant 0.000000e+00 : f32
    %24 = vector.broadcast %cst_10 : f32 to vector<8x512xf32>
    %25 = arith.cmpf ogt, %23, %24 : vector<8x512xf32>
    %cst_11 = arith.constant 2.000000e-01 : f32
    %26 = vector.broadcast %cst_11 : f32 to vector<8x512xf32>
    %27 = arith.mulf %26, %23 : vector<8x512xf32>
    %28 = arith.select %25, %23, %27 : vector<8x512xi1>, vector<8x512xf32>
    %29 = arith.truncf %28 : vector<8x512xf32> to vector<8x512xbf16>
    %c0_12 = arith.constant 0 : index
    %c0_13 = arith.constant 0 : index
    %30 = vector.load %arg5[%c0_12, %c0_13] : memref<8x512xbf16, #tpu.memory_space<vmem>>, vector<8x512xbf16>
    tpu.vector_store %arg5[%c0_12, %c0_13], %29 {strides = array<i32>} : memref<8x512xbf16, #tpu.memory_space<vmem>>, vector<8x512xbf16>,
    return
  }
  func.func @transform_0(%arg0: i32) -> (i32, i32) {
    %c0_i32 = arith.constant 0 : i32
    %c0_i32_0 = arith.constant 0 : i32
    return %arg0, %c0_i32 : i32, i32
  }
  func.func @transform_1(%arg0: i32) -> (i32, i32) {
    %c0_i32 = arith.constant 0 : i32
    %c0_i32_0 = arith.constant 0 : i32
    %c0_i32_1 = arith.constant 0 : i32
    return %c0_i32, %c0_i32_0 : i32, i32
  }
  func.func @transform_2(%arg0: i32) -> (i32, i32) {
    %c0_i32 = arith.constant 0 : i32
    %c0_i32_0 = arith.constant 0 : i32
    %c0_i32_1 = arith.constant 0 : i32
    return %c0_i32, %c0_i32_0 : i32, i32
  }
  func.func @transform_3(%arg0: i32) -> (i32, i32) {
    %c0_i32 = arith.constant 0 : i32
    %c0_i32_0 = arith.constant 0 : i32
    %c0_i32_1 = arith.constant 0 : i32
    return %c0_i32, %c0_i32_0 : i32, i32
  }
  func.func @transform_4(%arg0: i32) -> (i32, i32) {
    %c0_i32 = arith.constant 0 : i32
    %c0_i32_0 = arith.constant 0 : i32
    return %arg0, %c0_i32 : i32, i32
  }
}

module attributes {stable_mosaic.version = 11 : i64} {
  func.func @_mm_bias_stats_kernel(%arg0: i32, %arg1: i32, %arg2: i32, %arg3: memref<8x512xbf16, #tpu.memory_space<vmem>>, %arg4: memref<512x256xbf16, #tpu.memory_space<vmem>>, %arg5: memref<1x256xf32, #tpu.memory_space<vmem>>, %arg6: memref<8x256xf32, #tpu.memory_space<vmem>>, %arg7: memref<2x256xf32, #tpu.memory_space<vmem>>, %arg8: memref<8x256xf32, #tpu.memory_space<vmem>>) attributes {dimension_semantics = [#tpu.dimension_semantics<parallel>, #tpu.dimension_semantics<arbitrary>, #tpu.dimension_semantics<arbitrary>], iteration_bounds = array<i64: 2, 1, 9>, scalar_prefetch = 0 : i64, scratch_operands = 1 : i64, tpu.core_type = #tpu.core_type<tc>, window_params = [{transform_indices = @transform_0, window_bounds = array<i64: 8, 512>}, {transform_indices = @transform_1, window_bounds = array<i64: 512, 256>}, {transform_indices = @transform_2, window_bounds = array<i64: 1, 256>}, {transform_indices = @transform_3, window_bounds = array<i64: 8, 256>}, {transform_indices = @transform_4, window_bounds = array<i64: 2, 256>}]} {
    %c0_i32 = arith.constant 0 : i32
    %0 = arith.cmpi eq, %arg2, %c0_i32 : i32
    %1 = arith.extui %0 : i1 to i32
    %c0_i32_0 = arith.constant 0 : i32
    %2 = arith.cmpi ne, %1, %c0_i32_0 : i32
    scf.if %2 {
      %cst_12 = arith.constant 0.000000e+00 : f32
      %17 = vector.broadcast %cst_12 : f32 to vector<8x256xf32>
      %c0_13 = arith.constant 0 : index
      %c0_14 = arith.constant 0 : index
      %18 = vector.load %arg8[%c0_13, %c0_14] : memref<8x256xf32, #tpu.memory_space<vmem>>, vector<8x256xf32>
      tpu.vector_store %arg8[%c0_13, %c0_14], %17 {strides = array<i32>} : memref<8x256xf32, #tpu.memory_space<vmem>>, vector<8x256xf32>,
    } else {
    }
    %c0_i32_1 = arith.constant 0 : i32
    %3 = arith.cmpi eq, %arg1, %c0_i32_1 : i32
    %c0_i32_2 = arith.constant 0 : i32
    %4 = arith.cmpi eq, %arg2, %c0_i32_2 : i32
    %5 = arith.andi %3, %4 : i1
    %6 = arith.extui %5 : i1 to i32
    %c0_i32_3 = arith.constant 0 : i32
    %7 = arith.cmpi ne, %6, %c0_i32_3 : i32
    scf.if %7 {
      %cst_12 = arith.constant 0.000000e+00 : f32
      %17 = vector.broadcast %cst_12 : f32 to vector<2x256xf32>
      %c0_13 = arith.constant 0 : index
      %c0_14 = arith.constant 0 : index
      %18 = vector.load %arg7[%c0_13, %c0_14] : memref<2x256xf32, #tpu.memory_space<vmem>>, vector<2x256xf32>
      tpu.vector_store %arg7[%c0_13, %c0_14], %17 {strides = array<i32>} : memref<2x256xf32, #tpu.memory_space<vmem>>, vector<2x256xf32>,
    } else {
    }
    %c0 = arith.constant 0 : index
    %c0_4 = arith.constant 0 : index
    %8 = vector.load %arg8[%c0, %c0_4] : memref<8x256xf32, #tpu.memory_space<vmem>>, vector<8x256xf32>
    %c0_5 = arith.constant 0 : index
    %c0_6 = arith.constant 0 : index
    %9 = vector.load %arg3[%c0_5, %c0_6] : memref<8x512xbf16, #tpu.memory_space<vmem>>, vector<8x512xbf16>
    %c0_7 = arith.constant 0 : index
    %c0_8 = arith.constant 0 : index
    %10 = vector.load %arg4[%c0_7, %c0_8] : memref<512x256xbf16, #tpu.memory_space<vmem>>, vector<512x256xbf16>
    %cst = arith.constant dense<0.000000e+00> : vector<8x256xf32>
    %11 = tpu.matmul %9, %10, %cst {dimension_numbers = #tpu.dot_dimension_numbers<[1], [0], [0], [1], [0, 0, 1, 1], [], []>} : vector<8x512xbf16>, vector<512x256xbf16>, vector<8x256xf32> -> vector<8x256xf32>
    %12 = arith.addf %8, %11 : vector<8x256xf32>
    %c0_9 = arith.constant 0 : index
    %c0_10 = arith.constant 0 : index
    %13 = vector.load %arg8[%c0_9, %c0_10] : memref<8x256xf32, #tpu.memory_space<vmem>>, vector<8x256xf32>
    tpu.vector_store %arg8[%c0_9, %c0_10], %12 {strides = array<i32>} : memref<8x256xf32, #tpu.memory_space<vmem>>, vector<8x256xf32>,
    %c8_i32 = arith.constant 8 : i32
    %14 = arith.cmpi eq, %arg2, %c8_i32 : i32
    %15 = arith.extui %14 : i1 to i32
    %c0_i32_11 = arith.constant 0 : i32
    %16 = arith.cmpi ne, %15, %c0_i32_11 : i32
    scf.if %16 {
      %c0_12 = arith.constant 0 : index
      %c0_13 = arith.constant 0 : index
      %17 = vector.load %arg8[%c0_12, %c0_13] : memref<8x256xf32, #tpu.memory_space<vmem>>, vector<8x256xf32>
      %c0_14 = arith.constant 0 : index
      %c0_15 = arith.constant 0 : index
      %18 = vector.load %arg5[%c0_14, %c0_15] : memref<1x256xf32, #tpu.memory_space<vmem>>, vector<1x256xf32>
      %19 = vector.broadcast %18 : vector<1x256xf32> to vector<8x256xf32>
      %20 = arith.addf %17, %19 : vector<8x256xf32>
      %c0_16 = arith.constant 0 : index
      %c0_17 = arith.constant 0 : index
      %21 = vector.load %arg6[%c0_16, %c0_17] : memref<8x256xf32, #tpu.memory_space<vmem>>, vector<8x256xf32>
      tpu.vector_store %arg6[%c0_16, %c0_17], %20 {strides = array<i32>} : memref<8x256xf32, #tpu.memory_space<vmem>>, vector<8x256xf32>,
      %22 = tpu.iota {dimensions = array<i32: 0>} : vector<8x256xi32>
      %c8_i32_18 = arith.constant 8 : i32
      %23 = arith.muli %arg1, %c8_i32_18 : i32
      %24 = vector.broadcast %23 : i32 to vector<8x256xi32>
      %25 = arith.addi %22, %24 : vector<8x256xi32>
      %c2_i32 = arith.constant 2 : i32
      %26 = vector.broadcast %c2_i32 : i32 to vector<8x256xi32>
      %27 = arith.cmpi slt, %25, %26 : vector<8x256xi32>
      %cst_19 = arith.constant 0.000000e+00 : f32
      %28 = vector.broadcast %cst_19 : f32 to vector<8x256xf32>
      %29 = arith.select %27, %20, %28 : vector<8x256xi1>, vector<8x256xf32>
      %30 = arith.mulf %20, %20 : vector<8x256xf32>
      %cst_20 = arith.constant 0.000000e+00 : f32
      %31 = vector.broadcast %cst_20 : f32 to vector<8x256xf32>
      %32 = arith.select %27, %30, %31 : vector<8x256xi1>, vector<8x256xf32>
      %cst_21 = arith.constant dense<0.000000e+00> : vector<256xf32>
      %33 = vector.multi_reduction <add>, %29, %cst_21 [0] : vector<8x256xf32> to vector<256xf32>
      %34 = vector.shape_cast %33 : vector<256xf32> to vector<1x256xf32>
      %cst_22 = arith.constant dense<0.000000e+00> : vector<256xf32>
      %35 = vector.multi_reduction <add>, %32, %cst_22 [0] : vector<8x256xf32> to vector<256xf32>
      %36 = vector.shape_cast %35 : vector<256xf32> to vector<1x256xf32>
      %37 = tpu.concatenate %34, %36 in 0 : vector<1x256xf32>, vector<1x256xf32> -> vector<2x256xf32>
      %c0_23 = arith.constant 0 : index
      %c0_24 = arith.constant 0 : index
      %38 = vector.load %arg7[%c0_23, %c0_24] : memref<2x256xf32, #tpu.memory_space<vmem>>, vector<2x256xf32>
      %39 = arith.addf %38, %37 : vector<2x256xf32>
      %c0_25 = arith.constant 0 : index
      %c0_26 = arith.constant 0 : index
      %40 = vector.load %arg7[%c0_25, %c0_26] : memref<2x256xf32, #tpu.memory_space<vmem>>, vector<2x256xf32>
      tpu.vector_store %arg7[%c0_25, %c0_26], %39 {strides = array<i32>} : memref<2x256xf32, #tpu.memory_space<vmem>>, vector<2x256xf32>,
    } else {
    }
    return
  }
  func.func @transform_0(%arg0: i32, %arg1: i32, %arg2: i32) -> (i32, i32) {
    %c0_i32 = arith.constant 0 : i32
    return %arg1, %arg2 : i32, i32
  }
  func.func @transform_1(%arg0: i32, %arg1: i32, %arg2: i32) -> (i32, i32) {
    %c0_i32 = arith.constant 0 : i32
    return %arg2, %arg0 : i32, i32
  }
  func.func @transform_2(%arg0: i32, %arg1: i32, %arg2: i32) -> (i32, i32) {
    %c0_i32 = arith.constant 0 : i32
    %c0_i32_0 = arith.constant 0 : i32
    return %c0_i32, %arg0 : i32, i32
  }
  func.func @transform_3(%arg0: i32, %arg1: i32, %arg2: i32) -> (i32, i32) {
    %c0_i32 = arith.constant 0 : i32
    return %arg1, %arg0 : i32, i32
  }
  func.func @transform_4(%arg0: i32, %arg1: i32, %arg2: i32) -> (i32, i32) {
    %c0_i32 = arith.constant 0 : i32
    %c0_i32_0 = arith.constant 0 : i32
    return %c0_i32, %arg0 : i32, i32
  }
}

module attributes {stable_mosaic.version = 11 : i64} {
  func.func @_mm_bias_act_kernel(%arg0: i32, %arg1: i32, %arg2: i32, %arg3: memref<8x512xbf16, #tpu.memory_space<vmem>>, %arg4: memref<512x256xbf16, #tpu.memory_space<vmem>>, %arg5: memref<1x256xf32, #tpu.memory_space<vmem>>, %arg6: memref<8x256xbf16, #tpu.memory_space<vmem>>, %arg7: memref<8x256xf32, #tpu.memory_space<vmem>>) attributes {dimension_semantics = [#tpu.dimension_semantics<parallel>, #tpu.dimension_semantics<parallel>, #tpu.dimension_semantics<arbitrary>], iteration_bounds = array<i64: 4, 1, 1>, scalar_prefetch = 0 : i64, scratch_operands = 1 : i64, tpu.core_type = #tpu.core_type<tc>, window_params = [{transform_indices = @transform_0, window_bounds = array<i64: 8, 512>}, {transform_indices = @transform_1, window_bounds = array<i64: 512, 256>}, {transform_indices = @transform_2, window_bounds = array<i64: 1, 256>}, {transform_indices = @transform_3, window_bounds = array<i64: 8, 256>}]} {
    %c0_i32 = arith.constant 0 : i32
    %0 = arith.cmpi eq, %arg2, %c0_i32 : i32
    %1 = arith.extui %0 : i1 to i32
    %c0_i32_0 = arith.constant 0 : i32
    %2 = arith.cmpi ne, %1, %c0_i32_0 : i32
    scf.if %2 {
      %cst_10 = arith.constant 0.000000e+00 : f32
      %12 = vector.broadcast %cst_10 : f32 to vector<8x256xf32>
      %c0_11 = arith.constant 0 : index
      %c0_12 = arith.constant 0 : index
      %13 = vector.load %arg7[%c0_11, %c0_12] : memref<8x256xf32, #tpu.memory_space<vmem>>, vector<8x256xf32>
      tpu.vector_store %arg7[%c0_11, %c0_12], %12 {strides = array<i32>} : memref<8x256xf32, #tpu.memory_space<vmem>>, vector<8x256xf32>,
    } else {
    }
    %c0 = arith.constant 0 : index
    %c0_1 = arith.constant 0 : index
    %3 = vector.load %arg7[%c0, %c0_1] : memref<8x256xf32, #tpu.memory_space<vmem>>, vector<8x256xf32>
    %c0_2 = arith.constant 0 : index
    %c0_3 = arith.constant 0 : index
    %4 = vector.load %arg3[%c0_2, %c0_3] : memref<8x512xbf16, #tpu.memory_space<vmem>>, vector<8x512xbf16>
    %c0_4 = arith.constant 0 : index
    %c0_5 = arith.constant 0 : index
    %5 = vector.load %arg4[%c0_4, %c0_5] : memref<512x256xbf16, #tpu.memory_space<vmem>>, vector<512x256xbf16>
    %cst = arith.constant dense<0.000000e+00> : vector<8x256xf32>
    %6 = tpu.matmul %4, %5, %cst {dimension_numbers = #tpu.dot_dimension_numbers<[1], [0], [0], [1], [0, 0, 1, 1], [], []>} : vector<8x512xbf16>, vector<512x256xbf16>, vector<8x256xf32> -> vector<8x256xf32>
    %7 = arith.addf %3, %6 : vector<8x256xf32>
    %c0_6 = arith.constant 0 : index
    %c0_7 = arith.constant 0 : index
    %8 = vector.load %arg7[%c0_6, %c0_7] : memref<8x256xf32, #tpu.memory_space<vmem>>, vector<8x256xf32>
    tpu.vector_store %arg7[%c0_6, %c0_7], %7 {strides = array<i32>} : memref<8x256xf32, #tpu.memory_space<vmem>>, vector<8x256xf32>,
    %c0_i32_8 = arith.constant 0 : i32
    %9 = arith.cmpi eq, %arg2, %c0_i32_8 : i32
    %10 = arith.extui %9 : i1 to i32
    %c0_i32_9 = arith.constant 0 : i32
    %11 = arith.cmpi ne, %10, %c0_i32_9 : i32
    scf.if %11 {
      %c0_10 = arith.constant 0 : index
      %c0_11 = arith.constant 0 : index
      %12 = vector.load %arg7[%c0_10, %c0_11] : memref<8x256xf32, #tpu.memory_space<vmem>>, vector<8x256xf32>
      %c0_12 = arith.constant 0 : index
      %c0_13 = arith.constant 0 : index
      %13 = vector.load %arg5[%c0_12, %c0_13] : memref<1x256xf32, #tpu.memory_space<vmem>>, vector<1x256xf32>
      %14 = vector.broadcast %13 : vector<1x256xf32> to vector<8x256xf32>
      %15 = arith.addf %12, %14 : vector<8x256xf32>
      %cst_14 = arith.constant 0.000000e+00 : f32
      %16 = vector.broadcast %cst_14 : f32 to vector<8x256xf32>
      %17 = arith.cmpf ogt, %15, %16 : vector<8x256xf32>
      %cst_15 = arith.constant 2.000000e-01 : f32
      %18 = vector.broadcast %cst_15 : f32 to vector<8x256xf32>
      %19 = arith.mulf %18, %15 : vector<8x256xf32>
      %20 = arith.select %17, %15, %19 : vector<8x256xi1>, vector<8x256xf32>
      %21 = arith.truncf %20 : vector<8x256xf32> to vector<8x256xbf16>
      %c0_16 = arith.constant 0 : index
      %c0_17 = arith.constant 0 : index
      %22 = vector.load %arg6[%c0_16, %c0_17] : memref<8x256xbf16, #tpu.memory_space<vmem>>, vector<8x256xbf16>
      tpu.vector_store %arg6[%c0_16, %c0_17], %21 {strides = array<i32>} : memref<8x256xbf16, #tpu.memory_space<vmem>>, vector<8x256xbf16>,
    } else {
    }
    return
  }
  func.func @transform_0(%arg0: i32, %arg1: i32, %arg2: i32) -> (i32, i32) {
    %c0_i32 = arith.constant 0 : i32
    return %arg1, %arg2 : i32, i32
  }
  func.func @transform_1(%arg0: i32, %arg1: i32, %arg2: i32) -> (i32, i32) {
    %c0_i32 = arith.constant 0 : i32
    return %arg2, %arg0 : i32, i32
  }
  func.func @transform_2(%arg0: i32, %arg1: i32, %arg2: i32) -> (i32, i32) {
    %c0_i32 = arith.constant 0 : i32
    %c0_i32_0 = arith.constant 0 : i32
    return %c0_i32, %arg0 : i32, i32
  }
  func.func @transform_3(%arg0: i32, %arg1: i32, %arg2: i32) -> (i32, i32) {
    %c0_i32 = arith.constant 0 : i32
    return %arg1, %arg0 : i32, i32
  }
}

module attributes {stable_mosaic.version = 11 : i64} {
  func.func @_mm_bias_act_kernel(%arg0: i32, %arg1: i32, %arg2: i32, %arg3: memref<8x1024xbf16, #tpu.memory_space<vmem>>, %arg4: memref<1024x128xbf16, #tpu.memory_space<vmem>>, %arg5: memref<1x128xf32, #tpu.memory_space<vmem>>, %arg6: memref<8x128xf32, #tpu.memory_space<vmem>>, %arg7: memref<8x128xf32, #tpu.memory_space<vmem>>) attributes {dimension_semantics = [#tpu.dimension_semantics<parallel>, #tpu.dimension_semantics<parallel>, #tpu.dimension_semantics<arbitrary>], iteration_bounds = array<i64: 1, 1, 1>, scalar_prefetch = 0 : i64, scratch_operands = 1 : i64, tpu.core_type = #tpu.core_type<tc>, window_params = [{transform_indices = @transform_0, window_bounds = array<i64: 8, 1024>}, {transform_indices = @transform_1, window_bounds = array<i64: 1024, 128>}, {transform_indices = @transform_2, window_bounds = array<i64: 1, 128>}, {transform_indices = @transform_3, window_bounds = array<i64: 8, 128>}]} {
    %c0_i32 = arith.constant 0 : i32
    %0 = arith.cmpi eq, %arg2, %c0_i32 : i32
    %1 = arith.extui %0 : i1 to i32
    %c0_i32_0 = arith.constant 0 : i32
    %2 = arith.cmpi ne, %1, %c0_i32_0 : i32
    scf.if %2 {
      %cst_10 = arith.constant 0.000000e+00 : f32
      %12 = vector.broadcast %cst_10 : f32 to vector<8x128xf32>
      %c0_11 = arith.constant 0 : index
      %c0_12 = arith.constant 0 : index
      %13 = vector.load %arg7[%c0_11, %c0_12] : memref<8x128xf32, #tpu.memory_space<vmem>>, vector<8x128xf32>
      tpu.vector_store %arg7[%c0_11, %c0_12], %12 {strides = array<i32>} : memref<8x128xf32, #tpu.memory_space<vmem>>, vector<8x128xf32>,
    } else {
    }
    %c0 = arith.constant 0 : index
    %c0_1 = arith.constant 0 : index
    %3 = vector.load %arg7[%c0, %c0_1] : memref<8x128xf32, #tpu.memory_space<vmem>>, vector<8x128xf32>
    %c0_2 = arith.constant 0 : index
    %c0_3 = arith.constant 0 : index
    %4 = vector.load %arg3[%c0_2, %c0_3] : memref<8x1024xbf16, #tpu.memory_space<vmem>>, vector<8x1024xbf16>
    %c0_4 = arith.constant 0 : index
    %c0_5 = arith.constant 0 : index
    %5 = vector.load %arg4[%c0_4, %c0_5] : memref<1024x128xbf16, #tpu.memory_space<vmem>>, vector<1024x128xbf16>
    %cst = arith.constant dense<0.000000e+00> : vector<8x128xf32>
    %6 = tpu.matmul %4, %5, %cst {dimension_numbers = #tpu.dot_dimension_numbers<[1], [0], [0], [1], [0, 0, 1, 1], [], []>} : vector<8x1024xbf16>, vector<1024x128xbf16>, vector<8x128xf32> -> vector<8x128xf32>
    %7 = arith.addf %3, %6 : vector<8x128xf32>
    %c0_6 = arith.constant 0 : index
    %c0_7 = arith.constant 0 : index
    %8 = vector.load %arg7[%c0_6, %c0_7] : memref<8x128xf32, #tpu.memory_space<vmem>>, vector<8x128xf32>
    tpu.vector_store %arg7[%c0_6, %c0_7], %7 {strides = array<i32>} : memref<8x128xf32, #tpu.memory_space<vmem>>, vector<8x128xf32>,
    %c0_i32_8 = arith.constant 0 : i32
    %9 = arith.cmpi eq, %arg2, %c0_i32_8 : i32
    %10 = arith.extui %9 : i1 to i32
    %c0_i32_9 = arith.constant 0 : i32
    %11 = arith.cmpi ne, %10, %c0_i32_9 : i32
    scf.if %11 {
      %c0_10 = arith.constant 0 : index
      %c0_11 = arith.constant 0 : index
      %12 = vector.load %arg7[%c0_10, %c0_11] : memref<8x128xf32, #tpu.memory_space<vmem>>, vector<8x128xf32>
      %c0_12 = arith.constant 0 : index
      %c0_13 = arith.constant 0 : index
      %13 = vector.load %arg5[%c0_12, %c0_13] : memref<1x128xf32, #tpu.memory_space<vmem>>, vector<1x128xf32>
      %14 = vector.broadcast %13 : vector<1x128xf32> to vector<8x128xf32>
      %15 = arith.addf %12, %14 : vector<8x128xf32>
      %cst_14 = arith.constant 0.000000e+00 : f32
      %16 = vector.broadcast %cst_14 : f32 to vector<8x128xf32>
      %17 = arith.subf %16, %15 : vector<8x128xf32>
      %18 = math.exp %17 : vector<8x128xf32>
      %cst_15 = arith.constant 1.000000e+00 : f32
      %19 = vector.broadcast %cst_15 : f32 to vector<8x128xf32>
      %20 = arith.addf %19, %18 : vector<8x128xf32>
      %cst_16 = arith.constant 1.000000e+00 : f32
      %21 = vector.broadcast %cst_16 : f32 to vector<8x128xf32>
      %22 = arith.divf %21, %20 : vector<8x128xf32>
      %c0_17 = arith.constant 0 : index
      %c0_18 = arith.constant 0 : index
      %23 = vector.load %arg6[%c0_17, %c0_18] : memref<8x128xf32, #tpu.memory_space<vmem>>, vector<8x128xf32>
      tpu.vector_store %arg6[%c0_17, %c0_18], %22 {strides = array<i32>} : memref<8x128xf32, #tpu.memory_space<vmem>>, vector<8x128xf32>,
    } else {
    }
    return
  }
  func.func @transform_0(%arg0: i32, %arg1: i32, %arg2: i32) -> (i32, i32) {
    %c0_i32 = arith.constant 0 : i32
    return %arg1, %arg2 : i32, i32
  }
  func.func @transform_1(%arg0: i32, %arg1: i32, %arg2: i32) -> (i32, i32) {
    %c0_i32 = arith.constant 0 : i32
    return %arg2, %arg0 : i32, i32
  }
  func.func @transform_2(%arg0: i32, %arg1: i32, %arg2: i32) -> (i32, i32) {
    %c0_i32 = arith.constant 0 : i32
    %c0_i32_0 = arith.constant 0 : i32
    return %c0_i32, %arg0 : i32, i32
  }
  func.func @transform_3(%arg0: i32, %arg1: i32, %arg2: i32) -> (i32, i32) {
    %c0_i32 = arith.constant 0 : i32
    return %arg1, %arg0 : i32, i32
  }
}

</mosaic_0001>

<bundles_post_ra>
// kernel: forward.17
= control target key start
LH: loop header
LB: loop body
LE: loop exit
PB: predicated region body
PF: predicated region fallthrough
CT: control target
= control target key end

     0   :  { %8 = vsyncpa [#allocation4], 0  ;;  %s1265_s12 = smov 0   ;;  %s1267_s13 = smov 0   ;;  %s1516_s0 = inlined_call_operand.vmem [shape: bf16[512,36], index: 0, kind: input, shape index: {}]   ;;  %s1517_s1 = inlined_call_operand.vmem [shape: bf16[36,64], index: 1, kind: input, shape index: {}]   ;;  %s1518_s2 = inlined_call_operand.hbm [shape: f32[1,64], index: 2, kind: input, shape index: {}]   ;;  %s1519_s3 = inlined_call_operand.vmem [shape: bf16[512,64], index: 3, kind: output, shape index: {}]  }
   0x1   :  { %s1269_s14 = smov 0  }
   0x2 LB: > { %s1019_s15 = sadd.s32 4294967295, %s1241_s14   ;;  %s29_s16 = sadd.s32 1, %s1237_s13  ;;  %s1241_s14 = sphi %s1269_s14, %s14_s14   ;;  %s1237_s13 = sphi %s1267_s13, %s1521_s13   ;;  %s1233_s12 = sphi %s1265_s12, %s1520_s12  }
   0x3   : > { %p31_p0 = scmp.ge.s32.totalorder %s29_s16, 2  ;;  %p1021_p1 = scmp.ge.s32.totalorder %s1241_s14, 1 }
   0x4   : > { %p148_p2 = scmp.lt.s32.totalorder %s1241_s14, 3  ;;  %p1156_p4 = scmp.eq.s32.totalorder %s1019_s15, 0 }
   0x5   : > { %s1523_s16 = smov (%p31_p0, %s29_s16), 0  ;;  %s173_s19 = sshll.u32 %s1518_s2, 4  ;;  %s174_s19 = int_to_ptr.hbm [resolvable:$true] %s173_s19 }
   0x6   : > { %p149_p3 = pnand %p1021_p1, %p148_p2  ;;  %s1243_s20 = smov [#allocation3]  }
   0x7   : > { %s175_s21 = sshll.u32 %s1243_s20, 4  ;;  %s176_s21 = int_to_ptr.vmem [resolvable:$true] %s175_s21 }
   0x8   : > { %p1152_p5 = pneg %p149_p3  ;;  %200 = sbr.rel (%p149_p3) target bundleno = 242 (0xf2), region = 32 }
   0xa   : > { %p1153_p6 = pnand %p1156_p4, %p1152_p5 }
   0xc   : > { %1155 = dma.hbm_to_vmem [thread:$0]  (!%p1153_p6), %s174_s19, 16, %s176_s21, [#allocation4]  }
   0xd   : > { %1228 = dma.done.wait (%p1156_p4), [#allocation4], 16  }
   0xe   : > { %1230 = vsyncadd (%p1156_p4), [#allocation4], 4294967280  ;;  %s1027_s22 = sshll.u32 %s1233_s12, 5  ;;  %v372_v0 = vld [vmem:[%s1517_s1 + $0x10] sm:$0x3]  ;;  %vm517_vm0 = vcmask 1041408  }
   0xf   : > { %p240_p7 = scmp.lt.s32.totalorder %s1027_s22, 63  ;;  %v462_v1 = vunpack.c.l.b16 %v372_v0  ;;  %v1138_v4 = vld [vmem:[%s1517_s1 + $0x8] sm:$0xff]  ;;  %v1137_v5 = vld [vmem:[%s1517_s1] sm:$0xff]  ;;  %vm468_vm1 = vcmask 293888   ;;  %vm271_vm2 = vcmask 523264   ;;  %v1244_v14 = vmov 0.0  }
  0x10   : > { %272 = vst.msk [vmem:[#allocation2] sm:$0xff] %vm271_vm2, %v1244_v14  ;;  %v1372_v33 = vld [vmem:[#allocation3] ss:$0 sm:$0xff]  ;;  %vm874_vm5 = vcmask 519168  }
  0x11   : > { %v465_v2 = vpack.c.b16 %v462_v1, %v462_v1  ;;  %s1525_s22 = smov (!%p240_p7, %s1027_s22), 63  ;;  %273 = vst.msk [vmem:[#allocation2 + $0x8] sm:$0xff] %vm271_vm2, %v1244_v14 }
  0x12   : > { %s1028_s27 = sshll.u32 %s1525_s22, 2  ;;  %274 = vst.msk [vmem:[#allocation2 + $0x10] sm:$0xff] %vm271_vm2, %v1244_v14 }
  0x13   : > { %v519_v3 = vsel %vm517_vm0, %v465_v2, 0  ;;  %s1304_s5 = scalar_lea.vmem %s1516_s0, %s1028_s27  ;;  %275 = vst.msk [vmem:[#allocation2 + $0x18] sm:$0xff] %vm271_vm2, %v1244_v14  ;;  %s1385_s8 = scalar_lea.vmem %s1519_s3, %s1028_s27 }
  0x14   : > { %526 = vmatpush.bf16.msra.mxu0 %v519_v3  ;;  %1139 = vmatpush.bf16.msra.mxu1 %v519_v3  ;;  %v1121_v6 = vld [vmem:[%s1304_s5] sm:$0xff]  ;;  %v1122_v10 = vld [vmem:[%s1304_s5 + $0x8] sm:$0xff]  ;;  %276 = vst.msk [vmem:[#allocation2 + $0x20] sm:$0xff] %vm271_vm2, %v1244_v14  ;;  %v1123_v15 = vld [vmem:[%s1304_s5 + $0x10] sm:$0xff] }
  0x15   : > { %1140 = vmatpush.bf16.msra.mxu2 %v519_v3  ;;  %1141 = vmatpush.bf16.msra.mxu3 %v519_v3  ;;  %v1125_v7 = vld [vmem:[%s1304_s5 + $0x20] sm:$0xff]  ;;  %v1126_v11 = vld [vmem:[%s1304_s5 + $0x28] sm:$0xff]  ;;  %277 = vst.msk [vmem:[#allocation2 + $0x28] sm:$0xff] %vm271_vm2, %v1244_v14  ;;  %v1127_v16 = vld [vmem:[%s1304_s5 + $0x30] sm:$0xff] }
  0x16   : > { %v1129_v8 = vld [vmem:[%s1304_s5 + $0x40] sm:$0xff]  ;;  %v1130_v12 = vld [vmem:[%s1304_s5 + $0x48] sm:$0xff]  ;;  %278 = vst.msk [vmem:[#allocation2 + $0x30] sm:$0xff] %vm271_vm2, %v1244_v14  ;;  %v1131_v17 = vld [vmem:[%s1304_s5 + $0x50] sm:$0xff] }
  0x17   : > { %v1133_v9 = vld [vmem:[%s1304_s5 + $0x60] sm:$0xff]  ;;  %v1134_v13 = vld [vmem:[%s1304_s5 + $0x68] sm:$0xff]  ;;  %279 = vst.msk [vmem:[#allocation2 + $0x38] sm:$0xff] %vm271_vm2, %v1244_v14  ;;  %v1135_v18 = vld [vmem:[%s1304_s5 + $0x70] sm:$0xff] }
  0x18   : > { %527 = vmatpush.bf16.msra.mxu0 %v1138_v4  ;;  %1142 = vmatpush.bf16.msra.mxu1 %v1138_v4  ;;  %280 = vst.msk [vmem:[#allocation2 + $0x40] sm:$0xff] %vm271_vm2, %v1244_v14  ;;  %v1124_v19 = vld [vmem:[%s1304_s5 + $0x18] sm:$0xff]  ;;  %v304_v23 = vld [vmem:[#allocation2] sm:$0xff]  ;;  %v305_v31 = vld [vmem:[#allocation2 + $0x8] sm:$0xff] }
  0x19   : > { %1143 = vmatpush.bf16.msra.mxu2 %v1138_v4  ;;  %1144 = vmatpush.bf16.msra.mxu3 %v1138_v4  ;;  %281 = vst.msk [vmem:[#allocation2 + $0x48] sm:$0xff] %vm271_vm2, %v1244_v14  ;;  %v1128_v20 = vld [vmem:[%s1304_s5 + $0x38] sm:$0xff]  ;;  %v306_v53 = vld [vmem:[#allocation2 + $0x10] sm:$0xff] }
  0x1a   : > { %282 = vst.msk [vmem:[#allocation2 + $0x50] sm:$0xff] %vm271_vm2, %v1244_v14  ;;  %v1132_v21 = vld [vmem:[%s1304_s5 + $0x58] sm:$0xff] }
  0x1b   : > { %283 = vst.msk [vmem:[#allocation2 + $0x58] sm:$0xff] %vm271_vm2, %v1244_v14  ;;  %v1136_v22 = vld [vmem:[%s1304_s5 + $0x78] sm:$0xff] }
  0x1c   : > { %528 = vmatpush.bf16.msra.mxu0 %v1137_v5  ;;  %1145 = vmatpush.bf16.msra.mxu1 %v1137_v5  ;;  %284 = vst.msk [vmem:[#allocation2 + $0x60] sm:$0xff] %vm271_vm2, %v1244_v14 }
  0x1d   : > { %1146 = vmatpush.bf16.msra.mxu2 %v1137_v5  ;;  %1147 = vmatpush.bf16.msra.mxu3 %v1137_v5  ;;  %285 = vst.msk [vmem:[#allocation2 + $0x68] sm:$0xff] %vm271_vm2, %v1244_v14 }
  0x1e   : > { %286 = vst.msk [vmem:[#allocation2 + $0x70] sm:$0xff] %vm271_vm2, %v1244_v14 }
  0x1f   : > { %1103 = vmatmul.msk.bf16.vlgmr.msra.gmra.mxu0 %vm468_vm1, %v1121_v6  ;;  %1107 = vmatmul.msk.bf16.vlgmr.msra.gmra.mxu1 %vm468_vm1, %v1125_v7  ;;  %287 = vst.msk [vmem:[#allocation2 + $0x78] sm:$0xff] %vm271_vm2, %v1244_v14  ;;  %v312_v24 = vld [vmem:[#allocation2 + $0x40] sm:$0xff] }
  0x20   : > { %1111 = vmatmul.msk.bf16.vlgmr.msra.gmra.mxu2 %vm468_vm1, %v1129_v8  ;;  %1115 = vmatmul.msk.bf16.vlgmr.msra.gmra.mxu3 %vm468_vm1, %v1133_v9  ;;  %288 = vst.msk [vmem:[#allocation2 + $0x80] sm:$0xff] %vm271_vm2, %v1244_v14  ;;  %v313_v32 = vld [vmem:[#allocation2 + $0x48] sm:$0xff] }
  0x21   : > { %289 = vst.msk [vmem:[#allocation2 + $0x88] sm:$0xff] %vm271_vm2, %v1244_v14  ;;  %v314_v58 = vld [vmem:[#allocation2 + $0x50] sm:$0xff] }
  0x22   : > { %290 = vst.msk [vmem:[#allocation2 + $0x90] sm:$0xff] %vm271_vm2, %v1244_v14 }
  0x23   : > { %291 = vst.msk [vmem:[#allocation2 + $0x98] sm:$0xff] %vm271_vm2, %v1244_v14 }
  0x24   : > { %292 = vst.msk [vmem:[#allocation2 + $0xa0] sm:$0xff] %vm271_vm2, %v1244_v14 }
  0x25   : > { %293 = vst.msk [vmem:[#allocation2 + $0xa8] sm:$0xff] %vm271_vm2, %v1244_v14 }
  0x26   : > { %294 = vst.msk [vmem:[#allocation2 + $0xb0] sm:$0xff] %vm271_vm2, %v1244_v14 }
  0x27   : > { %295 = vst.msk [vmem:[#allocation2 + $0xb8] sm:$0xff] %vm271_vm2, %v1244_v14  ;;  %v320_v29 = vld [vmem:[#allocation2 + $0x80] sm:$0xff] }
  0x28   : > { %296 = vst.msk [vmem:[#allocation2 + $0xc0] sm:$0xff] %vm271_vm2, %v1244_v14  ;;  %v321_v47 = vld [vmem:[#allocation2 + $0x88] sm:$0xff] }
  0x29   : > { %297 = vst.msk [vmem:[#allocation2 + $0xc8] sm:$0xff] %vm271_vm2, %v1244_v14 }
  0x2a   : > { %298 = vst.msk [vmem:[#allocation2 + $0xd0] sm:$0xff] %vm271_vm2, %v1244_v14 }
  0x2b   : > { %299 = vst.msk [vmem:[#allocation2 + $0xd8] sm:$0xff] %vm271_vm2, %v1244_v14 }
  0x2c   : > { %300 = vst.msk [vmem:[#allocation2 + $0xe0] sm:$0xff] %vm271_vm2, %v1244_v14 }
  0x2d   : > { %301 = vst.msk [vmem:[#allocation2 + $0xe8] sm:$0xff] %vm271_vm2, %v1244_v14 }
  0x2e   : > { %302 = vst.msk [vmem:[#allocation2 + $0xf0] sm:$0xff] %vm271_vm2, %v1244_v14 }
  0x2f   : > { %1104 = vmatmul.msk.bf16.gmra.mxu0 %vm468_vm1, %v1122_v10  ;;  %1108 = vmatmul.msk.bf16.gmra.mxu1 %vm468_vm1, %v1126_v11  ;;  %303 = vst.msk [vmem:[#allocation2 + $0xf8] sm:$0xff] %vm271_vm2, %v1244_v14  ;;  %v328_v30 = vld [vmem:[#allocation2 + $0xc0] sm:$0xff] }
  0x30   : > { %1112 = vmatmul.msk.bf16.gmra.mxu2 %vm468_vm1, %v1130_v12  ;;  %1116 = vmatmul.msk.bf16.gmra.mxu3 %vm468_vm1, %v1134_v13  ;;  %v329_v49 = vld [vmem:[#allocation2 + $0xc8] sm:$0xff]  ;;  %v322_v12 = vld [vmem:[#allocation2 + $0x90] sm:$0xff] }
  0x3f   : > { %1105 = vmatmul.msk.bf16.gmra.mxu0 %vm468_vm1, %v1123_v15  ;;  %1109 = vmatmul.msk.bf16.gmra.mxu1 %vm468_vm1, %v1127_v16 }
  0x40   : > { %1113 = vmatmul.msk.bf16.gmra.mxu2 %vm468_vm1, %v1131_v17  ;;  %1117 = vmatmul.msk.bf16.gmra.mxu3 %vm468_vm1, %v1135_v18  ;;  %v330_v17 = vld [vmem:[#allocation2 + $0xd0] sm:$0xff] }
  0x4f   : > { %1106 = vmatmul.msk.bf16.gmra.mxu0 %vm468_vm1, %v1124_v19  ;;  %1110 = vmatmul.msk.bf16.gmra.mxu1 %vm468_vm1, %v1128_v20 }
  0x50   : > { %1114 = vmatmul.msk.bf16.gmra.mxu2 %vm468_vm1, %v1132_v21  ;;  %1118 = vmatmul.msk.bf16.gmra.mxu3 %vm468_vm1, %v1136_v22  ;;  %v307_v21 = vld [vmem:[#allocation2 + $0x18] sm:$0xff] }
  0x9c   : > { %v530_v25 = vpop.f32.mrf.mxu0  ;;  %v550_v26 = vpop.f32.mrf.mxu1 }
  0x9d   : > { %v610_v27 = vadd.f32 %v530_v25, %v304_v23  ;;  %v618_v28 = vadd.f32 %v550_v26, %v312_v24 }
  0x9f   : > { %643 = vst.msk [vmem:[#allocation2] sm:$0xff] %vm271_vm2, %v610_v27  ;;  %v315_v27 = vld [vmem:[#allocation2 + $0x58] sm:$0xff] }
  0xa0   : > { %651 = vst.msk [vmem:[#allocation2 + $0x40] sm:$0xff] %vm271_vm2, %v618_v28 }
  0xa3   : > { %v570_v34 = vpop.f32.mrf.mxu2  ;;  %v590_v35 = vpop.f32.mrf.mxu3 }
  0xa4   : > { %v626_v36 = vadd.f32 %v570_v34, %v320_v29  ;;  %v634_v37 = vadd.f32 %v590_v35, %v328_v30  ;;  %v532_v38 = vpop.f32.mrf.mxu0  ;;  %v552_v39 = vpop.f32.mrf.mxu1 }
  0xa5   : > { %v611_v40 = vadd.f32 %v532_v38, %v305_v31  ;;  %v619_v41 = vadd.f32 %v552_v39, %v313_v32  ;;  %v323_v38 = vld [vmem:[#allocation2 + $0x98] sm:$0xff] }
  0xa6   : > { %v678_v42 = vld [vmem:[#allocation2] sm:$0xff]  ;;  %659 = vst.msk [vmem:[#allocation2 + $0x80] sm:$0xff] %vm271_vm2, %v626_v36 }
  0xa7   : > { %v714_v43 = vadd.f32 %v1372_v33, %v678_v42  ;;  %v686_v44 = vld [vmem:[#allocation2 + $0x40] sm:$0xff]  ;;  %667 = vst.msk [vmem:[#allocation2 + $0xc0] sm:$0xff] %vm271_vm2, %v634_v37 }
  0xa8   : > { %v722_v45 = vadd.f32 %v1372_v33, %v686_v44  ;;  %644 = vst.msk [vmem:[#allocation2 + $0x8] sm:$0xff] %vm271_vm2, %v611_v40 }
  0xa9   : > { %vm746_vm3 = vcmp.gt.f32.partialorder %v714_v43, 0.0  ;;  %v778_v46 = vmul.f32 0.2, %v714_v43  ;;  %652 = vst.msk [vmem:[#allocation2 + $0x48] sm:$0xff] %vm271_vm2, %v619_v41 }
  0xaa   : > { %vm754_vm4 = vcmp.gt.f32.partialorder %v722_v45, 0.0  ;;  %v786_v48 = vmul.f32 0.2, %v722_v45 }
  0xab   : > { %v810_v50 = vsel %vm746_vm3, %v714_v43, %v778_v46  ;;  %v572_v51 = vpop.f32.mrf.mxu2  ;;  %v592_v52 = vpop.f32.mrf.mxu3 }
  0xac   : > { %v842_v54 = vpack.c.bf16 %v810_v50, %v810_v50  ;;  %v818_v55 = vsel %vm754_vm4, %v722_v45, %v786_v48  ;;  %v627_v56 = vadd.f32 %v572_v51, %v321_v47  ;;  %v535_v57 = vpop.f32.mrf.mxu0  ;;  %v555_v59 = vpop.f32.mrf.mxu1  ;;  %v635_v62 = vadd.f32 %v592_v52, %v329_v49  ;;  %v331_v49 = vld [vmem:[#allocation2 + $0xd8] sm:$0xff] }
  0xad   : > { %v850_v60 = vpack.c.bf16 %v818_v55, %v818_v55  ;;  %v694_v61 = vld [vmem:[#allocation2 + $0x80] sm:$0xff]  ;;  %v612_v1 = vadd.f32 %v535_v57, %v306_v53  ;;  %v620_v4 = vadd.f32 %v555_v59, %v314_v58 }
  0xae   : > { %875 = vst.msk [vmem:[%s1385_s8] sm:$0xf] %vm874_vm5, %v842_v54  ;;  %v730_v63 = vadd.f32 %v1372_v33, %v694_v61  ;;  %v702_v0 = vld [vmem:[#allocation2 + $0xc0] sm:$0xff] }
  0xaf   : > { %883 = vst.msk [vmem:[%s1385_s8 + $0x20] sm:$0xf] %vm874_vm5, %v850_v60  ;;  %v738_v2 = vadd.f32 %v1372_v33, %v702_v0  ;;  %v679_v3 = vld [vmem:[#allocation2 + $0x8] sm:$0xff]  ;;  %v308_v55 = vld [vmem:[#allocation2 + $0x20] sm:$0xff] }
  0xb0   : > { %vm762_vm6 = vcmp.gt.f32.partialorder %v730_v63, 0.0  ;;  %v794_v5 = vmul.f32 0.2, %v730_v63  ;;  %v715_v6 = vadd.f32 %v1372_v33, %v679_v3  ;;  %v687_v7 = vld [vmem:[#allocation2 + $0x48] sm:$0xff]  ;;  %660 = vst.msk [vmem:[#allocation2 + $0x88] sm:$0xff] %vm271_vm2, %v627_v56  ;;  %v316_v58 = vld [vmem:[#allocation2 + $0x60] sm:$0xff] }
  0xb1   : > { %vm770_vm7 = vcmp.gt.f32.partialorder %v738_v2, 0.0  ;;  %v802_v8 = vmul.f32 0.2, %v738_v2  ;;  %v723_v9 = vadd.f32 %v1372_v33, %v687_v7  ;;  %668 = vst.msk [vmem:[#allocation2 + $0xc8] sm:$0xff] %vm271_vm2, %v635_v62  ;;  %v332_v7 = vld [vmem:[#allocation2 + $0xe0] sm:$0xff] }
  0xb2   : > { %v826_v10 = vsel %vm762_vm6, %v730_v63, %v794_v5  ;;  %vm747_vm8 = vcmp.gt.f32.partialorder %v715_v6, 0.0  ;;  %v779_v11 = vmul.f32 0.2, %v715_v6  ;;  %645 = vst.msk [vmem:[#allocation2 + $0x10] sm:$0xff] %vm271_vm2, %v612_v1 }
  0xb3   : > { %v858_v13 = vpack.c.bf16 %v826_v10, %v826_v10  ;;  %v834_v14 = vsel %vm770_vm7, %v738_v2, %v802_v8  ;;  %vm755_vm9 = vcmp.gt.f32.partialorder %v723_v9, 0.0  ;;  %v787_v15 = vmul.f32 0.2, %v723_v9  ;;  %653 = vst.msk [vmem:[#allocation2 + $0x50] sm:$0xff] %vm271_vm2, %v620_v4  ;;  %v575_v16 = vpop.f32.mrf.mxu2  ;;  %v595_v18 = vpop.f32.mrf.mxu3  ;;  %v324_v4 = vld [vmem:[#allocation2 + $0xa0] sm:$0xff] }
  0xb4   : > { %v866_v19 = vpack.c.bf16 %v834_v14, %v834_v14  ;;  %v811_v20 = vsel %vm747_vm8, %v715_v6, %v779_v11  ;;  %v537_v22 = vpop.f32.mrf.mxu0  ;;  %v557_v23 = vpop.f32.mrf.mxu1  ;;  %v628_v26 = vadd.f32 %v575_v16, %v322_v12  ;;  %v636_v29 = vadd.f32 %v595_v18, %v330_v17 }
  0xb5   : > { %891 = vst.msk [vmem:[%s1385_s8 + $0x40] sm:$0xf] %vm874_vm5, %v858_v13  ;;  %v843_v24 = vpack.c.bf16 %v811_v20, %v811_v20  ;;  %v819_v25 = vsel %vm755_vm9, %v723_v9, %v787_v15  ;;  %v613_v31 = vadd.f32 %v537_v22, %v307_v21  ;;  %v621_v35 = vadd.f32 %v557_v23, %v315_v27  ;;  %v309_v22 = vld [vmem:[#allocation2 + $0x28] sm:$0xff] }
  0xb6   : > { %899 = vst.msk [vmem:[%s1385_s8 + $0x60] sm:$0xf] %vm874_vm5, %v866_v19  ;;  %v851_v28 = vpack.c.bf16 %v819_v25, %v819_v25 }
  0xb7   : > { %876 = vst.msk [vmem:[%s1385_s8 + $0x4] sm:$0xf] %vm874_vm5, %v843_v24  ;;  %v695_v30 = vld [vmem:[#allocation2 + $0x88] sm:$0xff] }
  0xb8   : > { %884 = vst.msk [vmem:[%s1385_s8 + $0x24] sm:$0xf] %vm874_vm5, %v851_v28  ;;  %v731_v32 = vadd.f32 %v1372_v33, %v695_v30  ;;  %v703_v34 = vld [vmem:[#allocation2 + $0xc8] sm:$0xff] }
  0xb9   : > { %v739_v36 = vadd.f32 %v1372_v33, %v703_v34  ;;  %v680_v37 = vld [vmem:[#allocation2 + $0x10] sm:$0xff]  ;;  %661 = vst.msk [vmem:[#allocation2 + $0x90] sm:$0xff] %vm271_vm2, %v628_v26  ;;  %v317_v26 = vld [vmem:[#allocation2 + $0x68] sm:$0xff] }
  0xba   : > { %vm763_vm10 = vcmp.gt.f32.partialorder %v731_v32, 0.0  ;;  %v795_v39 = vmul.f32 0.2, %v731_v32  ;;  %v716_v40 = vadd.f32 %v1372_v33, %v680_v37  ;;  %v688_v41 = vld [vmem:[#allocation2 + $0x50] sm:$0xff]  ;;  %669 = vst.msk [vmem:[#allocation2 + $0xd0] sm:$0xff] %vm271_vm2, %v636_v29  ;;  %v325_v34 = vld [vmem:[#allocation2 + $0xa8] sm:$0xff] }
  0xbb   : > { %vm771_vm11 = vcmp.gt.f32.partialorder %v739_v36, 0.0  ;;  %v803_v42 = vmul.f32 0.2, %v739_v36  ;;  %v724_v43 = vadd.f32 %v1372_v33, %v688_v41  ;;  %646 = vst.msk [vmem:[#allocation2 + $0x18] sm:$0xff] %vm271_vm2, %v613_v31  ;;  %v577_v44 = vpop.f32.mrf.mxu2  ;;  %v597_v45 = vpop.f32.mrf.mxu3 }
  0xbc   : > { %v827_v46 = vsel %vm763_vm10, %v731_v32, %v795_v39  ;;  %vm748_vm12 = vcmp.gt.f32.partialorder %v716_v40, 0.0  ;;  %v780_v47 = vmul.f32 0.2, %v716_v40  ;;  %654 = vst.msk [vmem:[#allocation2 + $0x58] sm:$0xff] %vm271_vm2, %v621_v35  ;;  %v629_v48 = vadd.f32 %v577_v44, %v323_v38  ;;  %v540_v50 = vpop.f32.mrf.mxu0  ;;  %v560_v51 = vpop.f32.mrf.mxu1  ;;  %v333_v38 = vld [vmem:[#allocation2 + $0xe8] sm:$0xff] }
  0xbd   : > { %v859_v52 = vpack.c.bf16 %v827_v46, %v827_v46  ;;  %v835_v53 = vsel %vm771_vm11, %v739_v36, %v803_v42  ;;  %vm756_vm13 = vcmp.gt.f32.partialorder %v724_v43, 0.0  ;;  %v788_v54 = vmul.f32 0.2, %v724_v43 }
  0xbe   : > { %v867_v56 = vpack.c.bf16 %v835_v53, %v835_v53  ;;  %v812_v57 = vsel %vm748_vm12, %v716_v40, %v780_v47  ;;  %662 = vst.msk [vmem:[#allocation2 + $0x98] sm:$0xff] %vm271_vm2, %v629_v48  ;;  %v637_v61 = vadd.f32 %v597_v45, %v331_v49  ;;  %v614_v0 = vadd.f32 %v540_v50, %v308_v55  ;;  %v310_v40 = vld [vmem:[#allocation2 + $0x30] sm:$0xff] }
  0xbf   : > { %892 = vst.msk [vmem:[%s1385_s8 + $0x44] sm:$0xf] %vm874_vm5, %v859_v52  ;;  %v844_v59 = vpack.c.bf16 %v812_v57, %v812_v57  ;;  %v820_v60 = vsel %vm756_vm13, %v724_v43, %v788_v54  ;;  %v622_v3 = vadd.f32 %v560_v51, %v316_v58 }
  0xc0   : > { %900 = vst.msk [vmem:[%s1385_s8 + $0x64] sm:$0xf] %vm874_vm5, %v867_v56  ;;  %v852_v62 = vpack.c.bf16 %v820_v60, %v820_v60  ;;  %v696_v63 = vld [vmem:[#allocation2 + $0x90] sm:$0xff] }
  0xc1   : > { %877 = vst.msk [vmem:[%s1385_s8 + $0x8] sm:$0xf] %vm874_vm5, %v844_v59  ;;  %v732_v1 = vadd.f32 %v1372_v33, %v696_v63  ;;  %v704_v2 = vld [vmem:[#allocation2 + $0xd0] sm:$0xff] }
  0xc2   : > { %885 = vst.msk [vmem:[%s1385_s8 + $0x28] sm:$0xf] %vm874_vm5, %v852_v62  ;;  %v740_v5 = vadd.f32 %v1372_v33, %v704_v2  ;;  %v681_v6 = vld [vmem:[#allocation2 + $0x18] sm:$0xff]  ;;  %v318_v2 = vld [vmem:[#allocation2 + $0x70] sm:$0xff] }
  0xc3   : > { %vm764_vm14 = vcmp.gt.f32.partialorder %v732_v1, 0.0  ;;  %v796_v8 = vmul.f32 0.2, %v732_v1  ;;  %v717_v9 = vadd.f32 %v1372_v33, %v681_v6  ;;  %v689_v10 = vld [vmem:[#allocation2 + $0x58] sm:$0xff]  ;;  %670 = vst.msk [vmem:[#allocation2 + $0xd8] sm:$0xff] %vm271_vm2, %v637_v61  ;;  %v580_v11 = vpop.f32.mrf.mxu2  ;;  %v600_v12 = vpop.f32.mrf.mxu3  ;;  %v326_v6 = vld [vmem:[#allocation2 + $0xb0] sm:$0xff] }
  0xc4   : > { %vm772_vm15 = vcmp.gt.f32.partialorder %v740_v5, 0.0  ;;  %v804_v13 = vmul.f32 0.2, %v740_v5  ;;  %v725_v14 = vadd.f32 %v1372_v33, %v689_v10  ;;  %647 = vst.msk [vmem:[#allocation2 + $0x20] sm:$0xff] %vm271_vm2, %v614_v0  ;;  %v630_v15 = vadd.f32 %v580_v11, %v324_v4  ;;  %v542_v16 = vpop.f32.mrf.mxu0  ;;  %v562_v17 = vpop.f32.mrf.mxu1 }
  0xc5   : > { %v828_v18 = vsel %vm764_vm14, %v732_v1, %v796_v8  ;;  %vm749_vm0 = vcmp.gt.f32.partialorder %v717_v9, 0.0  ;;  %v781_v19 = vmul.f32 0.2, %v717_v9  ;;  %v697_v20 = vld [vmem:[#allocation2 + $0x98] sm:$0xff]  ;;  %655 = vst.msk [vmem:[#allocation2 + $0x60] sm:$0xff] %vm271_vm2, %v622_v3  ;;  %v638_v21 = vadd.f32 %v600_v12, %v332_v7 }
  0xc6   : > { %v860_v23 = vpack.c.bf16 %v828_v18, %v828_v18  ;;  %v836_v24 = vsel %vm772_vm15, %v740_v5, %v804_v13  ;;  %vm757_vm1 = vcmp.gt.f32.partialorder %v725_v14, 0.0  ;;  %v789_v25 = vmul.f32 0.2, %v725_v14  ;;  %663 = vst.msk [vmem:[#allocation2 + $0xa0] sm:$0xff] %vm271_vm2, %v630_v15 }
  0xc7   : > { %v868_v27 = vpack.c.bf16 %v836_v24, %v836_v24  ;;  %v813_v28 = vsel %vm749_vm0, %v717_v9, %v781_v19  ;;  %v733_v29 = vadd.f32 %v1372_v33, %v697_v20  ;;  %671 = vst.msk [vmem:[#allocation2 + $0xe0] sm:$0xff] %vm271_vm2, %v638_v21  ;;  %v615_v32 = vadd.f32 %v542_v16, %v309_v22  ;;  %v334_v9 = vld [vmem:[#allocation2 + $0xf0] sm:$0xff]  ;;  %v311_v16 = vld [vmem:[#allocation2 + $0x38] sm:$0xff] }
  0xc8   : > { %893 = vst.msk [vmem:[%s1385_s8 + $0x48] sm:$0xf] %vm874_vm5, %v860_v23  ;;  %v845_v30 = vpack.c.bf16 %v813_v28, %v813_v28  ;;  %v821_v31 = vsel %vm757_vm1, %v725_v14, %v789_v25  ;;  %v623_v37 = vadd.f32 %v562_v17, %v317_v26  ;;  %v319_v24 = vld [vmem:[#allocation2 + $0x78] sm:$0xff] }
  0xc9   : > { %901 = vst.msk [vmem:[%s1385_s8 + $0x68] sm:$0xf] %vm874_vm5, %v868_v27  ;;  %v853_v35 = vpack.c.bf16 %v821_v31, %v821_v31  ;;  %vm765_vm3 = vcmp.gt.f32.partialorder %v733_v29, 0.0  ;;  %v797_v36 = vmul.f32 0.2, %v733_v29 }
  0xca   : > { %878 = vst.msk [vmem:[%s1385_s8 + $0xc] sm:$0xf] %vm874_vm5, %v845_v30  ;;  %v705_v39 = vld [vmem:[#allocation2 + $0xd8] sm:$0xff] }
  0xcb   : > { %886 = vst.msk [vmem:[%s1385_s8 + $0x2c] sm:$0xf] %vm874_vm5, %v853_v35  ;;  %v829_v41 = vsel %vm765_vm3, %v733_v29, %v797_v36  ;;  %v741_v42 = vadd.f32 %v1372_v33, %v705_v39  ;;  %v682_v43 = vld [vmem:[#allocation2 + $0x20] sm:$0xff]  ;;  %v582_v44 = vpop.f32.mrf.mxu2  ;;  %v602_v45 = vpop.f32.mrf.mxu3 }
  0xcc   : > { %v861_v46 = vpack.c.bf16 %v829_v41, %v829_v41  ;;  %v718_v47 = vadd.f32 %v1372_v33, %v682_v43  ;;  %v690_v48 = vld [vmem:[#allocation2 + $0x60] sm:$0xff]  ;;  %648 = vst.msk [vmem:[#allocation2 + $0x28] sm:$0xff] %vm271_vm2, %v615_v32  ;;  %v631_v49 = vadd.f32 %v582_v44, %v325_v34  ;;  %v639_v50 = vadd.f32 %v602_v45, %v333_v38  ;;  %v545_v51 = vpop.f32.mrf.mxu0  ;;  %v565_v52 = vpop.f32.mrf.mxu1  ;;  %v327_v43 = vld [vmem:[#allocation2 + $0xb8] sm:$0xff] }
  0xcd   : > { %vm773_vm4 = vcmp.gt.f32.partialorder %v741_v42, 0.0  ;;  %v805_v53 = vmul.f32 0.2, %v741_v42  ;;  %v726_v54 = vadd.f32 %v1372_v33, %v690_v48  ;;  %v698_v55 = vld [vmem:[#allocation2 + $0xa0] sm:$0xff]  ;;  %656 = vst.msk [vmem:[#allocation2 + $0x68] sm:$0xff] %vm271_vm2, %v623_v37  ;;  %v616_v56 = vadd.f32 %v545_v51, %v310_v40 }
  0xce   : > { %894 = vst.msk [vmem:[%s1385_s8 + $0x4c] sm:$0xf] %vm874_vm5, %v861_v46  ;;  %vm750_vm6 = vcmp.gt.f32.partialorder %v718_v47, 0.0  ;;  %v782_v57 = vmul.f32 0.2, %v718_v47  ;;  %v734_v58 = vadd.f32 %v1372_v33, %v698_v55  ;;  %v706_v59 = vld [vmem:[#allocation2 + $0xe0] sm:$0xff]  ;;  %v624_v13 = vadd.f32 %v565_v52, %v318_v2 }
  0xcf   : > { %v837_v60 = vsel %vm773_vm4, %v741_v42, %v805_v53  ;;  %vm758_vm7 = vcmp.gt.f32.partialorder %v726_v54, 0.0  ;;  %v790_v61 = vmul.f32 0.2, %v726_v54  ;;  %v742_v62 = vadd.f32 %v1372_v33, %v706_v59  ;;  %664 = vst.msk [vmem:[#allocation2 + $0xa8] sm:$0xff] %vm271_vm2, %v631_v49  ;;  %v335_v46 = vld [vmem:[#allocation2 + $0xf8] sm:$0xff] }
  0xd0   : > { %v869_v63 = vpack.c.bf16 %v837_v60, %v837_v60  ;;  %v814_v0 = vsel %vm750_vm6, %v718_v47, %v782_v57  ;;  %vm766_vm8 = vcmp.gt.f32.partialorder %v734_v58, 0.0  ;;  %v798_v1 = vmul.f32 0.2, %v734_v58  ;;  %672 = vst.msk [vmem:[#allocation2 + $0xe8] sm:$0xff] %vm271_vm2, %v639_v50 }
  0xd1   : > { %v846_v3 = vpack.c.bf16 %v814_v0, %v814_v0  ;;  %v822_v4 = vsel %vm758_vm7, %v726_v54, %v790_v61  ;;  %vm774_vm9 = vcmp.gt.f32.partialorder %v742_v62, 0.0  ;;  %v806_v5 = vmul.f32 0.2, %v742_v62  ;;  %649 = vst.msk [vmem:[#allocation2 + $0x30] sm:$0xff] %vm271_vm2, %v616_v56 }
  0xd2   : > { %902 = vst.msk [vmem:[%s1385_s8 + $0x6c] sm:$0xf] %vm874_vm5, %v869_v63  ;;  %v854_v7 = vpack.c.bf16 %v822_v4, %v822_v4  ;;  %v830_v8 = vsel %vm766_vm8, %v734_v58, %v798_v1 }
  0xd3   : > { %879 = vst.msk [vmem:[%s1385_s8 + $0x10] sm:$0xf] %vm874_vm5, %v846_v3  ;;  %v862_v10 = vpack.c.bf16 %v830_v8, %v830_v8  ;;  %v838_v11 = vsel %vm774_vm9, %v742_v62, %v806_v5  ;;  %v683_v12 = vld [vmem:[#allocation2 + $0x28] sm:$0xff]  ;;  %v585_v14 = vpop.f32.mrf.mxu2  ;;  %v605_v15 = vpop.f32.mrf.mxu3 }
  0xd4   : > { %887 = vst.msk [vmem:[%s1385_s8 + $0x30] sm:$0xf] %vm874_vm5, %v854_v7  ;;  %v870_v17 = vpack.c.bf16 %v838_v11, %v838_v11  ;;  %v719_v18 = vadd.f32 %v1372_v33, %v683_v12  ;;  %v691_v19 = vld [vmem:[#allocation2 + $0x68] sm:$0xff]  ;;  %v632_v20 = vadd.f32 %v585_v14, %v326_v6  ;;  %v547_v21 = vpop.f32.mrf.mxu0  ;;  %v640_v23 = vadd.f32 %v605_v15, %v334_v9  ;;  %v567_v25 = vpop.f32.mrf.mxu1 }
  0xd5   : > { %895 = vst.msk [vmem:[%s1385_s8 + $0x50] sm:$0xf] %vm874_vm5, %v862_v10  ;;  %v727_v22 = vadd.f32 %v1372_v33, %v691_v19  ;;  %v617_v28 = vadd.f32 %v547_v21, %v311_v16  ;;  %v625_v36 = vadd.f32 %v567_v25, %v319_v24 }
  0xd6   : > { %903 = vst.msk [vmem:[%s1385_s8 + $0x70] sm:$0xf] %vm874_vm5, %v870_v17  ;;  %vm751_vm10 = vcmp.gt.f32.partialorder %v719_v18, 0.0  ;;  %v783_v26 = vmul.f32 0.2, %v719_v18  ;;  %v699_v27 = vld [vmem:[#allocation2 + $0xa8] sm:$0xff] }
  0xd7   : > { %vm759_vm11 = vcmp.gt.f32.partialorder %v727_v22, 0.0  ;;  %v791_v29 = vmul.f32 0.2, %v727_v22  ;;  %v735_v30 = vadd.f32 %v1372_v33, %v699_v27  ;;  %v707_v31 = vld [vmem:[#allocation2 + $0xe8] sm:$0xff]  ;;  %657 = vst.msk [vmem:[#allocation2 + $0x70] sm:$0xff] %vm271_vm2, %v624_v13 }
  0xd8   : > { %v815_v32 = vsel %vm751_vm10, %v719_v18, %v783_v26  ;;  %v743_v34 = vadd.f32 %v1372_v33, %v707_v31  ;;  %v684_v35 = vld [vmem:[#allocation2 + $0x30] sm:$0xff]  ;;  %665 = vst.msk [vmem:[#allocation2 + $0xb0] sm:$0xff] %vm271_vm2, %v632_v20 }
  0xd9   : > { %v847_v37 = vpack.c.bf16 %v815_v32, %v815_v32  ;;  %v823_v38 = vsel %vm759_vm11, %v727_v22, %v791_v29  ;;  %vm767_vm12 = vcmp.gt.f32.partialorder %v735_v30, 0.0  ;;  %v799_v39 = vmul.f32 0.2, %v735_v30  ;;  %673 = vst.msk [vmem:[#allocation2 + $0xf0] sm:$0xff] %vm271_vm2, %v640_v23 }
  0xda   : > { %v855_v40 = vpack.c.bf16 %v823_v38, %v823_v38  ;;  %vm775_vm13 = vcmp.gt.f32.partialorder %v743_v34, 0.0  ;;  %v807_v41 = vmul.f32 0.2, %v743_v34  ;;  %v720_v42 = vadd.f32 %v1372_v33, %v684_v35  ;;  %650 = vst.msk [vmem:[#allocation2 + $0x38] sm:$0xff] %vm271_vm2, %v617_v28 }
  0xdb   : > { %880 = vst.msk [vmem:[%s1385_s8 + $0x14] sm:$0xf] %vm874_vm5, %v847_v37  ;;  %v831_v44 = vsel %vm767_vm12, %v735_v30, %v799_v39  ;;  %v587_v45 = vpop.f32.mrf.mxu2  ;;  %v607_v47 = vpop.f32.mrf.mxu3 }
  0xdc   : > { %888 = vst.msk [vmem:[%s1385_s8 + $0x34] sm:$0xf] %vm874_vm5, %v855_v40  ;;  %v863_v48 = vpack.c.bf16 %v831_v44, %v831_v44  ;;  %v839_v49 = vsel %vm775_vm13, %v743_v34, %v807_v41  ;;  %vm752_vm14 = vcmp.gt.f32.partialorder %v720_v42, 0.0  ;;  %v784_v50 = vmul.f32 0.2, %v720_v42 }
  0xdd   : > { %v871_v51 = vpack.c.bf16 %v839_v49, %v839_v49  ;;  %658 = vst.msk [vmem:[#allocation2 + $0x78] sm:$0xff] %vm271_vm2, %v625_v36  ;;  %v633_v52 = vadd.f32 %v587_v45, %v327_v43  ;;  %v641_v55 = vadd.f32 %v607_v47, %v335_v46 }
  0xde   : > { %896 = vst.msk [vmem:[%s1385_s8 + $0x54] sm:$0xf] %vm874_vm5, %v863_v48  ;;  %v816_v53 = vsel %vm752_vm14, %v720_v42, %v784_v50  ;;  %v692_v54 = vld [vmem:[#allocation2 + $0x70] sm:$0xff] }
  0xdf   : > { %904 = vst.msk [vmem:[%s1385_s8 + $0x74] sm:$0xf] %vm874_vm5, %v871_v51  ;;  %v848_v56 = vpack.c.bf16 %v816_v53, %v816_v53  ;;  %v728_v57 = vadd.f32 %v1372_v33, %v692_v54  ;;  %v700_v58 = vld [vmem:[#allocation2 + $0xb0] sm:$0xff] }
  0xe0   : > { %v736_v59 = vadd.f32 %v1372_v33, %v700_v58  ;;  %v708_v60 = vld [vmem:[#allocation2 + $0xf0] sm:$0xff]  ;;  %666 = vst.msk [vmem:[#allocation2 + $0xb8] sm:$0xff] %vm271_vm2, %v633_v52 }
  0xe1   : > { %881 = vst.msk [vmem:[%s1385_s8 + $0x18] sm:$0xf] %vm874_vm5, %v848_v56  ;;  %vm760_vm15 = vcmp.gt.f32.partialorder %v728_v57, 0.0  ;;  %v792_v61 = vmul.f32 0.2, %v728_v57  ;;  %v744_v62 = vadd.f32 %v1372_v33, %v708_v60  ;;  %v685_v63 = vld [vmem:[#allocation2 + $0x38] sm:$0xff] }
  0xe2   : > { %vm768_vm0 = vcmp.gt.f32.partialorder %v736_v59, 0.0  ;;  %v800_v0 = vmul.f32 0.2, %v736_v59  ;;  %v721_v1 = vadd.f32 %v1372_v33, %v685_v63  ;;  %674 = vst.msk [vmem:[#allocation2 + $0xf8] sm:$0xff] %vm271_vm2, %v641_v55 }
  0xe3   : > { %v824_v2 = vsel %vm760_vm15, %v728_v57, %v792_v61  ;;  %vm776_vm1 = vcmp.gt.f32.partialorder %v744_v62, 0.0  ;;  %v808_v3 = vmul.f32 0.2, %v744_v62 }
  0xe4   : > { %v856_v4 = vpack.c.bf16 %v824_v2, %v824_v2  ;;  %v832_v5 = vsel %vm768_vm0, %v736_v59, %v800_v0  ;;  %vm753_vm3 = vcmp.gt.f32.partialorder %v721_v1, 0.0  ;;  %v785_v6 = vmul.f32 0.2, %v721_v1  ;;  %v693_v7 = vld [vmem:[#allocation2 + $0x78] sm:$0xff] }
  0xe5   : > { %v864_v8 = vpack.c.bf16 %v832_v5, %v832_v5  ;;  %v840_v9 = vsel %vm776_vm1, %v744_v62, %v808_v3  ;;  %v729_v10 = vadd.f32 %v1372_v33, %v693_v7 }
  0xe6   : > { %889 = vst.msk [vmem:[%s1385_s8 + $0x38] sm:$0xf] %vm874_vm5, %v856_v4  ;;  %v872_v11 = vpack.c.bf16 %v840_v9, %v840_v9  ;;  %v817_v12 = vsel %vm753_vm3, %v721_v1, %v785_v6 }
  0xe7   : > { %897 = vst.msk [vmem:[%s1385_s8 + $0x58] sm:$0xf] %vm874_vm5, %v864_v8  ;;  %v849_v13 = vpack.c.bf16 %v817_v12, %v817_v12  ;;  %vm761_vm2 = vcmp.gt.f32.partialorder %v729_v10, 0.0  ;;  %v793_v14 = vmul.f32 0.2, %v729_v10  ;;  %v701_v15 = vld [vmem:[#allocation2 + $0xb8] sm:$0xff] }
  0xe8   : > { %905 = vst.msk [vmem:[%s1385_s8 + $0x78] sm:$0xf] %vm874_vm5, %v872_v11  ;;  %v737_v16 = vadd.f32 %v1372_v33, %v701_v15 }
  0xe9   : > { %882 = vst.msk [vmem:[%s1385_s8 + $0x1c] sm:$0xf] %vm874_vm5, %v849_v13  ;;  %v825_v17 = vsel %vm761_vm2, %v729_v10, %v793_v14  ;;  %v709_v18 = vld [vmem:[#allocation2 + $0xf8] sm:$0xff] }
  0xea   : > { %v857_v19 = vpack.c.bf16 %v825_v17, %v825_v17  ;;  %vm769_vm4 = vcmp.gt.f32.partialorder %v737_v16, 0.0  ;;  %v801_v20 = vmul.f32 0.2, %v737_v16  ;;  %v745_v21 = vadd.f32 %v1372_v33, %v709_v18 }
  0xec   : > { %890 = vst.msk [vmem:[%s1385_s8 + $0x3c] sm:$0xf] %vm874_vm5, %v857_v19  ;;  %v833_v22 = vsel %vm769_vm4, %v737_v16, %v801_v20  ;;  %vm777_vm6 = vcmp.gt.f32.partialorder %v745_v21, 0.0  ;;  %v809_v23 = vmul.f32 0.2, %v745_v21 }
  0xed   : > { %v865_v24 = vpack.c.bf16 %v833_v22, %v833_v22 }
  0xee   : > { %v841_v25 = vsel %vm777_vm6, %v745_v21, %v809_v23 }
  0xef   : > { %898 = vst.msk [vmem:[%s1385_s8 + $0x5c] sm:$0xf] %vm874_vm5, %v865_v24  ;;  %v873_v26 = vpack.c.bf16 %v841_v25, %v841_v25 }
  0xf1   : > { %906 = vst.msk [vmem:[%s1385_s8 + $0x7c] sm:$0xf] %vm874_vm5, %v873_v26 }
  0xf2 PF: > { %s14_s14 = sadd.s32 1, %s1241_s14   ;;  %s1520_s12 = smov %s1237_s13 }
  0xf3   : > { %p11_p8 = scmp.ge.s32.totalorder %s14_s14, 4   ;;  %s1521_s13 = smov %s1523_s16 }
  0xf5   :  { %13 = sbr.rel (!%p11_p8) target bundleno = 2 (0x2), region = 79 }
  0xfa   :  { %935 = vsyncpa [#allocation4], 1 }
  0xfb   :  { %937 = vsyncpa [#allocation4 + $0x1], 1 }

// kernel: forward.18
= control target key start
LH: loop header
LB: loop body
LE: loop exit
PB: predicated region body
PF: predicated region fallthrough
CT: control target
= control target key end

     0   :  { %vm21_vm0 = vcmask 523264   ;;  %vm43_vm1 = vcmask 517120   ;;  %vm1044_vm2 = vcmask 1040384   ;;  %s2115_s1 = inlined_call_operand.vmem [shape: bf16[576,64], index: 1, kind: input, shape index: {}]   ;;  %s2116_s0 = inlined_call_operand.vmem [shape: bf16[128,576], index: 0, kind: input, shape index: {}]   ;;  %s2117_s2 = inlined_call_operand.vmem [shape: f32[1,64], index: 2, kind: input, shape index: {}]   ;;  %s2118_s3 = inlined_call_operand.vmem [shape: f32[128,64], index: 3, kind: output, shape index: {0}]   ;;  %s2119_s4 = inlined_call_operand.vmem [shape: f32[2,64], index: 4, kind: output, shape index: {1}]  }
   0x1   :  { %v1417_v0 = vld [vmem:[%s2115_s1 + $0x38] sm:$0xff]  ;;  %v1416_v1 = vld [vmem:[%s2115_s1 + $0x30] sm:$0xff]  ;;  %v1415_v2 = vld [vmem:[%s2115_s1 + $0x28] sm:$0xff] }
   0x2   :  { %1446 = vmatpush.bf16.msra.mxu1 %v1417_v0  ;;  %1447 = vmatpush.bf16.msra.mxu2 %v1417_v0  ;;  %v1414_v3 = vld [vmem:[%s2115_s1 + $0x20] sm:$0xff]  ;;  %v1413_v4 = vld [vmem:[%s2115_s1 + $0x18] sm:$0xff]  ;;  %v1412_v5 = vld [vmem:[%s2115_s1 + $0x10] sm:$0xff] }
   0x3   :  { %1448 = vmatpush.bf16.msra.mxu3 %v1417_v0  ;;  %622 = vmatpush.bf16.msra.mxu0 %v1417_v0  ;;  %v1411_v6 = vld [vmem:[%s2115_s1 + $0x8] sm:$0xff]  ;;  %v1410_v7 = vld [vmem:[%s2115_s1] sm:$0xff]  ;;  %v1100_v8 = vld [vmem:[%s2116_s0 + $0x50] sm:$0xf] }
   0x4   :  { %v1382_v9 = vld [vmem:[%s2116_s0 + $0x60] sm:$0xf0]  ;;  %v1140_v10 = vld [vmem:[%s2116_s0 + $0xa0] sm:$0xf]  ;;  %v1392_v11 = vld [vmem:[%s2116_s0 + $0xb0] sm:$0xf0] }
   0x5   :  { %v1180_v12 = vld [vmem:[%s2116_s0 + $0xf0] sm:$0xf]  ;;  %v1402_v13 = vld [vmem:[%s2116_s0 + $0x100] sm:$0xf0]  ;;  %v1060_v14 = vld [vmem:[%s2116_s0] sm:$0xf]  ;;  %v1101_v18 = vor.u32 %v1382_v9, %v1100_v8  ;;  %v1141_v19 = vor.u32 %v1392_v11, %v1140_v10 }
   0x6   :  { %1449 = vmatpush.bf16.msra.mxu1 %v1416_v1  ;;  %1450 = vmatpush.bf16.msra.mxu2 %v1416_v1  ;;  %v1372_v15 = vld [vmem:[%s2116_s0 + $0x10] sm:$0xf0]  ;;  %v1433_v16 = vld [vmem:[%s2115_s1 + $0xb8] sm:$0xff]  ;;  %v1181_v20 = vor.u32 %v1402_v13, %v1180_v12  ;;  %v1431_v28 = vld [vmem:[%s2115_s1 + $0xa8] sm:$0xff] }
   0x7   :  { %1451 = vmatpush.bf16.msra.mxu3 %v1416_v1  ;;  %623 = vmatpush.bf16.msra.mxu0 %v1416_v1  ;;  %v1425_v17 = vld [vmem:[%s2115_s1 + $0x78] sm:$0xff]  ;;  %v1061_v21 = vor.u32 %v1372_v15, %v1060_v14  ;;  %v1432_v24 = vld [vmem:[%s2115_s1 + $0xb0] sm:$0xff]  ;;  %v1423_v29 = vld [vmem:[%s2115_s1 + $0x68] sm:$0xff] }
   0x8   :  { %v1441_v22 = vld [vmem:[%s2115_s1 + $0xf8] sm:$0xff]  ;;  %v1424_v25 = vld [vmem:[%s2115_s1 + $0x70] sm:$0xff]  ;;  %v1439_v30 = vld [vmem:[%s2115_s1 + $0xe8] sm:$0xff] }
   0x9   :  { %v1445_v23 = vld [vmem:[%s2115_s1 + $0x118] sm:$0xff]  ;;  %v1440_v26 = vld [vmem:[%s2115_s1 + $0xf0] sm:$0xff]  ;;  %v1443_v31 = vld [vmem:[%s2115_s1 + $0x108] sm:$0xff] }
   0xa   :  { %1452 = vmatpush.bf16.msra.mxu1 %v1415_v2  ;;  %1453 = vmatpush.bf16.msra.mxu2 %v1415_v2  ;;  %v1444_v27 = vld [vmem:[%s2115_s1 + $0x110] sm:$0xff]  ;;  %v1430_v32 = vld [vmem:[%s2115_s1 + $0xa0] sm:$0xff]  ;;  %v1120_v35 = vld [vmem:[%s2116_s0 + $0x78] sm:$0xf] }
   0xb   :  { %1454 = vmatpush.bf16.msra.mxu3 %v1415_v2  ;;  %624 = vmatpush.bf16.msra.mxu0 %v1415_v2  ;;  %v1422_v33 = vld [vmem:[%s2115_s1 + $0x60] sm:$0xff]  ;;  %v1387_v36 = vld [vmem:[%s2116_s0 + $0x88] sm:$0xf0]  ;;  %v1160_v37 = vld [vmem:[%s2116_s0 + $0xc8] sm:$0xf] }
   0xc   :  { %v1438_v34 = vld [vmem:[%s2115_s1 + $0xe0] sm:$0xff]  ;;  %v1397_v38 = vld [vmem:[%s2116_s0 + $0xd8] sm:$0xf0]  ;;  %v1200_v39 = vld [vmem:[%s2116_s0 + $0x118] sm:$0xf]  ;;  %v1121_v46 = vor.u32 %v1387_v36, %v1120_v35 }
   0xd   :  { %v1407_v40 = vld [vmem:[%s2116_s0 + $0x128] sm:$0xf0]  ;;  %v1080_v41 = vld [vmem:[%s2116_s0 + $0x28] sm:$0xf]  ;;  %v1377_v42 = vld [vmem:[%s2116_s0 + $0x38] sm:$0xf0]  ;;  %v1161_v47 = vor.u32 %v1397_v38, %v1160_v37 }
   0xe   :  { %1455 = vmatpush.bf16.msra.mxu1 %v1414_v3  ;;  %1456 = vmatpush.bf16.msra.mxu2 %v1414_v3  ;;  %v1442_v43 = vld [vmem:[%s2115_s1 + $0x100] sm:$0xff]  ;;  %v1429_v44 = vld [vmem:[%s2115_s1 + $0x98] sm:$0xff]  ;;  %v1201_v48 = vor.u32 %v1407_v40, %v1200_v39  ;;  %v1081_v49 = vor.u32 %v1377_v42, %v1080_v41  ;;  %v1428_v51 = vld [vmem:[%s2115_s1 + $0x90] sm:$0xff] }
   0xf   :  { %1457 = vmatpush.bf16.msra.mxu3 %v1414_v3  ;;  %625 = vmatpush.bf16.msra.mxu0 %v1414_v3  ;;  %v1421_v45 = vld [vmem:[%s2115_s1 + $0x58] sm:$0xff]  ;;  %v1420_v52 = vld [vmem:[%s2115_s1 + $0x50] sm:$0xff]  ;;  %v1427_v54 = vld [vmem:[%s2115_s1 + $0x88] sm:$0xff] }
  0x10   :  { %v1437_v50 = vld [vmem:[%s2115_s1 + $0xd8] sm:$0xff]  ;;  %v1436_v53 = vld [vmem:[%s2115_s1 + $0xd0] sm:$0xff]  ;;  %v1419_v55 = vld [vmem:[%s2115_s1 + $0x48] sm:$0xff] }
  0x11   :  { %v1435_v56 = vld [vmem:[%s2115_s1 + $0xc8] sm:$0xff]  ;;  %v1426_v57 = vld [vmem:[%s2115_s1 + $0x80] sm:$0xff]  ;;  %v1062_v61 = vld [vmem:[%s2116_s0 + $0x14] sm:$0xf0] }
  0x12   :  { %1458 = vmatpush.bf16.msra.mxu1 %v1413_v4  ;;  %1459 = vmatpush.bf16.msra.mxu2 %v1413_v4  ;;  %v1418_v58 = vld [vmem:[%s2115_s1 + $0x40] sm:$0xff]  ;;  %v1068_v62 = vld [vmem:[%s2116_s0 + $0x8] sm:$0xf]  ;;  %v1373_v63 = vld [vmem:[%s2116_s0 + $0x18] sm:$0xf0] }
  0x13   :  { %1460 = vmatpush.bf16.msra.mxu3 %v1413_v4  ;;  %626 = vmatpush.bf16.msra.mxu0 %v1413_v4  ;;  %v1434_v59 = vld [vmem:[%s2115_s1 + $0xc0] sm:$0xff]  ;;  %v1371_v0 = vld [vmem:[%s2116_s0 + $0xc] sm:$0xf]  ;;  %v1076_v2 = vld [vmem:[%s2116_s0 + $0x10] sm:$0xf] }
  0x14   :  { %v1370_v60 = vld [vmem:[%s2116_s0 + $0x4] sm:$0xf]  ;;  %v1070_v1 = vld [vmem:[%s2116_s0 + $0x1c] sm:$0xf0]  ;;  %v1375_v8 = vld [vmem:[%s2116_s0 + $0x2c] sm:$0xf] }
  0x15   :  { %v1374_v3 = vld [vmem:[%s2116_s0 + $0x20] sm:$0xf0]  ;;  %v1065_v4 = vor.u32 %v1370_v60, %v1062_v61  ;;  %v1082_v9 = vld [vmem:[%s2116_s0 + $0x3c] sm:$0xf0]  ;;  %v1088_v10 = vld [vmem:[%s2116_s0 + $0x30] sm:$0xf] }
  0x16   :  { %1461 = vmatpush.bf16.msra.mxu1 %v1412_v5  ;;  %1462 = vmatpush.bf16.msra.mxu2 %v1412_v5  ;;  %v1378_v11 = vld [vmem:[%s2116_s0 + $0x40] sm:$0xf0]  ;;  %v1376_v12 = vld [vmem:[%s2116_s0 + $0x34] sm:$0xf]  ;;  %v1090_v13 = vld [vmem:[%s2116_s0 + $0x44] sm:$0xf0] }
  0x17   :  { %1463 = vmatpush.bf16.msra.mxu3 %v1412_v5  ;;  %627 = vmatpush.bf16.msra.mxu0 %v1412_v5  ;;  %v1069_v5 = vor.u32 %v1373_v63, %v1068_v62  ;;  %v1096_v14 = vld [vmem:[%s2116_s0 + $0x38] sm:$0xf]  ;;  %v1379_v15 = vld [vmem:[%s2116_s0 + $0x48] sm:$0xf0]  ;;  %v1388_v35 = vld [vmem:[%s2116_s0 + $0x90] sm:$0xf0] }
  0x18   :  { %v1386_v36 = vld [vmem:[%s2116_s0 + $0x84] sm:$0xf]  ;;  %v1130_v37 = vld [vmem:[%s2116_s0 + $0x94] sm:$0xf0]  ;;  %v1136_v38 = vld [vmem:[%s2116_s0 + $0x88] sm:$0xf] }
  0x19   :  { %v1389_v39 = vld [vmem:[%s2116_s0 + $0x98] sm:$0xf0]  ;;  %v1133_v42 = vor.u32 %v1386_v36, %v1130_v37  ;;  %v1396_v60 = vld [vmem:[%s2116_s0 + $0xd4] sm:$0xf]  ;;  %v1170_v61 = vld [vmem:[%s2116_s0 + $0xe4] sm:$0xf0] }
  0x1a   :  { %1464 = vmatpush.bf16.msra.mxu1 %v1411_v6  ;;  %1465 = vmatpush.bf16.msra.mxu2 %v1411_v6  ;;  %v1176_v62 = vld [vmem:[%s2116_s0 + $0xd8] sm:$0xf]  ;;  %v1399_v63 = vld [vmem:[%s2116_s0 + $0xe8] sm:$0xf0] }
  0x1b   :  { %1466 = vmatpush.bf16.msra.mxu3 %v1411_v6  ;;  %628 = vmatpush.bf16.msra.mxu0 %v1411_v6  ;;  %v1073_v6 = vor.u32 %v1371_v0, %v1070_v1 }
  0x1e   :  { %1467 = vmatpush.bf16.msra.mxu1 %v1410_v7  ;;  %1468 = vmatpush.bf16.msra.mxu2 %v1410_v7 }
  0x1f   :  { %1469 = vmatpush.bf16.msra.mxu3 %v1410_v7  ;;  %629 = vmatpush.bf16.msra.mxu0 %v1410_v7  ;;  %v1077_v7 = vor.u32 %v1374_v3, %v1076_v2  ;;  %v1173_v2 = vor.u32 %v1396_v60, %v1170_v61  ;;  %v1177_v3 = vor.u32 %v1399_v63, %v1176_v62 }
  0x21   :  { %640 = vmatmul.bf16.vlgmr.msra.gmra.mxu1 %v1101_v18  ;;  %650 = vmatmul.bf16.vlgmr.msra.gmra.mxu2 %v1141_v19  ;;  %v1093_v18 = vor.u32 %v1376_v12, %v1090_v13  ;;  %v1097_v19 = vor.u32 %v1379_v15, %v1096_v14 }
  0x22   :  { %720 = vmatpush.bf16.msrb.mxu2 %v1433_v16  ;;  %671 = vmatpush.bf16.msrb.mxu1 %v1425_v17  ;;  %v1085_v16 = vor.u32 %v1375_v8, %v1082_v9  ;;  %v1089_v17 = vor.u32 %v1378_v11, %v1088_v10  ;;  %v1401_v8 = vld [vmem:[%s2116_s0 + $0xfc] sm:$0xf]  ;;  %v1190_v9 = vld [vmem:[%s2116_s0 + $0x10c] sm:$0xf0]  ;;  %v1196_v10 = vld [vmem:[%s2116_s0 + $0x100] sm:$0xf] }
  0x23   :  { %660 = vmatmul.bf16.vlgmr.msra.gmra.mxu3 %v1181_v20  ;;  %630 = vmatmul.bf16.vlgmr.msra.gmra.mxu0 %v1061_v21  ;;  %v1380_v20 = vld [vmem:[%s2116_s0 + $0x54] sm:$0xf]  ;;  %v1102_v21 = vld [vmem:[%s2116_s0 + $0x64] sm:$0xf0]  ;;  %v1193_v15 = vor.u32 %v1401_v8, %v1190_v9 }
  0x24   :  { %769 = vmatpush.bf16.msrb.mxu3 %v1441_v22  ;;  %822 = vmatpush.bf16.msrb.mxu0 %v1445_v23  ;;  %v1108_v22 = vld [vmem:[%s2116_s0 + $0x58] sm:$0xf]  ;;  %v1383_v23 = vld [vmem:[%s2116_s0 + $0x68] sm:$0xf0]  ;;  %v1404_v11 = vld [vmem:[%s2116_s0 + $0x110] sm:$0xf0] }
  0x26   :  { %721 = vmatpush.bf16.msrb.mxu2 %v1432_v24  ;;  %672 = vmatpush.bf16.msrb.mxu1 %v1424_v25  ;;  %v1381_v24 = vld [vmem:[%s2116_s0 + $0x5c] sm:$0xf]  ;;  %v1110_v25 = vld [vmem:[%s2116_s0 + $0x6c] sm:$0xf0] }
  0x28   :  { %770 = vmatpush.bf16.msrb.mxu3 %v1440_v26  ;;  %823 = vmatpush.bf16.msrb.mxu0 %v1444_v27  ;;  %v1116_v26 = vld [vmem:[%s2116_s0 + $0x60] sm:$0xf]  ;;  %v1384_v27 = vld [vmem:[%s2116_s0 + $0x70] sm:$0xf0] }
  0x2a   :  { %722 = vmatpush.bf16.msrb.mxu2 %v1431_v28  ;;  %673 = vmatpush.bf16.msrb.mxu1 %v1423_v29  ;;  %v1105_v28 = vor.u32 %v1380_v20, %v1102_v21  ;;  %v1109_v29 = vor.u32 %v1383_v23, %v1108_v22  ;;  %v1405_v23 = vld [vmem:[%s2116_s0 + $0x11c] sm:$0xf] }
  0x2c   :  { %771 = vmatpush.bf16.msrb.mxu3 %v1439_v30  ;;  %824 = vmatpush.bf16.msrb.mxu0 %v1443_v31  ;;  %v1113_v30 = vor.u32 %v1381_v24, %v1110_v25  ;;  %v1117_v31 = vor.u32 %v1384_v27, %v1116_v26  ;;  %v1202_v24 = vld [vmem:[%s2116_s0 + $0x12c] sm:$0xf0]  ;;  %v1208_v25 = vld [vmem:[%s2116_s0 + $0x120] sm:$0xf]  ;;  %v1408_v26 = vld [vmem:[%s2116_s0 + $0x130] sm:$0xf0] }
  0x2d   :  { %v1406_v27 = vld [vmem:[%s2116_s0 + $0x124] sm:$0xf] }
  0x2e   :  { %723 = vmatpush.bf16.msrb.mxu2 %v1430_v32  ;;  %674 = vmatpush.bf16.msrb.mxu1 %v1422_v33  ;;  %v1385_v32 = vld [vmem:[%s2116_s0 + $0x7c] sm:$0xf]  ;;  %v1122_v33 = vld [vmem:[%s2116_s0 + $0x8c] sm:$0xf0] }
  0x2f   :  { %v1125_v40 = vor.u32 %v1385_v32, %v1122_v33  ;;  %v1205_v33 = vor.u32 %v1405_v23, %v1202_v24 }
  0x30   :  { %772 = vmatpush.bf16.msrb.mxu3 %v1438_v34  ;;  %825 = vmatpush.bf16.msrb.mxu0 %v1442_v43  ;;  %v1128_v34 = vld [vmem:[%s2116_s0 + $0x80] sm:$0xf]  ;;  %v1137_v43 = vor.u32 %v1389_v39, %v1136_v38 }
  0x31   :  { %645 = vmatmul.bf16.gmra.mxu1 %v1121_v46  ;;  %655 = vmatmul.bf16.gmra.mxu2 %v1161_v47  ;;  %v1129_v41 = vor.u32 %v1388_v35, %v1128_v34  ;;  %v1148_v46 = vld [vmem:[%s2116_s0 + $0xa8] sm:$0xf]  ;;  %v1393_v47 = vld [vmem:[%s2116_s0 + $0xb8] sm:$0xf0]  ;;  %v1209_v34 = vor.u32 %v1408_v26, %v1208_v25 }
  0x32   :  { %724 = vmatpush.bf16.msrb.mxu2 %v1429_v44  ;;  %675 = vmatpush.bf16.msrb.mxu1 %v1421_v45  ;;  %v1390_v44 = vld [vmem:[%s2116_s0 + $0xa4] sm:$0xf]  ;;  %v1142_v45 = vld [vmem:[%s2116_s0 + $0xb4] sm:$0xf0] }
  0x33   :  { %665 = vmatmul.bf16.gmra.mxu3 %v1201_v48  ;;  %635 = vmatmul.bf16.gmra.mxu0 %v1081_v49  ;;  %v1391_v48 = vld [vmem:[%s2116_s0 + $0xac] sm:$0xf]  ;;  %v1150_v49 = vld [vmem:[%s2116_s0 + $0xbc] sm:$0xf0] }
  0x34   :  { %773 = vmatpush.bf16.msrb.mxu3 %v1437_v50  ;;  %v1156_v50 = vld [vmem:[%s2116_s0 + $0xb0] sm:$0xf] }
  0x36   :  { %725 = vmatpush.bf16.msrb.mxu2 %v1428_v51  ;;  %676 = vmatpush.bf16.msrb.mxu1 %v1420_v52  ;;  %v1394_v51 = vld [vmem:[%s2116_s0 + $0xc0] sm:$0xf0]  ;;  %v1145_v52 = vor.u32 %v1390_v44, %v1142_v45 }
  0x38   :  { %774 = vmatpush.bf16.msrb.mxu3 %v1436_v53  ;;  %v1149_v53 = vor.u32 %v1393_v47, %v1148_v46 }
  0x3a   :  { %726 = vmatpush.bf16.msrb.mxu2 %v1427_v54  ;;  %677 = vmatpush.bf16.msrb.mxu1 %v1419_v55  ;;  %v1153_v54 = vor.u32 %v1391_v48, %v1150_v49  ;;  %v1157_v55 = vor.u32 %v1394_v51, %v1156_v50 }
  0x3c   :  { %775 = vmatpush.bf16.msrb.mxu3 %v1435_v56  ;;  %v1395_v56 = vld [vmem:[%s2116_s0 + $0xcc] sm:$0xf] }
  0x3e   :  { %727 = vmatpush.bf16.msrb.mxu2 %v1426_v57  ;;  %678 = vmatpush.bf16.msrb.mxu1 %v1418_v58  ;;  %v1162_v57 = vld [vmem:[%s2116_s0 + $0xdc] sm:$0xf0]  ;;  %v1168_v58 = vld [vmem:[%s2116_s0 + $0xd0] sm:$0xf] }
  0x3f   :  { %v1165_v0 = vor.u32 %v1395_v56, %v1162_v57 }
  0x40   :  { %776 = vmatpush.bf16.msrb.mxu3 %v1434_v59  ;;  %v1398_v59 = vld [vmem:[%s2116_s0 + $0xe0] sm:$0xf0] }
  0x41   :  { %679 = vmatmul.bf16.vlgmr.msrb.gmra.mxu1 %v1065_v4  ;;  %728 = vmatmul.bf16.vlgmr.msrb.gmra.mxu2 %v1069_v5  ;;  %v1169_v1 = vor.u32 %v1398_v59, %v1168_v58  ;;  %v1400_v4 = vld [vmem:[%s2116_s0 + $0xf4] sm:$0xf]  ;;  %v1182_v5 = vld [vmem:[%s2116_s0 + $0x104] sm:$0xf0] }
  0x42   :  { %v1185_v12 = vor.u32 %v1400_v4, %v1182_v5 }
  0x43   :  { %777 = vmatmul.bf16.vlgmr.msrb.gmra.mxu3 %v1073_v6  ;;  %1362 = vmatmul.msk.bf16.vlgmr.msrb.gmra.mxu0 %vm21_vm0, %v1077_v7  ;;  %v1188_v6 = vld [vmem:[%s2116_s0 + $0xf8] sm:$0xf]  ;;  %v1403_v7 = vld [vmem:[%s2116_s0 + $0x108] sm:$0xf0] }
  0x44   :  { %v1189_v13 = vor.u32 %v1403_v7, %v1188_v6 }
  0x51   :  { %684 = vmatmul.bf16.gmra.mxu1 %v1085_v16  ;;  %733 = vmatmul.bf16.gmra.mxu2 %v1089_v17  ;;  %v1197_v16 = vor.u32 %v1404_v11, %v1196_v10 }
  0x53   :  { %782 = vmatmul.bf16.gmra.mxu3 %v1093_v18  ;;  %1363 = vmatmul.msk.bf16.gmra.mxu0 %vm21_vm0, %v1097_v19  ;;  %v1472_v19 = vmov 0.0  }
  0x54   :  { %22 = vst.msk [vmem:[#allocation2] sm:$0xff] %vm21_vm0, %v1472_v19 }
  0x55   :  { %23 = vst.msk [vmem:[#allocation2 + $0x8] sm:$0xff] %vm21_vm0, %v1472_v19 }
  0x56   :  { %24 = vst.msk [vmem:[#allocation2 + $0x10] sm:$0xff] %vm21_vm0, %v1472_v19 }
  0x57   :  { %25 = vst.msk [vmem:[#allocation2 + $0x18] sm:$0xff] %vm21_vm0, %v1472_v19 }
  0x58   :  { %26 = vst.msk [vmem:[#allocation2 + $0x20] sm:$0xff] %vm21_vm0, %v1472_v19 }
  0x59   :  { %27 = vst.msk [vmem:[#allocation2 + $0x28] sm:$0xff] %vm21_vm0, %v1472_v19 }
  0x5a   :  { %28 = vst.msk [vmem:[#allocation2 + $0x30] sm:$0xff] %vm21_vm0, %v1472_v19 }
  0x5b   :  { %29 = vst.msk [vmem:[#allocation2 + $0x38] sm:$0xff] %vm21_vm0, %v1472_v19 }
  0x5c   :  { %30 = vst.msk [vmem:[#allocation2 + $0x40] sm:$0xff] %vm21_vm0, %v1472_v19 }
  0x5d   :  { %31 = vst.msk [vmem:[#allocation2 + $0x48] sm:$0xff] %vm21_vm0, %v1472_v19 }
  0x5e   :  { %32 = vst.msk [vmem:[#allocation2 + $0x50] sm:$0xff] %vm21_vm0, %v1472_v19 }
  0x5f   :  { %33 = vst.msk [vmem:[#allocation2 + $0x58] sm:$0xff] %vm21_vm0, %v1472_v19 }
  0x60   :  { %34 = vst.msk [vmem:[#allocation2 + $0x60] sm:$0xff] %vm21_vm0, %v1472_v19 }
  0x61   :  { %689 = vmatmul.bf16.gmra.mxu1 %v1105_v28  ;;  %738 = vmatmul.bf16.gmra.mxu2 %v1109_v29  ;;  %v1210_v28 = vld [vmem:[%s2116_s0 + $0x134] sm:$0xf0]  ;;  %v1216_v29 = vld [vmem:[%s2116_s0 + $0x128] sm:$0xf]  ;;  %35 = vst.msk [vmem:[#allocation2 + $0x68] sm:$0xff] %vm21_vm0, %v1472_v19 }
  0x62   :  { %v1213_v36 = vor.u32 %v1406_v27, %v1210_v28  ;;  %36 = vst.msk [vmem:[#allocation2 + $0x70] sm:$0xff] %vm21_vm0, %v1472_v19 }
  0x63   :  { %787 = vmatmul.bf16.gmra.mxu3 %v1113_v30  ;;  %1364 = vmatmul.msk.bf16.gmra.mxu0 %vm21_vm0, %v1117_v31  ;;  %v1409_v30 = vld [vmem:[%s2116_s0 + $0x138] sm:$0xf0]  ;;  %37 = vst.msk [vmem:[#allocation2 + $0x78] sm:$0xff] %vm21_vm0, %v1472_v19 }
  0x64   :  { %v1217_v37 = vor.u32 %v1409_v30, %v1216_v29  ;;  %44 = vst.msk [vmem:[%s2119_s4] sm:$0x3] %vm43_vm1, %v1472_v19 }
  0x71   :  { %694 = vmatmul.bf16.gmra.mxu1 %v1125_v40  ;;  %743 = vmatmul.bf16.gmra.mxu2 %v1129_v41 }
  0x73   :  { %792 = vmatmul.bf16.gmra.mxu3 %v1133_v42  ;;  %1365 = vmatmul.msk.bf16.gmra.mxu0 %vm21_vm0, %v1137_v43 }
  0x81   :  { %699 = vmatmul.bf16.gmra.mxu1 %v1145_v52  ;;  %748 = vmatmul.bf16.gmra.mxu2 %v1149_v53 }
  0x83   :  { %797 = vmatmul.bf16.gmra.mxu3 %v1153_v54  ;;  %1366 = vmatmul.msk.bf16.gmra.mxu0 %vm21_vm0, %v1157_v55  ;;  %v45_v54 = vld [vmem:[#allocation2] sm:$0xff] }
  0x91   :  { %704 = vmatmul.bf16.gmra.mxu1 %v1165_v0  ;;  %753 = vmatmul.bf16.gmra.mxu2 %v1169_v1  ;;  %v46_v0 = vld [vmem:[#allocation2 + $0x8] sm:$0xff]  ;;  %v1914_v1 = vld [vmem:[%s2117_s2] ss:$0 sm:$0xff] }
  0x93   :  { %802 = vmatmul.bf16.gmra.mxu3 %v1173_v2  ;;  %1367 = vmatmul.msk.bf16.gmra.mxu0 %vm21_vm0, %v1177_v3 }
  0x9e   :  { %v1828_v14 = vpop.f32.mrf.mxu1 }
  0xa0   :  { %v631_v17 = vpop.f32.mrf.mxu0 }
  0xa1   :  { %709 = vmatmul.bf16.gmra.mxu1 %v1185_v12  ;;  %758 = vmatmul.bf16.gmra.mxu2 %v1189_v13  ;;  %v47_v13 = vld [vmem:[#allocation2 + $0x10] sm:$0xff] }
  0xa3   :  { %807 = vmatmul.bf16.gmra.mxu3 %v1193_v15  ;;  %1368 = vmatmul.msk.bf16.gmra.mxu0 %vm21_vm0, %v1197_v16 }
  0xa4   :  { %v1831_v18 = vpop.f32.mrf.mxu2 }
  0xa6   :  { %v1835_v20 = vpop.f32.mrf.mxu3  ;;  %v1839_v21 = vpop.f32.mrf.mxu1 }
  0xa8   :  { %v633_v22 = vpop.f32.mrf.mxu0 }
  0xac   :  { %v1877_v31 = vpop.f32.mrf.mxu2 }
  0xae   :  { %v1881_v32 = vpop.f32.mrf.mxu3  ;;  %v1885_v35 = vpop.f32.mrf.mxu1 }
  0xb0   :  { %v636_v38 = vpop.f32.mrf.mxu0 }
  0xb1   :  { %714 = vmatmul.bf16.gmra.mxu1 %v1205_v33  ;;  %763 = vmatmul.bf16.gmra.mxu2 %v1209_v34 }
  0xb3   :  { %812 = vmatmul.bf16.gmra.mxu3 %v1213_v36  ;;  %1369 = vmatmul.msk.bf16.gmra.mxu0 %vm21_vm0, %v1217_v37 }
  0xb4   :  { %v1900_v39 = vpop.f32.mrf.mxu2 }
  0xb6   :  { %v1902_v40 = vpop.f32.mrf.mxu3  ;;  %v1904_v41 = vpop.f32.mrf.mxu1 }
  0xb8   :  { %v638_v42 = vpop.f32.mrf.mxu0 }
  0xbc   :  { %v1906_v43 = vpop.f32.mrf.mxu2 }
  0xbe   :  { %v1908_v44 = vpop.f32.mrf.mxu3  ;;  %v680_v45 = vpop.f32.mrf.mxu1 }
  0xbf   :  { %v681_v47 = vadd.f32 %v680_v45, %v631_v17 }
  0xc0   :  { %v827_v46 = vpop.f32.mrf.mxu0 }
  0xc4   :  { %v729_v48 = vpop.f32.mrf.mxu2 }
  0xc5   :  { %v730_v49 = vadd.f32 %v729_v48, %v681_v47 }
  0xc6   :  { %v778_v50 = vpop.f32.mrf.mxu3  ;;  %v682_v51 = vpop.f32.mrf.mxu1 }
  0xc7   :  { %v779_v52 = vadd.f32 %v778_v50, %v730_v49  ;;  %v683_v57 = vadd.f32 %v682_v51, %v633_v22 }
  0xc8   :  { %v829_v53 = vpop.f32.mrf.mxu0 }
  0xc9   :  { %v828_v55 = vadd.f32 %v827_v46, %v779_v52 }
  0xcb   :  { %v867_v56 = vadd.f32 %v828_v55, %v45_v54 }
  0xcc   :  { %v731_v58 = vpop.f32.mrf.mxu2 }
  0xcd   :  { %883 = vst.msk [vmem:[#allocation2] sm:$0xff] %vm21_vm0, %v867_v56  ;;  %v732_v59 = vadd.f32 %v731_v58, %v683_v57 }
  0xce   :  { %v780_v60 = vpop.f32.mrf.mxu3  ;;  %v685_v61 = vpop.f32.mrf.mxu1 }
  0xcf   :  { %v781_v62 = vadd.f32 %v780_v60, %v732_v59  ;;  %v686_v4 = vadd.f32 %v685_v61, %v636_v38  ;;  %v48_v38 = vld [vmem:[#allocation2 + $0x18] sm:$0xff]  ;;  %v49_v60 = vld [vmem:[#allocation2 + $0x20] sm:$0xff] }
  0xd0   :  { %v832_v63 = vpop.f32.mrf.mxu0 }
  0xd1   :  { %v830_v2 = vadd.f32 %v829_v53, %v781_v62 }
  0xd3   :  { %v868_v3 = vadd.f32 %v830_v2, %v46_v0 }
  0xd4   :  { %v902_v5 = vld [vmem:[#allocation2] sm:$0xff]  ;;  %v734_v6 = vpop.f32.mrf.mxu2 }
  0xd5   :  { %v922_v7 = vadd.f32 %v1914_v1, %v902_v5  ;;  %884 = vst.msk [vmem:[#allocation2 + $0x8] sm:$0xff] %vm21_vm0, %v868_v3  ;;  %v735_v8 = vadd.f32 %v734_v6, %v686_v4 }
  0xd6   :  { %v783_v9 = vpop.f32.mrf.mxu3  ;;  %v687_v10 = vpop.f32.mrf.mxu1 }
  0xd7   :  { %938 = vst.msk [vmem:[%s2118_s3] sm:$0xff] %vm21_vm0, %v922_v7  ;;  %v784_v11 = vadd.f32 %v783_v9, %v735_v8  ;;  %v688_v17 = vadd.f32 %v687_v10, %v638_v42  ;;  %v954_v24 = vmul.f32 %v922_v7, %v922_v7  ;;  %v970_v29 = vsel %vm21_vm0, %v922_v7, 0.0 }
  0xd8   :  { %v834_v12 = vpop.f32.mrf.mxu0 }
  0xd9   :  { %v833_v15 = vadd.f32 %v832_v63, %v784_v11  ;;  %v1007_v42 = vsel %vm21_vm0, %v954_v24, 0.0 }
  0xdb   :  { %v869_v16 = vadd.f32 %v833_v15, %v47_v13  ;;  %v50_v13 = vld [vmem:[#allocation2 + $0x28] sm:$0xff] }
  0xdc   :  { %v903_v22 = vld [vmem:[#allocation2 + $0x8] sm:$0xff]  ;;  %v736_v23 = vpop.f32.mrf.mxu2 }
  0xdd   :  { %v923_v25 = vadd.f32 %v1914_v1, %v903_v22  ;;  %885 = vst.msk [vmem:[#allocation2 + $0x10] sm:$0xff] %vm21_vm0, %v869_v16  ;;  %v737_v26 = vadd.f32 %v736_v23, %v688_v17 }
  0xde   :  { %v785_v27 = vpop.f32.mrf.mxu3  ;;  %v690_v28 = vpop.f32.mrf.mxu1 }
  0xdf   :  { %939 = vst.msk [vmem:[%s2118_s3 + $0x8] sm:$0xff] %vm21_vm0, %v923_v25  ;;  %v955_v30 = vmul.f32 %v923_v25, %v923_v25  ;;  %v971_v33 = vsel %vm21_vm0, %v923_v25, 0.0  ;;  %v786_v34 = vadd.f32 %v785_v27, %v737_v26  ;;  %v691_v49 = vadd.f32 %v690_v28, %v1828_v14 }
  0xe0   :  { %v837_v36 = vpop.f32.mrf.mxu0  ;;  %v972_v37 = vadd.f32 %v971_v33, %v970_v29 }
  0xe1   :  { %v1008_v45 = vsel %vm21_vm0, %v955_v30, 0.0  ;;  %v835_v46 = vadd.f32 %v834_v12, %v786_v34 }
  0xe2   :  { %v1009_v47 = vadd.f32 %v1008_v45, %v1007_v42 }
  0xe3   :  { %v870_v48 = vadd.f32 %v835_v46, %v48_v38 }
  0xe4   :  { %v904_v50 = vld [vmem:[#allocation2 + $0x10] sm:$0xff]  ;;  %v739_v51 = vpop.f32.mrf.mxu2 }
  0xe5   :  { %v924_v52 = vadd.f32 %v1914_v1, %v904_v50  ;;  %886 = vst.msk [vmem:[#allocation2 + $0x18] sm:$0xff] %vm21_vm0, %v870_v48  ;;  %v740_v53 = vadd.f32 %v739_v51, %v691_v49 }
  0xe6   :  { %v788_v54 = vpop.f32.mrf.mxu3  ;;  %v692_v55 = vpop.f32.mrf.mxu1 }
  0xe7   :  { %940 = vst.msk [vmem:[%s2118_s3 + $0x10] sm:$0xff] %vm21_vm0, %v924_v52  ;;  %v956_v56 = vmul.f32 %v924_v52, %v924_v52  ;;  %v973_v57 = vsel %vm21_vm0, %v924_v52, 0.0  ;;  %v789_v58 = vadd.f32 %v788_v54, %v740_v53  ;;  %v693_v2 = vadd.f32 %v692_v55, %v1839_v21 }
  0xe8   :  { %v839_v59 = vpop.f32.mrf.mxu0  ;;  %v974_v14 = vadd.f32 %v973_v57, %v972_v37  ;;  %v51_v37 = vld [vmem:[#allocation2 + $0x30] sm:$0xff] }
  0xe9   :  { %v1010_v61 = vsel %vm21_vm0, %v956_v56, 0.0  ;;  %v838_v62 = vadd.f32 %v837_v36, %v789_v58  ;;  %v52_v56 = vld [vmem:[#allocation2 + $0x38] sm:$0xff] }
  0xea   :  { %v1011_v63 = vadd.f32 %v1010_v61, %v1009_v47 }
  0xeb   :  { %v871_v0 = vadd.f32 %v838_v62, %v49_v60 }
  0xec   :  { %v905_v3 = vld [vmem:[#allocation2 + $0x18] sm:$0xff]  ;;  %v741_v4 = vpop.f32.mrf.mxu2 }
  0xed   :  { %v925_v5 = vadd.f32 %v1914_v1, %v905_v3  ;;  %887 = vst.msk [vmem:[#allocation2 + $0x20] sm:$0xff] %vm21_vm0, %v871_v0  ;;  %v742_v6 = vadd.f32 %v741_v4, %v693_v2  ;;  %v53_v3 = vld [vmem:[#allocation2 + $0x40] sm:$0xff] }
  0xee   :  { %v790_v7 = vpop.f32.mrf.mxu3  ;;  %v695_v8 = vpop.f32.mrf.mxu1 }
  0xef   :  { %941 = vst.msk [vmem:[%s2118_s3 + $0x18] sm:$0xff] %vm21_vm0, %v925_v5  ;;  %v957_v9 = vmul.f32 %v925_v5, %v925_v5  ;;  %v975_v10 = vsel %vm21_vm0, %v925_v5, 0.0  ;;  %v791_v11 = vadd.f32 %v790_v7, %v742_v6  ;;  %v696_v23 = vadd.f32 %v695_v8, %v1885_v35 }
  0xf0   :  { %v842_v12 = vpop.f32.mrf.mxu0  ;;  %v976_v21 = vadd.f32 %v975_v10, %v974_v14 }
  0xf1   :  { %v1012_v15 = vsel %vm21_vm0, %v957_v9, 0.0  ;;  %v840_v16 = vadd.f32 %v839_v59, %v791_v11 }
  0xf2   :  { %v1013_v17 = vadd.f32 %v1012_v15, %v1011_v63 }
  0xf3   :  { %v872_v22 = vadd.f32 %v840_v16, %v50_v13  ;;  %v54_v13 = vld [vmem:[#allocation2 + $0x48] sm:$0xff] }
  0xf4   :  { %v906_v24 = vld [vmem:[#allocation2 + $0x20] sm:$0xff]  ;;  %v744_v25 = vpop.f32.mrf.mxu2 }
  0xf5   :  { %v926_v26 = vadd.f32 %v1914_v1, %v906_v24  ;;  %888 = vst.msk [vmem:[#allocation2 + $0x28] sm:$0xff] %vm21_vm0, %v872_v22  ;;  %v745_v27 = vadd.f32 %v744_v25, %v696_v23 }
  0xf6   :  { %v793_v28 = vpop.f32.mrf.mxu3  ;;  %v697_v29 = vpop.f32.mrf.mxu1 }
  0xf7   :  { %942 = vst.msk [vmem:[%s2118_s3 + $0x20] sm:$0xff] %vm21_vm0, %v926_v26  ;;  %v958_v30 = vmul.f32 %v926_v26, %v926_v26  ;;  %v977_v33 = vsel %vm21_vm0, %v926_v26, 0.0  ;;  %v794_v34 = vadd.f32 %v793_v28, %v745_v27  ;;  %v698_v47 = vadd.f32 %v697_v29, %v1904_v41  ;;  %v55_v28 = vld [vmem:[#allocation2 + $0x50] sm:$0xff] }
  0xf8   :  { %v844_v36 = vpop.f32.mrf.mxu0  ;;  %v1958_v35 = vadd.f32 %v977_v33, %v976_v21 }
  0xf9   :  { %v1014_v38 = vsel %vm21_vm0, %v958_v30, 0.0  ;;  %v843_v42 = vadd.f32 %v842_v12, %v794_v34 }
  0xfa   :  { %v1961_v45 = vadd.f32 %v1014_v38, %v1013_v17 }
  0xfb   :  { %v873_v46 = vadd.f32 %v843_v42, %v51_v37 }
  0xfc   :  { %v907_v48 = vld [vmem:[#allocation2 + $0x28] sm:$0xff]  ;;  %v746_v49 = vpop.f32.mrf.mxu2 }
  0xfd   :  { %v1965_v50 = vadd.f32 %v1914_v1, %v907_v48  ;;  %889 = vst.msk [vmem:[#allocation2 + $0x30] sm:$0xff] %vm21_vm0, %v873_v46  ;;  %v747_v51 = vadd.f32 %v746_v49, %v698_v47  ;;  %v56_v48 = vld [vmem:[#allocation2 + $0x58] sm:$0xff] }
  0xfe   :  { %v795_v52 = vpop.f32.mrf.mxu3  ;;  %v700_v53 = vpop.f32.mrf.mxu1 }
  0xff   :  { %943 = vst.msk [vmem:[%s2118_s3 + $0x28] sm:$0xff] %vm21_vm0, %v1965_v50  ;;  %v796_v54 = vadd.f32 %v795_v52, %v747_v51  ;;  %v701_v58 = vadd.f32 %v700_v53, %v1831_v18 }
 0x100   :  { %v847_v55 = vpop.f32.mrf.mxu0 }
 0x101   :  { %v845_v41 = vadd.f32 %v844_v36, %v796_v54 }
 0x103   :  { %v874_v57 = vadd.f32 %v845_v41, %v52_v56 }
 0x104   :  { %v908_v59 = vld [vmem:[#allocation2 + $0x30] sm:$0xff]  ;;  %v749_v14 = vpop.f32.mrf.mxu2 }
 0x105   :  { %v1975_v60 = vadd.f32 %v1914_v1, %v908_v59  ;;  %890 = vst.msk [vmem:[#allocation2 + $0x38] sm:$0xff] %vm21_vm0, %v874_v57  ;;  %v750_v61 = vadd.f32 %v749_v14, %v701_v58  ;;  %v57_v59 = vld [vmem:[#allocation2 + $0x60] sm:$0xff] }
 0x106   :  { %v798_v62 = vpop.f32.mrf.mxu3  ;;  %v702_v63 = vpop.f32.mrf.mxu1 }
 0x107   :  { %944 = vst.msk [vmem:[%s2118_s3 + $0x30] sm:$0xff] %vm21_vm0, %v1975_v60  ;;  %v799_v0 = vadd.f32 %v798_v62, %v750_v61  ;;  %v703_v5 = vadd.f32 %v702_v63, %v1877_v31 }
 0x108   :  { %v849_v2 = vpop.f32.mrf.mxu0 }
 0x109   :  { %v848_v18 = vadd.f32 %v847_v55, %v799_v0 }
 0x10b   :  { %v875_v4 = vadd.f32 %v848_v18, %v53_v3 }
 0x10c   :  { %v909_v6 = vld [vmem:[#allocation2 + $0x38] sm:$0xff]  ;;  %v751_v7 = vpop.f32.mrf.mxu2 }
 0x10d   :  { %v1985_v8 = vadd.f32 %v1914_v1, %v909_v6  ;;  %891 = vst.msk [vmem:[#allocation2 + $0x40] sm:$0xff] %vm21_vm0, %v875_v4  ;;  %v752_v9 = vadd.f32 %v751_v7, %v703_v5  ;;  %v58_v5 = vld [vmem:[#allocation2 + $0x68] sm:$0xff] }
 0x10e   :  { %v800_v10 = vpop.f32.mrf.mxu3  ;;  %v705_v11 = vpop.f32.mrf.mxu1 }
 0x10f   :  { %945 = vst.msk [vmem:[%s2118_s3 + $0x38] sm:$0xff] %vm21_vm0, %v1985_v8  ;;  %v801_v12 = vadd.f32 %v800_v10, %v752_v9  ;;  %v706_v16 = vadd.f32 %v705_v11, %v1900_v39 }
 0x110   :  { %v852_v21 = vpop.f32.mrf.mxu0 }
 0x111   :  { %v850_v31 = vadd.f32 %v849_v2, %v801_v12 }
 0x113   :  { %v876_v15 = vadd.f32 %v850_v31, %v54_v13  ;;  %v959_v13 = vmul.f32 %v1965_v50, %v1965_v50 }
 0x114   :  { %v910_v17 = vld [vmem:[#allocation2 + $0x40] sm:$0xff]  ;;  %v754_v22 = vpop.f32.mrf.mxu2 }
 0x115   :  { %v1995_v23 = vadd.f32 %v1914_v1, %v910_v17  ;;  %892 = vst.msk [vmem:[#allocation2 + $0x48] sm:$0xff] %vm21_vm0, %v876_v15  ;;  %v755_v24 = vadd.f32 %v754_v22, %v706_v16  ;;  %v59_v16 = vld [vmem:[#allocation2 + $0x70] sm:$0xff]  ;;  %v979_v22 = vsel %vm21_vm0, %v1965_v50, 0.0  ;;  %v983_v50 = vsel %vm21_vm0, %v1985_v8, 0.0 }
 0x116   :  { %v803_v25 = vpop.f32.mrf.mxu3  ;;  %v707_v26 = vpop.f32.mrf.mxu1 }
 0x117   :  { %946 = vst.msk [vmem:[%s2118_s3 + $0x40] sm:$0xff] %vm21_vm0, %v1995_v23  ;;  %v804_v27 = vadd.f32 %v803_v25, %v755_v24  ;;  %v708_v33 = vadd.f32 %v707_v26, %v1906_v43  ;;  %v1016_v25 = vsel %vm21_vm0, %v959_v13, 0.0  ;;  %v981_v26 = vsel %vm21_vm0, %v1975_v60, 0.0 }
 0x118   :  { %v854_v29 = vpop.f32.mrf.mxu0 }
 0x119   :  { %v853_v39 = vadd.f32 %v852_v21, %v804_v27  ;;  %v961_v27 = vmul.f32 %v1985_v8, %v1985_v8 }
 0x11b   :  { %v877_v30 = vadd.f32 %v853_v39, %v55_v28  ;;  %v980_v39 = vadd.f32 %v979_v22, %v1958_v35  ;;  %v1020_v35 = vsel %vm21_vm0, %v961_v27, 0.0 }
 0x11c   :  { %v911_v34 = vld [vmem:[#allocation2 + $0x48] sm:$0xff]  ;;  %v756_v36 = vpop.f32.mrf.mxu2 }
 0x11d   :  { %v2005_v37 = vadd.f32 %v1914_v1, %v911_v34  ;;  %893 = vst.msk [vmem:[#allocation2 + $0x50] sm:$0xff] %vm21_vm0, %v877_v30  ;;  %v757_v38 = vadd.f32 %v756_v36, %v708_v33  ;;  %v962_v36 = vmul.f32 %v1995_v23, %v1995_v23 }
 0x11e   :  { %v805_v42 = vpop.f32.mrf.mxu3  ;;  %v710_v46 = vpop.f32.mrf.mxu1 }
 0x11f   :  { %947 = vst.msk [vmem:[%s2118_s3 + $0x48] sm:$0xff] %vm21_vm0, %v2005_v37  ;;  %v806_v47 = vadd.f32 %v805_v42, %v757_v38  ;;  %v711_v52 = vadd.f32 %v710_v46, %v1835_v20  ;;  %v1017_v42 = vadd.f32 %v1016_v25, %v1961_v45  ;;  %v963_v8 = vmul.f32 %v2005_v37, %v2005_v37  ;;  %v60_v45 = vld [vmem:[#allocation2 + $0x78] sm:$0xff] }
 0x120   :  { %v857_v43 = vpop.f32.mrf.mxu0 }
 0x121   :  { %v855_v49 = vadd.f32 %v854_v29, %v806_v47  ;;  %v985_v47 = vsel %vm21_vm0, %v1995_v23, 0.0 }
 0x123   :  { %v878_v51 = vadd.f32 %v855_v49, %v56_v48 }
 0x124   :  { %v912_v53 = vld [vmem:[#allocation2 + $0x50] sm:$0xff]  ;;  %v759_v54 = vpop.f32.mrf.mxu2 }
 0x125   :  { %v2015_v55 = vadd.f32 %v1914_v1, %v912_v53  ;;  %894 = vst.msk [vmem:[#allocation2 + $0x58] sm:$0xff] %vm21_vm0, %v878_v51  ;;  %v760_v56 = vadd.f32 %v759_v54, %v711_v52  ;;  %v1022_v52 = vsel %vm21_vm0, %v962_v36, 0.0  ;;  %v987_v53 = vsel %vm21_vm0, %v2005_v37, 0.0 }
 0x126   :  { %v808_v41 = vpop.f32.mrf.mxu3  ;;  %v712_v57 = vpop.f32.mrf.mxu1 }
 0x127   :  { %948 = vst.msk [vmem:[%s2118_s3 + $0x50] sm:$0xff] %vm21_vm0, %v2015_v55  ;;  %v809_v58 = vadd.f32 %v808_v41, %v760_v56  ;;  %v713_v61 = vadd.f32 %v712_v57, %v1881_v32  ;;  %v964_v23 = vmul.f32 %v2015_v55, %v2015_v55  ;;  %v1024_v57 = vsel %vm21_vm0, %v963_v8, 0.0 }
 0x128   :  { %v859_v63 = vpop.f32.mrf.mxu0 }
 0x129   :  { %v858_v14 = vadd.f32 %v857_v43, %v809_v58  ;;  %v989_v58 = vsel %vm21_vm0, %v2015_v55, 0.0  ;;  %v1026_v37 = vsel %vm21_vm0, %v964_v23, 0.0 }
 0x12b   :  { %v879_v20 = vadd.f32 %v858_v14, %v57_v59 }
 0x12c   :  { %v913_v62 = vld [vmem:[#allocation2 + $0x58] sm:$0xff]  ;;  %v761_v0 = vpop.f32.mrf.mxu2 }
 0x12d   :  { %v2030_v2 = vadd.f32 %v1914_v1, %v913_v62  ;;  %895 = vst.msk [vmem:[#allocation2 + $0x60] sm:$0xff] %vm21_vm0, %v879_v20  ;;  %v762_v3 = vadd.f32 %v761_v0, %v713_v61 }
 0x12e   :  { %v810_v18 = vpop.f32.mrf.mxu3  ;;  %v715_v4 = vpop.f32.mrf.mxu1 }
 0x12f   :  { %949 = vst.msk [vmem:[%s2118_s3 + $0x58] sm:$0xff] %vm21_vm0, %v2030_v2  ;;  %v811_v32 = vadd.f32 %v810_v18, %v762_v3  ;;  %v716_v7 = vadd.f32 %v715_v4, %v1902_v40  ;;  %v960_v40 = vmul.f32 %v1975_v60, %v1975_v60  ;;  %v965_v59 = vmul.f32 %v2030_v2, %v2030_v2 }
 0x130   :  { %v862_v31 = vpop.f32.mrf.mxu0 }
 0x131   :  { %v860_v19 = vadd.f32 %v859_v63, %v811_v32  ;;  %v1018_v30 = vsel %vm21_vm0, %v960_v40, 0.0  ;;  %v991_v63 = vsel %vm21_vm0, %v2030_v2, 0.0  ;;  %v1028_v55 = vsel %vm21_vm0, %v965_v59, 0.0 }
 0x132   :  { %v1019_v49 = vadd.f32 %v1018_v30, %v1017_v42 }
 0x133   :  { %v880_v6 = vadd.f32 %v860_v19, %v58_v5 }
 0x134   :  { %v914_v9 = vld [vmem:[#allocation2 + $0x60] sm:$0xff]  ;;  %v764_v10 = vpop.f32.mrf.mxu2  ;;  %v1021_v56 = vadd.f32 %v1020_v35, %v1019_v49 }
 0x135   :  { %v934_v11 = vadd.f32 %v1914_v1, %v914_v9  ;;  %896 = vst.msk [vmem:[#allocation2 + $0x68] sm:$0xff] %vm21_vm0, %v880_v6  ;;  %v765_v12 = vadd.f32 %v764_v10, %v716_v7  ;;  %v1046_v35 = vld [vmem:[%s2119_s4] sm:$0x3] }
 0x136   :  { %v813_v21 = vpop.f32.mrf.mxu3  ;;  %v717_v17 = vpop.f32.mrf.mxu1  ;;  %v1023_v20 = vadd.f32 %v1022_v52, %v1021_v56 }
 0x137   :  { %950 = vst.msk [vmem:[%s2118_s3 + $0x60] sm:$0xff] %vm21_vm0, %v934_v11  ;;  %v814_v15 = vadd.f32 %v813_v21, %v765_v12  ;;  %v718_v29 = vadd.f32 %v717_v17, %v1908_v44  ;;  %v982_v44 = vadd.f32 %v981_v26, %v980_v39  ;;  %v966_v0 = vmul.f32 %v934_v11, %v934_v11 }
 0x138   :  { %v864_v51 = vpop.f32.mrf.mxu0  ;;  %v1025_v18 = vadd.f32 %v1024_v57, %v1023_v20  ;;  %v993_v32 = vsel %vm21_vm0, %v934_v11, 0.0 }
 0x139   :  { %v863_v24 = vadd.f32 %v862_v31, %v814_v15  ;;  %v984_v43 = vadd.f32 %v983_v50, %v982_v44  ;;  %v1030_v2 = vsel %vm21_vm0, %v966_v0, 0.0 }
 0x13a   :  { %v1027_v19 = vadd.f32 %v1026_v37, %v1025_v18 }
 0x13b   :  { %v881_v28 = vadd.f32 %v863_v24, %v59_v16  ;;  %v986_v41 = vadd.f32 %v985_v47, %v984_v43 }
 0x13c   :  { %v915_v33 = vld [vmem:[#allocation2 + $0x68] sm:$0xff]  ;;  %v766_v34 = vpop.f32.mrf.mxu2  ;;  %v1029_v10 = vadd.f32 %v1028_v55, %v1027_v19 }
 0x13d   :  { %v935_v60 = vadd.f32 %v1914_v1, %v915_v33  ;;  %897 = vst.msk [vmem:[#allocation2 + $0x70] sm:$0xff] %vm21_vm0, %v881_v28  ;;  %v767_v38 = vadd.f32 %v766_v34, %v718_v29  ;;  %v988_v61 = vadd.f32 %v987_v53, %v986_v41 }
 0x13e   :  { %v815_v46 = vpop.f32.mrf.mxu3  ;;  %v1031_v11 = vadd.f32 %v1030_v2, %v1029_v10 }
 0x13f   :  { %951 = vst.msk [vmem:[%s2118_s3 + $0x68] sm:$0xff] %vm21_vm0, %v935_v60  ;;  %v816_v48 = vadd.f32 %v815_v46, %v767_v38  ;;  %v990_v4 = vadd.f32 %v989_v58, %v988_v61  ;;  %v967_v5 = vmul.f32 %v935_v60, %v935_v60  ;;  %v995_v7 = vsel %vm21_vm0, %v935_v60, 0.0 }
 0x141   :  { %v865_v54 = vadd.f32 %v864_v51, %v816_v48  ;;  %v992_v6 = vadd.f32 %v991_v63, %v990_v4  ;;  %v1032_v21 = vsel %vm21_vm0, %v967_v5, 0.0 }
 0x142   :  { %v1033_v17 = vadd.f32 %v1032_v21, %v1031_v11 }
 0x143   :  { %v882_v14 = vadd.f32 %v865_v54, %v60_v45  ;;  %v994_v12 = vadd.f32 %v993_v32, %v992_v6 }
 0x144   :  { %v916_v62 = vld [vmem:[#allocation2 + $0x70] sm:$0xff] }
 0x145   :  { %v936_v3 = vadd.f32 %v1914_v1, %v916_v62  ;;  %898 = vst.msk [vmem:[#allocation2 + $0x78] sm:$0xff] %vm21_vm0, %v882_v14  ;;  %v996_v31 = vadd.f32 %v995_v7, %v994_v12 }
 0x147   :  { %952 = vst.msk [vmem:[%s2118_s3 + $0x70] sm:$0xff] %vm21_vm0, %v936_v3  ;;  %v968_v9 = vmul.f32 %v936_v3, %v936_v3  ;;  %v997_v13 = vsel %vm21_vm0, %v936_v3, 0.0 }
 0x148   :  { %v998_v22 = vadd.f32 %v997_v13, %v996_v31 }
 0x149   :  { %v1034_v40 = vsel %vm21_vm0, %v968_v9, 0.0 }
 0x14a   :  { %v1035_v26 = vadd.f32 %v1034_v40, %v1033_v17 }
 0x14c   :  { %v917_v15 = vld [vmem:[#allocation2 + $0x78] sm:$0xff] }
 0x14d   :  { %v937_v16 = vadd.f32 %v1914_v1, %v917_v15 }
 0x14f   :  { %953 = vst.msk [vmem:[%s2118_s3 + $0x78] sm:$0xff] %vm21_vm0, %v937_v16  ;;  %v969_v24 = vmul.f32 %v937_v16, %v937_v16  ;;  %v999_v25 = vsel %vm21_vm0, %v937_v16, 0.0 }
 0x150   :  { %v1000_v27 = vadd.f32 %v999_v25, %v998_v22 }
 0x151   :  { %v1036_v28 = vsel %vm21_vm0, %v969_v24, 0.0 }
 0x152   :  { %v1001_v29 = vrot.slane %v1000_v27, 4  ;;  %v1037_v39 = vadd.f32 %v1036_v28, %v1035_v26 }
 0x154   :  { %v1002_v30 = vadd.f32 %v1001_v29, %v1000_v27  ;;  %v1038_v33 = vrot.slane %v1037_v39, 4 }
 0x156   :  { %v1003_v34 = vrot.slane %v1002_v30, 2  ;;  %v1039_v1 = vadd.f32 %v1038_v33, %v1037_v39 }
 0x158   :  { %v1004_v50 = vadd.f32 %v1003_v34, %v1002_v30  ;;  %v1040_v36 = vrot.slane %v1039_v1, 2 }
 0x15a   :  { %v1005_v60 = vrot.slane %v1004_v50, 1  ;;  %v1041_v38 = vadd.f32 %v1040_v36, %v1039_v1 }
 0x15c   :  { %v1042_v42 = vrot.slane %v1041_v38, 1  ;;  %v1006_v44 = vadd.f32 %v1005_v60, %v1004_v50 }
 0x15e   :  { %v1043_v46 = vadd.f32 %v1042_v42, %v1041_v38 }
 0x160   :  { %v1045_v47 = vsel %vm1044_vm2, %v1006_v44, %v1043_v46 }
 0x161   :  { %v1047_v8 = vadd.f32 %v1046_v35, %v1045_v47 }
 0x163   :  { %1049 = vst.msk [vmem:[%s2119_s4] sm:$0x3] %vm43_vm1, %v1047_v8 }

// kernel: forward.19
= control target key start
LH: loop header
LB: loop body
LE: loop exit
PB: predicated region body
PF: predicated region fallthrough
CT: control target
= control target key end

     0   :  { %vm164_vm3 = vcmask 519168   ;;  %s369_s1 = inlined_call_operand.vmem [shape: f32[2,64], index: 1, kind: input, shape index: {}]   ;;  %s370_s2 = inlined_call_operand.vmem [shape: f32[1,64], index: 2, kind: input, shape index: {}]   ;;  %s371_s3 = inlined_call_operand.vmem [shape: f32[1,64], index: 3, kind: input, shape index: {}]   ;;  %s372_s0 = inlined_call_operand.vmem [shape: f32[128,64], index: 0, kind: input, shape index: {}]   ;;  %s373_s4 = inlined_call_operand.vmem [shape: bf16[128,64], index: 4, kind: output, shape index: {}]  }
   0x1   :  { %v17_v0 = vld [vmem:[%s369_s1] sm:$0x3]  ;;  %v47_v19 = vld [vmem:[%s372_s0 + $0x8] sm:$0xff]  ;;  %v48_v20 = vld [vmem:[%s372_s0 + $0x10] sm:$0xff] }
   0x2   :  { %v18_v1 = vmul.f32 0.0078125, %v17_v0  ;;  %v25_v14 = vld [vmem:[%s370_s2] sm:$0x1]  ;;  %v49_v21 = vld [vmem:[%s372_s0 + $0x18] sm:$0xff]  ;;  %v51_v25 = vld [vmem:[%s372_s0 + $0x28] sm:$0xff] }
   0x3   :  { %v43_v17 = vld [vmem:[%s371_s3] sm:$0x1]  ;;  %v52_v26 = vld [vmem:[%s372_s0 + $0x30] sm:$0xff]  ;;  %v53_v27 = vld [vmem:[%s372_s0 + $0x38] sm:$0xff] }
   0x4   :  { %v19_v2 = vmul.f32 %v18_v1, %v18_v1  ;;  %v46_v18 = vld [vmem:[%s372_s0] sm:$0xff]  ;;  %v55_v29 = vld [vmem:[%s372_s0 + $0x48] sm:$0xff]  ;;  %v56_v30 = vld [vmem:[%s372_s0 + $0x50] sm:$0xff] }
   0x5   :  { %v50_v22 = vld [vmem:[%s372_s0 + $0x20] sm:$0xff]  ;;  %v57_v35 = vld [vmem:[%s372_s0 + $0x58] sm:$0xff]  ;;  %v59_v37 = vld [vmem:[%s372_s0 + $0x68] sm:$0xff] }
   0x6   :  { %v21_v3 = vrot.slane %v19_v2, 7  ;;  %v54_v28 = vld [vmem:[%s372_s0 + $0x40] sm:$0xff] }
   0x7   :  { %v58_v36 = vld [vmem:[%s372_s0 + $0x60] sm:$0xff] }
   0x8   :  { %v23_v4 = vsub.f32 %v18_v1, %v21_v3 }
   0xa   :  { %v24_v5 = vmax.f32 %v23_v4, 0.0 }
   0xc   :  { %v26_v6 = vadd.f32 1e-05, %v24_v5 }
   0xe   :  { %185 = vrsqrt.f32 %v26_v6  ;;  %vm33_vm0 = vweird.f32 %v26_v6 }
  0x14   :  { %v186_v7 = vpop.eup %185 }
  0x15   :  { %v28_v8 = vmul.f32 %v186_v7, %v26_v6  ;;  %vm34_vm1 = vweird.f32 %v186_v7 }
  0x16   :  { %vm35_vm2 = vmor %vm33_vm0, %vm34_vm1 }
  0x17   :  { %v29_v9 = vmul.f32 %v186_v7, %v28_v8 }
  0x19   :  { %v30_v10 = vmul.f32 0.5, %v29_v9 }
  0x1b   :  { %v31_v11 = vsub.f32 1.5, %v30_v10 }
  0x1d   :  { %v32_v12 = vmul.f32 %v186_v7, %v31_v11 }
  0x1f   :  { %v36_v13 = vsel %vm35_vm2, %v186_v7, %v32_v12 }
  0x20   :  { %38 = vst [vmem:[#allocation1] sm:$0xff] %v36_v13 }
  0x27   :  { %v40_v15 = vld [vmem:[#allocation1 + $0x1] ss:$9 sm:$0xff] }
  0x28   :  { %v42_v16 = vmul.f32 %v40_v15, %v25_v14 }
  0x2a   :  { %v44_v23 = vmul.f32 %v42_v16, %v18_v1  ;;  %v236_v24 = vperm.slane %v42_v16, 0 }
  0x2c   :  { %v45_v31 = vsub.f32 %v43_v17, %v44_v23  ;;  %v65_v32 = vmul.f32 %v236_v24, %v46_v18  ;;  %v66_v33 = vmul.f32 %v236_v24, %v47_v19  ;;  %v67_v34 = vmul.f32 %v236_v24, %v48_v20 }
  0x2d   :  { %v68_v38 = vmul.f32 %v236_v24, %v49_v21  ;;  %v69_v39 = vmul.f32 %v236_v24, %v50_v22  ;;  %v70_v40 = vmul.f32 %v236_v24, %v51_v25  ;;  %v71_v41 = vmul.f32 %v236_v24, %v52_v26  ;;  %v60_v21 = vld [vmem:[%s372_s0 + $0x70] sm:$0xff] }
  0x2e   :  { %v272_v42 = vperm.slane %v45_v31, 0  ;;  %v72_v43 = vmul.f32 %v236_v24, %v53_v27  ;;  %v73_v44 = vmul.f32 %v236_v24, %v54_v28  ;;  %v74_v45 = vmul.f32 %v236_v24, %v55_v29 }
  0x2f   :  { %v75_v46 = vmul.f32 %v236_v24, %v56_v30  ;;  %v76_v47 = vmul.f32 %v236_v24, %v57_v35  ;;  %v77_v48 = vmul.f32 %v236_v24, %v58_v36  ;;  %v78_v49 = vmul.f32 %v236_v24, %v59_v37  ;;  %v61_v35 = vld [vmem:[%s372_s0 + $0x78] sm:$0xff] }
  0x30   :  { %v84_v50 = vadd.f32 %v272_v42, %v65_v32  ;;  %v85_v51 = vadd.f32 %v272_v42, %v66_v33  ;;  %v86_v52 = vadd.f32 %v272_v42, %v67_v34  ;;  %v87_v53 = vadd.f32 %v272_v42, %v68_v38 }
  0x31   :  { %v88_v54 = vadd.f32 %v272_v42, %v69_v39  ;;  %v89_v55 = vadd.f32 %v272_v42, %v70_v40  ;;  %v90_v56 = vadd.f32 %v272_v42, %v71_v41  ;;  %v91_v57 = vadd.f32 %v272_v42, %v72_v43 }
  0x32   :  { %vm100_vm4 = vcmp.gt.f32.partialorder %v84_v50, 0.0  ;;  %v116_v58 = vmul.f32 0.2, %v84_v50  ;;  %vm101_vm5 = vcmp.gt.f32.partialorder %v85_v51, 0.0  ;;  %v117_v59 = vmul.f32 0.2, %v85_v51 }
  0x33   :  { %vm102_vm6 = vcmp.gt.f32.partialorder %v86_v52, 0.0  ;;  %v118_v60 = vmul.f32 0.2, %v86_v52  ;;  %vm103_vm7 = vcmp.gt.f32.partialorder %v87_v53, 0.0  ;;  %v119_v61 = vmul.f32 0.2, %v87_v53 }
  0x34   :  { %v132_v62 = vsel %vm100_vm4, %v84_v50, %v116_v58  ;;  %v133_v63 = vsel %vm101_vm5, %v85_v51, %v117_v59  ;;  %vm104_vm8 = vcmp.gt.f32.partialorder %v88_v54, 0.0  ;;  %v120_v0 = vmul.f32 0.2, %v88_v54 }
  0x35   :  { %v148_v1 = vpack.c.bf16 %v132_v62, %v132_v62  ;;  %v149_v2 = vpack.c.bf16 %v133_v63, %v133_v63  ;;  %v134_v3 = vsel %vm102_vm6, %v86_v52, %v118_v60  ;;  %v135_v4 = vsel %vm103_vm7, %v87_v53, %v119_v61 }
  0x36   :  { %v150_v5 = vpack.c.bf16 %v134_v3, %v134_v3  ;;  %v151_v6 = vpack.c.bf16 %v135_v4, %v135_v4  ;;  %v136_v7 = vsel %vm104_vm8, %v88_v54, %v120_v0  ;;  %vm105_vm9 = vcmp.gt.f32.partialorder %v89_v55, 0.0 }
  0x37   :  { %165 = vst.msk [vmem:[%s373_s4] sm:$0xf] %vm164_vm3, %v148_v1  ;;  %v152_v8 = vpack.c.bf16 %v136_v7, %v136_v7  ;;  %v121_v9 = vmul.f32 0.2, %v89_v55  ;;  %vm106_vm10 = vcmp.gt.f32.partialorder %v90_v56, 0.0  ;;  %vm107_vm11 = vcmp.gt.f32.partialorder %v91_v57, 0.0 }
  0x38   :  { %166 = vst.msk [vmem:[%s373_s4 + $0x4] sm:$0xf] %vm164_vm3, %v149_v2  ;;  %v122_v10 = vmul.f32 0.2, %v90_v56  ;;  %v123_v11 = vmul.f32 0.2, %v91_v57  ;;  %v92_v12 = vadd.f32 %v272_v42, %v73_v44  ;;  %v93_v13 = vadd.f32 %v272_v42, %v74_v45 }
  0x39   :  { %167 = vst.msk [vmem:[%s373_s4 + $0x8] sm:$0xf] %vm164_vm3, %v150_v5  ;;  %v137_v14 = vsel %vm105_vm9, %v89_v55, %v121_v9  ;;  %v94_v15 = vadd.f32 %v272_v42, %v75_v46  ;;  %v95_v16 = vadd.f32 %v272_v42, %v76_v47  ;;  %v96_v17 = vadd.f32 %v272_v42, %v77_v48 }
  0x3a   :  { %168 = vst.msk [vmem:[%s373_s4 + $0xc] sm:$0xf] %vm164_vm3, %v151_v6  ;;  %v153_v18 = vpack.c.bf16 %v137_v14, %v137_v14  ;;  %v138_v19 = vsel %vm106_vm10, %v90_v56, %v122_v10  ;;  %v139_v20 = vsel %vm107_vm11, %v91_v57, %v123_v11  ;;  %vm108_vm12 = vcmp.gt.f32.partialorder %v92_v12, 0.0 }
  0x3b   :  { %169 = vst.msk [vmem:[%s373_s4 + $0x10] sm:$0xf] %vm164_vm3, %v152_v8  ;;  %v154_v22 = vpack.c.bf16 %v138_v19, %v138_v19  ;;  %v155_v23 = vpack.c.bf16 %v139_v20, %v139_v20  ;;  %v124_v25 = vmul.f32 0.2, %v92_v12  ;;  %vm109_vm13 = vcmp.gt.f32.partialorder %v93_v13, 0.0 }
  0x3c   :  { %170 = vst.msk [vmem:[%s373_s4 + $0x14] sm:$0xf] %vm164_vm3, %v153_v18  ;;  %v125_v26 = vmul.f32 0.2, %v93_v13  ;;  %vm110_vm14 = vcmp.gt.f32.partialorder %v94_v15, 0.0  ;;  %vm111_vm15 = vcmp.gt.f32.partialorder %v95_v16, 0.0  ;;  %v97_v27 = vadd.f32 %v272_v42, %v78_v49 }
  0x3d   :  { %171 = vst.msk [vmem:[%s373_s4 + $0x18] sm:$0xf] %vm164_vm3, %v154_v22  ;;  %v140_v28 = vsel %vm108_vm12, %v92_v12, %v124_v25  ;;  %v126_v29 = vmul.f32 0.2, %v94_v15  ;;  %v127_v30 = vmul.f32 0.2, %v95_v16  ;;  %v79_v31 = vmul.f32 %v236_v24, %v60_v21 }
  0x3e   :  { %172 = vst.msk [vmem:[%s373_s4 + $0x1c] sm:$0xf] %vm164_vm3, %v155_v23  ;;  %v156_v32 = vpack.c.bf16 %v140_v28, %v140_v28  ;;  %v141_v33 = vsel %vm109_vm13, %v93_v13, %v125_v26  ;;  %vm112_vm0 = vcmp.gt.f32.partialorder %v96_v17, 0.0  ;;  %v128_v34 = vmul.f32 0.2, %v96_v17 }
  0x3f   :  { %v157_v36 = vpack.c.bf16 %v141_v33, %v141_v33  ;;  %v142_v37 = vsel %vm110_vm14, %v94_v15, %v126_v29  ;;  %v143_v38 = vsel %vm111_vm15, %v95_v16, %v127_v30  ;;  %vm113_vm1 = vcmp.gt.f32.partialorder %v97_v27, 0.0 }
  0x40   :  { %173 = vst.msk [vmem:[%s373_s4 + $0x20] sm:$0xf] %vm164_vm3, %v156_v32  ;;  %v158_v39 = vpack.c.bf16 %v142_v37, %v142_v37  ;;  %v159_v40 = vpack.c.bf16 %v143_v38, %v143_v38  ;;  %v144_v41 = vsel %vm112_vm0, %v96_v17, %v128_v34  ;;  %v129_v43 = vmul.f32 0.2, %v97_v27 }
  0x41   :  { %174 = vst.msk [vmem:[%s373_s4 + $0x24] sm:$0xf] %vm164_vm3, %v157_v36  ;;  %v160_v44 = vpack.c.bf16 %v144_v41, %v144_v41  ;;  %v98_v45 = vadd.f32 %v272_v42, %v79_v31  ;;  %v80_v46 = vmul.f32 %v236_v24, %v61_v35 }
  0x42   :  { %175 = vst.msk [vmem:[%s373_s4 + $0x28] sm:$0xf] %vm164_vm3, %v158_v39  ;;  %v145_v47 = vsel %vm113_vm1, %v97_v27, %v129_v43 }
  0x43   :  { %176 = vst.msk [vmem:[%s373_s4 + $0x2c] sm:$0xf] %vm164_vm3, %v159_v40  ;;  %v161_v48 = vpack.c.bf16 %v145_v47, %v145_v47  ;;  %vm114_vm2 = vcmp.gt.f32.partialorder %v98_v45, 0.0  ;;  %v130_v49 = vmul.f32 0.2, %v98_v45  ;;  %v99_v50 = vadd.f32 %v272_v42, %v80_v46 }
  0x44   :  { %177 = vst.msk [vmem:[%s373_s4 + $0x30] sm:$0xf] %vm164_vm3, %v160_v44 }
  0x45   :  { %178 = vst.msk [vmem:[%s373_s4 + $0x34] sm:$0xf] %vm164_vm3, %v161_v48  ;;  %v146_v24 = vsel %vm114_vm2, %v98_v45, %v130_v49  ;;  %vm115_vm4 = vcmp.gt.f32.partialorder %v99_v50, 0.0  ;;  %v131_v51 = vmul.f32 0.2, %v99_v50 }
  0x46   :  { %v162_v52 = vpack.c.bf16 %v146_v24, %v146_v24 }
  0x47   :  { %v147_v53 = vsel %vm115_vm4, %v99_v50, %v131_v51 }
  0x48   :  { %179 = vst.msk [vmem:[%s373_s4 + $0x38] sm:$0xf] %vm164_vm3, %v162_v52  ;;  %v163_v42 = vpack.c.bf16 %v147_v53, %v147_v53 }
  0x4a   :  { %180 = vst.msk [vmem:[%s373_s4 + $0x3c] sm:$0xf] %vm164_vm3, %v163_v42 }

// kernel: forward.21
= control target key start
LH: loop header
LB: loop body
LE: loop exit
PB: predicated region body
PF: predicated region fallthrough
CT: control target
= control target key end

     0   :  { %s375_s1 = inlined_call_operand.vmem [shape: f32[2,128], index: 1, kind: input, shape index: {}]   ;;  %s376_s2 = inlined_call_operand.vmem [shape: f32[1,128], index: 2, kind: input, shape index: {}]   ;;  %s377_s3 = inlined_call_operand.vmem [shape: f32[1,128], index: 3, kind: input, shape index: {}]   ;;  %s378_s0 = inlined_call_operand.vmem [shape: f32[128,128], index: 0, kind: input, shape index: {}]   ;;  %s379_s4 = inlined_call_operand.vmem [shape: bf16[128,128], index: 4, kind: output, shape index: {}]  }
   0x1   :  { %v17_v0 = vld [vmem:[%s375_s1] sm:$0x3]  ;;  %v47_v19 = vld [vmem:[%s378_s0 + $0x8] sm:$0xff]  ;;  %v48_v20 = vld [vmem:[%s378_s0 + $0x10] sm:$0xff] }
   0x2   :  { %v18_v1 = vmul.f32 0.0078125, %v17_v0  ;;  %v25_v14 = vld [vmem:[%s376_s2] sm:$0x1]  ;;  %v49_v21 = vld [vmem:[%s378_s0 + $0x18] sm:$0xff]  ;;  %v51_v25 = vld [vmem:[%s378_s0 + $0x28] sm:$0xff] }
   0x3   :  { %v43_v17 = vld [vmem:[%s377_s3] sm:$0x1]  ;;  %v52_v26 = vld [vmem:[%s378_s0 + $0x30] sm:$0xff]  ;;  %v53_v27 = vld [vmem:[%s378_s0 + $0x38] sm:$0xff] }
   0x4   :  { %v19_v2 = vmul.f32 %v18_v1, %v18_v1  ;;  %v46_v18 = vld [vmem:[%s378_s0] sm:$0xff]  ;;  %v55_v29 = vld [vmem:[%s378_s0 + $0x48] sm:$0xff]  ;;  %v56_v30 = vld [vmem:[%s378_s0 + $0x50] sm:$0xff] }
   0x5   :  { %v50_v22 = vld [vmem:[%s378_s0 + $0x20] sm:$0xff]  ;;  %v57_v35 = vld [vmem:[%s378_s0 + $0x58] sm:$0xff]  ;;  %v59_v37 = vld [vmem:[%s378_s0 + $0x68] sm:$0xff] }
   0x6   :  { %v21_v3 = vrot.slane %v19_v2, 7  ;;  %v54_v28 = vld [vmem:[%s378_s0 + $0x40] sm:$0xff] }
   0x7   :  { %v58_v36 = vld [vmem:[%s378_s0 + $0x60] sm:$0xff] }
   0x8   :  { %v23_v4 = vsub.f32 %v18_v1, %v21_v3 }
   0xa   :  { %v24_v5 = vmax.f32 %v23_v4, 0.0 }
   0xc   :  { %v26_v6 = vadd.f32 1e-05, %v24_v5 }
   0xe   :  { %231 = vrsqrt.f32 %v26_v6  ;;  %vm33_vm0 = vweird.f32 %v26_v6 }
  0x14   :  { %v232_v7 = vpop.eup %231 }
  0x15   :  { %v28_v8 = vmul.f32 %v232_v7, %v26_v6  ;;  %vm34_vm1 = vweird.f32 %v232_v7 }
  0x16   :  { %vm35_vm2 = vmor %vm33_vm0, %vm34_vm1 }
  0x17   :  { %v29_v9 = vmul.f32 %v232_v7, %v28_v8 }
  0x19   :  { %v30_v10 = vmul.f32 0.5, %v29_v9 }
  0x1b   :  { %v31_v11 = vsub.f32 1.5, %v30_v10 }
  0x1d   :  { %v32_v12 = vmul.f32 %v232_v7, %v31_v11 }
  0x1f   :  { %v36_v13 = vsel %vm35_vm2, %v232_v7, %v32_v12 }
  0x20   :  { %38 = vst [vmem:[#allocation1] sm:$0xff] %v36_v13 }
  0x27   :  { %v40_v15 = vld [vmem:[#allocation1 + $0x1] ss:$9 sm:$0xff] }
  0x28   :  { %v42_v16 = vmul.f32 %v40_v15, %v25_v14 }
  0x2a   :  { %v44_v23 = vmul.f32 %v42_v16, %v18_v1  ;;  %v282_v24 = vperm.slane %v42_v16, 0 }
  0x2c   :  { %v45_v31 = vsub.f32 %v43_v17, %v44_v23  ;;  %v65_v32 = vmul.f32 %v282_v24, %v46_v18  ;;  %v66_v33 = vmul.f32 %v282_v24, %v47_v19  ;;  %v67_v34 = vmul.f32 %v282_v24, %v48_v20 }
  0x2d   :  { %v68_v38 = vmul.f32 %v282_v24, %v49_v21  ;;  %v69_v39 = vmul.f32 %v282_v24, %v50_v22  ;;  %v70_v40 = vmul.f32 %v282_v24, %v51_v25  ;;  %v71_v41 = vmul.f32 %v282_v24, %v52_v26  ;;  %v60_v22 = vld [vmem:[%s378_s0 + $0x70] sm:$0xff] }
  0x2e   :  { %v318_v42 = vperm.slane %v45_v31, 0  ;;  %v72_v43 = vmul.f32 %v282_v24, %v53_v27  ;;  %v73_v44 = vmul.f32 %v282_v24, %v54_v28  ;;  %v74_v45 = vmul.f32 %v282_v24, %v55_v29  ;;  %v61_v28 = vld [vmem:[%s378_s0 + $0x78] sm:$0xff] }
  0x2f   :  { %v75_v46 = vmul.f32 %v282_v24, %v56_v30  ;;  %v76_v47 = vmul.f32 %v282_v24, %v57_v35  ;;  %v77_v48 = vmul.f32 %v282_v24, %v58_v36  ;;  %v78_v49 = vmul.f32 %v282_v24, %v59_v37 }
  0x30   :  { %v84_v50 = vadd.f32 %v318_v42, %v65_v32  ;;  %v85_v51 = vadd.f32 %v318_v42, %v66_v33  ;;  %v86_v52 = vadd.f32 %v318_v42, %v67_v34  ;;  %v87_v53 = vadd.f32 %v318_v42, %v68_v38 }
  0x31   :  { %v88_v54 = vadd.f32 %v318_v42, %v69_v39  ;;  %v89_v55 = vadd.f32 %v318_v42, %v70_v40  ;;  %v90_v56 = vadd.f32 %v318_v42, %v71_v41  ;;  %v91_v57 = vadd.f32 %v318_v42, %v72_v43 }
  0x32   :  { %vm100_vm3 = vcmp.gt.f32.partialorder %v84_v50, 0.0  ;;  %vm101_vm4 = vcmp.gt.f32.partialorder %v85_v51, 0.0  ;;  %v116_v58 = vmul.f32 0.2, %v84_v50  ;;  %v117_v59 = vmul.f32 0.2, %v85_v51 }
  0x33   :  { %vm102_vm5 = vcmp.gt.f32.partialorder %v86_v52, 0.0  ;;  %vm103_vm6 = vcmp.gt.f32.partialorder %v87_v53, 0.0  ;;  %v118_v60 = vmul.f32 0.2, %v86_v52  ;;  %v119_v61 = vmul.f32 0.2, %v87_v53 }
  0x34   :  { %v132_v62 = vsel %vm100_vm3, %v84_v50, %v116_v58  ;;  %v133_v63 = vsel %vm101_vm4, %v85_v51, %v117_v59  ;;  %vm104_vm7 = vcmp.gt.f32.partialorder %v88_v54, 0.0  ;;  %vm105_vm8 = vcmp.gt.f32.partialorder %v89_v55, 0.0 }
  0x35   :  { %v187_v0 = vpack.c.bf16 %v133_v63, %v132_v62  ;;  %v134_v1 = vsel %vm102_vm5, %v86_v52, %v118_v60  ;;  %v135_v2 = vsel %vm103_vm6, %v87_v53, %v119_v61  ;;  %v120_v3 = vmul.f32 0.2, %v88_v54 }
  0x36   :  { %v192_v4 = vpack.c.bf16 %v135_v2, %v134_v1  ;;  %v121_v5 = vmul.f32 0.2, %v89_v55  ;;  %vm106_vm9 = vcmp.gt.f32.partialorder %v90_v56, 0.0  ;;  %vm107_vm10 = vcmp.gt.f32.partialorder %v91_v57, 0.0 }
  0x37   :  { %188 = vst [vmem:[%s379_s4] sm:$0xff] %v187_v0   ;;  %v136_v6 = vsel %vm104_vm7, %v88_v54, %v120_v3  ;;  %v122_v7 = vmul.f32 0.2, %v90_v56  ;;  %v123_v8 = vmul.f32 0.2, %v91_v57  ;;  %v92_v9 = vadd.f32 %v318_v42, %v73_v44 }
  0x38   :  { %224 = vst [vmem:[%s379_s4 + $0x8] sm:$0xff] %v192_v4   ;;  %v137_v10 = vsel %vm105_vm8, %v89_v55, %v121_v5  ;;  %v93_v11 = vadd.f32 %v318_v42, %v74_v45  ;;  %v94_v12 = vadd.f32 %v318_v42, %v75_v46  ;;  %v95_v13 = vadd.f32 %v318_v42, %v76_v47 }
  0x39   :  { %v197_v14 = vpack.c.bf16 %v137_v10, %v136_v6  ;;  %v138_v15 = vsel %vm106_vm9, %v90_v56, %v122_v7  ;;  %v139_v16 = vsel %vm107_vm10, %v91_v57, %v123_v8  ;;  %vm108_vm11 = vcmp.gt.f32.partialorder %v92_v9, 0.0 }
  0x3a   :  { %v202_v17 = vpack.c.bf16 %v139_v16, %v138_v15  ;;  %vm109_vm12 = vcmp.gt.f32.partialorder %v93_v11, 0.0  ;;  %v124_v18 = vmul.f32 0.2, %v92_v9  ;;  %v125_v19 = vmul.f32 0.2, %v93_v11 }
  0x3b   :  { %225 = vst [vmem:[%s379_s4 + $0x10] sm:$0xff] %v197_v14   ;;  %vm110_vm13 = vcmp.gt.f32.partialorder %v94_v12, 0.0  ;;  %vm111_vm14 = vcmp.gt.f32.partialorder %v95_v13, 0.0  ;;  %v126_v20 = vmul.f32 0.2, %v94_v12  ;;  %v96_v21 = vadd.f32 %v318_v42, %v77_v48 }
  0x3c   :  { %226 = vst [vmem:[%s379_s4 + $0x18] sm:$0xff] %v202_v17   ;;  %v140_v23 = vsel %vm108_vm11, %v92_v9, %v124_v18  ;;  %v141_v25 = vsel %vm109_vm12, %v93_v11, %v125_v19  ;;  %v127_v26 = vmul.f32 0.2, %v95_v13  ;;  %v97_v27 = vadd.f32 %v318_v42, %v78_v49 }
  0x3d   :  { %v207_v29 = vpack.c.bf16 %v141_v25, %v140_v23  ;;  %v142_v30 = vsel %vm110_vm13, %v94_v12, %v126_v20  ;;  %vm112_vm15 = vcmp.gt.f32.partialorder %v96_v21, 0.0  ;;  %v128_v31 = vmul.f32 0.2, %v96_v21 }
  0x3e   :  { %v143_v32 = vsel %vm111_vm14, %v95_v13, %v127_v26  ;;  %vm113_vm0 = vcmp.gt.f32.partialorder %v97_v27, 0.0  ;;  %v129_v33 = vmul.f32 0.2, %v97_v27  ;;  %v79_v34 = vmul.f32 %v282_v24, %v60_v22 }
  0x3f   :  { %227 = vst [vmem:[%s379_s4 + $0x20] sm:$0xff] %v207_v29   ;;  %v212_v35 = vpack.c.bf16 %v143_v32, %v142_v30  ;;  %v144_v36 = vsel %vm112_vm15, %v96_v21, %v128_v31  ;;  %v80_v37 = vmul.f32 %v282_v24, %v61_v28 }
  0x40   :  { %v145_v38 = vsel %vm113_vm0, %v97_v27, %v129_v33  ;;  %v98_v39 = vadd.f32 %v318_v42, %v79_v34 }
  0x41   :  { %228 = vst [vmem:[%s379_s4 + $0x28] sm:$0xff] %v212_v35   ;;  %v217_v40 = vpack.c.bf16 %v145_v38, %v144_v36  ;;  %v99_v41 = vadd.f32 %v318_v42, %v80_v37 }
  0x42   :  { %vm114_vm1 = vcmp.gt.f32.partialorder %v98_v39, 0.0  ;;  %v130_v43 = vmul.f32 0.2, %v98_v39 }
  0x43   :  { %229 = vst [vmem:[%s379_s4 + $0x30] sm:$0xff] %v217_v40   ;;  %vm115_vm2 = vcmp.gt.f32.partialorder %v99_v41, 0.0  ;;  %v131_v44 = vmul.f32 0.2, %v99_v41 }
  0x44   :  { %v146_v45 = vsel %vm114_vm1, %v98_v39, %v130_v43 }
  0x45   :  { %v147_v24 = vsel %vm115_vm2, %v99_v41, %v131_v44 }
  0x46   :  { %v222_v46 = vpack.c.bf16 %v147_v24, %v146_v45 }
  0x48   :  { %230 = vst [vmem:[%s379_s4 + $0x38] sm:$0xff] %v222_v46  }

// kernel: forward.20
= control target key start
LH: loop header
LB: loop body
LE: loop exit
PB: predicated region body
PF: predicated region fallthrough
CT: control target
= control target key end

     0   :  { %vm595_vm0 = vcmask 523264   ;;  %vm1010_vm1 = vcmask 1040384   ;;  %s1939_s1 = inlined_call_operand.vmem [shape: bf16[576,128], index: 1, kind: input, shape index: {}]   ;;  %s1940_s0 = inlined_call_operand.vmem [shape: bf16[128,576], index: 0, kind: input, shape index: {}]   ;;  %s1941_s2 = inlined_call_operand.vmem [shape: f32[1,128], index: 2, kind: input, shape index: {}]   ;;  %s1942_s3 = inlined_call_operand.vmem [shape: f32[128,128], index: 3, kind: output, shape index: {0}]   ;;  %s1943_s4 = inlined_call_operand.vmem [shape: f32[2,128], index: 4, kind: output, shape index: {1}]  }
   0x1   :  { %v1382_v0 = vld [vmem:[%s1939_s1 + $0x38] sm:$0xff]  ;;  %v1381_v1 = vld [vmem:[%s1939_s1 + $0x30] sm:$0xff]  ;;  %v1380_v2 = vld [vmem:[%s1939_s1 + $0x28] sm:$0xff] }
   0x2   :  { %1411 = vmatpush.bf16.msra.mxu1 %v1382_v0  ;;  %1412 = vmatpush.bf16.msra.mxu2 %v1382_v0  ;;  %v1379_v3 = vld [vmem:[%s1939_s1 + $0x20] sm:$0xff]  ;;  %v1378_v4 = vld [vmem:[%s1939_s1 + $0x18] sm:$0xff]  ;;  %v1377_v5 = vld [vmem:[%s1939_s1 + $0x10] sm:$0xff] }
   0x3   :  { %1413 = vmatpush.bf16.msra.mxu3 %v1382_v0  ;;  %620 = vmatpush.bf16.msra.mxu0 %v1382_v0  ;;  %v1376_v6 = vld [vmem:[%s1939_s1 + $0x8] sm:$0xff]  ;;  %v1375_v7 = vld [vmem:[%s1939_s1] sm:$0xff]  ;;  %v1065_v8 = vld [vmem:[%s1940_s0 + $0x50] sm:$0xf] }
   0x4   :  { %v1347_v9 = vld [vmem:[%s1940_s0 + $0x60] sm:$0xf0]  ;;  %v1105_v10 = vld [vmem:[%s1940_s0 + $0xa0] sm:$0xf]  ;;  %v1357_v11 = vld [vmem:[%s1940_s0 + $0xb0] sm:$0xf0] }
   0x5   :  { %v1145_v12 = vld [vmem:[%s1940_s0 + $0xf0] sm:$0xf]  ;;  %v1367_v13 = vld [vmem:[%s1940_s0 + $0x100] sm:$0xf0]  ;;  %v1025_v14 = vld [vmem:[%s1940_s0] sm:$0xf]  ;;  %v1066_v18 = vor.u32 %v1347_v9, %v1065_v8  ;;  %v1106_v19 = vor.u32 %v1357_v11, %v1105_v10 }
   0x6   :  { %1414 = vmatpush.bf16.msra.mxu1 %v1381_v1  ;;  %1415 = vmatpush.bf16.msra.mxu2 %v1381_v1  ;;  %v1337_v15 = vld [vmem:[%s1940_s0 + $0x10] sm:$0xf0]  ;;  %v1398_v16 = vld [vmem:[%s1939_s1 + $0xb8] sm:$0xff]  ;;  %v1146_v20 = vor.u32 %v1367_v13, %v1145_v12  ;;  %v1396_v28 = vld [vmem:[%s1939_s1 + $0xa8] sm:$0xff] }
   0x7   :  { %1416 = vmatpush.bf16.msra.mxu3 %v1381_v1  ;;  %621 = vmatpush.bf16.msra.mxu0 %v1381_v1  ;;  %v1390_v17 = vld [vmem:[%s1939_s1 + $0x78] sm:$0xff]  ;;  %v1026_v21 = vor.u32 %v1337_v15, %v1025_v14  ;;  %v1397_v24 = vld [vmem:[%s1939_s1 + $0xb0] sm:$0xff]  ;;  %v1388_v29 = vld [vmem:[%s1939_s1 + $0x68] sm:$0xff] }
   0x8   :  { %v1406_v22 = vld [vmem:[%s1939_s1 + $0xf8] sm:$0xff]  ;;  %v1389_v25 = vld [vmem:[%s1939_s1 + $0x70] sm:$0xff]  ;;  %v1404_v30 = vld [vmem:[%s1939_s1 + $0xe8] sm:$0xff] }
   0x9   :  { %v1410_v23 = vld [vmem:[%s1939_s1 + $0x118] sm:$0xff]  ;;  %v1405_v26 = vld [vmem:[%s1939_s1 + $0xf0] sm:$0xff]  ;;  %v1408_v31 = vld [vmem:[%s1939_s1 + $0x108] sm:$0xff] }
   0xa   :  { %1417 = vmatpush.bf16.msra.mxu1 %v1380_v2  ;;  %1418 = vmatpush.bf16.msra.mxu2 %v1380_v2  ;;  %v1409_v27 = vld [vmem:[%s1939_s1 + $0x110] sm:$0xff]  ;;  %v1395_v32 = vld [vmem:[%s1939_s1 + $0xa0] sm:$0xff]  ;;  %v1085_v35 = vld [vmem:[%s1940_s0 + $0x78] sm:$0xf] }
   0xb   :  { %1419 = vmatpush.bf16.msra.mxu3 %v1380_v2  ;;  %622 = vmatpush.bf16.msra.mxu0 %v1380_v2  ;;  %v1387_v33 = vld [vmem:[%s1939_s1 + $0x60] sm:$0xff]  ;;  %v1352_v36 = vld [vmem:[%s1940_s0 + $0x88] sm:$0xf0]  ;;  %v1125_v37 = vld [vmem:[%s1940_s0 + $0xc8] sm:$0xf] }
   0xc   :  { %v1403_v34 = vld [vmem:[%s1939_s1 + $0xe0] sm:$0xff]  ;;  %v1362_v38 = vld [vmem:[%s1940_s0 + $0xd8] sm:$0xf0]  ;;  %v1165_v39 = vld [vmem:[%s1940_s0 + $0x118] sm:$0xf]  ;;  %v1086_v46 = vor.u32 %v1352_v36, %v1085_v35 }
   0xd   :  { %v1372_v40 = vld [vmem:[%s1940_s0 + $0x128] sm:$0xf0]  ;;  %v1045_v41 = vld [vmem:[%s1940_s0 + $0x28] sm:$0xf]  ;;  %v1342_v42 = vld [vmem:[%s1940_s0 + $0x38] sm:$0xf0]  ;;  %v1126_v47 = vor.u32 %v1362_v38, %v1125_v37 }
   0xe   :  { %1420 = vmatpush.bf16.msra.mxu1 %v1379_v3  ;;  %1421 = vmatpush.bf16.msra.mxu2 %v1379_v3  ;;  %v1407_v43 = vld [vmem:[%s1939_s1 + $0x100] sm:$0xff]  ;;  %v1394_v44 = vld [vmem:[%s1939_s1 + $0x98] sm:$0xff]  ;;  %v1166_v48 = vor.u32 %v1372_v40, %v1165_v39  ;;  %v1046_v49 = vor.u32 %v1342_v42, %v1045_v41  ;;  %v1393_v51 = vld [vmem:[%s1939_s1 + $0x90] sm:$0xff] }
   0xf   :  { %1422 = vmatpush.bf16.msra.mxu3 %v1379_v3  ;;  %623 = vmatpush.bf16.msra.mxu0 %v1379_v3  ;;  %v1386_v45 = vld [vmem:[%s1939_s1 + $0x58] sm:$0xff]  ;;  %v1385_v52 = vld [vmem:[%s1939_s1 + $0x50] sm:$0xff]  ;;  %v1392_v54 = vld [vmem:[%s1939_s1 + $0x88] sm:$0xff] }
  0x10   :  { %v1402_v50 = vld [vmem:[%s1939_s1 + $0xd8] sm:$0xff]  ;;  %v1401_v53 = vld [vmem:[%s1939_s1 + $0xd0] sm:$0xff]  ;;  %v1384_v55 = vld [vmem:[%s1939_s1 + $0x48] sm:$0xff] }
  0x11   :  { %v1400_v56 = vld [vmem:[%s1939_s1 + $0xc8] sm:$0xff]  ;;  %v1391_v57 = vld [vmem:[%s1939_s1 + $0x80] sm:$0xff]  ;;  %v1027_v61 = vld [vmem:[%s1940_s0 + $0x14] sm:$0xf0] }
  0x12   :  { %1423 = vmatpush.bf16.msra.mxu1 %v1378_v4  ;;  %1424 = vmatpush.bf16.msra.mxu2 %v1378_v4  ;;  %v1383_v58 = vld [vmem:[%s1939_s1 + $0x40] sm:$0xff]  ;;  %v1033_v62 = vld [vmem:[%s1940_s0 + $0x8] sm:$0xf]  ;;  %v1338_v63 = vld [vmem:[%s1940_s0 + $0x18] sm:$0xf0] }
  0x13   :  { %1425 = vmatpush.bf16.msra.mxu3 %v1378_v4  ;;  %624 = vmatpush.bf16.msra.mxu0 %v1378_v4  ;;  %v1399_v59 = vld [vmem:[%s1939_s1 + $0xc0] sm:$0xff]  ;;  %v1336_v0 = vld [vmem:[%s1940_s0 + $0xc] sm:$0xf]  ;;  %v1041_v2 = vld [vmem:[%s1940_s0 + $0x10] sm:$0xf] }
  0x14   :  { %v1335_v60 = vld [vmem:[%s1940_s0 + $0x4] sm:$0xf]  ;;  %v1035_v1 = vld [vmem:[%s1940_s0 + $0x1c] sm:$0xf0]  ;;  %v1340_v8 = vld [vmem:[%s1940_s0 + $0x2c] sm:$0xf] }
  0x15   :  { %v1339_v3 = vld [vmem:[%s1940_s0 + $0x20] sm:$0xf0]  ;;  %v1030_v4 = vor.u32 %v1335_v60, %v1027_v61  ;;  %v1047_v9 = vld [vmem:[%s1940_s0 + $0x3c] sm:$0xf0]  ;;  %v1053_v10 = vld [vmem:[%s1940_s0 + $0x30] sm:$0xf] }
  0x16   :  { %1426 = vmatpush.bf16.msra.mxu1 %v1377_v5  ;;  %1427 = vmatpush.bf16.msra.mxu2 %v1377_v5  ;;  %v1343_v11 = vld [vmem:[%s1940_s0 + $0x40] sm:$0xf0]  ;;  %v1341_v12 = vld [vmem:[%s1940_s0 + $0x34] sm:$0xf]  ;;  %v1055_v13 = vld [vmem:[%s1940_s0 + $0x44] sm:$0xf0] }
  0x17   :  { %1428 = vmatpush.bf16.msra.mxu3 %v1377_v5  ;;  %625 = vmatpush.bf16.msra.mxu0 %v1377_v5  ;;  %v1034_v5 = vor.u32 %v1338_v63, %v1033_v62  ;;  %v1061_v14 = vld [vmem:[%s1940_s0 + $0x38] sm:$0xf]  ;;  %v1344_v15 = vld [vmem:[%s1940_s0 + $0x48] sm:$0xf0]  ;;  %v1353_v35 = vld [vmem:[%s1940_s0 + $0x90] sm:$0xf0] }
  0x18   :  { %v1351_v36 = vld [vmem:[%s1940_s0 + $0x84] sm:$0xf]  ;;  %v1095_v37 = vld [vmem:[%s1940_s0 + $0x94] sm:$0xf0]  ;;  %v1101_v38 = vld [vmem:[%s1940_s0 + $0x88] sm:$0xf] }
  0x19   :  { %v1354_v39 = vld [vmem:[%s1940_s0 + $0x98] sm:$0xf0]  ;;  %v1098_v42 = vor.u32 %v1351_v36, %v1095_v37  ;;  %v1361_v60 = vld [vmem:[%s1940_s0 + $0xd4] sm:$0xf]  ;;  %v1135_v61 = vld [vmem:[%s1940_s0 + $0xe4] sm:$0xf0] }
  0x1a   :  { %1429 = vmatpush.bf16.msra.mxu1 %v1376_v6  ;;  %1430 = vmatpush.bf16.msra.mxu2 %v1376_v6  ;;  %v1141_v62 = vld [vmem:[%s1940_s0 + $0xd8] sm:$0xf]  ;;  %v1364_v63 = vld [vmem:[%s1940_s0 + $0xe8] sm:$0xf0] }
  0x1b   :  { %1431 = vmatpush.bf16.msra.mxu3 %v1376_v6  ;;  %626 = vmatpush.bf16.msra.mxu0 %v1376_v6  ;;  %v1038_v6 = vor.u32 %v1336_v0, %v1035_v1 }
  0x1e   :  { %1432 = vmatpush.bf16.msra.mxu1 %v1375_v7  ;;  %1433 = vmatpush.bf16.msra.mxu2 %v1375_v7 }
  0x1f   :  { %1434 = vmatpush.bf16.msra.mxu3 %v1375_v7  ;;  %627 = vmatpush.bf16.msra.mxu0 %v1375_v7  ;;  %v1042_v7 = vor.u32 %v1339_v3, %v1041_v2  ;;  %v1138_v2 = vor.u32 %v1361_v60, %v1135_v61  ;;  %v1142_v3 = vor.u32 %v1364_v63, %v1141_v62 }
  0x21   :  { %638 = vmatmul.bf16.vlgmr.msra.gmra.mxu1 %v1066_v18  ;;  %648 = vmatmul.bf16.vlgmr.msra.gmra.mxu2 %v1106_v19  ;;  %v1058_v18 = vor.u32 %v1341_v12, %v1055_v13  ;;  %v1062_v19 = vor.u32 %v1344_v15, %v1061_v14 }
  0x22   :  { %718 = vmatpush.bf16.msrb.mxu2 %v1398_v16  ;;  %669 = vmatpush.bf16.msrb.mxu1 %v1390_v17  ;;  %v1050_v16 = vor.u32 %v1340_v8, %v1047_v9  ;;  %v1054_v17 = vor.u32 %v1343_v11, %v1053_v10  ;;  %v1366_v8 = vld [vmem:[%s1940_s0 + $0xfc] sm:$0xf]  ;;  %v1155_v9 = vld [vmem:[%s1940_s0 + $0x10c] sm:$0xf0]  ;;  %v1161_v10 = vld [vmem:[%s1940_s0 + $0x100] sm:$0xf] }
  0x23   :  { %658 = vmatmul.bf16.vlgmr.msra.gmra.mxu3 %v1146_v20  ;;  %628 = vmatmul.bf16.vlgmr.msra.gmra.mxu0 %v1026_v21  ;;  %v1345_v20 = vld [vmem:[%s1940_s0 + $0x54] sm:$0xf]  ;;  %v1067_v21 = vld [vmem:[%s1940_s0 + $0x64] sm:$0xf0]  ;;  %v1158_v15 = vor.u32 %v1366_v8, %v1155_v9 }
  0x24   :  { %767 = vmatpush.bf16.msrb.mxu3 %v1406_v22  ;;  %820 = vmatpush.bf16.msrb.mxu0 %v1410_v23  ;;  %v1073_v22 = vld [vmem:[%s1940_s0 + $0x58] sm:$0xf]  ;;  %v1348_v23 = vld [vmem:[%s1940_s0 + $0x68] sm:$0xf0]  ;;  %v1369_v11 = vld [vmem:[%s1940_s0 + $0x110] sm:$0xf0] }
  0x26   :  { %719 = vmatpush.bf16.msrb.mxu2 %v1397_v24  ;;  %670 = vmatpush.bf16.msrb.mxu1 %v1389_v25  ;;  %v1346_v24 = vld [vmem:[%s1940_s0 + $0x5c] sm:$0xf]  ;;  %v1075_v25 = vld [vmem:[%s1940_s0 + $0x6c] sm:$0xf0] }
  0x28   :  { %768 = vmatpush.bf16.msrb.mxu3 %v1405_v26  ;;  %821 = vmatpush.bf16.msrb.mxu0 %v1409_v27  ;;  %v1081_v26 = vld [vmem:[%s1940_s0 + $0x60] sm:$0xf]  ;;  %v1349_v27 = vld [vmem:[%s1940_s0 + $0x70] sm:$0xf0] }
  0x2a   :  { %720 = vmatpush.bf16.msrb.mxu2 %v1396_v28  ;;  %671 = vmatpush.bf16.msrb.mxu1 %v1388_v29  ;;  %v1070_v28 = vor.u32 %v1345_v20, %v1067_v21  ;;  %v1074_v29 = vor.u32 %v1348_v23, %v1073_v22  ;;  %v1370_v22 = vld [vmem:[%s1940_s0 + $0x11c] sm:$0xf]  ;;  %v1167_v23 = vld [vmem:[%s1940_s0 + $0x12c] sm:$0xf0] }
  0x2c   :  { %769 = vmatpush.bf16.msrb.mxu3 %v1404_v30  ;;  %822 = vmatpush.bf16.msrb.mxu0 %v1408_v31  ;;  %v1078_v30 = vor.u32 %v1346_v24, %v1075_v25  ;;  %v1082_v31 = vor.u32 %v1349_v27, %v1081_v26  ;;  %v1173_v24 = vld [vmem:[%s1940_s0 + $0x120] sm:$0xf]  ;;  %v1373_v25 = vld [vmem:[%s1940_s0 + $0x130] sm:$0xf0]  ;;  %v1371_v26 = vld [vmem:[%s1940_s0 + $0x124] sm:$0xf] }
  0x2d   :  { %v1175_v27 = vld [vmem:[%s1940_s0 + $0x134] sm:$0xf0] }
  0x2e   :  { %721 = vmatpush.bf16.msrb.mxu2 %v1395_v32  ;;  %672 = vmatpush.bf16.msrb.mxu1 %v1387_v33  ;;  %v1350_v32 = vld [vmem:[%s1940_s0 + $0x7c] sm:$0xf]  ;;  %v1087_v33 = vld [vmem:[%s1940_s0 + $0x8c] sm:$0xf0] }
  0x2f   :  { %v1090_v40 = vor.u32 %v1350_v32, %v1087_v33  ;;  %v1170_v32 = vor.u32 %v1370_v22, %v1167_v23  ;;  %v1174_v33 = vor.u32 %v1373_v25, %v1173_v24 }
  0x30   :  { %770 = vmatpush.bf16.msrb.mxu3 %v1403_v34  ;;  %823 = vmatpush.bf16.msrb.mxu0 %v1407_v43  ;;  %v1093_v34 = vld [vmem:[%s1940_s0 + $0x80] sm:$0xf]  ;;  %v1102_v43 = vor.u32 %v1354_v39, %v1101_v38 }
  0x31   :  { %643 = vmatmul.bf16.gmra.mxu1 %v1086_v46  ;;  %653 = vmatmul.bf16.gmra.mxu2 %v1126_v47  ;;  %v1094_v41 = vor.u32 %v1353_v35, %v1093_v34  ;;  %v1113_v46 = vld [vmem:[%s1940_s0 + $0xa8] sm:$0xf]  ;;  %v1358_v47 = vld [vmem:[%s1940_s0 + $0xb8] sm:$0xf0]  ;;  %v1178_v35 = vor.u32 %v1371_v26, %v1175_v27 }
  0x32   :  { %722 = vmatpush.bf16.msrb.mxu2 %v1394_v44  ;;  %673 = vmatpush.bf16.msrb.mxu1 %v1386_v45  ;;  %v1355_v44 = vld [vmem:[%s1940_s0 + $0xa4] sm:$0xf]  ;;  %v1107_v45 = vld [vmem:[%s1940_s0 + $0xb4] sm:$0xf0] }
  0x33   :  { %663 = vmatmul.bf16.gmra.mxu3 %v1166_v48  ;;  %633 = vmatmul.bf16.gmra.mxu0 %v1046_v49  ;;  %v1356_v48 = vld [vmem:[%s1940_s0 + $0xac] sm:$0xf]  ;;  %v1115_v49 = vld [vmem:[%s1940_s0 + $0xbc] sm:$0xf0] }
  0x34   :  { %771 = vmatpush.bf16.msrb.mxu3 %v1402_v50  ;;  %v1121_v50 = vld [vmem:[%s1940_s0 + $0xb0] sm:$0xf] }
  0x36   :  { %723 = vmatpush.bf16.msrb.mxu2 %v1393_v51  ;;  %674 = vmatpush.bf16.msrb.mxu1 %v1385_v52  ;;  %v1359_v51 = vld [vmem:[%s1940_s0 + $0xc0] sm:$0xf0]  ;;  %v1110_v52 = vor.u32 %v1355_v44, %v1107_v45 }
  0x38   :  { %772 = vmatpush.bf16.msrb.mxu3 %v1401_v53  ;;  %v1114_v53 = vor.u32 %v1358_v47, %v1113_v46 }
  0x3a   :  { %724 = vmatpush.bf16.msrb.mxu2 %v1392_v54  ;;  %675 = vmatpush.bf16.msrb.mxu1 %v1384_v55  ;;  %v1118_v54 = vor.u32 %v1356_v48, %v1115_v49  ;;  %v1122_v55 = vor.u32 %v1359_v51, %v1121_v50 }
  0x3c   :  { %773 = vmatpush.bf16.msrb.mxu3 %v1400_v56  ;;  %v1360_v56 = vld [vmem:[%s1940_s0 + $0xcc] sm:$0xf] }
  0x3e   :  { %725 = vmatpush.bf16.msrb.mxu2 %v1391_v57  ;;  %676 = vmatpush.bf16.msrb.mxu1 %v1383_v58  ;;  %v1127_v57 = vld [vmem:[%s1940_s0 + $0xdc] sm:$0xf0]  ;;  %v1133_v58 = vld [vmem:[%s1940_s0 + $0xd0] sm:$0xf] }
  0x3f   :  { %v1130_v0 = vor.u32 %v1360_v56, %v1127_v57 }
  0x40   :  { %774 = vmatpush.bf16.msrb.mxu3 %v1399_v59  ;;  %v1363_v59 = vld [vmem:[%s1940_s0 + $0xe0] sm:$0xf0] }
  0x41   :  { %677 = vmatmul.bf16.vlgmr.msrb.gmra.mxu1 %v1030_v4  ;;  %726 = vmatmul.bf16.vlgmr.msrb.gmra.mxu2 %v1034_v5  ;;  %v1134_v1 = vor.u32 %v1363_v59, %v1133_v58  ;;  %v1365_v4 = vld [vmem:[%s1940_s0 + $0xf4] sm:$0xf]  ;;  %v1147_v5 = vld [vmem:[%s1940_s0 + $0x104] sm:$0xf0] }
  0x42   :  { %v1150_v12 = vor.u32 %v1365_v4, %v1147_v5 }
  0x43   :  { %775 = vmatmul.bf16.vlgmr.msrb.gmra.mxu3 %v1038_v6  ;;  %1327 = vmatmul.msk.bf16.vlgmr.msrb.gmra.mxu0 %vm595_vm0, %v1042_v7  ;;  %v1153_v6 = vld [vmem:[%s1940_s0 + $0xf8] sm:$0xf]  ;;  %v1368_v7 = vld [vmem:[%s1940_s0 + $0x108] sm:$0xf0] }
  0x44   :  { %v1154_v13 = vor.u32 %v1368_v7, %v1153_v6 }
  0x51   :  { %682 = vmatmul.bf16.gmra.mxu1 %v1050_v16  ;;  %731 = vmatmul.bf16.gmra.mxu2 %v1054_v17  ;;  %v1162_v16 = vor.u32 %v1369_v11, %v1161_v10 }
  0x53   :  { %780 = vmatmul.bf16.gmra.mxu3 %v1058_v18  ;;  %1328 = vmatmul.msk.bf16.gmra.mxu0 %vm595_vm0, %v1062_v19 }
  0x61   :  { %687 = vmatmul.bf16.gmra.mxu1 %v1070_v28  ;;  %736 = vmatmul.bf16.gmra.mxu2 %v1074_v29  ;;  %v1181_v28 = vld [vmem:[%s1940_s0 + $0x128] sm:$0xf]  ;;  %v1374_v29 = vld [vmem:[%s1940_s0 + $0x138] sm:$0xf0] }
  0x62   :  { %v1182_v36 = vor.u32 %v1374_v29, %v1181_v28 }
  0x63   :  { %785 = vmatmul.bf16.gmra.mxu3 %v1078_v30  ;;  %1329 = vmatmul.msk.bf16.gmra.mxu0 %vm595_vm0, %v1082_v31 }
  0x71   :  { %692 = vmatmul.bf16.gmra.mxu1 %v1090_v40  ;;  %741 = vmatmul.bf16.gmra.mxu2 %v1094_v41 }
  0x73   :  { %790 = vmatmul.bf16.gmra.mxu3 %v1098_v42  ;;  %1330 = vmatmul.msk.bf16.gmra.mxu0 %vm595_vm0, %v1102_v43 }
  0x81   :  { %697 = vmatmul.bf16.gmra.mxu1 %v1110_v52  ;;  %746 = vmatmul.bf16.gmra.mxu2 %v1114_v53  ;;  %v1846_v52 = vld [vmem:[%s1941_s2] ss:$0 sm:$0xff] }
  0x83   :  { %795 = vmatmul.bf16.gmra.mxu3 %v1118_v54  ;;  %1331 = vmatmul.msk.bf16.gmra.mxu0 %vm595_vm0, %v1122_v55 }
  0x91   :  { %702 = vmatmul.bf16.gmra.mxu1 %v1130_v0  ;;  %751 = vmatmul.bf16.gmra.mxu2 %v1134_v1 }
  0x93   :  { %800 = vmatmul.bf16.gmra.mxu3 %v1138_v2  ;;  %1332 = vmatmul.msk.bf16.gmra.mxu0 %vm595_vm0, %v1142_v3 }
  0x9e   :  { %v1793_v14 = vpop.f32.mrf.mxu1 }
  0xa0   :  { %v629_v17 = vpop.f32.mrf.mxu0 }
  0xa1   :  { %707 = vmatmul.bf16.gmra.mxu1 %v1150_v12  ;;  %756 = vmatmul.bf16.gmra.mxu2 %v1154_v13 }
  0xa3   :  { %805 = vmatmul.bf16.gmra.mxu3 %v1158_v15  ;;  %1333 = vmatmul.msk.bf16.gmra.mxu0 %vm595_vm0, %v1162_v16 }
  0xa4   :  { %v1796_v18 = vpop.f32.mrf.mxu2 }
  0xa6   :  { %v1798_v19 = vpop.f32.mrf.mxu3  ;;  %v1800_v20 = vpop.f32.mrf.mxu1 }
  0xa8   :  { %v631_v21 = vpop.f32.mrf.mxu0 }
  0xac   :  { %v1826_v30 = vpop.f32.mrf.mxu2 }
  0xae   :  { %v1828_v31 = vpop.f32.mrf.mxu3  ;;  %v1830_v34 = vpop.f32.mrf.mxu1 }
  0xb0   :  { %v634_v37 = vpop.f32.mrf.mxu0 }
  0xb1   :  { %712 = vmatmul.bf16.gmra.mxu1 %v1170_v32  ;;  %761 = vmatmul.bf16.gmra.mxu2 %v1174_v33 }
  0xb3   :  { %810 = vmatmul.bf16.gmra.mxu3 %v1178_v35  ;;  %1334 = vmatmul.msk.bf16.gmra.mxu0 %vm595_vm0, %v1182_v36 }
  0xb4   :  { %v1833_v38 = vpop.f32.mrf.mxu2 }
  0xb6   :  { %v1835_v39 = vpop.f32.mrf.mxu3  ;;  %v1837_v40 = vpop.f32.mrf.mxu1 }
  0xb8   :  { %v636_v41 = vpop.f32.mrf.mxu0 }
  0xbc   :  { %v1839_v42 = vpop.f32.mrf.mxu2 }
  0xbe   :  { %v1841_v43 = vpop.f32.mrf.mxu3  ;;  %v678_v44 = vpop.f32.mrf.mxu1 }
  0xbf   :  { %v679_v46 = vadd.f32 %v678_v44, %v629_v17 }
  0xc0   :  { %v825_v45 = vpop.f32.mrf.mxu0 }
  0xc4   :  { %v727_v47 = vpop.f32.mrf.mxu2 }
  0xc5   :  { %v728_v48 = vadd.f32 %v727_v47, %v679_v46 }
  0xc6   :  { %v776_v49 = vpop.f32.mrf.mxu3  ;;  %v680_v50 = vpop.f32.mrf.mxu1 }
  0xc7   :  { %v777_v51 = vadd.f32 %v776_v49, %v728_v48  ;;  %v681_v56 = vadd.f32 %v680_v50, %v631_v21 }
  0xc8   :  { %v827_v53 = vpop.f32.mrf.mxu0 }
  0xc9   :  { %v826_v54 = vadd.f32 %v825_v45, %v777_v51 }
  0xcb   :  { %v920_v55 = vadd.f32 %v1846_v52, %v826_v54 }
  0xcc   :  { %v729_v57 = vpop.f32.mrf.mxu2 }
  0xcd   :  { %936 = vst [vmem:[%s1942_s3] sm:$0xff] %v920_v55  ;;  %v730_v58 = vadd.f32 %v729_v57, %v681_v56  ;;  %v952_v3 = vmul.f32 %v920_v55, %v920_v55 }
  0xce   :  { %v778_v59 = vpop.f32.mrf.mxu3  ;;  %v683_v60 = vpop.f32.mrf.mxu1 }
  0xcf   :  { %v779_v61 = vadd.f32 %v778_v59, %v730_v58  ;;  %v684_v1 = vadd.f32 %v683_v60, %v634_v37 }
  0xd0   :  { %v830_v62 = vpop.f32.mrf.mxu0 }
  0xd1   :  { %v828_v63 = vadd.f32 %v827_v53, %v779_v61 }
  0xd3   :  { %v921_v0 = vadd.f32 %v1846_v52, %v828_v63 }
  0xd4   :  { %v732_v2 = vpop.f32.mrf.mxu2 }
  0xd5   :  { %937 = vst [vmem:[%s1942_s3 + $0x8] sm:$0xff] %v921_v0  ;;  %v953_v4 = vmul.f32 %v921_v0, %v921_v0  ;;  %v968_v5 = vadd.f32 %v921_v0, %v920_v55  ;;  %v733_v6 = vadd.f32 %v732_v2, %v684_v1 }
  0xd6   :  { %v781_v7 = vpop.f32.mrf.mxu3  ;;  %v685_v8 = vpop.f32.mrf.mxu1 }
  0xd7   :  { %v989_v9 = vadd.f32 %v953_v4, %v952_v3  ;;  %v782_v10 = vadd.f32 %v781_v7, %v733_v6  ;;  %v686_v15 = vadd.f32 %v685_v8, %v636_v41 }
  0xd8   :  { %v832_v11 = vpop.f32.mrf.mxu0 }
  0xd9   :  { %v831_v12 = vadd.f32 %v830_v62, %v782_v10 }
  0xdb   :  { %v922_v13 = vadd.f32 %v1846_v52, %v831_v12 }
  0xdc   :  { %v734_v16 = vpop.f32.mrf.mxu2 }
  0xdd   :  { %938 = vst [vmem:[%s1942_s3 + $0x10] sm:$0xff] %v922_v13  ;;  %v954_v17 = vmul.f32 %v922_v13, %v922_v13  ;;  %v969_v21 = vadd.f32 %v968_v5, %v922_v13  ;;  %v735_v22 = vadd.f32 %v734_v16, %v686_v15 }
  0xde   :  { %v783_v23 = vpop.f32.mrf.mxu3  ;;  %v688_v24 = vpop.f32.mrf.mxu1 }
  0xdf   :  { %v990_v25 = vadd.f32 %v989_v9, %v954_v17  ;;  %v784_v26 = vadd.f32 %v783_v23, %v735_v22  ;;  %v689_v32 = vadd.f32 %v688_v24, %v1793_v14 }
  0xe0   :  { %v835_v27 = vpop.f32.mrf.mxu0 }
  0xe1   :  { %v833_v28 = vadd.f32 %v832_v11, %v784_v26 }
  0xe3   :  { %v923_v29 = vadd.f32 %v1846_v52, %v833_v28 }
  0xe4   :  { %v737_v33 = vpop.f32.mrf.mxu2 }
  0xe5   :  { %939 = vst [vmem:[%s1942_s3 + $0x18] sm:$0xff] %v923_v29  ;;  %v955_v35 = vmul.f32 %v923_v29, %v923_v29  ;;  %v970_v36 = vadd.f32 %v969_v21, %v923_v29  ;;  %v738_v37 = vadd.f32 %v737_v33, %v689_v32 }
  0xe6   :  { %v786_v41 = vpop.f32.mrf.mxu3  ;;  %v690_v44 = vpop.f32.mrf.mxu1 }
  0xe7   :  { %v991_v45 = vadd.f32 %v990_v25, %v955_v35  ;;  %v787_v46 = vadd.f32 %v786_v41, %v738_v37  ;;  %v691_v50 = vadd.f32 %v690_v44, %v1800_v20 }
  0xe8   :  { %v837_v47 = vpop.f32.mrf.mxu0 }
  0xe9   :  { %v836_v48 = vadd.f32 %v835_v27, %v787_v46 }
  0xeb   :  { %v924_v49 = vadd.f32 %v1846_v52, %v836_v48 }
  0xec   :  { %v739_v51 = vpop.f32.mrf.mxu2 }
  0xed   :  { %940 = vst [vmem:[%s1942_s3 + $0x20] sm:$0xff] %v924_v49  ;;  %v956_v14 = vmul.f32 %v924_v49, %v924_v49  ;;  %v971_v53 = vadd.f32 %v970_v36, %v924_v49  ;;  %v740_v54 = vadd.f32 %v739_v51, %v691_v50 }
  0xee   :  { %v788_v55 = vpop.f32.mrf.mxu3  ;;  %v693_v56 = vpop.f32.mrf.mxu1 }
  0xef   :  { %v992_v57 = vadd.f32 %v991_v45, %v956_v14  ;;  %v789_v58 = vadd.f32 %v788_v55, %v740_v54  ;;  %v694_v62 = vadd.f32 %v693_v56, %v1830_v34 }
  0xf0   :  { %v840_v59 = vpop.f32.mrf.mxu0 }
  0xf1   :  { %v838_v60 = vadd.f32 %v837_v47, %v789_v58 }
  0xf3   :  { %v925_v61 = vadd.f32 %v1846_v52, %v838_v60 }
  0xf4   :  { %v742_v63 = vpop.f32.mrf.mxu2 }
  0xf5   :  { %941 = vst [vmem:[%s1942_s3 + $0x28] sm:$0xff] %v925_v61  ;;  %v957_v20 = vmul.f32 %v925_v61, %v925_v61  ;;  %v972_v0 = vadd.f32 %v971_v53, %v925_v61  ;;  %v743_v1 = vadd.f32 %v742_v63, %v694_v62 }
  0xf6   :  { %v791_v2 = vpop.f32.mrf.mxu3  ;;  %v695_v3 = vpop.f32.mrf.mxu1 }
  0xf7   :  { %v993_v4 = vadd.f32 %v992_v57, %v957_v20  ;;  %v792_v5 = vadd.f32 %v791_v2, %v743_v1  ;;  %v696_v9 = vadd.f32 %v695_v3, %v1837_v40  ;;  %v1437_v20 = vmov 0.0  }
  0xf8   :  { %v842_v6 = vpop.f32.mrf.mxu0  ;;  %42 = vst [vmem:[%s1943_s4] sm:$0x3] %v1437_v20 }
  0xf9   :  { %v841_v7 = vadd.f32 %v840_v59, %v792_v5 }
  0xfb   :  { %v926_v8 = vadd.f32 %v1846_v52, %v841_v7 }
  0xfc   :  { %v744_v10 = vpop.f32.mrf.mxu2 }
  0xfd   :  { %942 = vst [vmem:[%s1942_s3 + $0x30] sm:$0xff] %v926_v8  ;;  %v958_v34 = vmul.f32 %v926_v8, %v926_v8  ;;  %v973_v11 = vadd.f32 %v972_v0, %v926_v8  ;;  %v745_v12 = vadd.f32 %v744_v10, %v696_v9 }
  0xfe   :  { %v793_v13 = vpop.f32.mrf.mxu3  ;;  %v698_v15 = vpop.f32.mrf.mxu1 }
  0xff   :  { %v994_v16 = vadd.f32 %v993_v4, %v958_v34  ;;  %v794_v17 = vadd.f32 %v793_v13, %v745_v12  ;;  %v699_v24 = vadd.f32 %v698_v15, %v1796_v18 }
 0x100   :  { %v845_v21 = vpop.f32.mrf.mxu0 }
 0x101   :  { %v843_v22 = vadd.f32 %v842_v6, %v794_v17 }
 0x103   :  { %v927_v23 = vadd.f32 %v1846_v52, %v843_v22 }
 0x104   :  { %v747_v25 = vpop.f32.mrf.mxu2 }
 0x105   :  { %943 = vst [vmem:[%s1942_s3 + $0x38] sm:$0xff] %v927_v23  ;;  %v959_v40 = vmul.f32 %v927_v23, %v927_v23  ;;  %v1885_v26 = vadd.f32 %v973_v11, %v927_v23  ;;  %v748_v27 = vadd.f32 %v747_v25, %v699_v24 }
 0x106   :  { %v796_v28 = vpop.f32.mrf.mxu3  ;;  %v700_v29 = vpop.f32.mrf.mxu1 }
 0x107   :  { %v1887_v32 = vadd.f32 %v994_v16, %v959_v40  ;;  %v797_v33 = vadd.f32 %v796_v28, %v748_v27  ;;  %v701_v18 = vadd.f32 %v700_v29, %v1826_v30 }
 0x108   :  { %v847_v35 = vpop.f32.mrf.mxu0 }
 0x109   :  { %v846_v36 = vadd.f32 %v845_v21, %v797_v33 }
 0x10b   :  { %v928_v37 = vadd.f32 %v1846_v52, %v846_v36 }
 0x10c   :  { %v749_v41 = vpop.f32.mrf.mxu2 }
 0x10d   :  { %944 = vst [vmem:[%s1942_s3 + $0x40] sm:$0xff] %v928_v37  ;;  %v750_v44 = vadd.f32 %v749_v41, %v701_v18  ;;  %v960_v22 = vmul.f32 %v928_v37, %v928_v37  ;;  %v975_v27 = vadd.f32 %v1885_v26, %v928_v37 }
 0x10e   :  { %v798_v45 = vpop.f32.mrf.mxu3  ;;  %v703_v46 = vpop.f32.mrf.mxu1 }
 0x10f   :  { %v799_v47 = vadd.f32 %v798_v45, %v750_v44  ;;  %v704_v51 = vadd.f32 %v703_v46, %v1833_v38  ;;  %v996_v29 = vadd.f32 %v1887_v32, %v960_v22 }
 0x110   :  { %v850_v48 = vpop.f32.mrf.mxu0 }
 0x111   :  { %v848_v49 = vadd.f32 %v847_v35, %v799_v47 }
 0x113   :  { %v929_v50 = vadd.f32 %v1846_v52, %v848_v49 }
 0x114   :  { %v752_v14 = vpop.f32.mrf.mxu2 }
 0x115   :  { %945 = vst [vmem:[%s1942_s3 + $0x48] sm:$0xff] %v929_v50  ;;  %v753_v30 = vadd.f32 %v752_v14, %v704_v51  ;;  %v961_v25 = vmul.f32 %v929_v50, %v929_v50  ;;  %v976_v35 = vadd.f32 %v975_v27, %v929_v50 }
 0x116   :  { %v801_v53 = vpop.f32.mrf.mxu3  ;;  %v705_v54 = vpop.f32.mrf.mxu1 }
 0x117   :  { %v802_v55 = vadd.f32 %v801_v53, %v753_v30  ;;  %v706_v59 = vadd.f32 %v705_v54, %v1839_v42 }
 0x118   :  { %v852_v56 = vpop.f32.mrf.mxu0 }
 0x119   :  { %v851_v57 = vadd.f32 %v850_v48, %v802_v55 }
 0x11b   :  { %v930_v58 = vadd.f32 %v1846_v52, %v851_v57 }
 0x11c   :  { %v754_v60 = vpop.f32.mrf.mxu2 }
 0x11d   :  { %946 = vst [vmem:[%s1942_s3 + $0x50] sm:$0xff] %v930_v58  ;;  %v755_v38 = vadd.f32 %v754_v60, %v706_v59  ;;  %v962_v36 = vmul.f32 %v930_v58, %v930_v58  ;;  %v977_v41 = vadd.f32 %v976_v35, %v930_v58 }
 0x11e   :  { %v803_v61 = vpop.f32.mrf.mxu3  ;;  %v708_v62 = vpop.f32.mrf.mxu1 }
 0x11f   :  { %v804_v63 = vadd.f32 %v803_v61, %v755_v38  ;;  %v709_v42 = vadd.f32 %v708_v62, %v1798_v19 }
 0x120   :  { %v855_v1 = vpop.f32.mrf.mxu0 }
 0x121   :  { %v853_v0 = vadd.f32 %v852_v56, %v804_v63 }
 0x123   :  { %v931_v2 = vadd.f32 %v1846_v52, %v853_v0 }
 0x124   :  { %v757_v3 = vpop.f32.mrf.mxu2 }
 0x125   :  { %947 = vst [vmem:[%s1942_s3 + $0x58] sm:$0xff] %v931_v2  ;;  %v758_v4 = vadd.f32 %v757_v3, %v709_v42  ;;  %v963_v44 = vmul.f32 %v931_v2, %v931_v2  ;;  %v978_v49 = vadd.f32 %v977_v41, %v931_v2 }
 0x126   :  { %v806_v5 = vpop.f32.mrf.mxu3  ;;  %v710_v6 = vpop.f32.mrf.mxu1 }
 0x127   :  { %v807_v7 = vadd.f32 %v806_v5, %v758_v4  ;;  %v711_v10 = vadd.f32 %v710_v6, %v1828_v31 }
 0x128   :  { %v857_v34 = vpop.f32.mrf.mxu0 }
 0x129   :  { %v856_v8 = vadd.f32 %v855_v1, %v807_v7 }
 0x12b   :  { %v932_v9 = vadd.f32 %v1846_v52, %v856_v8  ;;  %v1012_v8 = vld [vmem:[%s1943_s4] sm:$0x3] }
 0x12c   :  { %v759_v11 = vpop.f32.mrf.mxu2 }
 0x12d   :  { %948 = vst [vmem:[%s1942_s3 + $0x60] sm:$0xff] %v932_v9  ;;  %v760_v19 = vadd.f32 %v759_v11, %v711_v10  ;;  %v964_v51 = vmul.f32 %v932_v9, %v932_v9  ;;  %v979_v50 = vadd.f32 %v978_v49, %v932_v9 }
 0x12e   :  { %v808_v12 = vpop.f32.mrf.mxu3  ;;  %v713_v13 = vpop.f32.mrf.mxu1 }
 0x12f   :  { %v809_v15 = vadd.f32 %v808_v12, %v760_v19  ;;  %v714_v21 = vadd.f32 %v713_v13, %v1835_v39  ;;  %v997_v39 = vadd.f32 %v996_v29, %v961_v25 }
 0x130   :  { %v860_v40 = vpop.f32.mrf.mxu0 }
 0x131   :  { %v858_v16 = vadd.f32 %v857_v34, %v809_v15  ;;  %v998_v48 = vadd.f32 %v997_v39, %v962_v36 }
 0x133   :  { %v933_v17 = vadd.f32 %v1846_v52, %v858_v16  ;;  %v999_v37 = vadd.f32 %v998_v48, %v963_v44 }
 0x134   :  { %v762_v23 = vpop.f32.mrf.mxu2 }
 0x135   :  { %949 = vst [vmem:[%s1942_s3 + $0x68] sm:$0xff] %v933_v17  ;;  %v763_v31 = vadd.f32 %v762_v23, %v714_v21  ;;  %v965_v14 = vmul.f32 %v933_v17, %v933_v17  ;;  %v1000_v54 = vadd.f32 %v999_v37, %v964_v51  ;;  %v980_v55 = vadd.f32 %v979_v50, %v933_v17 }
 0x136   :  { %v811_v24 = vpop.f32.mrf.mxu3  ;;  %v715_v33 = vpop.f32.mrf.mxu1 }
 0x137   :  { %v812_v28 = vadd.f32 %v811_v24, %v763_v31  ;;  %v716_v46 = vadd.f32 %v715_v33, %v1841_v43  ;;  %v1001_v43 = vadd.f32 %v1000_v54, %v965_v14 }
 0x138   :  { %v862_v53 = vpop.f32.mrf.mxu0 }
 0x139   :  { %v861_v18 = vadd.f32 %v860_v40, %v812_v28 }
 0x13b   :  { %v934_v45 = vadd.f32 %v1846_v52, %v861_v18 }
 0x13c   :  { %v764_v47 = vpop.f32.mrf.mxu2 }
 0x13d   :  { %950 = vst [vmem:[%s1942_s3 + $0x70] sm:$0xff] %v934_v45  ;;  %v765_v26 = vadd.f32 %v764_v47, %v716_v46  ;;  %v966_v56 = vmul.f32 %v934_v45, %v934_v45  ;;  %v981_v58 = vadd.f32 %v980_v55, %v934_v45 }
 0x13e   :  { %v813_v32 = vpop.f32.mrf.mxu3 }
 0x13f   :  { %v814_v30 = vadd.f32 %v813_v32, %v765_v26  ;;  %v1002_v60 = vadd.f32 %v1001_v43, %v966_v56 }
 0x141   :  { %v863_v57 = vadd.f32 %v862_v53, %v814_v30 }
 0x143   :  { %v935_v59 = vadd.f32 %v1846_v52, %v863_v57 }
 0x145   :  { %951 = vst [vmem:[%s1942_s3 + $0x78] sm:$0xff] %v935_v59  ;;  %v967_v38 = vmul.f32 %v935_v59, %v935_v59  ;;  %v982_v61 = vadd.f32 %v981_v58, %v935_v59 }
 0x147   :  { %v983_v62 = vrot.slane %v982_v61, 4  ;;  %v1003_v63 = vadd.f32 %v1002_v60, %v967_v38 }
 0x149   :  { %v984_v20 = vadd.f32 %v983_v62, %v982_v61  ;;  %v1004_v0 = vrot.slane %v1003_v63, 4 }
 0x14b   :  { %v985_v1 = vrot.slane %v984_v20, 2  ;;  %v1005_v2 = vadd.f32 %v1004_v0, %v1003_v63 }
 0x14d   :  { %v986_v42 = vadd.f32 %v985_v1, %v984_v20  ;;  %v1006_v3 = vrot.slane %v1005_v2, 2 }
 0x14f   :  { %v987_v4 = vrot.slane %v986_v42, 1  ;;  %v1007_v5 = vadd.f32 %v1006_v3, %v1005_v2 }
 0x151   :  { %v1008_v6 = vrot.slane %v1007_v5, 1  ;;  %v988_v52 = vadd.f32 %v987_v4, %v986_v42 }
 0x153   :  { %v1009_v7 = vadd.f32 %v1008_v6, %v1007_v5 }
 0x155   :  { %v1011_v9 = vsel %vm1010_vm1, %v988_v52, %v1009_v7 }
 0x156   :  { %v1013_v10 = vadd.f32 %v1012_v8, %v1011_v9 }
 0x158   :  { %1014 = vst [vmem:[%s1943_s4] sm:$0x3] %v1013_v10 }

// kernel: forward.22
= control target key start
LH: loop header
LB: loop body
LE: loop exit
PB: predicated region body
PF: predicated region fallthrough
CT: control target
= control target key end

     0   :  { %s1135_s15 = smov 0   ;;  %s1137_s16 = smov 0   ;;  %s1269_s0 = inlined_call_operand.vmem [shape: bf16[32,1152], index: 0, kind: input, shape index: {}]   ;;  %s1270_s1 = inlined_call_operand.vmem [shape: bf16[1152,128], index: 1, kind: input, shape index: {}]   ;;  %s1271_s2 = inlined_call_operand.vmem [shape: f32[1,128], index: 2, kind: input, shape index: {}]   ;;  %s1272_s3 = inlined_call_operand.vmem [shape: f32[32,128], index: 3, kind: output, shape index: {0}]   ;;  %s1273_s4 = inlined_call_operand.vmem [shape: f32[2,128], index: 4, kind: output, shape index: {1}]  }
   0x1   :  { %s1139_s17 = smov 0   ;;  %s1141_s18 = smov 0  }
   0x2   :  { %s1143_s19 = smov 0  }
   0x3 LB: > { %s27_s20 = sadd.s32 1, %s1102_s18  ;;  %p50_p1 = scmp.ne.s32.totalorder %s1094_s16, %s1090_s15  ;;  %s1106_s19 = sphi %s1143_s19, %s15_s19   ;;  %s1102_s18 = sphi %s1141_s18, %s1277_s18   ;;  %s1098_s17 = sphi %s1139_s17, %s1276_s17   ;;  %s1094_s16 = sphi %s1137_s16, %s1275_s16   ;;  %s1090_s15 = sphi %s1135_s15, %s1274_s15  }
   0x4   : > { %p28_p0 = scmp.ge.s32.totalorder %s27_s20, 3  ;;  %p51_p2 = scmp.eq.s32.totalorder %s1106_s19, 0 }
   0x5   : > { %s43_s22 = sadd.s32 1, %s1094_s16  ;;  %p843_p5 = scmp.ge.s32.totalorder %s1106_s19, 3 }
   0x6   : > { %s1279_s20 = smov (%p28_p0, %s27_s20), 0  ;;  %p52_p3 = por %p51_p2, %p50_p1 }
   0x7   : > { %s39_s21 = ssub.s32 %s1102_s18, %s1279_s20  ;;  %190 = sbr.rel (%p843_p5) target bundleno = 25 (0x19), region = 20 }
   0x8   : > { %p41_p4 = scmp.eq.s32.totalorder %s39_s21, 0 }
   0xa   : > { %s1170_s23 = scalar_select %p41_p4, %s1094_s16, %s43_s22  }
   0xc   : > { %193 = sbr.rel (!%p52_p3) target bundleno = 25 (0x19), region = 24  ;;  %s195_s24 = sand.u32 (%p52_p3), 1, %s1094_s16  }
   0xd   : > { %s983_s25 = smul.u32 (%p52_p3), 12, %s1102_s18 }
   0xe   : > { %s1023_s26 = smul.u32 (%p52_p3), 48, %s195_s24 }
   0xf   : > { %s203_s29 = scalar_lea.vmem (%p52_p3), %s1269_s0, %s983_s25 }
  0x10   : > { %v218_v0 = vld [vmem:[%s203_s29] sm:$0xff] (%p52_p3)  ;;  %v222_v2 = vld [vmem:[%s203_s29 + $0x48] sm:$0xff] (%p52_p3)  ;;  %s197_s30 = scalar_lea.vmem (%p52_p3), [#allocation3], %s1023_s26  ;;  %v849_v6 = vld [vmem:[%s203_s29 + $0x50] sm:$0xf] (%p52_p3) }
  0x11   : > { %v220_v1 = vld [vmem:[%s203_s29 + $0x24] sm:$0xff]  ;;  %219 = vst [vmem:[%s197_s30] sm:$0xff] %v218_v0  ;;  %v224_v3 = vld [vmem:[%s203_s29 + $0x6c] sm:$0xff]  ;;  %v851_v7 = vld [vmem:[%s203_s29 + $0x74] sm:$0xf] }
  0x12   : > { %221 = vst [vmem:[%s197_s30 + $0xc] sm:$0xff] %v220_v1  ;;  %v845_v4 = vld [vmem:[%s203_s29 + $0x8] sm:$0xf]  ;;  %v847_v5 = vld [vmem:[%s203_s29 + $0x2c] sm:$0xf] }
  0x13   : > { %223 = vst [vmem:[%s197_s30 + $0x18] sm:$0xff] %v222_v2 }
  0x14   : > { %225 = vst [vmem:[%s197_s30 + $0x24] sm:$0xff] %v224_v3 }
  0x15   : > { %846 = vst [vmem:[%s197_s30 + $0x8] sm:$0xf] %v845_v4 }
  0x16   : > { %848 = vst [vmem:[%s197_s30 + $0x14] sm:$0xf] %v847_v5 }
  0x17   : > { %850 = vst [vmem:[%s197_s30 + $0x20] sm:$0xf] %v849_v6 }
  0x18   : > { %852 = vst [vmem:[%s197_s30 + $0x2c] sm:$0xf] %v851_v7 }
  0x19 PF: > { %p853_p6 = scmp.ge.s32.totalorder %s1106_s19, 1  ;;  %p258_p7 = scmp.lt.s32.totalorder %s1106_s19, 4 }
  0x1b   : > { %p259_p8 = pnand %p853_p6, %p258_p7 }
  0x1c   : > { %s265_s5 = sand.u32 (!%p259_p8), 1, %s1090_s15   ;;  %s310_s6 = smul.u32 (!%p259_p8), 48, %s1098_s17 }
  0x1d   : > { %262 = sbr.rel (%p259_p8) target bundleno = 273 (0x111), region = 54  ;;  %p335_p9 = scmp.eq.s32.totalorder (!%p259_p8), %s1098_s17, 0 }
  0x1e   : > { %s1024_s7 = smul.u32 (!%p259_p8), 48, %s265_s5  ;;  %p311_p10 = scmp.lt.s32.totalorder (!%p259_p8), %s310_s6, 143 }
  0x1f   : > { %p855_p11 = scmp.ne.s32.totalorder (!%p259_p8), %s1098_s17, 0 }
  0x20   : > { %s1188_s12 = scalar_lea.vmem (!%p259_p8), [#allocation3], %s1024_s7 }
  0x22   : > { %s1281_s6 = smov (!%p311_p10, %s310_s6), 143  ;;  %338 = sbr.rel (%p855_p11) target bundleno = 44 (0x2c), region = 62 }
  0x23   : > { %s854_s8 = sshll.u32 %s1281_s6, 2 }
  0x24   : > { %s1186_s11 = scalar_lea.vmem %s1270_s1, %s854_s8 }
  0x27   : > { %v1108_v8 = vmov 0.0  }
  0x28   : > { %339 = vst [vmem:[#allocation2 + $0x10] sm:$0xff] %v1108_v8 }
  0x29   : > { %340 = vst [vmem:[#allocation2] sm:$0xff] %v1108_v8 }
  0x2a   : > { %341 = vst [vmem:[#allocation2 + $0x18] sm:$0xff] %v1108_v8 }
  0x2b   : > { %342 = vst [vmem:[#allocation2 + $0x8] sm:$0xff] %v1108_v8 }
  0x2c PF: > { %347 = sbr.rel (!%p335_p9) target bundleno = 49 (0x31), region = 66  ;;  %v1109_v9 = vmov (%p335_p9), 0.0  }
  0x2d   : > { %348 = vst [vmem:[%s1273_s4] sm:$0x3] (%p335_p9), %v1109_v9 }
  0x31 PF: > { %v998_v10 = vld [vmem:[%s1186_s11 + $0x38] sm:$0xff]  ;;  %v997_v13 = vld [vmem:[%s1186_s11 + $0x30] sm:$0xff]  ;;  %v996_v16 = vld [vmem:[%s1186_s11 + $0x28] sm:$0xff]  ;;  %p977_p12 = scmp.ne.s32.totalorder %s1098_s17, 2 }
  0x32   : > { %v1006_v11 = vld [vmem:[%s1186_s11 + $0x78] sm:$0xff]  ;;  %585 = vmatpush.bf16.msra.mxu0 %v998_v10  ;;  %v1005_v14 = vld [vmem:[%s1186_s11 + $0x70] sm:$0xff]  ;;  %1015 = vmatpush.bf16.msra.mxu3 %v998_v10  ;;  %v1004_v17 = vld [vmem:[%s1186_s11 + $0x68] sm:$0xff] }
  0x33   : > { %v1014_v12 = vld [vmem:[%s1186_s11 + $0xb8] sm:$0xff]  ;;  %604 = vmatpush.bf16.msra.mxu1 %v1006_v11  ;;  %v1013_v15 = vld [vmem:[%s1186_s11 + $0xb0] sm:$0xff]  ;;  %v1012_v18 = vld [vmem:[%s1186_s11 + $0xa8] sm:$0xff] }
  0x34   : > { %623 = vmatpush.bf16.msra.mxu2 %v1014_v12  ;;  %v995_v19 = vld [vmem:[%s1186_s11 + $0x20] sm:$0xff]  ;;  %v994_v22 = vld [vmem:[%s1186_s11 + $0x18] sm:$0xff]  ;;  %v993_v25 = vld [vmem:[%s1186_s11 + $0x10] sm:$0xff] }
  0x35   : > { %v1003_v20 = vld [vmem:[%s1186_s11 + $0x60] sm:$0xff]  ;;  %v1002_v23 = vld [vmem:[%s1186_s11 + $0x58] sm:$0xff]  ;;  %v1001_v26 = vld [vmem:[%s1186_s11 + $0x50] sm:$0xff] }
  0x36   : > { %586 = vmatpush.bf16.msra.mxu0 %v997_v13  ;;  %1016 = vmatpush.bf16.msra.mxu3 %v997_v13  ;;  %v1011_v21 = vld [vmem:[%s1186_s11 + $0xa0] sm:$0xff]  ;;  %v1010_v24 = vld [vmem:[%s1186_s11 + $0x98] sm:$0xff]  ;;  %v1009_v27 = vld [vmem:[%s1186_s11 + $0x90] sm:$0xff] }
  0x37   : > { %605 = vmatpush.bf16.msra.mxu1 %v1005_v14  ;;  %v992_v28 = vld [vmem:[%s1186_s11 + $0x8] sm:$0xff]  ;;  %v991_v31 = vld [vmem:[%s1186_s11] sm:$0xff]  ;;  %v349_v55 = vld [vmem:[#allocation2 + $0x10] sm:$0xff] }
  0x38   : > { %624 = vmatpush.bf16.msra.mxu2 %v1013_v15  ;;  %v1000_v29 = vld [vmem:[%s1186_s11 + $0x48] sm:$0xff]  ;;  %v999_v32 = vld [vmem:[%s1186_s11 + $0x40] sm:$0xff]  ;;  %v351_v5 = vld [vmem:[#allocation2 + $0x18] sm:$0xff] }
  0x39   : > { %v1008_v30 = vld [vmem:[%s1186_s11 + $0x88] sm:$0xff]  ;;  %v1007_v33 = vld [vmem:[%s1186_s11 + $0x80] sm:$0xff] }
  0x3a   : > { %587 = vmatpush.bf16.msra.mxu0 %v996_v16  ;;  %1017 = vmatpush.bf16.msra.mxu3 %v996_v16  ;;  %v859_v34 = vld [vmem:[%s1188_s12] sm:$0xf]  ;;  %v986_v35 = vld [vmem:[%s1188_s12 + $0x8] sm:$0xf0]  ;;  %v985_v36 = vld [vmem:[%s1188_s12 + $0x4] sm:$0xf] }
  0x3b   : > { %606 = vmatpush.bf16.msra.mxu1 %v1004_v17  ;;  %v861_v37 = vld [vmem:[%s1188_s12 + $0xc] sm:$0xf0]  ;;  %v867_v38 = vld [vmem:[%s1188_s12 + $0x8] sm:$0xf]  ;;  %v987_v39 = vld [vmem:[%s1188_s12 + $0x10] sm:$0xf0]  ;;  %v860_v42 = vor.u32 %v986_v35, %v859_v34 }
  0x3c   : > { %625 = vmatpush.bf16.msra.mxu2 %v1012_v18  ;;  %v871_v40 = vld [vmem:[%s1188_s12 + $0x18] sm:$0xf]  ;;  %v989_v41 = vld [vmem:[%s1188_s12 + $0x20] sm:$0xf0]  ;;  %v864_v43 = vor.u32 %v985_v36, %v861_v37  ;;  %v868_v44 = vor.u32 %v987_v39, %v867_v38  ;;  %v988_v46 = vld [vmem:[%s1188_s12 + $0x1c] sm:$0xf] }
  0x3d   : > { %v872_v45 = vor.u32 %v989_v41, %v871_v40  ;;  %v873_v47 = vld [vmem:[%s1188_s12 + $0x24] sm:$0xf0]  ;;  %v879_v48 = vld [vmem:[%s1188_s12 + $0x20] sm:$0xf]  ;;  %v990_v49 = vld [vmem:[%s1188_s12 + $0x28] sm:$0xf0] }
  0x3e   : > { %588 = vmatpush.bf16.msra.mxu0 %v995_v19  ;;  %1018 = vmatpush.bf16.msra.mxu3 %v995_v19  ;;  %v876_v50 = vor.u32 %v988_v46, %v873_v47  ;;  %v880_v51 = vor.u32 %v990_v49, %v879_v48  ;;  %v350_v62 = vld [vmem:[#allocation2] sm:$0xff]  ;;  %v352_v12 = vld [vmem:[#allocation2 + $0x8] sm:$0xff] }
  0x3f   : > { %607 = vmatpush.bf16.msra.mxu1 %v1003_v20 }
  0x40   : > { %626 = vmatpush.bf16.msra.mxu2 %v1011_v21 }
  0x42   : > { %589 = vmatpush.bf16.msra.mxu0 %v994_v22  ;;  %1019 = vmatpush.bf16.msra.mxu3 %v994_v22 }
  0x43   : > { %608 = vmatpush.bf16.msra.mxu1 %v1002_v23 }
  0x44   : > { %627 = vmatpush.bf16.msra.mxu2 %v1010_v24 }
  0x46   : > { %590 = vmatpush.bf16.msra.mxu0 %v993_v25  ;;  %1020 = vmatpush.bf16.msra.mxu3 %v993_v25 }
  0x47   : > { %609 = vmatpush.bf16.msra.mxu1 %v1001_v26 }
  0x48   : > { %628 = vmatpush.bf16.msra.mxu2 %v1009_v27 }
  0x4a   : > { %591 = vmatpush.bf16.msra.mxu0 %v992_v28  ;;  %1021 = vmatpush.bf16.msra.mxu3 %v992_v28 }
  0x4b   : > { %610 = vmatpush.bf16.msra.mxu1 %v1000_v29 }
  0x4c   : > { %629 = vmatpush.bf16.msra.mxu2 %v1008_v30 }
  0x4e   : > { %592 = vmatpush.bf16.msra.mxu0 %v991_v31  ;;  %1022 = vmatpush.bf16.msra.mxu3 %v991_v31 }
  0x4f   : > { %611 = vmatpush.bf16.msra.mxu1 %v999_v32 }
  0x50   : > { %630 = vmatpush.bf16.msra.mxu2 %v1007_v33 }
  0x51   : > { %593 = vmatmul.bf16.vlgmr.msra.gmra.mxu0 %v860_v42  ;;  %598 = vmatmul.bf16.vlgmr.msra.gmra.mxu3 %v872_v45 }
  0x52   : > { %612 = vmatmul.bf16.vlgmr.msra.gmra.mxu1 %v864_v43 }
  0x53   : > { %631 = vmatmul.bf16.vlgmr.msra.gmra.mxu2 %v868_v44 }
  0x62   : > { %617 = vmatmul.bf16.gmra.mxu1 %v876_v50 }
  0x63   : > { %636 = vmatmul.bf16.gmra.mxu2 %v880_v51 }
  0xce   : > { %v594_v53 = vpop.f32.mrf.mxu0 }
  0xcf   : > { %v613_v52 = vpop.f32.mrf.mxu1 }
  0xd0   : > { %v614_v54 = vadd.f32 %v613_v52, %v594_v53 }
  0xd4   : > { %v599_v3 = vpop.f32.mrf.mxu3 }
  0xd6   : > { %v632_v56 = vpop.f32.mrf.mxu2  ;;  %v596_v60 = vpop.f32.mrf.mxu0 }
  0xd7   : > { %v633_v57 = vadd.f32 %v632_v56, %v614_v54  ;;  %v615_v58 = vpop.f32.mrf.mxu1 }
  0xd8   : > { %v616_v61 = vadd.f32 %v615_v58, %v596_v60 }
  0xd9   : > { %v642_v59 = vadd.f32 %v633_v57, %v349_v55 }
  0xdb   : > { %646 = vst [vmem:[#allocation2 + $0x10] sm:$0xff] %v642_v59 }
  0xdc   : > { %v601_v10 = vpop.f32.mrf.mxu3 }
  0xde   : > { %v634_v63 = vpop.f32.mrf.mxu2 }
  0xdf   : > { %v635_v0 = vadd.f32 %v634_v63, %v616_v61  ;;  %v618_v1 = vpop.f32.mrf.mxu1 }
  0xe0   : > { %v619_v4 = vadd.f32 %v618_v1, %v599_v3 }
  0xe1   : > { %v643_v2 = vadd.f32 %v635_v0, %v350_v62 }
  0xe3   : > { %647 = vst [vmem:[#allocation2] sm:$0xff] %v643_v2 }
  0xe6   : > { %v637_v6 = vpop.f32.mrf.mxu2 }
  0xe7   : > { %v638_v7 = vadd.f32 %v637_v6, %v619_v4  ;;  %v620_v9 = vpop.f32.mrf.mxu1 }
  0xe8   : > { %v621_v11 = vadd.f32 %v620_v9, %v601_v10 }
  0xe9   : > { %v644_v8 = vadd.f32 %v638_v7, %v351_v5 }
  0xeb   : > { %648 = vst [vmem:[#allocation2 + $0x18] sm:$0xff] %v644_v8 }
  0xee   : > { %v639_v13 = vpop.f32.mrf.mxu2 }
  0xef   : > { %v640_v14 = vadd.f32 %v639_v13, %v621_v11  ;;  %653 = sbr.rel (%p977_p12) target bundleno = 273 (0x111), region = 70 }
  0xf1   : > { %v645_v15 = vadd.f32 %v640_v14, %v352_v12 }
  0xf3   : > { %649 = vst [vmem:[#allocation2 + $0x8] sm:$0xff] %v645_v15 }
  0xf4   : > { %v654_v16 = vld [vmem:[#allocation2 + $0x10] sm:$0xff]  ;;  %v1067_v17 = vld [vmem:[%s1271_s2] ss:$0 sm:$0xff]  ;;  %v656_v19 = vld [vmem:[#allocation2 + $0x18] sm:$0xff]  ;;  %vm692_vm0 = vcmask 1040384  }
  0xf5   : > { %v655_v18 = vld [vmem:[#allocation2] sm:$0xff]  ;;  %v662_v21 = vadd.f32 %v1067_v17, %v654_v16  ;;  %v664_v23 = vadd.f32 %v1067_v17, %v656_v19 }
  0xf6   : > { %v663_v22 = vadd.f32 %v1067_v17, %v655_v18  ;;  %v694_v47 = vld [vmem:[%s1273_s4] sm:$0x3] }
  0xf7   : > { %666 = vst [vmem:[%s1272_s3] sm:$0xff] %v662_v21  ;;  %v670_v25 = vmul.f32 %v662_v21, %v662_v21  ;;  %v672_v28 = vmul.f32 %v664_v23, %v664_v23 }
  0xf8   : > { %v671_v26 = vmul.f32 %v663_v22, %v663_v22  ;;  %v674_v27 = vadd.f32 %v663_v22, %v662_v21  ;;  %667 = vst [vmem:[%s1272_s3 + $0x8] sm:$0xff] %v663_v22 }
  0xf9   : > { %668 = vst [vmem:[%s1272_s3 + $0x10] sm:$0xff] %v664_v23 }
  0xfa   : > { %v657_v20 = vld [vmem:[#allocation2 + $0x8] sm:$0xff]  ;;  %v683_v29 = vadd.f32 %v671_v26, %v670_v25  ;;  %v675_v30 = vadd.f32 %v674_v27, %v664_v23 }
  0xfb   : > { %v665_v24 = vadd.f32 %v1067_v17, %v657_v20 }
  0xfc   : > { %v684_v32 = vadd.f32 %v683_v29, %v672_v28 }
  0xfd   : > { %v673_v31 = vmul.f32 %v665_v24, %v665_v24  ;;  %669 = vst [vmem:[%s1272_s3 + $0x18] sm:$0xff] %v665_v24  ;;  %v676_v33 = vadd.f32 %v675_v30, %v665_v24 }
  0xff   : > { %v677_v34 = vrot.slane %v676_v33, 4  ;;  %v685_v35 = vadd.f32 %v684_v32, %v673_v31 }
 0x101   : > { %v678_v36 = vadd.f32 %v677_v34, %v676_v33  ;;  %v686_v37 = vrot.slane %v685_v35, 4 }
 0x103   : > { %v679_v38 = vrot.slane %v678_v36, 2  ;;  %v687_v39 = vadd.f32 %v686_v37, %v685_v35 }
 0x105   : > { %v680_v40 = vadd.f32 %v679_v38, %v678_v36  ;;  %v688_v41 = vrot.slane %v687_v39, 2 }
 0x107   : > { %v681_v42 = vrot.slane %v680_v40, 1  ;;  %v689_v43 = vadd.f32 %v688_v41, %v687_v39 }
 0x109   : > { %v682_v44 = vadd.f32 %v681_v42, %v680_v40  ;;  %v690_v45 = vrot.slane %v689_v43, 1 }
 0x10b   : > { %v691_v46 = vadd.f32 %v690_v45, %v689_v43 }
 0x10d   : > { %v693_v48 = vsel %vm692_vm0, %v682_v44, %v691_v46 }
 0x10e   : > { %v695_v49 = vadd.f32 %v694_v47, %v693_v48 }
 0x110   : > { %696 = vst [vmem:[%s1273_s4] sm:$0x3] %v695_v49 }
 0x111 PF: > { %s15_s19 = sadd.s32 1, %s1106_s19   ;;  %s1274_s15 = smov %s1094_s16 }
 0x112   : > { %p12_p13 = scmp.ge.s32.totalorder %s15_s19, 5   ;;  %s1275_s16 = smov %s1170_s23 }
 0x113   : > { %s1276_s17 = smov %s1102_s18  ;;  %s1277_s18 = smov %s1279_s20 }
 0x114   :  { %14 = sbr.rel (!%p12_p13) target bundleno = 3 (0x3), region = 129 }

// kernel: forward.23
= control target key start
LH: loop header
LB: loop body
LE: loop exit
PB: predicated region body
PF: predicated region fallthrough
CT: control target
= control target key end

     0   :  { %s153_s1 = inlined_call_operand.vmem [shape: f32[2,128], index: 1, kind: input, shape index: {}]   ;;  %s154_s2 = inlined_call_operand.vmem [shape: f32[1,128], index: 2, kind: input, shape index: {}]   ;;  %s155_s3 = inlined_call_operand.vmem [shape: f32[1,128], index: 3, kind: input, shape index: {}]   ;;  %s156_s0 = inlined_call_operand.vmem [shape: f32[32,128], index: 0, kind: input, shape index: {}]   ;;  %s157_s4 = inlined_call_operand.vmem [shape: bf16[32,128], index: 4, kind: output, shape index: {}]  }
   0x1   :  { %v17_v0 = vld [vmem:[%s153_s1] sm:$0x3]  ;;  %v47_v21 = vld [vmem:[%s156_s0 + $0x8] sm:$0xff]  ;;  %v48_v22 = vld [vmem:[%s156_s0 + $0x10] sm:$0xff] }
   0x2   :  { %v18_v1 = vmul.f32 0.03125, %v17_v0  ;;  %v25_v14 = vld [vmem:[%s154_s2] sm:$0x1]  ;;  %v49_v23 = vld [vmem:[%s156_s0 + $0x18] sm:$0xff] }
   0x3   :  { %v43_v17 = vld [vmem:[%s155_s3] sm:$0x1] }
   0x4   :  { %v19_v2 = vmul.f32 %v18_v1, %v18_v1  ;;  %v46_v19 = vld [vmem:[%s156_s0] sm:$0xff] }
   0x6   :  { %v21_v3 = vrot.slane %v19_v2, 7 }
   0x8   :  { %v23_v4 = vsub.f32 %v18_v1, %v21_v3 }
   0xa   :  { %v24_v5 = vmax.f32 %v23_v4, 0.0 }
   0xc   :  { %v26_v6 = vadd.f32 1e-05, %v24_v5 }
   0xe   :  { %99 = vrsqrt.f32 %v26_v6  ;;  %vm33_vm0 = vweird.f32 %v26_v6 }
  0x14   :  { %v100_v7 = vpop.eup %99 }
  0x15   :  { %v28_v8 = vmul.f32 %v100_v7, %v26_v6  ;;  %vm34_vm1 = vweird.f32 %v100_v7 }
  0x16   :  { %vm35_vm2 = vmor %vm33_vm0, %vm34_vm1 }
  0x17   :  { %v29_v9 = vmul.f32 %v100_v7, %v28_v8 }
  0x19   :  { %v30_v10 = vmul.f32 0.5, %v29_v9 }
  0x1b   :  { %v31_v11 = vsub.f32 1.5, %v30_v10 }
  0x1d   :  { %v32_v12 = vmul.f32 %v100_v7, %v31_v11 }
  0x1f   :  { %v36_v13 = vsel %vm35_vm2, %v100_v7, %v32_v12 }
  0x20   :  { %38 = vst [vmem:[#allocation1] sm:$0xff] %v36_v13 }
  0x27   :  { %v40_v15 = vld [vmem:[#allocation1 + $0x1] ss:$9 sm:$0xff] }
  0x28   :  { %v42_v16 = vmul.f32 %v40_v15, %v25_v14 }
  0x2a   :  { %v44_v18 = vmul.f32 %v42_v16, %v18_v1  ;;  %v51_v20 = vperm.slane %v42_v16, 0 }
  0x2c   :  { %v45_v24 = vsub.f32 %v43_v17, %v44_v18  ;;  %v53_v25 = vmul.f32 %v51_v20, %v46_v19  ;;  %v54_v26 = vmul.f32 %v51_v20, %v47_v21  ;;  %v55_v28 = vmul.f32 %v51_v20, %v48_v22 }
  0x2d   :  { %v56_v29 = vmul.f32 %v51_v20, %v49_v23 }
  0x2e   :  { %v58_v27 = vperm.slane %v45_v24, 0 }
  0x30   :  { %v60_v30 = vadd.f32 %v58_v27, %v53_v25  ;;  %v61_v31 = vadd.f32 %v58_v27, %v54_v26  ;;  %v62_v32 = vadd.f32 %v58_v27, %v55_v28  ;;  %v63_v33 = vadd.f32 %v58_v27, %v56_v29 }
  0x32   :  { %vm64_vm3 = vcmp.gt.f32.partialorder %v60_v30, 0.0  ;;  %vm65_vm4 = vcmp.gt.f32.partialorder %v61_v31, 0.0  ;;  %v68_v34 = vmul.f32 0.2, %v60_v30  ;;  %v69_v35 = vmul.f32 0.2, %v61_v31 }
  0x33   :  { %vm66_vm5 = vcmp.gt.f32.partialorder %v62_v32, 0.0  ;;  %vm67_vm6 = vcmp.gt.f32.partialorder %v63_v33, 0.0  ;;  %v70_v36 = vmul.f32 0.2, %v62_v32  ;;  %v71_v37 = vmul.f32 0.2, %v63_v33 }
  0x34   :  { %v72_v38 = vsel %vm64_vm3, %v60_v30, %v68_v34  ;;  %v73_v39 = vsel %vm65_vm4, %v61_v31, %v69_v35 }
  0x35   :  { %v91_v40 = vpack.c.bf16 %v73_v39, %v72_v38  ;;  %v74_v41 = vsel %vm66_vm5, %v62_v32, %v70_v36  ;;  %v75_v42 = vsel %vm67_vm6, %v63_v33, %v71_v37 }
  0x36   :  { %v96_v43 = vpack.c.bf16 %v75_v42, %v74_v41 }
  0x37   :  { %92 = vst [vmem:[%s157_s4] sm:$0xff] %v91_v40  }
  0x38   :  { %98 = vst [vmem:[%s157_s4 + $0x8] sm:$0xff] %v96_v43  }

// kernel: forward.25
= control target key start
LH: loop header
LB: loop body
LE: loop exit
PB: predicated region body
PF: predicated region fallthrough
CT: control target
= control target key end

     0   :  { %v135_v14 = vmov 857870592   ;;  %vm55_vm3 = vcmask 1040384   ;;  %vm57_vm4 = vcmask 1042434   ;;  %vm59_vm5 = vcmask 1041408   ;;  %s206_s1 = inlined_call_operand.vmem [shape: f32[2,256], index: 1, kind: input, shape index: {}]   ;;  %s207_s2 = inlined_call_operand.vmem [shape: f32[1,256], index: 2, kind: input, shape index: {}]   ;;  %s208_s3 = inlined_call_operand.vmem [shape: f32[1,256], index: 3, kind: input, shape index: {}]   ;;  %s209_s0 = inlined_call_operand.vmem [shape: f32[32,256], index: 0, kind: input, shape index: {}]   ;;  %s210_s4 = inlined_call_operand.vmem [shape: bf16[32,256], index: 4, kind: output, shape index: {}]  }
   0x1   :  { %v17_v0 = vld [vmem:[%s206_s1] sm:$0xf]  ;;  %v46_v15 = vunpack.c.l.s4 %v135_v14  ;;  %v64_v31 = vld [vmem:[%s209_s0 + $0x8] sm:$0xff]  ;;  %v65_v33 = vld [vmem:[%s209_s0 + $0x10] sm:$0xff] }
   0x2   :  { %v18_v1 = vmul.f32 0.03125, %v17_v0  ;;  %v25_v16 = vld [vmem:[%s207_s2] sm:$0x3]  ;;  %v66_v34 = vld [vmem:[%s209_s0 + $0x18] sm:$0xff]  ;;  %v68_v37 = vld [vmem:[%s209_s0 + $0x28] sm:$0xff] }
   0x3   :  { %v47_v17 = vunpack.c.0.s8 %v46_v15  ;;  %v43_v25 = vld [vmem:[%s208_s3] sm:$0x3]  ;;  %v69_v38 = vld [vmem:[%s209_s0 + $0x30] sm:$0xff]  ;;  %v70_v39 = vld [vmem:[%s209_s0 + $0x38] sm:$0xff] }
   0x4   :  { %v19_v2 = vmul.f32 %v18_v1, %v18_v1  ;;  %v63_v30 = vld [vmem:[%s209_s0] sm:$0xff] }
   0x5   :  { %v67_v35 = vld [vmem:[%s209_s0 + $0x20] sm:$0xff] }
   0x6   :  { %v21_v3 = vrot.slane %v19_v2, 7 }
   0x8   :  { %v23_v4 = vsub.f32 %v18_v1, %v21_v3 }
   0xa   :  { %v24_v5 = vmax.f32 %v23_v4, 0.0 }
   0xc   :  { %v26_v6 = vadd.f32 1e-05, %v24_v5 }
   0xe   :  { %133 = vrsqrt.f32 %v26_v6  ;;  %vm33_vm0 = vweird.f32 %v26_v6 }
  0x14   :  { %v134_v7 = vpop.eup %133 }
  0x15   :  { %v28_v8 = vmul.f32 %v134_v7, %v26_v6  ;;  %vm34_vm1 = vweird.f32 %v134_v7 }
  0x16   :  { %vm35_vm2 = vmor %vm33_vm0, %vm34_vm1 }
  0x17   :  { %v29_v9 = vmul.f32 %v134_v7, %v28_v8 }
  0x19   :  { %v30_v10 = vmul.f32 0.5, %v29_v9 }
  0x1b   :  { %v31_v11 = vsub.f32 1.5, %v30_v10 }
  0x1d   :  { %v32_v12 = vmul.f32 %v134_v7, %v31_v11 }
  0x1f   :  { %v36_v13 = vsel %vm35_vm2, %v134_v7, %v32_v12 }
  0x20   :  { %38 = vst [vmem:[#allocation1] sm:$0xff] %v36_v13 }
  0x27   :  { %v40_v18 = vld [vmem:[#allocation1 + $0x1] ss:$2 sm:$0xff] }
  0x28   :  { %v42_v19 = vmul.f32 %v40_v18, %v25_v16 }
  0x2a   :  { %v48_v20 = vperm.slane %v42_v19, %v47_v17  ;;  %v71_v26 = vperm.slane %v42_v19, 0  ;;  %v72_v27 = vperm.slane %v42_v19, 1 }
  0x2c   :  { %v50_v21 = vmul.f32 %v48_v20, %v18_v1  ;;  %v75_v40 = vmul.f32 %v71_v26, %v63_v30  ;;  %v76_v41 = vmul.f32 %v72_v27, %v64_v31  ;;  %v77_v44 = vmul.f32 %v71_v26, %v65_v33 }
  0x2d   :  { %v78_v45 = vmul.f32 %v72_v27, %v66_v34  ;;  %v79_v46 = vmul.f32 %v71_v26, %v67_v35  ;;  %v80_v47 = vmul.f32 %v72_v27, %v68_v37  ;;  %v81_v48 = vmul.f32 %v71_v26, %v69_v38 }
  0x2e   :  { %v52_v22 = vrot.slane %v50_v21, 1  ;;  %v53_v23 = vrot.slane %v50_v21, 2  ;;  %v54_v24 = vrot.slane %v50_v21, 3  ;;  %v82_v49 = vmul.f32 %v72_v27, %v70_v39 }
  0x30   :  { %v56_v28 = vsel %vm55_vm3, %v50_v21, %v52_v22  ;;  %v58_v29 = vsel %vm57_vm4, %v53_v23, %v54_v24 }
  0x31   :  { %v60_v32 = vsel %vm59_vm5, %v56_v28, %v58_v29 }
  0x32   :  { %v62_v36 = vsub.f32 %v43_v25, %v60_v32 }
  0x34   :  { %v84_v42 = vperm.slane %v62_v36, 0  ;;  %v85_v43 = vperm.slane %v62_v36, 1 }
  0x36   :  { %v88_v50 = vadd.f32 %v84_v42, %v75_v40  ;;  %v89_v51 = vadd.f32 %v85_v43, %v76_v41  ;;  %v90_v52 = vadd.f32 %v84_v42, %v77_v44  ;;  %v91_v53 = vadd.f32 %v85_v43, %v78_v45 }
  0x37   :  { %v92_v54 = vadd.f32 %v84_v42, %v79_v46  ;;  %v93_v55 = vadd.f32 %v85_v43, %v80_v47  ;;  %v94_v56 = vadd.f32 %v84_v42, %v81_v48  ;;  %v95_v57 = vadd.f32 %v85_v43, %v82_v49 }
  0x38   :  { %vm96_vm6 = vcmp.gt.f32.partialorder %v88_v50, 0.0  ;;  %vm97_vm7 = vcmp.gt.f32.partialorder %v89_v51, 0.0  ;;  %v104_v58 = vmul.f32 0.2, %v88_v50  ;;  %v105_v59 = vmul.f32 0.2, %v89_v51 }
  0x39   :  { %vm98_vm8 = vcmp.gt.f32.partialorder %v90_v52, 0.0  ;;  %vm99_vm9 = vcmp.gt.f32.partialorder %v91_v53, 0.0  ;;  %v106_v60 = vmul.f32 0.2, %v90_v52  ;;  %v107_v61 = vmul.f32 0.2, %v91_v53 }
  0x3a   :  { %v112_v62 = vsel %vm96_vm6, %v88_v50, %v104_v58  ;;  %v113_v63 = vsel %vm97_vm7, %v89_v51, %v105_v59  ;;  %vm100_vm10 = vcmp.gt.f32.partialorder %v92_v54, 0.0  ;;  %vm101_vm11 = vcmp.gt.f32.partialorder %v93_v55, 0.0 }
  0x3b   :  { %v120_v0 = vpack.c.bf16 %v113_v63, %v112_v62  ;;  %v114_v1 = vsel %vm98_vm8, %v90_v52, %v106_v60  ;;  %v115_v2 = vsel %vm99_vm9, %v91_v53, %v107_v61  ;;  %v108_v3 = vmul.f32 0.2, %v92_v54 }
  0x3c   :  { %v121_v4 = vpack.c.bf16 %v115_v2, %v114_v1  ;;  %v109_v5 = vmul.f32 0.2, %v93_v55  ;;  %vm102_vm12 = vcmp.gt.f32.partialorder %v94_v56, 0.0  ;;  %vm103_vm13 = vcmp.gt.f32.partialorder %v95_v57, 0.0 }
  0x3d   :  { %124 = vst [vmem:[%s210_s4] sm:$0xff] %v120_v0  ;;  %v116_v6 = vsel %vm100_vm10, %v92_v54, %v108_v3  ;;  %v110_v7 = vmul.f32 0.2, %v94_v56  ;;  %v111_v8 = vmul.f32 0.2, %v95_v57 }
  0x3e   :  { %125 = vst [vmem:[%s210_s4 + $0x8] sm:$0xff] %v121_v4  ;;  %v117_v9 = vsel %vm101_vm11, %v93_v55, %v109_v5 }
  0x3f   :  { %v122_v10 = vpack.c.bf16 %v117_v9, %v116_v6  ;;  %v118_v11 = vsel %vm102_vm12, %v94_v56, %v110_v7  ;;  %v119_v12 = vsel %vm103_vm13, %v95_v57, %v111_v8 }
  0x40   :  { %v123_v13 = vpack.c.bf16 %v119_v12, %v118_v11 }
  0x41   :  { %126 = vst [vmem:[%s210_s4 + $0x10] sm:$0xff] %v122_v10 }
  0x42   :  { %127 = vst [vmem:[%s210_s4 + $0x18] sm:$0xff] %v123_v13 }

// kernel: forward.24
= control target key start
LH: loop header
LB: loop body
LE: loop exit
PB: predicated region body
PF: predicated region fallthrough
CT: control target
= control target key end

     0   :  { %s1513_s15 = smov 0   ;;  %s1515_s16 = smov 0   ;;  %s1739_s0 = inlined_call_operand.vmem [shape: bf16[32,1152], index: 0, kind: input, shape index: {}]   ;;  %s1740_s1 = inlined_call_operand.vmem [shape: bf16[1152,256], index: 1, kind: input, shape index: {}]   ;;  %s1741_s2 = inlined_call_operand.vmem [shape: f32[1,256], index: 2, kind: input, shape index: {}]   ;;  %s1742_s3 = inlined_call_operand.vmem [shape: f32[32,256], index: 3, kind: output, shape index: {0}]   ;;  %s1743_s4 = inlined_call_operand.vmem [shape: f32[2,256], index: 4, kind: output, shape index: {1}]  }
   0x1   :  { %s1517_s17 = smov 0   ;;  %s1519_s18 = smov 0  }
   0x2   :  { %s1521_s19 = smov 0  }
   0x3 LB: > { %s27_s20 = sadd.s32 1, %s1480_s18  ;;  %p50_p1 = scmp.ne.s32.totalorder %s1472_s16, %s1468_s15  ;;  %s1484_s19 = sphi %s1521_s19, %s15_s19   ;;  %s1480_s18 = sphi %s1519_s18, %s1747_s18   ;;  %s1476_s17 = sphi %s1517_s17, %s1746_s17   ;;  %s1472_s16 = sphi %s1515_s16, %s1745_s16   ;;  %s1468_s15 = sphi %s1513_s15, %s1744_s15  }
   0x4   : > { %p28_p0 = scmp.ge.s32.totalorder %s27_s20, 3  ;;  %p51_p2 = scmp.eq.s32.totalorder %s1484_s19, 0 }
   0x5   : > { %s43_s22 = sadd.s32 1, %s1472_s16  ;;  %p1091_p5 = scmp.ge.s32.totalorder %s1484_s19, 3 }
   0x6   : > { %s1749_s20 = smov (%p28_p0, %s27_s20), 0  ;;  %p52_p3 = por %p51_p2, %p50_p1 }
   0x7   : > { %s39_s21 = ssub.s32 %s1480_s18, %s1749_s20  ;;  %192 = sbr.rel (%p1091_p5) target bundleno = 25 (0x19), region = 20 }
   0x8   : > { %p41_p4 = scmp.eq.s32.totalorder %s39_s21, 0 }
   0xa   : > { %s1548_s23 = scalar_select %p41_p4, %s1472_s16, %s43_s22  }
   0xc   : > { %195 = sbr.rel (!%p52_p3) target bundleno = 25 (0x19), region = 24  ;;  %s197_s24 = sand.u32 (%p52_p3), 1, %s1472_s16  }
   0xd   : > { %s1329_s25 = smul.u32 (%p52_p3), 12, %s1480_s18 }
   0xe   : > { %s1402_s26 = smul.u32 (%p52_p3), 48, %s197_s24 }
   0xf   : > { %s205_s29 = scalar_lea.vmem (%p52_p3), %s1739_s0, %s1329_s25 }
  0x10   : > { %v220_v0 = vld [vmem:[%s205_s29] sm:$0xff] (%p52_p3)  ;;  %v224_v2 = vld [vmem:[%s205_s29 + $0x48] sm:$0xff] (%p52_p3)  ;;  %s199_s30 = scalar_lea.vmem (%p52_p3), [#allocation3], %s1402_s26  ;;  %v1097_v6 = vld [vmem:[%s205_s29 + $0x50] sm:$0xf] (%p52_p3) }
  0x11   : > { %v222_v1 = vld [vmem:[%s205_s29 + $0x24] sm:$0xff]  ;;  %221 = vst [vmem:[%s199_s30] sm:$0xff] %v220_v0  ;;  %v226_v3 = vld [vmem:[%s205_s29 + $0x6c] sm:$0xff]  ;;  %v1099_v7 = vld [vmem:[%s205_s29 + $0x74] sm:$0xf] }
  0x12   : > { %223 = vst [vmem:[%s199_s30 + $0xc] sm:$0xff] %v222_v1  ;;  %v1093_v4 = vld [vmem:[%s205_s29 + $0x8] sm:$0xf]  ;;  %v1095_v5 = vld [vmem:[%s205_s29 + $0x2c] sm:$0xf] }
  0x13   : > { %225 = vst [vmem:[%s199_s30 + $0x18] sm:$0xff] %v224_v2 }
  0x14   : > { %227 = vst [vmem:[%s199_s30 + $0x24] sm:$0xff] %v226_v3 }
  0x15   : > { %1094 = vst [vmem:[%s199_s30 + $0x8] sm:$0xf] %v1093_v4 }
  0x16   : > { %1096 = vst [vmem:[%s199_s30 + $0x14] sm:$0xf] %v1095_v5 }
  0x17   : > { %1098 = vst [vmem:[%s199_s30 + $0x20] sm:$0xf] %v1097_v6 }
  0x18   : > { %1100 = vst [vmem:[%s199_s30 + $0x2c] sm:$0xf] %v1099_v7 }
  0x19 PF: > { %p1101_p6 = scmp.ge.s32.totalorder %s1484_s19, 1  ;;  %p263_p7 = scmp.lt.s32.totalorder %s1484_s19, 4 }
  0x1b   : > { %p264_p8 = pnand %p1101_p6, %p263_p7 }
  0x1c   : > { %s270_s5 = sand.u32 (!%p264_p8), 1, %s1468_s15   ;;  %s321_s6 = smul.u32 (!%p264_p8), 48, %s1476_s17 }
  0x1d   : > { %267 = sbr.rel (%p264_p8) target bundleno = 301 (0x12d), region = 54  ;;  %p356_p9 = scmp.eq.s32.totalorder (!%p264_p8), %s1476_s17, 0 }
  0x1e   : > { %s1403_s7 = smul.u32 (!%p264_p8), 48, %s270_s5  ;;  %p323_p10 = scmp.lt.s32.totalorder (!%p264_p8), %s321_s6, 143 }
  0x1f   : > { %p1104_p11 = scmp.ne.s32.totalorder (!%p264_p8), %s1476_s17, 0 }
  0x20   : > { %s1566_s12 = scalar_lea.vmem (!%p264_p8), [#allocation3], %s1403_s7 }
  0x22   : > { %s1751_s6 = smov (!%p323_p10, %s321_s6), 143  ;;  %359 = sbr.rel (%p1104_p11) target bundleno = 48 (0x30), region = 62 }
  0x23   : > { %s1330_s8 = sshll.u32 %s1751_s6, 3 }
  0x24   : > { %s1564_s11 = scalar_lea.vmem %s1740_s1, %s1330_s8 }
  0x27   : > { %v1486_v8 = vmov 0.0  }
  0x28   : > { %360 = vst [vmem:[#allocation2 + $0x30] sm:$0xff] %v1486_v8 }
  0x29   : > { %361 = vst [vmem:[#allocation2] sm:$0xff] %v1486_v8 }
  0x2a   : > { %362 = vst [vmem:[#allocation2 + $0x18] sm:$0xff] %v1486_v8 }
  0x2b   : > { %363 = vst [vmem:[#allocation2 + $0x10] sm:$0xff] %v1486_v8 }
  0x2c   : > { %364 = vst [vmem:[#allocation2 + $0x8] sm:$0xff] %v1486_v8 }
  0x2d   : > { %365 = vst [vmem:[#allocation2 + $0x20] sm:$0xff] %v1486_v8 }
  0x2e   : > { %366 = vst [vmem:[#allocation2 + $0x28] sm:$0xff] %v1486_v8 }
  0x2f   : > { %367 = vst [vmem:[#allocation2 + $0x38] sm:$0xff] %v1486_v8 }
  0x30 PF: > { %372 = sbr.rel (!%p356_p9) target bundleno = 53 (0x35), region = 66  ;;  %v1487_v9 = vmov (%p356_p9), 0.0  }
  0x31   : > { %373 = vst [vmem:[%s1743_s4] sm:$0xf] (%p356_p9), %v1487_v9 }
  0x35 PF: > { %v1188_v10 = vld [vmem:[%s1564_s11 + $0x70] sm:$0xf]  ;;  %v1353_v11 = vld [vmem:[%s1564_s11 + $0x74] sm:$0xf0]  ;;  %v1352_v19 = vld [vmem:[%s1564_s11 + $0x74] sm:$0xf] }
  0x36   : > { %v1252_v12 = vld [vmem:[%s1564_s11 + $0xf0] sm:$0xf]  ;;  %v1189_v13 = vor.u32 %v1353_v11, %v1188_v10  ;;  %v1369_v14 = vld [vmem:[%s1564_s11 + $0xf4] sm:$0xf0]  ;;  %v1190_v20 = vld [vmem:[%s1564_s11 + $0x78] sm:$0xf0] }
  0x37   : > { %v1316_v15 = vld [vmem:[%s1564_s11 + $0x170] sm:$0xf]  ;;  %v1385_v16 = vld [vmem:[%s1564_s11 + $0x174] sm:$0xf0]  ;;  %v1253_v17 = vor.u32 %v1369_v14, %v1252_v12  ;;  %v1180_v21 = vld [vmem:[%s1564_s11 + $0x60] sm:$0xf]  ;;  %v1193_v22 = vor.u32 %v1352_v19, %v1190_v20 }
  0x38   : > { %v1317_v18 = vor.u32 %v1385_v16, %v1316_v15  ;;  %710 = vmatpush.bf16.msra.mxu0 %v1189_v13  ;;  %v1351_v23 = vld [vmem:[%s1564_s11 + $0x64] sm:$0xf0]  ;;  %v1244_v24 = vld [vmem:[%s1564_s11 + $0xe0] sm:$0xf]  ;;  %v1350_v30 = vld [vmem:[%s1564_s11 + $0x64] sm:$0xf] }
  0x39   : > { %v1367_v25 = vld [vmem:[%s1564_s11 + $0xe4] sm:$0xf0]  ;;  %729 = vmatpush.bf16.msra.mxu1 %v1253_v17  ;;  %v1181_v26 = vor.u32 %v1351_v23, %v1180_v21  ;;  %v1308_v28 = vld [vmem:[%s1564_s11 + $0x160] sm:$0xf]  ;;  %767 = vmatpush.bf16.msra.mxu3 %v1193_v22  ;;  %v1182_v32 = vld [vmem:[%s1564_s11 + $0x68] sm:$0xf0] }
  0x3a   : > { %748 = vmatpush.bf16.msra.mxu2 %v1317_v18  ;;  %v1245_v27 = vor.u32 %v1367_v25, %v1244_v24  ;;  %v1383_v29 = vld [vmem:[%s1564_s11 + $0x164] sm:$0xf0]  ;;  %v1172_v33 = vld [vmem:[%s1564_s11 + $0x50] sm:$0xf]  ;;  %v1349_v34 = vld [vmem:[%s1564_s11 + $0x54] sm:$0xf0]  ;;  %v1185_v35 = vor.u32 %v1350_v30, %v1182_v32 }
  0x3b   : > { %v1309_v31 = vor.u32 %v1383_v29, %v1308_v28  ;;  %v1236_v36 = vld [vmem:[%s1564_s11 + $0xd0] sm:$0xf]  ;;  %v1365_v37 = vld [vmem:[%s1564_s11 + $0xd4] sm:$0xf0]  ;;  %v1173_v39 = vor.u32 %v1349_v34, %v1172_v33  ;;  %v1348_v41 = vld [vmem:[%s1564_s11 + $0x54] sm:$0xf] }
  0x3c   : > { %v1300_v38 = vld [vmem:[%s1564_s11 + $0x150] sm:$0xf]  ;;  %711 = vmatpush.bf16.msra.mxu0 %v1181_v26  ;;  %v1381_v40 = vld [vmem:[%s1564_s11 + $0x154] sm:$0xf0]  ;;  %v1174_v42 = vld [vmem:[%s1564_s11 + $0x58] sm:$0xf0]  ;;  %v1237_v43 = vor.u32 %v1365_v37, %v1236_v36 }
  0x3d   : > { %730 = vmatpush.bf16.msra.mxu1 %v1245_v27  ;;  %v1301_v44 = vor.u32 %v1381_v40, %v1300_v38  ;;  %v1164_v45 = vld [vmem:[%s1564_s11 + $0x40] sm:$0xf]  ;;  %v1347_v46 = vld [vmem:[%s1564_s11 + $0x44] sm:$0xf0]  ;;  %768 = vmatpush.bf16.msra.mxu3 %v1185_v35  ;;  %v1177_v48 = vor.u32 %v1348_v41, %v1174_v42  ;;  %v1346_v52 = vld [vmem:[%s1564_s11 + $0x44] sm:$0xf] }
  0x3e   : > { %749 = vmatpush.bf16.msra.mxu2 %v1309_v31  ;;  %v1228_v47 = vld [vmem:[%s1564_s11 + $0xc0] sm:$0xf]  ;;  %v1363_v49 = vld [vmem:[%s1564_s11 + $0xc4] sm:$0xf0]  ;;  %v1166_v53 = vld [vmem:[%s1564_s11 + $0x48] sm:$0xf0]  ;;  %v1165_v54 = vor.u32 %v1347_v46, %v1164_v45 }
  0x3f   : > { %v1292_v50 = vld [vmem:[%s1564_s11 + $0x140] sm:$0xf]  ;;  %v1379_v51 = vld [vmem:[%s1564_s11 + $0x144] sm:$0xf0]  ;;  %v1229_v55 = vor.u32 %v1363_v49, %v1228_v47  ;;  %v1156_v57 = vld [vmem:[%s1564_s11 + $0x30] sm:$0xf]  ;;  %v1169_v60 = vor.u32 %v1346_v52, %v1166_v53 }
  0x40   : > { %712 = vmatpush.bf16.msra.mxu0 %v1173_v39  ;;  %v1293_v56 = vor.u32 %v1379_v51, %v1292_v50  ;;  %v1345_v58 = vld [vmem:[%s1564_s11 + $0x34] sm:$0xf0]  ;;  %v1220_v59 = vld [vmem:[%s1564_s11 + $0xb0] sm:$0xf]  ;;  %v1344_v0 = vld [vmem:[%s1564_s11 + $0x34] sm:$0xf] }
  0x41   : > { %731 = vmatpush.bf16.msra.mxu1 %v1237_v43  ;;  %769 = vmatpush.bf16.msra.mxu3 %v1177_v48  ;;  %v1361_v61 = vld [vmem:[%s1564_s11 + $0xb4] sm:$0xf0]  ;;  %v1284_v62 = vld [vmem:[%s1564_s11 + $0x130] sm:$0xf]  ;;  %v1158_v1 = vld [vmem:[%s1564_s11 + $0x38] sm:$0xf0]  ;;  %v1157_v2 = vor.u32 %v1345_v58, %v1156_v57 }
  0x42   : > { %750 = vmatpush.bf16.msra.mxu2 %v1301_v44  ;;  %v1377_v63 = vld [vmem:[%s1564_s11 + $0x134] sm:$0xf0]  ;;  %v1221_v3 = vor.u32 %v1361_v61, %v1220_v59  ;;  %v1148_v5 = vld [vmem:[%s1564_s11 + $0x20] sm:$0xf]  ;;  %v1343_v6 = vld [vmem:[%s1564_s11 + $0x24] sm:$0xf0]  ;;  %v1161_v8 = vor.u32 %v1344_v0, %v1158_v1 }
  0x43   : > { %v1285_v4 = vor.u32 %v1377_v63, %v1284_v62  ;;  %v1212_v7 = vld [vmem:[%s1564_s11 + $0xa0] sm:$0xf]  ;;  %v1359_v9 = vld [vmem:[%s1564_s11 + $0xa4] sm:$0xf0]  ;;  %v1342_v12 = vld [vmem:[%s1564_s11 + $0x24] sm:$0xf]  ;;  %v1149_v14 = vor.u32 %v1343_v6, %v1148_v5 }
  0x44   : > { %713 = vmatpush.bf16.msra.mxu0 %v1165_v54  ;;  %v1276_v10 = vld [vmem:[%s1564_s11 + $0x120] sm:$0xf]  ;;  %v1375_v11 = vld [vmem:[%s1564_s11 + $0x124] sm:$0xf0]  ;;  %v1150_v13 = vld [vmem:[%s1564_s11 + $0x28] sm:$0xf0]  ;;  %v1213_v15 = vor.u32 %v1359_v9, %v1212_v7 }
  0x45   : > { %732 = vmatpush.bf16.msra.mxu1 %v1229_v55  ;;  %770 = vmatpush.bf16.msra.mxu3 %v1169_v60  ;;  %v1277_v16 = vor.u32 %v1375_v11, %v1276_v10  ;;  %v1140_v17 = vld [vmem:[%s1564_s11 + $0x10] sm:$0xf]  ;;  %v1341_v18 = vld [vmem:[%s1564_s11 + $0x14] sm:$0xf0]  ;;  %v1153_v20 = vor.u32 %v1342_v12, %v1150_v13  ;;  %v1340_v24 = vld [vmem:[%s1564_s11 + $0x14] sm:$0xf] }
  0x46   : > { %751 = vmatpush.bf16.msra.mxu2 %v1293_v56  ;;  %v1204_v19 = vld [vmem:[%s1564_s11 + $0x90] sm:$0xf]  ;;  %v1357_v21 = vld [vmem:[%s1564_s11 + $0x94] sm:$0xf0]  ;;  %v1142_v25 = vld [vmem:[%s1564_s11 + $0x18] sm:$0xf0]  ;;  %v1141_v26 = vor.u32 %v1341_v18, %v1140_v17 }
  0x47   : > { %v1268_v22 = vld [vmem:[%s1564_s11 + $0x110] sm:$0xf]  ;;  %v1373_v23 = vld [vmem:[%s1564_s11 + $0x114] sm:$0xf0]  ;;  %v1132_v27 = vld [vmem:[%s1564_s11] sm:$0xf]  ;;  %v1205_v30 = vor.u32 %v1357_v21, %v1204_v19  ;;  %v1145_v35 = vor.u32 %v1340_v24, %v1142_v25 }
  0x48   : > { %714 = vmatpush.bf16.msra.mxu0 %v1157_v2  ;;  %v1339_v28 = vld [vmem:[%s1564_s11 + $0x4] sm:$0xf0]  ;;  %v1196_v29 = vld [vmem:[%s1564_s11 + $0x80] sm:$0xf]  ;;  %v1269_v31 = vor.u32 %v1373_v23, %v1268_v22  ;;  %v1338_v36 = vld [vmem:[%s1564_s11 + $0x4] sm:$0xf] }
  0x49   : > { %733 = vmatpush.bf16.msra.mxu1 %v1221_v3  ;;  %771 = vmatpush.bf16.msra.mxu3 %v1161_v8  ;;  %v1355_v32 = vld [vmem:[%s1564_s11 + $0x84] sm:$0xf0]  ;;  %v1260_v33 = vld [vmem:[%s1564_s11 + $0x100] sm:$0xf]  ;;  %v1134_v37 = vld [vmem:[%s1564_s11 + $0x8] sm:$0xf0]  ;;  %v1133_v42 = vor.u32 %v1339_v28, %v1132_v27 }
  0x4a   : > { %752 = vmatpush.bf16.msra.mxu2 %v1285_v4  ;;  %v1371_v34 = vld [vmem:[%s1564_s11 + $0x104] sm:$0xf0]  ;;  %v1108_v38 = vld [vmem:[%s1566_s12] sm:$0xf]  ;;  %v1333_v39 = vld [vmem:[%s1566_s12 + $0x8] sm:$0xf0]  ;;  %v1197_v46 = vor.u32 %v1355_v32, %v1196_v29  ;;  %v1137_v51 = vor.u32 %v1338_v36, %v1134_v37 }
  0x4b   : > { %v1368_v40 = vld [vmem:[%s1564_s11 + $0xf4] sm:$0xf]  ;;  %v1254_v41 = vld [vmem:[%s1564_s11 + $0xf8] sm:$0xf0]  ;;  %v1261_v47 = vor.u32 %v1371_v34, %v1260_v33  ;;  %v1110_v48 = vld [vmem:[%s1566_s12 + $0xc] sm:$0xf0]  ;;  %v1109_v53 = vor.u32 %v1333_v39, %v1108_v38 }
  0x4c   : > { %715 = vmatpush.bf16.msra.mxu0 %v1149_v14  ;;  %v1332_v43 = vld [vmem:[%s1566_s12 + $0x4] sm:$0xf]  ;;  %v1318_v45 = vld [vmem:[%s1564_s11 + $0x178] sm:$0xf0]  ;;  %v1116_v49 = vld [vmem:[%s1566_s12 + $0x8] sm:$0xf]  ;;  %v1257_v52 = vor.u32 %v1368_v40, %v1254_v41 }
  0x4d   : > { %734 = vmatpush.bf16.msra.mxu1 %v1213_v15  ;;  %772 = vmatpush.bf16.msra.mxu3 %v1153_v20  ;;  %v1384_v44 = vld [vmem:[%s1564_s11 + $0x174] sm:$0xf]  ;;  %v1366_v55 = vld [vmem:[%s1564_s11 + $0xe4] sm:$0xf]  ;;  %v1246_v56 = vld [vmem:[%s1564_s11 + $0xe8] sm:$0xf0]  ;;  %v1650_v57 = vor.u32 %v1332_v43, %v1110_v48 }
  0x4e   : > { %753 = vmatpush.bf16.msra.mxu2 %v1277_v16  ;;  %v1334_v50 = vld [vmem:[%s1566_s12 + $0x10] sm:$0xf0]  ;;  %v1321_v54 = vor.u32 %v1384_v44, %v1318_v45  ;;  %v1310_v60 = vld [vmem:[%s1564_s11 + $0x168] sm:$0xf0]  ;;  %v1249_v61 = vor.u32 %v1366_v55, %v1246_v56  ;;  %v1238_v0 = vld [vmem:[%s1564_s11 + $0xd8] sm:$0xf0] }
  0x4f   : > { %v1652_v58 = vor.u32 %v1334_v50, %v1116_v49  ;;  %v1382_v59 = vld [vmem:[%s1564_s11 + $0x164] sm:$0xf]  ;;  %v1364_v63 = vld [vmem:[%s1564_s11 + $0xd4] sm:$0xf]  ;;  %v1302_v2 = vld [vmem:[%s1564_s11 + $0x158] sm:$0xf0] }
  0x50   : > { %716 = vmatpush.bf16.msra.mxu0 %v1141_v26  ;;  %v1313_v62 = vor.u32 %v1382_v59, %v1310_v60  ;;  %v1380_v1 = vld [vmem:[%s1564_s11 + $0x154] sm:$0xf]  ;;  %v1241_v3 = vor.u32 %v1364_v63, %v1238_v0  ;;  %v1362_v5 = vld [vmem:[%s1564_s11 + $0xc4] sm:$0xf]  ;;  %v1230_v6 = vld [vmem:[%s1564_s11 + $0xc8] sm:$0xf0] }
  0x51   : > { %735 = vmatpush.bf16.msra.mxu1 %v1205_v30  ;;  %773 = vmatpush.bf16.msra.mxu3 %v1145_v35  ;;  %v1305_v4 = vor.u32 %v1380_v1, %v1302_v2  ;;  %v1378_v7 = vld [vmem:[%s1564_s11 + $0x144] sm:$0xf]  ;;  %v1294_v8 = vld [vmem:[%s1564_s11 + $0x148] sm:$0xf0]  ;;  %v1233_v9 = vor.u32 %v1362_v5, %v1230_v6  ;;  %v1120_v10 = vld [vmem:[%s1566_s12 + $0x18] sm:$0xf] }
  0x52   : > { %754 = vmatpush.bf16.msra.mxu2 %v1269_v31  ;;  %v1297_v11 = vor.u32 %v1378_v7, %v1294_v8  ;;  %v1336_v12 = vld [vmem:[%s1566_s12 + $0x20] sm:$0xf0]  ;;  %v1222_v14 = vld [vmem:[%s1564_s11 + $0xb8] sm:$0xf0]  ;;  %v1122_v18 = vld [vmem:[%s1566_s12 + $0x24] sm:$0xf0] }
  0x53   : > { %v1360_v13 = vld [vmem:[%s1564_s11 + $0xb4] sm:$0xf]  ;;  %v1335_v15 = vld [vmem:[%s1566_s12 + $0x1c] sm:$0xf]  ;;  %v1128_v19 = vld [vmem:[%s1566_s12 + $0x20] sm:$0xf]  ;;  %v1121_v22 = vor.u32 %v1336_v12, %v1120_v10 }
  0x54   : > { %717 = vmatpush.bf16.msra.mxu0 %v1133_v42  ;;  %v1376_v16 = vld [vmem:[%s1564_s11 + $0x134] sm:$0xf]  ;;  %v1286_v17 = vld [vmem:[%s1564_s11 + $0x138] sm:$0xf0]  ;;  %v1225_v21 = vor.u32 %v1360_v13, %v1222_v14  ;;  %v1358_v24 = vld [vmem:[%s1564_s11 + $0xa4] sm:$0xf]  ;;  %v1125_v26 = vor.u32 %v1335_v15, %v1122_v18 }
  0x55   : > { %736 = vmatpush.bf16.msra.mxu1 %v1197_v46  ;;  %774 = vmatpush.bf16.msra.mxu3 %v1137_v51  ;;  %v1337_v20 = vld [vmem:[%s1566_s12 + $0x28] sm:$0xf0]  ;;  %v1289_v23 = vor.u32 %v1376_v16, %v1286_v17  ;;  %v1374_v28 = vld [vmem:[%s1564_s11 + $0x124] sm:$0xf]  ;;  %v1356_v32 = vld [vmem:[%s1564_s11 + $0x94] sm:$0xf] }
  0x56   : > { %755 = vmatpush.bf16.msra.mxu2 %v1261_v47  ;;  %v1214_v25 = vld [vmem:[%s1564_s11 + $0xa8] sm:$0xf0]  ;;  %v1129_v27 = vor.u32 %v1337_v20, %v1128_v19  ;;  %v1206_v33 = vld [vmem:[%s1564_s11 + $0x98] sm:$0xf0]  ;;  %v1372_v34 = vld [vmem:[%s1564_s11 + $0x114] sm:$0xf] }
  0x57   : > { %718 = vmatmul.bf16.vlgmr.msra.gmra.mxu0 %v1109_v53  ;;  %v1278_v29 = vld [vmem:[%s1564_s11 + $0x128] sm:$0xf0]  ;;  %v1217_v30 = vor.u32 %v1358_v24, %v1214_v25  ;;  %v1270_v35 = vld [vmem:[%s1564_s11 + $0x118] sm:$0xf0]  ;;  %v1209_v36 = vor.u32 %v1356_v32, %v1206_v33  ;;  %v1354_v38 = vld [vmem:[%s1564_s11 + $0x84] sm:$0xf] }
  0x58   : > { %737 = vmatmul.bf16.vlgmr.msra.gmra.mxu1 %v1650_v57  ;;  %775 = vmatmul.bf16.vlgmr.msra.gmra.mxu3 %v1109_v53  ;;  %v1281_v31 = vor.u32 %v1374_v28, %v1278_v29  ;;  %v1273_v37 = vor.u32 %v1372_v34, %v1270_v35  ;;  %v1198_v39 = vld [vmem:[%s1564_s11 + $0x88] sm:$0xf0]  ;;  %v1370_v40 = vld [vmem:[%s1564_s11 + $0x104] sm:$0xf]  ;;  %v374_v47 = vld [vmem:[#allocation2 + $0x30] sm:$0xff]  ;;  %p1322_p12 = scmp.ne.s32.totalorder %s1476_s17, 2 }
  0x59   : > { %805 = vmatpush.bf16.msrb.mxu1 %v1321_v54  ;;  %756 = vmatmul.bf16.vlgmr.msra.gmra.mxu2 %v1652_v58  ;;  %v1262_v41 = vld [vmem:[%s1564_s11 + $0x108] sm:$0xf0]  ;;  %v1201_v42 = vor.u32 %v1354_v38, %v1198_v39  ;;  %v376_v55 = vld [vmem:[#allocation2 + $0x18] sm:$0xff]  ;;  %v375_v15 = vld [vmem:[#allocation2] sm:$0xff] }
  0x5a   : > { %1386 = vmatpush.bf16.msrb.mxu2 %v1257_v52  ;;  %786 = vmatpush.bf16.msrb.mxu0 %v1257_v52  ;;  %v1265_v43 = vor.u32 %v1370_v40, %v1262_v41  ;;  %v378_v63 = vld [vmem:[#allocation2 + $0x8] sm:$0xff]  ;;  %v377_v25 = vld [vmem:[#allocation2 + $0x10] sm:$0xff]  ;;  %v381_v32 = vld [vmem:[#allocation2 + $0x38] sm:$0xff] }
  0x5b   : > { %1394 = vmatpush.bf16.msrb.mxu3 %v1321_v54  ;;  %v380_v7 = vld [vmem:[#allocation2 + $0x28] sm:$0xff] }
  0x5d   : > { %806 = vmatpush.bf16.msrb.mxu1 %v1313_v62 }
  0x5e   : > { %1387 = vmatpush.bf16.msrb.mxu2 %v1249_v61  ;;  %787 = vmatpush.bf16.msrb.mxu0 %v1249_v61 }
  0x5f   : > { %1395 = vmatpush.bf16.msrb.mxu3 %v1313_v62 }
  0x61   : > { %807 = vmatpush.bf16.msrb.mxu1 %v1305_v4 }
  0x62   : > { %1388 = vmatpush.bf16.msrb.mxu2 %v1241_v3  ;;  %788 = vmatpush.bf16.msrb.mxu0 %v1241_v3 }
  0x63   : > { %1396 = vmatpush.bf16.msrb.mxu3 %v1305_v4 }
  0x65   : > { %808 = vmatpush.bf16.msrb.mxu1 %v1297_v11 }
  0x66   : > { %1389 = vmatpush.bf16.msrb.mxu2 %v1233_v9  ;;  %789 = vmatpush.bf16.msrb.mxu0 %v1233_v9 }
  0x67   : > { %1397 = vmatpush.bf16.msrb.mxu3 %v1297_v11  ;;  %723 = vmatmul.bf16.gmra.mxu0 %v1121_v22 }
  0x68   : > { %742 = vmatmul.bf16.gmra.mxu1 %v1125_v26  ;;  %780 = vmatmul.bf16.gmra.mxu3 %v1121_v22 }
  0x69   : > { %809 = vmatpush.bf16.msrb.mxu1 %v1289_v23  ;;  %761 = vmatmul.bf16.gmra.mxu2 %v1129_v27 }
  0x6a   : > { %1390 = vmatpush.bf16.msrb.mxu2 %v1225_v21  ;;  %790 = vmatpush.bf16.msrb.mxu0 %v1225_v21  ;;  %v379_v21 = vld [vmem:[#allocation2 + $0x20] sm:$0xff] }
  0x6b   : > { %1398 = vmatpush.bf16.msrb.mxu3 %v1289_v23 }
  0x6d   : > { %810 = vmatpush.bf16.msrb.mxu1 %v1281_v31 }
  0x6e   : > { %1391 = vmatpush.bf16.msrb.mxu2 %v1217_v30  ;;  %791 = vmatpush.bf16.msrb.mxu0 %v1217_v30 }
  0x6f   : > { %1399 = vmatpush.bf16.msrb.mxu3 %v1281_v31 }
  0x71   : > { %811 = vmatpush.bf16.msrb.mxu1 %v1273_v37 }
  0x72   : > { %1392 = vmatpush.bf16.msrb.mxu2 %v1209_v36  ;;  %792 = vmatpush.bf16.msrb.mxu0 %v1209_v36 }
  0x73   : > { %1400 = vmatpush.bf16.msrb.mxu3 %v1273_v37 }
  0x75   : > { %812 = vmatpush.bf16.msrb.mxu1 %v1265_v43 }
  0x76   : > { %1393 = vmatpush.bf16.msrb.mxu2 %v1201_v42  ;;  %793 = vmatpush.bf16.msrb.mxu0 %v1201_v42 }
  0x77   : > { %1401 = vmatpush.bf16.msrb.mxu3 %v1265_v43 }
  0x78   : > { %813 = vmatmul.bf16.vlgmr.msrb.gmra.mxu1 %v1652_v58 }
  0x79   : > { %794 = vmatmul.bf16.vlgmr.msrb.gmra.mxu0 %v1650_v57  ;;  %799 = vmatmul.bf16.vlgmr.msrb.gmra.mxu2 %v1125_v26 }
  0x7a   : > { %818 = vmatmul.bf16.vlgmr.msrb.gmra.mxu3 %v1129_v27 }
  0xd4   : > { %v719_v44 = vpop.f32.mrf.mxu0 }
  0xd5   : > { %v738_v45 = vpop.f32.mrf.mxu1 }
  0xd6   : > { %v739_v46 = vadd.f32 %v738_v45, %v719_v44 }
  0xdb   : > { %v776_v50 = vpop.f32.mrf.mxu3 }
  0xdc   : > { %v757_v48 = vpop.f32.mrf.mxu2  ;;  %v721_v51 = vpop.f32.mrf.mxu0 }
  0xdd   : > { %v758_v49 = vadd.f32 %v757_v48, %v739_v46  ;;  %v740_v52 = vpop.f32.mrf.mxu1 }
  0xde   : > { %v741_v54 = vadd.f32 %v740_v52, %v721_v51 }
  0xdf   : > { %v824_v53 = vadd.f32 %v758_v49, %v374_v47 }
  0xe1   : > { %832 = vst [vmem:[#allocation2 + $0x30] sm:$0xff] %v824_v53 }
  0xe3   : > { %v778_v57 = vpop.f32.mrf.mxu3 }
  0xe4   : > { %v759_v56 = vpop.f32.mrf.mxu2  ;;  %v724_v60 = vpop.f32.mrf.mxu0 }
  0xe5   : > { %v760_v59 = vadd.f32 %v759_v56, %v741_v54  ;;  %v743_v61 = vpop.f32.mrf.mxu1 }
  0xe6   : > { %v744_v62 = vadd.f32 %v743_v61, %v724_v60 }
  0xe7   : > { %v826_v58 = vadd.f32 %v760_v59, %v376_v55 }
  0xe9   : > { %834 = vst [vmem:[#allocation2 + $0x18] sm:$0xff] %v826_v58 }
  0xeb   : > { %v781_v2 = vpop.f32.mrf.mxu3 }
  0xec   : > { %v762_v0 = vpop.f32.mrf.mxu2  ;;  %v726_v3 = vpop.f32.mrf.mxu0 }
  0xed   : > { %v763_v1 = vadd.f32 %v762_v0, %v744_v62  ;;  %v745_v4 = vpop.f32.mrf.mxu1 }
  0xee   : > { %v746_v6 = vadd.f32 %v745_v4, %v726_v3 }
  0xef   : > { %v828_v5 = vadd.f32 %v763_v1, %v378_v63 }
  0xf1   : > { %836 = vst [vmem:[#allocation2 + $0x8] sm:$0xff] %v828_v5 }
  0xf3   : > { %v783_v10 = vpop.f32.mrf.mxu3 }
  0xf4   : > { %v764_v8 = vpop.f32.mrf.mxu2 }
  0xf5   : > { %v765_v9 = vadd.f32 %v764_v8, %v746_v6  ;;  %v814_v14 = vpop.f32.mrf.mxu1 }
  0xf6   : > { %v795_v11 = vpop.f32.mrf.mxu0 }
  0xf7   : > { %v830_v12 = vadd.f32 %v765_v9, %v380_v7  ;;  %v796_v13 = vadd.f32 %v795_v11, %v776_v50 }
  0xf9   : > { %838 = vst [vmem:[#allocation2 + $0x28] sm:$0xff] %v830_v12  ;;  %v815_v16 = vadd.f32 %v814_v14, %v796_v13 }
  0xfb   : > { %v825_v17 = vadd.f32 %v815_v16, %v375_v15 }
  0xfc   : > { %v800_v18 = vpop.f32.mrf.mxu2 }
  0xfd   : > { %833 = vst [vmem:[#allocation2] sm:$0xff] %v825_v17  ;;  %v801_v19 = vadd.f32 %v800_v18, %v781_v2  ;;  %v819_v20 = vpop.f32.mrf.mxu3  ;;  %v816_v26 = vpop.f32.mrf.mxu1 }
  0xfe   : > { %v797_v22 = vpop.f32.mrf.mxu0 }
  0xff   : > { %v820_v23 = vadd.f32 %v819_v20, %v801_v19  ;;  %v798_v24 = vadd.f32 %v797_v22, %v778_v57 }
 0x101   : > { %v829_v27 = vadd.f32 %v820_v23, %v379_v21  ;;  %v817_v28 = vadd.f32 %v816_v26, %v798_v24 }
 0x103   : > { %837 = vst [vmem:[#allocation2 + $0x20] sm:$0xff] %v829_v27  ;;  %v827_v29 = vadd.f32 %v817_v28, %v377_v25 }
 0x104   : > { %v802_v30 = vpop.f32.mrf.mxu2 }
 0x105   : > { %835 = vst [vmem:[#allocation2 + $0x10] sm:$0xff] %v827_v29  ;;  %v803_v31 = vadd.f32 %v802_v30, %v783_v10  ;;  %v821_v33 = vpop.f32.mrf.mxu3 }
 0x107   : > { %v822_v34 = vadd.f32 %v821_v33, %v803_v31  ;;  %843 = sbr.rel (%p1322_p12) target bundleno = 301 (0x12d), region = 70 }
 0x109   : > { %v831_v35 = vadd.f32 %v822_v34, %v381_v32 }
 0x10b   : > { %839 = vst [vmem:[#allocation2 + $0x38] sm:$0xff] %v831_v35 }
 0x10c   : > { %v844_v36 = vld [vmem:[#allocation2 + $0x30] sm:$0xff]  ;;  %v852_v37 = vld [vmem:[%s1741_s2] sm:$0x3]  ;;  %v846_v41 = vld [vmem:[#allocation2 + $0x18] sm:$0xff]  ;;  %vm918_vm0 = vcmask 1040384   ;;  %vm925_vm1 = vcmask 1041408  }
 0x10d   : > { %v845_v38 = vld [vmem:[#allocation2] sm:$0xff]  ;;  %v854_v39 = vperm.slane %v852_v37, 0  ;;  %v855_v40 = vperm.slane %v852_v37, 1  ;;  %v847_v42 = vld [vmem:[#allocation2 + $0x10] sm:$0xff]  ;;  %v848_v43 = vld [vmem:[#allocation2 + $0x8] sm:$0xff] }
 0x10e   : > { %v849_v44 = vld [vmem:[#allocation2 + $0x20] sm:$0xff]  ;;  %v850_v45 = vld [vmem:[#allocation2 + $0x28] sm:$0xff] }
 0x10f   : > { %v858_v47 = vadd.f32 %v854_v39, %v844_v36  ;;  %v859_v48 = vadd.f32 %v855_v40, %v845_v38  ;;  %v860_v49 = vadd.f32 %v854_v39, %v846_v41  ;;  %v861_v50 = vadd.f32 %v855_v40, %v847_v42  ;;  %v921_v37 = vld [vmem:[%s1743_s4] sm:$0xf] }
 0x110   : > { %v862_v51 = vadd.f32 %v854_v39, %v848_v43  ;;  %v863_v52 = vadd.f32 %v855_v40, %v849_v44  ;;  %v864_v53 = vadd.f32 %v854_v39, %v850_v45 }
 0x111   : > { %866 = vst [vmem:[%s1742_s3] sm:$0xff] %v858_v47  ;;  %v874_v55 = vmul.f32 %v858_v47, %v858_v47  ;;  %v875_v56 = vmul.f32 %v859_v48, %v859_v48  ;;  %v876_v59 = vmul.f32 %v860_v49, %v860_v49  ;;  %v882_v57 = vadd.f32 %v860_v49, %v858_v47 }
 0x112   : > { %v851_v46 = vld [vmem:[#allocation2 + $0x38] sm:$0xff]  ;;  %867 = vst [vmem:[%s1742_s3 + $0x8] sm:$0xff] %v859_v48  ;;  %v877_v60 = vmul.f32 %v861_v50, %v861_v50  ;;  %v891_v61 = vadd.f32 %v861_v50, %v859_v48  ;;  %v878_v58 = vmul.f32 %v862_v51, %v862_v51  ;;  %v879_v62 = vmul.f32 %v863_v52, %v863_v52 }
 0x113   : > { %v865_v54 = vadd.f32 %v855_v40, %v851_v46  ;;  %868 = vst [vmem:[%s1742_s3 + $0x10] sm:$0xff] %v860_v49  ;;  %v900_v63 = vadd.f32 %v876_v59, %v874_v55  ;;  %v883_v0 = vadd.f32 %v882_v57, %v862_v51  ;;  %v880_v1 = vmul.f32 %v864_v53, %v864_v53 }
 0x114   : > { %869 = vst [vmem:[%s1742_s3 + $0x18] sm:$0xff] %v861_v50  ;;  %v909_v2 = vadd.f32 %v877_v60, %v875_v56  ;;  %v892_v3 = vadd.f32 %v891_v61, %v863_v52 }
 0x115   : > { %v881_v4 = vmul.f32 %v865_v54, %v865_v54  ;;  %870 = vst [vmem:[%s1742_s3 + $0x20] sm:$0xff] %v862_v51  ;;  %v901_v5 = vadd.f32 %v900_v63, %v878_v58  ;;  %v884_v6 = vadd.f32 %v883_v0, %v864_v53 }
 0x116   : > { %871 = vst [vmem:[%s1742_s3 + $0x28] sm:$0xff] %v863_v52  ;;  %v910_v7 = vadd.f32 %v909_v2, %v879_v62  ;;  %v893_v8 = vadd.f32 %v892_v3, %v865_v54 }
 0x117   : > { %872 = vst [vmem:[%s1742_s3 + $0x30] sm:$0xff] %v864_v53  ;;  %v885_v9 = vrot.slane %v884_v6, 4  ;;  %v902_v10 = vadd.f32 %v901_v5, %v880_v1 }
 0x118   : > { %873 = vst [vmem:[%s1742_s3 + $0x38] sm:$0xff] %v865_v54  ;;  %v894_v11 = vrot.slane %v893_v8, 4  ;;  %v911_v12 = vadd.f32 %v910_v7, %v881_v4 }
 0x119   : > { %v886_v13 = vadd.f32 %v885_v9, %v884_v6  ;;  %v903_v14 = vrot.slane %v902_v10, 4 }
 0x11a   : > { %v895_v15 = vadd.f32 %v894_v11, %v893_v8  ;;  %v912_v16 = vrot.slane %v911_v12, 4 }
 0x11b   : > { %v887_v17 = vrot.slane %v886_v13, 2  ;;  %v904_v18 = vadd.f32 %v903_v14, %v902_v10 }
 0x11c   : > { %v896_v19 = vrot.slane %v895_v15, 2  ;;  %v913_v20 = vadd.f32 %v912_v16, %v911_v12 }
 0x11d   : > { %v888_v21 = vadd.f32 %v887_v17, %v886_v13  ;;  %v905_v22 = vrot.slane %v904_v18, 2 }
 0x11e   : > { %v897_v23 = vadd.f32 %v896_v19, %v895_v15  ;;  %v914_v24 = vrot.slane %v913_v20, 2 }
 0x11f   : > { %v889_v25 = vrot.slane %v888_v21, 1  ;;  %v906_v26 = vadd.f32 %v905_v22, %v904_v18 }
 0x120   : > { %v898_v27 = vrot.slane %v897_v23, 1  ;;  %v915_v28 = vadd.f32 %v914_v24, %v913_v20 }
 0x121   : > { %v907_v29 = vrot.slane %v906_v26, 1  ;;  %v890_v30 = vadd.f32 %v889_v25, %v888_v21 }
 0x122   : > { %v899_v31 = vadd.f32 %v898_v27, %v897_v23  ;;  %v916_v32 = vrot.slane %v915_v28, 1 }
 0x123   : > { %v908_v33 = vadd.f32 %v907_v29, %v906_v26 }
 0x124   : > { %v917_v34 = vadd.f32 %v916_v32, %v915_v28 }
 0x125   : > { %v919_v35 = vsel %vm918_vm0, %v890_v30, %v908_v33 }
 0x126   : > { %v920_v36 = vsel %vm918_vm0, %v899_v31, %v917_v34 }
 0x127   : > { %v924_v38 = vrot.slane %v920_v36, 6 }
 0x129   : > { %v926_v39 = vsel %vm925_vm1, %v919_v35, %v924_v38 }
 0x12a   : > { %v928_v40 = vadd.f32 %v926_v39, %v921_v37 }
 0x12c   : > { %929 = vst [vmem:[%s1743_s4] sm:$0xf] %v928_v40 }
 0x12d PF: > { %s15_s19 = sadd.s32 1, %s1484_s19   ;;  %s1744_s15 = smov %s1472_s16 }
 0x12e   : > { %p12_p13 = scmp.ge.s32.totalorder %s15_s19, 5   ;;  %s1745_s16 = smov %s1548_s23 }
 0x12f   : > { %s1746_s17 = smov %s1480_s18  ;;  %s1747_s18 = smov %s1749_s20 }
 0x130   :  { %14 = sbr.rel (!%p12_p13) target bundleno = 3 (0x3), region = 129 }

// kernel: forward.27
= control target key start
LH: loop header
LB: loop body
LE: loop exit
PB: predicated region body
PF: predicated region fallthrough
CT: control target
= control target key end

     0   :  { %v93_v14 = vmov 857870592   ;;  %vm55_vm3 = vcmask 1040384   ;;  %vm57_vm4 = vcmask 1042434   ;;  %vm59_vm5 = vcmask 1041408   ;;  %s137_s1 = inlined_call_operand.vmem [shape: f32[2,256], index: 1, kind: input, shape index: {}]   ;;  %s138_s2 = inlined_call_operand.vmem [shape: f32[1,256], index: 2, kind: input, shape index: {}]   ;;  %s139_s3 = inlined_call_operand.vmem [shape: f32[1,256], index: 3, kind: input, shape index: {}]   ;;  %s140_s0 = inlined_call_operand.vmem [shape: f32[8,256], index: 0, kind: input, shape index: {}]   ;;  %s141_s4 = inlined_call_operand.vmem [shape: bf16[8,256], index: 4, kind: output, shape index: {}]  }
   0x1   :  { %v17_v0 = vld [vmem:[%s137_s1] sm:$0xf]  ;;  %v46_v15 = vunpack.c.l.s4 %v93_v14  ;;  %v64_v32 = vld [vmem:[%s140_s0 + $0x8] sm:$0xff] }
   0x2   :  { %v18_v1 = vmul.f32 0.125, %v17_v0  ;;  %v25_v16 = vld [vmem:[%s138_s2] sm:$0x3] }
   0x3   :  { %v47_v17 = vunpack.c.0.s8 %v46_v15  ;;  %v43_v25 = vld [vmem:[%s139_s3] sm:$0x3] }
   0x4   :  { %v19_v2 = vmul.f32 %v18_v1, %v18_v1  ;;  %v63_v31 = vld [vmem:[%s140_s0] sm:$0xff] }
   0x6   :  { %v21_v3 = vrot.slane %v19_v2, 7 }
   0x8   :  { %v23_v4 = vsub.f32 %v18_v1, %v21_v3 }
   0xa   :  { %v24_v5 = vmax.f32 %v23_v4, 0.0 }
   0xc   :  { %v26_v6 = vadd.f32 1e-05, %v24_v5 }
   0xe   :  { %91 = vrsqrt.f32 %v26_v6  ;;  %vm33_vm0 = vweird.f32 %v26_v6 }
  0x14   :  { %v92_v7 = vpop.eup %91 }
  0x15   :  { %v28_v8 = vmul.f32 %v92_v7, %v26_v6  ;;  %vm34_vm1 = vweird.f32 %v92_v7 }
  0x16   :  { %vm35_vm2 = vmor %vm33_vm0, %vm34_vm1 }
  0x17   :  { %v29_v9 = vmul.f32 %v92_v7, %v28_v8 }
  0x19   :  { %v30_v10 = vmul.f32 0.5, %v29_v9 }
  0x1b   :  { %v31_v11 = vsub.f32 1.5, %v30_v10 }
  0x1d   :  { %v32_v12 = vmul.f32 %v92_v7, %v31_v11 }
  0x1f   :  { %v36_v13 = vsel %vm35_vm2, %v92_v7, %v32_v12 }
  0x20   :  { %38 = vst [vmem:[#allocation1] sm:$0xff] %v36_v13 }
  0x27   :  { %v40_v18 = vld [vmem:[#allocation1 + $0x1] ss:$2 sm:$0xff] }
  0x28   :  { %v42_v19 = vmul.f32 %v40_v18, %v25_v16 }
  0x2a   :  { %v48_v20 = vperm.slane %v42_v19, %v47_v17  ;;  %v65_v28 = vperm.slane %v42_v19, 0  ;;  %v66_v29 = vperm.slane %v42_v19, 1 }
  0x2c   :  { %v50_v21 = vmul.f32 %v48_v20, %v18_v1  ;;  %v69_v34 = vmul.f32 %v65_v28, %v63_v31  ;;  %v70_v35 = vmul.f32 %v66_v29, %v64_v32 }
  0x2e   :  { %v52_v22 = vrot.slane %v50_v21, 1  ;;  %v53_v23 = vrot.slane %v50_v21, 2  ;;  %v54_v24 = vrot.slane %v50_v21, 3 }
  0x30   :  { %v56_v26 = vsel %vm55_vm3, %v50_v21, %v52_v22  ;;  %v58_v27 = vsel %vm57_vm4, %v53_v23, %v54_v24 }
  0x31   :  { %v60_v30 = vsel %vm59_vm5, %v56_v26, %v58_v27 }
  0x32   :  { %v62_v33 = vsub.f32 %v43_v25, %v60_v30 }
  0x34   :  { %v72_v36 = vperm.slane %v62_v33, 0  ;;  %v73_v37 = vperm.slane %v62_v33, 1 }
  0x36   :  { %v76_v38 = vadd.f32 %v72_v36, %v69_v34  ;;  %v77_v39 = vadd.f32 %v73_v37, %v70_v35 }
  0x38   :  { %vm78_vm6 = vcmp.gt.f32.partialorder %v76_v38, 0.0  ;;  %vm79_vm7 = vcmp.gt.f32.partialorder %v77_v39, 0.0  ;;  %v80_v40 = vmul.f32 0.2, %v76_v38  ;;  %v81_v41 = vmul.f32 0.2, %v77_v39 }
  0x3a   :  { %v82_v42 = vsel %vm78_vm6, %v76_v38, %v80_v40  ;;  %v83_v43 = vsel %vm79_vm7, %v77_v39, %v81_v41 }
  0x3b   :  { %v84_v44 = vpack.c.bf16 %v83_v43, %v82_v42 }
  0x3d   :  { %85 = vst [vmem:[%s141_s4] sm:$0xff] %v84_v44 }

// kernel: forward.26
= control target key start
LH: loop header
LB: loop body
LE: loop exit
PB: predicated region body
PF: predicated region fallthrough
CT: control target
= control target key end

     0   :  { %s1253_s15 = smov 0   ;;  %s1255_s16 = smov 0   ;;  %s1419_s0 = inlined_call_operand.vmem [shape: bf16[8,2304], index: 0, kind: input, shape index: {}]   ;;  %s1420_s1 = inlined_call_operand.vmem [shape: bf16[2304,256], index: 1, kind: input, shape index: {}]   ;;  %s1421_s2 = inlined_call_operand.vmem [shape: f32[1,256], index: 2, kind: input, shape index: {}]   ;;  %s1422_s3 = inlined_call_operand.vmem [shape: f32[8,256], index: 3, kind: output, shape index: {0}]   ;;  %s1423_s4 = inlined_call_operand.vmem [shape: f32[2,256], index: 4, kind: output, shape index: {1}]  }
   0x1   :  { %s1257_s17 = smov 0  }
   0x2 LB: > { %s27_s18 = sadd.s32 1, %s1220_s16  ;;  %p921_p0 = scmp.ge.s32.totalorder %s1224_s17, 1  ;;  %s1224_s17 = sphi %s1257_s17, %s15_s17   ;;  %s1220_s16 = sphi %s1255_s16, %s1425_s16   ;;  %s1216_s15 = sphi %s1253_s15, %s1424_s15  }
   0x3   : > { %p28_p1 = scmp.ge.s32.totalorder %s27_s18, 6  ;;  %p222_p2 = scmp.lt.s32.totalorder %s1224_s17, 7 }
   0x5   : > { %s1427_s18 = smov (%p28_p1, %s27_s18), 0  ;;  %p223_p3 = pnand %p921_p0, %p222_p2 }
   0x6   : > { %s275_s19 = smul.u32 (!%p223_p3), 3, %s1216_s15  ;;  %p318_p4 = scmp.eq.s32.totalorder (!%p223_p3), %s1216_s15, 0 }
   0x7   : > { %226 = sbr.rel (%p223_p3) target bundleno = 257 (0x101), region = 32  ;;  %p925_p7 = scmp.ne.s32.totalorder (!%p223_p3), %s1216_s15, 0 }
   0x8   : > { %s285_s20 = smul.u32 (!%p223_p3), 48, %s1216_s15  ;;  %p278_p5 = scmp.lt.s32.totalorder (!%p223_p3), %s275_s19, 17 }
   0xa   : > { %p287_p6 = scmp.lt.s32.totalorder (!%p223_p3), %s285_s20, 287 }
   0xc   : > { %s1429_s19 = smov (!%p278_p5, %s275_s19), 17  ;;  %s1431_s20 = smov (!%p287_p6, %s285_s20), 287 }
   0xd   : > { %s922_s21 = sshll.u32 %s1429_s19, 2  ;;  %s1126_s25 = sshll.u32 %s1431_s20, 3 }
   0xe   : > { %s1279_s24 = scalar_lea.vmem %s1419_s0, %s922_s21  ;;  %s1284_s28 = scalar_lea.vmem %s1420_s1, %s1126_s25 }
   0xf   : > { %321 = sbr.rel (%p925_p7) target bundleno = 23 (0x17), region = 36 }
  0x14   : > { %v1226_v0 = vmov 0.0  }
  0x15   : > { %322 = vst [vmem:[#allocation2] sm:$0xff] %v1226_v0 }
  0x16   : > { %323 = vst [vmem:[#allocation2 + $0x8] sm:$0xff] %v1226_v0 }
  0x17 PF: > { %328 = sbr.rel (!%p318_p4) target bundleno = 28 (0x1c), region = 40  ;;  %v1227_v1 = vmov (%p318_p4), 0.0  }
  0x18   : > { %329 = vst [vmem:[%s1423_s4] sm:$0xf] (%p318_p4), %v1227_v1 }
  0x1c PF: > { %v985_v2 = vld [vmem:[%s1284_s28 + $0x70] sm:$0xf]  ;;  %v1143_v3 = vld [vmem:[%s1284_s28 + $0x74] sm:$0xf0]  ;;  %v977_v7 = vld [vmem:[%s1284_s28 + $0x60] sm:$0xf] }
  0x1d   : > { %v1049_v4 = vld [vmem:[%s1284_s28 + $0xf0] sm:$0xf]  ;;  %v986_v5 = vor.u32 %v1143_v3, %v985_v2  ;;  %v1159_v6 = vld [vmem:[%s1284_s28 + $0xf4] sm:$0xf0]  ;;  %v1141_v8 = vld [vmem:[%s1284_s28 + $0x64] sm:$0xf0] }
  0x1e   : > { %v1050_v9 = vor.u32 %v1159_v6, %v1049_v4  ;;  %v1041_v10 = vld [vmem:[%s1284_s28 + $0xe0] sm:$0xf]  ;;  %v1157_v11 = vld [vmem:[%s1284_s28 + $0xe4] sm:$0xf0]  ;;  %v978_v12 = vor.u32 %v1141_v8, %v977_v7  ;;  %v969_v13 = vld [vmem:[%s1284_s28 + $0x50] sm:$0xf] }
  0x1f   : > { %633 = vmatpush.bf16.msra.mxu0 %v986_v5  ;;  %v1042_v14 = vor.u32 %v1157_v11, %v1041_v10  ;;  %v1139_v15 = vld [vmem:[%s1284_s28 + $0x54] sm:$0xf0]  ;;  %v1113_v16 = vld [vmem:[%s1284_s28 + $0x170] sm:$0xf]  ;;  %v1105_v21 = vld [vmem:[%s1284_s28 + $0x160] sm:$0xf] }
  0x20   : > { %646 = vmatpush.bf16.msra.mxu1 %v1050_v9  ;;  %v1175_v17 = vld [vmem:[%s1284_s28 + $0x174] sm:$0xf0]  ;;  %v1033_v18 = vld [vmem:[%s1284_s28 + $0xd0] sm:$0xf]  ;;  %v1173_v22 = vld [vmem:[%s1284_s28 + $0x164] sm:$0xf0]  ;;  %v970_v24 = vor.u32 %v1139_v15, %v969_v13 }
  0x21   : > { %v1155_v19 = vld [vmem:[%s1284_s28 + $0xd4] sm:$0xf0]  ;;  %v1114_v20 = vor.u32 %v1175_v17, %v1113_v16  ;;  %v1142_v23 = vld [vmem:[%s1284_s28 + $0x74] sm:$0xf]  ;;  %v961_v25 = vld [vmem:[%s1284_s28 + $0x40] sm:$0xf]  ;;  %v1106_v27 = vor.u32 %v1173_v22, %v1105_v21 }
  0x22   : > { %v1137_v26 = vld [vmem:[%s1284_s28 + $0x44] sm:$0xf0]  ;;  %v987_v28 = vld [vmem:[%s1284_s28 + $0x78] sm:$0xf0]  ;;  %v1034_v29 = vor.u32 %v1155_v19, %v1033_v18  ;;  %v1025_v30 = vld [vmem:[%s1284_s28 + $0xc0] sm:$0xf] }
  0x23   : > { %634 = vmatpush.bf16.msra.mxu0 %v978_v12  ;;  %659 = vmatpush.bf16.msra.mxu2 %v1114_v20  ;;  %v1153_v31 = vld [vmem:[%s1284_s28 + $0xc4] sm:$0xf0]  ;;  %v990_v32 = vor.u32 %v1142_v23, %v987_v28  ;;  %v1097_v33 = vld [vmem:[%s1284_s28 + $0x150] sm:$0xf]  ;;  %v1171_v34 = vld [vmem:[%s1284_s28 + $0x154] sm:$0xf0]  ;;  %v962_v38 = vor.u32 %v1137_v26, %v961_v25 }
  0x24   : > { %647 = vmatpush.bf16.msra.mxu1 %v1042_v14  ;;  %v1140_v35 = vld [vmem:[%s1284_s28 + $0x64] sm:$0xf]  ;;  %v979_v36 = vld [vmem:[%s1284_s28 + $0x68] sm:$0xf0]  ;;  %v953_v39 = vld [vmem:[%s1284_s28 + $0x30] sm:$0xf]  ;;  %v1098_v41 = vor.u32 %v1171_v34, %v1097_v33  ;;  %v1026_v43 = vor.u32 %v1153_v31, %v1025_v30 }
  0x25   : > { %672 = vmatpush.bf16.msra.mxu3 %v990_v32  ;;  %v982_v37 = vor.u32 %v1140_v35, %v979_v36  ;;  %v1135_v40 = vld [vmem:[%s1284_s28 + $0x34] sm:$0xf0]  ;;  %v1089_v42 = vld [vmem:[%s1284_s28 + $0x140] sm:$0xf]  ;;  %v1169_v44 = vld [vmem:[%s1284_s28 + $0x144] sm:$0xf0] }
  0x26   : > { %v1138_v45 = vld [vmem:[%s1284_s28 + $0x54] sm:$0xf]  ;;  %v971_v46 = vld [vmem:[%s1284_s28 + $0x58] sm:$0xf0]  ;;  %v1017_v47 = vld [vmem:[%s1284_s28 + $0xb0] sm:$0xf]  ;;  %v954_v50 = vor.u32 %v1135_v40, %v953_v39  ;;  %v1090_v52 = vor.u32 %v1169_v44, %v1089_v42 }
  0x27   : > { %635 = vmatpush.bf16.msra.mxu0 %v970_v24  ;;  %660 = vmatpush.bf16.msra.mxu2 %v1106_v27  ;;  %v1151_v48 = vld [vmem:[%s1284_s28 + $0xb4] sm:$0xf0]  ;;  %v974_v49 = vor.u32 %v1138_v45, %v971_v46  ;;  %v945_v51 = vld [vmem:[%s1284_s28 + $0x20] sm:$0xf]  ;;  %v1136_v53 = vld [vmem:[%s1284_s28 + $0x44] sm:$0xf] }
  0x28   : > { %648 = vmatpush.bf16.msra.mxu1 %v1034_v29  ;;  %v963_v54 = vld [vmem:[%s1284_s28 + $0x48] sm:$0xf0]  ;;  %v1018_v55 = vor.u32 %v1151_v48, %v1017_v47  ;;  %v1133_v56 = vld [vmem:[%s1284_s28 + $0x24] sm:$0xf0]  ;;  %v1081_v57 = vld [vmem:[%s1284_s28 + $0x130] sm:$0xf] }
  0x29   : > { %673 = vmatpush.bf16.msra.mxu3 %v982_v37  ;;  %v1167_v58 = vld [vmem:[%s1284_s28 + $0x134] sm:$0xf0]  ;;  %v1009_v59 = vld [vmem:[%s1284_s28 + $0xa0] sm:$0xf]  ;;  %v1149_v60 = vld [vmem:[%s1284_s28 + $0xa4] sm:$0xf0]  ;;  %v966_v61 = vor.u32 %v1136_v53, %v963_v54  ;;  %v946_v62 = vor.u32 %v1133_v56, %v945_v51 }
  0x2a   : > { %v937_v63 = vld [vmem:[%s1284_s28 + $0x10] sm:$0xf]  ;;  %v1082_v0 = vor.u32 %v1167_v58, %v1081_v57  ;;  %v1134_v1 = vld [vmem:[%s1284_s28 + $0x34] sm:$0xf]  ;;  %v955_v2 = vld [vmem:[%s1284_s28 + $0x38] sm:$0xf0]  ;;  %v1010_v3 = vor.u32 %v1149_v60, %v1009_v59 }
  0x2b   : > { %636 = vmatpush.bf16.msra.mxu0 %v962_v38  ;;  %661 = vmatpush.bf16.msra.mxu2 %v1098_v41  ;;  %v1131_v4 = vld [vmem:[%s1284_s28 + $0x14] sm:$0xf0]  ;;  %v1073_v5 = vld [vmem:[%s1284_s28 + $0x120] sm:$0xf]  ;;  %v1165_v6 = vld [vmem:[%s1284_s28 + $0x124] sm:$0xf0]  ;;  %v958_v11 = vor.u32 %v1134_v1, %v955_v2 }
  0x2c   : > { %649 = vmatpush.bf16.msra.mxu1 %v1026_v43  ;;  %v1001_v7 = vld [vmem:[%s1284_s28 + $0x90] sm:$0xf]  ;;  %v1147_v8 = vld [vmem:[%s1284_s28 + $0x94] sm:$0xf0]  ;;  %v929_v9 = vld [vmem:[%s1284_s28] sm:$0xf]  ;;  %v938_v12 = vor.u32 %v1131_v4, %v937_v63  ;;  %v1074_v13 = vor.u32 %v1165_v6, %v1073_v5 }
  0x2d   : > { %674 = vmatpush.bf16.msra.mxu3 %v974_v49  ;;  %v1129_v10 = vld [vmem:[%s1284_s28 + $0x4] sm:$0xf0]  ;;  %v1132_v14 = vld [vmem:[%s1284_s28 + $0x24] sm:$0xf]  ;;  %v947_v15 = vld [vmem:[%s1284_s28 + $0x28] sm:$0xf0]  ;;  %v1002_v17 = vor.u32 %v1147_v8, %v1001_v7 }
  0x2e   : > { %v332_v16 = vld [vmem:[%s1279_s24] sm:$0xff]  ;;  %v1065_v19 = vld [vmem:[%s1284_s28 + $0x110] sm:$0xf]  ;;  %v1163_v20 = vld [vmem:[%s1284_s28 + $0x114] sm:$0xf0]  ;;  %v950_v26 = vor.u32 %v1132_v14, %v947_v15  ;;  %v930_v28 = vor.u32 %v1129_v10, %v929_v9  ;;  %p1119_p8 = scmp.ne.s32.totalorder %s1216_s15, 5 }
  0x2f   : > { %637 = vmatpush.bf16.msra.mxu0 %v954_v50  ;;  %662 = vmatpush.bf16.msra.mxu2 %v1090_v52  ;;  %v993_v18 = vld [vmem:[%s1284_s28 + $0x80] sm:$0xf]  ;;  %v1145_v21 = vld [vmem:[%s1284_s28 + $0x84] sm:$0xf0]  ;;  %v1158_v22 = vld [vmem:[%s1284_s28 + $0xf4] sm:$0xf]  ;;  %v384_v27 = vunpack.c.l.b16 %v332_v16  ;;  %v1066_v29 = vor.u32 %v1163_v20, %v1065_v19  ;;  %v385_v30 = vunpack.c.h.b16 %v332_v16 }
  0x30   : > { %650 = vmatpush.bf16.msra.mxu1 %v1018_v55  ;;  %v1051_v23 = vld [vmem:[%s1284_s28 + $0xf8] sm:$0xf0]  ;;  %v1174_v24 = vld [vmem:[%s1284_s28 + $0x174] sm:$0xf]  ;;  %v333_v33 = vld [vmem:[%s1279_s24 + $0x8] sm:$0xf]  ;;  %v994_v34 = vor.u32 %v1145_v21, %v993_v18 }
  0x31   : > { %675 = vmatpush.bf16.msra.mxu3 %v966_v61  ;;  %v1115_v25 = vld [vmem:[%s1284_s28 + $0x178] sm:$0xf0]  ;;  %v1130_v31 = vld [vmem:[%s1284_s28 + $0x14] sm:$0xf]  ;;  %v1054_v35 = vor.u32 %v1158_v22, %v1051_v23  ;;  %v1057_v36 = vld [vmem:[%s1284_s28 + $0x100] sm:$0xf]  ;;  %v387_v43 = vpack.c.b16 %v384_v27, %v384_v27  ;;  %v386_v45 = vunpack.c.l.b16 %v333_v33  ;;  %v1364_v46 = vpack.c.b16 %v385_v30, %v385_v30 }
  0x32   : > { %v939_v32 = vld [vmem:[%s1284_s28 + $0x18] sm:$0xf0]  ;;  %v1161_v37 = vld [vmem:[%s1284_s28 + $0x104] sm:$0xf0]  ;;  %v1118_v38 = vor.u32 %v1174_v24, %v1115_v25  ;;  %v1156_v39 = vld [vmem:[%s1284_s28 + $0xe4] sm:$0xf] }
  0x33   : > { %638 = vmatpush.bf16.msra.mxu0 %v946_v62  ;;  %663 = vmatpush.bf16.msra.mxu2 %v1082_v0  ;;  %v1043_v40 = vld [vmem:[%s1284_s28 + $0xe8] sm:$0xf0]  ;;  %v1172_v41 = vld [vmem:[%s1284_s28 + $0x164] sm:$0xf]  ;;  %v942_v44 = vor.u32 %v1130_v31, %v939_v32  ;;  %v1058_v47 = vor.u32 %v1161_v37, %v1057_v36  ;;  %v1154_v52 = vld [vmem:[%s1284_s28 + $0xd4] sm:$0xf]  ;;  %v389_v56 = vpack.c.b16 %v386_v45, %v386_v45 }
  0x34   : > { %651 = vmatpush.bf16.msra.mxu1 %v1010_v3  ;;  %v1107_v42 = vld [vmem:[%s1284_s28 + $0x168] sm:$0xf0]  ;;  %v1128_v48 = vld [vmem:[%s1284_s28 + $0x4] sm:$0xf]  ;;  %v1046_v50 = vor.u32 %v1156_v39, %v1043_v40  ;;  %v1035_v53 = vld [vmem:[%s1284_s28 + $0xd8] sm:$0xf0] }
  0x35   : > { %676 = vmatpush.bf16.msra.mxu3 %v958_v11  ;;  %v931_v49 = vld [vmem:[%s1284_s28 + $0x8] sm:$0xf0]  ;;  %v1110_v51 = vor.u32 %v1172_v41, %v1107_v42  ;;  %v1170_v54 = vld [vmem:[%s1284_s28 + $0x154] sm:$0xf]  ;;  %v1099_v55 = vld [vmem:[%s1284_s28 + $0x158] sm:$0xf0]  ;;  %v1038_v58 = vor.u32 %v1154_v52, %v1035_v53 }
  0x36   : > { %v934_v57 = vor.u32 %v1128_v48, %v931_v49  ;;  %v1102_v59 = vor.u32 %v1170_v54, %v1099_v55  ;;  %v1152_v60 = vld [vmem:[%s1284_s28 + $0xc4] sm:$0xf]  ;;  %v1027_v61 = vld [vmem:[%s1284_s28 + $0xc8] sm:$0xf0]  ;;  %v1150_v2 = vld [vmem:[%s1284_s28 + $0xb4] sm:$0xf] }
  0x37   : > { %639 = vmatpush.bf16.msra.mxu0 %v938_v12  ;;  %664 = vmatpush.bf16.msra.mxu2 %v1074_v13  ;;  %v1168_v62 = vld [vmem:[%s1284_s28 + $0x144] sm:$0xf]  ;;  %v1091_v63 = vld [vmem:[%s1284_s28 + $0x148] sm:$0xf0]  ;;  %v1030_v0 = vor.u32 %v1152_v60, %v1027_v61  ;;  %v1019_v3 = vld [vmem:[%s1284_s28 + $0xb8] sm:$0xf0] }
  0x38   : > { %652 = vmatpush.bf16.msra.mxu1 %v1002_v17  ;;  %v1094_v1 = vor.u32 %v1168_v62, %v1091_v63  ;;  %v1166_v4 = vld [vmem:[%s1284_s28 + $0x134] sm:$0xf]  ;;  %v1083_v5 = vld [vmem:[%s1284_s28 + $0x138] sm:$0xf0]  ;;  %v1022_v6 = vor.u32 %v1150_v2, %v1019_v3  ;;  %v1148_v8 = vld [vmem:[%s1284_s28 + $0xa4] sm:$0xf] }
  0x39   : > { %677 = vmatpush.bf16.msra.mxu3 %v950_v26  ;;  %v1086_v7 = vor.u32 %v1166_v4, %v1083_v5  ;;  %v1011_v9 = vld [vmem:[%s1284_s28 + $0xa8] sm:$0xf0]  ;;  %v1164_v10 = vld [vmem:[%s1284_s28 + $0x124] sm:$0xf]  ;;  %v1146_v14 = vld [vmem:[%s1284_s28 + $0x94] sm:$0xf] }
  0x3a   : > { %v1075_v11 = vld [vmem:[%s1284_s28 + $0x128] sm:$0xf0]  ;;  %v1014_v12 = vor.u32 %v1148_v8, %v1011_v9  ;;  %v1003_v15 = vld [vmem:[%s1284_s28 + $0x98] sm:$0xf0]  ;;  %v1162_v16 = vld [vmem:[%s1284_s28 + $0x114] sm:$0xf] }
  0x3b   : > { %640 = vmatpush.bf16.msra.mxu0 %v930_v28  ;;  %665 = vmatpush.bf16.msra.mxu2 %v1066_v29  ;;  %v1078_v13 = vor.u32 %v1164_v10, %v1075_v11  ;;  %v1067_v17 = vld [vmem:[%s1284_s28 + $0x118] sm:$0xf0]  ;;  %v1006_v18 = vor.u32 %v1146_v14, %v1003_v15  ;;  %v1144_v20 = vld [vmem:[%s1284_s28 + $0x84] sm:$0xf]  ;;  %v995_v21 = vld [vmem:[%s1284_s28 + $0x88] sm:$0xf0] }
  0x3c   : > { %653 = vmatpush.bf16.msra.mxu1 %v994_v34  ;;  %v1070_v19 = vor.u32 %v1162_v16, %v1067_v17  ;;  %v1160_v22 = vld [vmem:[%s1284_s28 + $0x104] sm:$0xf]  ;;  %v1059_v23 = vld [vmem:[%s1284_s28 + $0x108] sm:$0xf0]  ;;  %v998_v24 = vor.u32 %v1144_v20, %v995_v21 }
  0x3d   : > { %678 = vmatpush.bf16.msra.mxu3 %v942_v44  ;;  %v1062_v25 = vor.u32 %v1160_v22, %v1059_v23  ;;  %v330_v31 = vld [vmem:[#allocation2] sm:$0xff]  ;;  %v331_v41 = vld [vmem:[#allocation2 + $0x8] sm:$0xff] }
  0x3e   : > { %641 = vmatmul.bf16.vlgmr.msra.gmra.mxu0 %v387_v43 }
  0x3f   : > { %685 = vmatpush.bf16.msrb.mxu0 %v1054_v35  ;;  %654 = vmatmul.bf16.vlgmr.msra.gmra.mxu1 %v1364_v46 }
  0x40   : > { %698 = vmatpush.bf16.msrb.mxu1 %v1118_v38  ;;  %666 = vmatpush.bf16.msra.mxu2 %v1058_v47 }
  0x41   : > { %679 = vmatpush.bf16.msra.mxu3 %v934_v57 }
  0x43   : > { %686 = vmatpush.bf16.msrb.mxu0 %v1046_v50  ;;  %667 = vmatmul.bf16.vlgmr.msra.gmra.mxu2 %v389_v56 }
  0x44   : > { %699 = vmatpush.bf16.msrb.mxu1 %v1110_v51  ;;  %680 = vmatmul.bf16.vlgmr.msra.gmra.mxu3 %v387_v43 }
  0x47   : > { %687 = vmatpush.bf16.msrb.mxu0 %v1038_v58 }
  0x48   : > { %700 = vmatpush.bf16.msrb.mxu1 %v1102_v59 }
  0x4b   : > { %688 = vmatpush.bf16.msrb.mxu0 %v1030_v0 }
  0x4c   : > { %701 = vmatpush.bf16.msrb.mxu1 %v1094_v1 }
  0x4f   : > { %689 = vmatpush.bf16.msrb.mxu0 %v1022_v6 }
  0x50   : > { %702 = vmatpush.bf16.msrb.mxu1 %v1086_v7 }
  0x53   : > { %690 = vmatpush.bf16.msrb.mxu0 %v1014_v12 }
  0x54   : > { %703 = vmatpush.bf16.msrb.mxu1 %v1078_v13 }
  0x57   : > { %691 = vmatpush.bf16.msrb.mxu0 %v1006_v18 }
  0x58   : > { %704 = vmatpush.bf16.msrb.mxu1 %v1070_v19 }
  0x5b   : > { %692 = vmatpush.bf16.msrb.mxu0 %v998_v24 }
  0x5c   : > { %705 = vmatpush.bf16.msrb.mxu1 %v1062_v25 }
  0x5e   : > { %693 = vmatmul.bf16.vlgmr.msrb.gmra.mxu0 %v1364_v46 }
  0x5f   : > { %706 = vmatmul.bf16.vlgmr.msrb.gmra.mxu1 %v389_v56 }
  0xbb   : > { %v642_v26 = vpop.f32.mrf.mxu0 }
  0xbc   : > { %v655_v27 = vpop.f32.mrf.mxu1 }
  0xbd   : > { %v656_v28 = vadd.f32 %v655_v27, %v642_v26 }
  0xc3   : > { %v644_v29 = vpop.f32.mrf.mxu0 }
  0xc4   : > { %v657_v30 = vpop.f32.mrf.mxu1 }
  0xc6   : > { %v668_v32 = vpop.f32.mrf.mxu2 }
  0xc7   : > { %v669_v33 = vadd.f32 %v668_v32, %v656_v28  ;;  %v681_v35 = vpop.f32.mrf.mxu3 }
  0xc9   : > { %v711_v34 = vadd.f32 %v669_v33, %v330_v31 }
  0xcb   : > { %713 = vst [vmem:[#allocation2] sm:$0xff] %v711_v34 }
  0xce   : > { %v670_v36 = vpop.f32.mrf.mxu2 }
  0xcf   : > { %v683_v37 = vpop.f32.mrf.mxu3 }
  0xdb   : > { %v694_v38 = vpop.f32.mrf.mxu0 }
  0xdc   : > { %v695_v39 = vadd.f32 %v694_v38, %v681_v35  ;;  %v707_v40 = vpop.f32.mrf.mxu1 }
  0xde   : > { %v708_v42 = vadd.f32 %v707_v40, %v695_v39 }
  0xe0   : > { %v712_v43 = vadd.f32 %v708_v42, %v331_v41  ;;  %718 = sbr.rel (%p1119_p8) target bundleno = 257 (0x101), region = 44 }
  0xe2   : > { %714 = vst [vmem:[#allocation2 + $0x8] sm:$0xff] %v712_v43 }
  0xe3   : > { %v696_v44 = vpop.f32.mrf.mxu0 }
  0xe4   : > { %v709_v45 = vpop.f32.mrf.mxu1 }
  0xe5   : > { %v719_v46 = vld [vmem:[#allocation2] sm:$0xff]  ;;  %vm757_vm0 = vcmask 1040384   ;;  %vm764_vm1 = vcmask 1041408  }
  0xe6   : > { %v721_v47 = vld [vmem:[%s1421_s2] sm:$0x3] }
  0xe7   : > { %v723_v49 = vperm.slane %v721_v47, 0  ;;  %v724_v50 = vperm.slane %v721_v47, 1  ;;  %v760_v17 = vld [vmem:[%s1423_s4] sm:$0xf] }
  0xe9   : > { %v720_v48 = vld [vmem:[#allocation2 + $0x8] sm:$0xff]  ;;  %v727_v51 = vadd.f32 %v723_v49, %v719_v46 }
  0xea   : > { %v728_v52 = vadd.f32 %v724_v50, %v720_v48 }
  0xeb   : > { %729 = vst [vmem:[%s1422_s3] sm:$0xff] %v727_v51  ;;  %v731_v55 = vmul.f32 %v727_v51, %v727_v51  ;;  %v733_v56 = vrot.slane %v727_v51, 4 }
  0xec   : > { %v732_v53 = vmul.f32 %v728_v52, %v728_v52  ;;  %v739_v54 = vrot.slane %v728_v52, 4  ;;  %730 = vst [vmem:[%s1422_s3 + $0x8] sm:$0xff] %v728_v52 }
  0xed   : > { %v734_v59 = vadd.f32 %v733_v56, %v727_v51  ;;  %v745_v60 = vrot.slane %v731_v55, 4 }
  0xee   : > { %v740_v57 = vadd.f32 %v739_v54, %v728_v52  ;;  %v751_v58 = vrot.slane %v732_v53, 4 }
  0xef   : > { %v735_v61 = vrot.slane %v734_v59, 2  ;;  %v746_v63 = vadd.f32 %v745_v60, %v731_v55 }
  0xf0   : > { %v741_v62 = vrot.slane %v740_v57, 2  ;;  %v752_v0 = vadd.f32 %v751_v58, %v732_v53 }
  0xf1   : > { %v736_v1 = vadd.f32 %v735_v61, %v734_v59  ;;  %v747_v3 = vrot.slane %v746_v63, 2 }
  0xf2   : > { %v742_v2 = vadd.f32 %v741_v62, %v740_v57  ;;  %v753_v4 = vrot.slane %v752_v0, 2 }
  0xf3   : > { %v737_v5 = vrot.slane %v736_v1, 1  ;;  %v748_v7 = vadd.f32 %v747_v3, %v746_v63 }
  0xf4   : > { %v743_v6 = vrot.slane %v742_v2, 1  ;;  %v754_v8 = vadd.f32 %v753_v4, %v752_v0 }
  0xf5   : > { %v738_v9 = vadd.f32 %v737_v5, %v736_v1  ;;  %v749_v11 = vrot.slane %v748_v7, 1 }
  0xf6   : > { %v744_v10 = vadd.f32 %v743_v6, %v742_v2  ;;  %v755_v12 = vrot.slane %v754_v8, 1 }
  0xf7   : > { %v750_v13 = vadd.f32 %v749_v11, %v748_v7 }
  0xf8   : > { %v756_v14 = vadd.f32 %v755_v12, %v754_v8 }
  0xf9   : > { %v758_v15 = vsel %vm757_vm0, %v738_v9, %v750_v13 }
  0xfa   : > { %v759_v16 = vsel %vm757_vm0, %v744_v10, %v756_v14 }
  0xfb   : > { %v763_v18 = vrot.slane %v759_v16, 6 }
  0xfd   : > { %v765_v19 = vsel %vm764_vm1, %v758_v15, %v763_v18 }
  0xfe   : > { %v767_v20 = vadd.f32 %v765_v19, %v760_v17 }
 0x100   : > { %768 = vst [vmem:[%s1423_s4] sm:$0xf] %v767_v20 }
 0x101 PF: > { %s15_s17 = sadd.s32 1, %s1224_s17   ;;  %s1424_s15 = smov %s1220_s16 }
 0x102   : > { %p12_p9 = scmp.ge.s32.totalorder %s15_s17, 8   ;;  %s1425_s16 = smov %s1427_s18 }
 0x104   :  { %14 = sbr.rel (!%p12_p9) target bundleno = 2 (0x2), region = 92 }

// kernel: forward.28
= control target key start
LH: loop header
LB: loop body
LE: loop exit
PB: predicated region body
PF: predicated region fallthrough
CT: control target
= control target key end

     0   :  { %s1540_s15 = smov 0   ;;  %s1542_s16 = smov 0   ;;  %s1868_s0 = inlined_call_operand.vmem [shape: bf16[8,2304], index: 0, kind: input, shape index: {}]   ;;  %s1869_s1 = inlined_call_operand.vmem [shape: bf16[2304,512], index: 1, kind: input, shape index: {}]   ;;  %s1870_s2 = inlined_call_operand.vmem [shape: f32[1,512], index: 2, kind: input, shape index: {}]   ;;  %s1871_s3 = inlined_call_operand.vmem [shape: f32[8,512], index: 3, kind: output, shape index: {0}]   ;;  %s1872_s4 = inlined_call_operand.vmem [shape: f32[2,512], index: 4, kind: output, shape index: {1}]  }
   0x1   :  { %s1544_s17 = smov 0   ;;  %s1546_s18 = smov 0  }
   0x2   :  { %s1548_s19 = smov 0   ;;  %s1550_s20 = smov 0  }
   0x3   :  { %s1552_s21 = smov 0  }
   0x4 LB: > { %s27_s22 = sadd.s32 1, %s1503_s19  ;;  %s34_s23 = sadd.s32 1, %s1507_s20  ;;  %s1511_s21 = sphi %s1552_s21, %s15_s21   ;;  %s1507_s20 = sphi %s1550_s20, %s1878_s20   ;;  %s1503_s19 = sphi %s1548_s19, %s1877_s19   ;;  %s1499_s18 = sphi %s1546_s18, %s1876_s18   ;;  %s1495_s17 = sphi %s1544_s17, %s1875_s17   ;;  %s1491_s16 = sphi %s1542_s16, %s1874_s16   ;;  %s1487_s15 = sphi %s1540_s15, %s1873_s15  }
   0x5   : > { %p28_p0 = scmp.ge.s32.totalorder %s27_s22, 6  ;;  %p78_p1 = scmp.ne.s32.totalorder %s1491_s16, %s1487_s15 }
   0x6   : > { %p79_p2 = scmp.eq.s32.totalorder %s1511_s21, 0  ;;  %s71_s27 = sadd.s32 1, %s1491_s16 }
   0x7   : > { %s1880_s22 = smov (%p28_p0, %s27_s22), 0  ;;  %s1882_s23 = smov (!%p28_p0, %s34_s23), %s1507_s20 }
   0x8   : > { %p80_p3 = por %p79_p2, %p78_p1  ;;  %p36_p4 = scmp.ge.s32.totalorder %s1882_s23, 2 }
   0x9   : > { %s66_s24 = ssub.s32 %s1503_s19, %s1880_s22  ;;  %p1139_p6 = scmp.ge.s32.totalorder %s1511_s21, 12 }
   0xa   : > { %s1884_s23 = smov (%p36_p4, %s1882_s23), 0 }
   0xb   : > { %s67_s25 = ssub.s32 %s1507_s20, %s1884_s23  ;;  %184 = sbr.rel (%p1139_p6) target bundleno = 72 (0x48), region = 16 }
   0xc   : > { %s68_s26 = sor.u32 %s67_s25, %s66_s24 }
   0xd   : > { %p69_p5 = scmp.eq.s32.totalorder %s68_s26, 0 }
   0xf   : > { %s1591_s28 = scalar_select %p69_p5, %s1491_s16, %s71_s27  }
  0x10   : > { %200 = sbr.rel (!%p80_p3) target bundleno = 72 (0x48), region = 24  ;;  %s202_s29 = sand.u32 (%p80_p3), 1, %s1491_s16  }
  0x11   : > { %s1397_s30 = smul.u32 (%p80_p3), 384, %s202_s29  ;;  %s1140_s5 = sshll.u32 (%p80_p3), %s1507_s20, 1 }
  0x12   : > { %s1347_s6 = smul.u32 (%p80_p3), 192, %s1503_s19 }
  0x13   : > { %s1605_s12 = scalar_lea.vmem (%p80_p3), [#allocation3], %s1397_s30 }
  0x14   : > { %s208_s7 = sadd.s32 (%p80_p3), %s1347_s6, %s1140_s5 }
  0x15   : > { %s1142_s8 = sshll.u32 %s208_s7, 2 }
  0x16   : > { %s1600_s11 = scalar_lea.vmem %s1869_s1, %s1142_s8 }
  0x17   : > { %v333_v0 = vld [vmem:[%s1600_s11] sm:$0xff]  ;;  %v335_v1 = vld [vmem:[%s1600_s11 + $0x10] sm:$0xff] }
  0x18   : > { %v337_v2 = vld [vmem:[%s1600_s11 + $0x20] sm:$0xff]  ;;  %334 = vst [vmem:[%s1605_s12] sm:$0xff] %v333_v0  ;;  %v339_v3 = vld [vmem:[%s1600_s11 + $0x30] sm:$0xff] }
  0x19   : > { %336 = vst [vmem:[%s1605_s12 + $0x8] sm:$0xff] %v335_v1  ;;  %v341_v4 = vld [vmem:[%s1600_s11 + $0x40] sm:$0xff]  ;;  %v343_v5 = vld [vmem:[%s1600_s11 + $0x50] sm:$0xff] }
  0x1a   : > { %338 = vst [vmem:[%s1605_s12 + $0x10] sm:$0xff] %v337_v2  ;;  %v345_v6 = vld [vmem:[%s1600_s11 + $0x60] sm:$0xff]  ;;  %v347_v7 = vld [vmem:[%s1600_s11 + $0x70] sm:$0xff] }
  0x1b   : > { %340 = vst [vmem:[%s1605_s12 + $0x18] sm:$0xff] %v339_v3  ;;  %v349_v8 = vld [vmem:[%s1600_s11 + $0x80] sm:$0xff]  ;;  %v351_v9 = vld [vmem:[%s1600_s11 + $0x90] sm:$0xff] }
  0x1c   : > { %342 = vst [vmem:[%s1605_s12 + $0x20] sm:$0xff] %v341_v4  ;;  %v353_v10 = vld [vmem:[%s1600_s11 + $0xa0] sm:$0xff]  ;;  %v355_v11 = vld [vmem:[%s1600_s11 + $0xb0] sm:$0xff] }
  0x1d   : > { %344 = vst [vmem:[%s1605_s12 + $0x28] sm:$0xff] %v343_v5  ;;  %v357_v12 = vld [vmem:[%s1600_s11 + $0xc0] sm:$0xff]  ;;  %v359_v13 = vld [vmem:[%s1600_s11 + $0xd0] sm:$0xff] }
  0x1e   : > { %346 = vst [vmem:[%s1605_s12 + $0x30] sm:$0xff] %v345_v6  ;;  %v361_v14 = vld [vmem:[%s1600_s11 + $0xe0] sm:$0xff]  ;;  %v363_v15 = vld [vmem:[%s1600_s11 + $0xf0] sm:$0xff] }
  0x1f   : > { %348 = vst [vmem:[%s1605_s12 + $0x38] sm:$0xff] %v347_v7  ;;  %v365_v16 = vld [vmem:[%s1600_s11 + $0x100] sm:$0xff]  ;;  %v367_v17 = vld [vmem:[%s1600_s11 + $0x110] sm:$0xff] }
  0x20   : > { %350 = vst [vmem:[%s1605_s12 + $0x40] sm:$0xff] %v349_v8  ;;  %v369_v18 = vld [vmem:[%s1600_s11 + $0x120] sm:$0xff]  ;;  %v371_v19 = vld [vmem:[%s1600_s11 + $0x130] sm:$0xff] }
  0x21   : > { %352 = vst [vmem:[%s1605_s12 + $0x48] sm:$0xff] %v351_v9  ;;  %v373_v20 = vld [vmem:[%s1600_s11 + $0x140] sm:$0xff]  ;;  %v375_v21 = vld [vmem:[%s1600_s11 + $0x150] sm:$0xff] }
  0x22   : > { %354 = vst [vmem:[%s1605_s12 + $0x50] sm:$0xff] %v353_v10  ;;  %v377_v22 = vld [vmem:[%s1600_s11 + $0x160] sm:$0xff]  ;;  %v379_v23 = vld [vmem:[%s1600_s11 + $0x170] sm:$0xff] }
  0x23   : > { %356 = vst [vmem:[%s1605_s12 + $0x58] sm:$0xff] %v355_v11  ;;  %v381_v24 = vld [vmem:[%s1600_s11 + $0x180] sm:$0xff]  ;;  %v383_v25 = vld [vmem:[%s1600_s11 + $0x190] sm:$0xff] }
  0x24   : > { %358 = vst [vmem:[%s1605_s12 + $0x60] sm:$0xff] %v357_v12  ;;  %v385_v26 = vld [vmem:[%s1600_s11 + $0x1a0] sm:$0xff]  ;;  %v387_v27 = vld [vmem:[%s1600_s11 + $0x1b0] sm:$0xff] }
  0x25   : > { %360 = vst [vmem:[%s1605_s12 + $0x68] sm:$0xff] %v359_v13  ;;  %v389_v28 = vld [vmem:[%s1600_s11 + $0x1c0] sm:$0xff]  ;;  %v391_v29 = vld [vmem:[%s1600_s11 + $0x1d0] sm:$0xff] }
  0x26   : > { %362 = vst [vmem:[%s1605_s12 + $0x70] sm:$0xff] %v361_v14  ;;  %v393_v30 = vld [vmem:[%s1600_s11 + $0x1e0] sm:$0xff]  ;;  %v395_v31 = vld [vmem:[%s1600_s11 + $0x1f0] sm:$0xff] }
  0x27   : > { %364 = vst [vmem:[%s1605_s12 + $0x78] sm:$0xff] %v363_v15  ;;  %v397_v32 = vld [vmem:[%s1600_s11 + $0x200] sm:$0xff]  ;;  %v399_v33 = vld [vmem:[%s1600_s11 + $0x210] sm:$0xff] }
  0x28   : > { %366 = vst [vmem:[%s1605_s12 + $0x80] sm:$0xff] %v365_v16  ;;  %v401_v34 = vld [vmem:[%s1600_s11 + $0x220] sm:$0xff]  ;;  %v403_v35 = vld [vmem:[%s1600_s11 + $0x230] sm:$0xff] }
  0x29   : > { %368 = vst [vmem:[%s1605_s12 + $0x88] sm:$0xff] %v367_v17  ;;  %v405_v36 = vld [vmem:[%s1600_s11 + $0x240] sm:$0xff]  ;;  %v407_v37 = vld [vmem:[%s1600_s11 + $0x250] sm:$0xff] }
  0x2a   : > { %370 = vst [vmem:[%s1605_s12 + $0x90] sm:$0xff] %v369_v18  ;;  %v409_v38 = vld [vmem:[%s1600_s11 + $0x260] sm:$0xff]  ;;  %v411_v39 = vld [vmem:[%s1600_s11 + $0x270] sm:$0xff] }
  0x2b   : > { %372 = vst [vmem:[%s1605_s12 + $0x98] sm:$0xff] %v371_v19  ;;  %v413_v40 = vld [vmem:[%s1600_s11 + $0x280] sm:$0xff]  ;;  %v415_v41 = vld [vmem:[%s1600_s11 + $0x290] sm:$0xff] }
  0x2c   : > { %374 = vst [vmem:[%s1605_s12 + $0xa0] sm:$0xff] %v373_v20  ;;  %v417_v42 = vld [vmem:[%s1600_s11 + $0x2a0] sm:$0xff]  ;;  %v419_v43 = vld [vmem:[%s1600_s11 + $0x2b0] sm:$0xff] }
  0x2d   : > { %376 = vst [vmem:[%s1605_s12 + $0xa8] sm:$0xff] %v375_v21  ;;  %v421_v44 = vld [vmem:[%s1600_s11 + $0x2c0] sm:$0xff]  ;;  %v423_v45 = vld [vmem:[%s1600_s11 + $0x2d0] sm:$0xff] }
  0x2e   : > { %378 = vst [vmem:[%s1605_s12 + $0xb0] sm:$0xff] %v377_v22  ;;  %v425_v46 = vld [vmem:[%s1600_s11 + $0x2e0] sm:$0xff]  ;;  %v427_v47 = vld [vmem:[%s1600_s11 + $0x2f0] sm:$0xff] }
  0x2f   : > { %380 = vst [vmem:[%s1605_s12 + $0xb8] sm:$0xff] %v379_v23 }
  0x30   : > { %382 = vst [vmem:[%s1605_s12 + $0xc0] sm:$0xff] %v381_v24 }
  0x31   : > { %384 = vst [vmem:[%s1605_s12 + $0xc8] sm:$0xff] %v383_v25 }
  0x32   : > { %386 = vst [vmem:[%s1605_s12 + $0xd0] sm:$0xff] %v385_v26 }
  0x33   : > { %388 = vst [vmem:[%s1605_s12 + $0xd8] sm:$0xff] %v387_v27 }
  0x34   : > { %390 = vst [vmem:[%s1605_s12 + $0xe0] sm:$0xff] %v389_v28 }
  0x35   : > { %392 = vst [vmem:[%s1605_s12 + $0xe8] sm:$0xff] %v391_v29 }
  0x36   : > { %394 = vst [vmem:[%s1605_s12 + $0xf0] sm:$0xff] %v393_v30 }
  0x37   : > { %396 = vst [vmem:[%s1605_s12 + $0xf8] sm:$0xff] %v395_v31 }
  0x38   : > { %398 = vst [vmem:[%s1605_s12 + $0x100] sm:$0xff] %v397_v32 }
  0x39   : > { %400 = vst [vmem:[%s1605_s12 + $0x108] sm:$0xff] %v399_v33 }
  0x3a   : > { %402 = vst [vmem:[%s1605_s12 + $0x110] sm:$0xff] %v401_v34 }
  0x3b   : > { %404 = vst [vmem:[%s1605_s12 + $0x118] sm:$0xff] %v403_v35 }
  0x3c   : > { %406 = vst [vmem:[%s1605_s12 + $0x120] sm:$0xff] %v405_v36 }
  0x3d   : > { %408 = vst [vmem:[%s1605_s12 + $0x128] sm:$0xff] %v407_v37 }
  0x3e   : > { %410 = vst [vmem:[%s1605_s12 + $0x130] sm:$0xff] %v409_v38 }
  0x3f   : > { %412 = vst [vmem:[%s1605_s12 + $0x138] sm:$0xff] %v411_v39 }
  0x40   : > { %414 = vst [vmem:[%s1605_s12 + $0x140] sm:$0xff] %v413_v40 }
  0x41   : > { %416 = vst [vmem:[%s1605_s12 + $0x148] sm:$0xff] %v415_v41 }
  0x42   : > { %418 = vst [vmem:[%s1605_s12 + $0x150] sm:$0xff] %v417_v42 }
  0x43   : > { %420 = vst [vmem:[%s1605_s12 + $0x158] sm:$0xff] %v419_v43 }
  0x44   : > { %422 = vst [vmem:[%s1605_s12 + $0x160] sm:$0xff] %v421_v44 }
  0x45   : > { %424 = vst [vmem:[%s1605_s12 + $0x168] sm:$0xff] %v423_v45 }
  0x46   : > { %426 = vst [vmem:[%s1605_s12 + $0x170] sm:$0xff] %v425_v46 }
  0x47   : > { %428 = vst [vmem:[%s1605_s12 + $0x178] sm:$0xff] %v427_v47 }
  0x48 PF: > { %p1143_p7 = scmp.ge.s32.totalorder %s1511_s21, 1  ;;  %p441_p8 = scmp.lt.s32.totalorder %s1511_s21, 13 }
  0x4a   : > { %p442_p9 = pnand %p1143_p7, %p441_p8 }
  0x4b   : > { %s448_s13 = sand.u32 (!%p442_p9), 1, %s1487_s15   ;;  %s495_s14 = smul.u32 (!%p442_p9), 3, %s1495_s17 }
  0x4c   : > { %445 = sbr.rel (%p442_p9) target bundleno = 328 (0x148), region = 66  ;;  %s1145_s25 = sshll.u32 (!%p442_p9), %s1499_s18, 1 }
  0x4d   : > { %s1398_s24 = smul.u32 (!%p442_p9), 384, %s448_s13  ;;  %p498_p10 = scmp.lt.s32.totalorder (!%p442_p9), %s495_s14, 17 }
  0x4e   : > { %p508_p11 = scmp.lt.s32.totalorder (!%p442_p9), %s1145_s25, 3  ;;  %p528_p12 = scmp.eq.s32.totalorder (!%p442_p9), %s1495_s17, 0 }
  0x4f   : > { %p1150_p13 = scmp.ne.s32.totalorder (!%p442_p9), %s1495_s17, 0 }
  0x51   : > { %s1886_s14 = smov (!%p498_p10, %s495_s14), 17  ;;  %s1888_s25 = smov (!%p508_p11, %s1145_s25), 3 }
  0x52   : > { %s1144_s26 = sshll.u32 %s1886_s14, 2  ;;  %s510_s6 = scalar_lea.vmem %s1870_s2, %s1888_s25 }
  0x53   : > { %s1711_s30 = scalar_lea.vmem %s1868_s0, %s1144_s26  ;;  %s1147_s18 = sshll.u32 %s1888_s25, 3 }
  0x54   : > { %s1149_s7 = sshll.u32 %s1888_s25, 1  ;;  %s1722_s10 = scalar_lea.vmem %s1871_s3, %s1147_s18 }
  0x55   : > { %s1727_s13 = scalar_lea.vmem %s1872_s4, %s1149_s7  ;;  %s1729_s14 = scalar_lea.vmem [#allocation3], %s1398_s24 }
  0x56   : > { %531 = sbr.rel (%p1150_p13) target bundleno = 94 (0x5e), region = 74 }
  0x5b   : > { %v1513_v48 = vmov 0.0  }
  0x5c   : > { %532 = vst [vmem:[#allocation2] sm:$0xff] %v1513_v48 }
  0x5d   : > { %533 = vst [vmem:[#allocation2 + $0x8] sm:$0xff] %v1513_v48 }
  0x5e PF: > { %538 = sbr.rel (!%p528_p12) target bundleno = 99 (0x63), region = 78  ;;  %v1514_v49 = vmov (%p528_p12), 0.0  }
  0x5f   : > { %539 = vst [vmem:[%s1727_s13] sm:$0xf] (%p528_p12), %v1514_v49 }
  0x63 PF: > { %v1210_v50 = vld [vmem:[%s1729_s14 + $0x70] sm:$0xf]  ;;  %v1364_v51 = vld [vmem:[%s1729_s14 + $0x74] sm:$0xf0]  ;;  %v1202_v55 = vld [vmem:[%s1729_s14 + $0x60] sm:$0xf] }
  0x64   : > { %v1274_v52 = vld [vmem:[%s1729_s14 + $0xf0] sm:$0xf]  ;;  %v1211_v53 = vor.u32 %v1364_v51, %v1210_v50  ;;  %v1380_v54 = vld [vmem:[%s1729_s14 + $0xf4] sm:$0xf0]  ;;  %v1362_v56 = vld [vmem:[%s1729_s14 + $0x64] sm:$0xf0] }
  0x65   : > { %v1275_v57 = vor.u32 %v1380_v54, %v1274_v52  ;;  %v1266_v58 = vld [vmem:[%s1729_s14 + $0xe0] sm:$0xf]  ;;  %v1378_v59 = vld [vmem:[%s1729_s14 + $0xe4] sm:$0xf0]  ;;  %v1203_v60 = vor.u32 %v1362_v56, %v1202_v55  ;;  %v1194_v61 = vld [vmem:[%s1729_s14 + $0x50] sm:$0xf] }
  0x66   : > { %843 = vmatpush.bf16.msra.mxu0 %v1211_v53  ;;  %v1267_v62 = vor.u32 %v1378_v59, %v1266_v58  ;;  %v1360_v63 = vld [vmem:[%s1729_s14 + $0x54] sm:$0xf0]  ;;  %v1338_v0 = vld [vmem:[%s1729_s14 + $0x170] sm:$0xf]  ;;  %v1330_v5 = vld [vmem:[%s1729_s14 + $0x160] sm:$0xf] }
  0x67   : > { %856 = vmatpush.bf16.msra.mxu1 %v1275_v57  ;;  %v1396_v1 = vld [vmem:[%s1729_s14 + $0x174] sm:$0xf0]  ;;  %v1258_v2 = vld [vmem:[%s1729_s14 + $0xd0] sm:$0xf]  ;;  %v1394_v6 = vld [vmem:[%s1729_s14 + $0x164] sm:$0xf0]  ;;  %v1195_v8 = vor.u32 %v1360_v63, %v1194_v61 }
  0x68   : > { %v1376_v3 = vld [vmem:[%s1729_s14 + $0xd4] sm:$0xf0]  ;;  %v1339_v4 = vor.u32 %v1396_v1, %v1338_v0  ;;  %v1363_v7 = vld [vmem:[%s1729_s14 + $0x74] sm:$0xf]  ;;  %v1186_v9 = vld [vmem:[%s1729_s14 + $0x40] sm:$0xf]  ;;  %v1331_v11 = vor.u32 %v1394_v6, %v1330_v5 }
  0x69   : > { %v1358_v10 = vld [vmem:[%s1729_s14 + $0x44] sm:$0xf0]  ;;  %v1212_v12 = vld [vmem:[%s1729_s14 + $0x78] sm:$0xf0]  ;;  %v1259_v13 = vor.u32 %v1376_v3, %v1258_v2  ;;  %v1250_v14 = vld [vmem:[%s1729_s14 + $0xc0] sm:$0xf] }
  0x6a   : > { %844 = vmatpush.bf16.msra.mxu0 %v1203_v60  ;;  %869 = vmatpush.bf16.msra.mxu2 %v1339_v4  ;;  %v1374_v15 = vld [vmem:[%s1729_s14 + $0xc4] sm:$0xf0]  ;;  %v1215_v16 = vor.u32 %v1363_v7, %v1212_v12  ;;  %v1322_v17 = vld [vmem:[%s1729_s14 + $0x150] sm:$0xf]  ;;  %v1392_v18 = vld [vmem:[%s1729_s14 + $0x154] sm:$0xf0]  ;;  %v1187_v22 = vor.u32 %v1358_v10, %v1186_v9 }
  0x6b   : > { %857 = vmatpush.bf16.msra.mxu1 %v1267_v62  ;;  %v1361_v19 = vld [vmem:[%s1729_s14 + $0x64] sm:$0xf]  ;;  %v1204_v20 = vld [vmem:[%s1729_s14 + $0x68] sm:$0xf0]  ;;  %v1178_v23 = vld [vmem:[%s1729_s14 + $0x30] sm:$0xf]  ;;  %v1323_v25 = vor.u32 %v1392_v18, %v1322_v17  ;;  %v1251_v27 = vor.u32 %v1374_v15, %v1250_v14 }
  0x6c   : > { %882 = vmatpush.bf16.msra.mxu3 %v1215_v16  ;;  %v1207_v21 = vor.u32 %v1361_v19, %v1204_v20  ;;  %v1356_v24 = vld [vmem:[%s1729_s14 + $0x34] sm:$0xf0]  ;;  %v1314_v26 = vld [vmem:[%s1729_s14 + $0x140] sm:$0xf]  ;;  %v1390_v28 = vld [vmem:[%s1729_s14 + $0x144] sm:$0xf0] }
  0x6d   : > { %v1359_v29 = vld [vmem:[%s1729_s14 + $0x54] sm:$0xf]  ;;  %v1196_v30 = vld [vmem:[%s1729_s14 + $0x58] sm:$0xf0]  ;;  %v1242_v31 = vld [vmem:[%s1729_s14 + $0xb0] sm:$0xf]  ;;  %v1179_v34 = vor.u32 %v1356_v24, %v1178_v23  ;;  %v1315_v36 = vor.u32 %v1390_v28, %v1314_v26 }
  0x6e   : > { %845 = vmatpush.bf16.msra.mxu0 %v1195_v8  ;;  %870 = vmatpush.bf16.msra.mxu2 %v1331_v11  ;;  %v1372_v32 = vld [vmem:[%s1729_s14 + $0xb4] sm:$0xf0]  ;;  %v1199_v33 = vor.u32 %v1359_v29, %v1196_v30  ;;  %v1170_v35 = vld [vmem:[%s1729_s14 + $0x20] sm:$0xf]  ;;  %v1357_v37 = vld [vmem:[%s1729_s14 + $0x44] sm:$0xf] }
  0x6f   : > { %858 = vmatpush.bf16.msra.mxu1 %v1259_v13  ;;  %v1188_v38 = vld [vmem:[%s1729_s14 + $0x48] sm:$0xf0]  ;;  %v1243_v39 = vor.u32 %v1372_v32, %v1242_v31  ;;  %v1354_v40 = vld [vmem:[%s1729_s14 + $0x24] sm:$0xf0]  ;;  %v1306_v41 = vld [vmem:[%s1729_s14 + $0x130] sm:$0xf] }
  0x70   : > { %883 = vmatpush.bf16.msra.mxu3 %v1207_v21  ;;  %v1388_v42 = vld [vmem:[%s1729_s14 + $0x134] sm:$0xf0]  ;;  %v1234_v43 = vld [vmem:[%s1729_s14 + $0xa0] sm:$0xf]  ;;  %v1370_v44 = vld [vmem:[%s1729_s14 + $0xa4] sm:$0xf0]  ;;  %v1191_v45 = vor.u32 %v1357_v37, %v1188_v38  ;;  %v1171_v46 = vor.u32 %v1354_v40, %v1170_v35 }
  0x71   : > { %v1162_v47 = vld [vmem:[%s1729_s14 + $0x10] sm:$0xf]  ;;  %v1307_v48 = vor.u32 %v1388_v42, %v1306_v41  ;;  %v1355_v49 = vld [vmem:[%s1729_s14 + $0x34] sm:$0xf]  ;;  %v1180_v50 = vld [vmem:[%s1729_s14 + $0x38] sm:$0xf0]  ;;  %v1235_v51 = vor.u32 %v1370_v44, %v1234_v43 }
  0x72   : > { %846 = vmatpush.bf16.msra.mxu0 %v1187_v22  ;;  %871 = vmatpush.bf16.msra.mxu2 %v1323_v25  ;;  %v1352_v52 = vld [vmem:[%s1729_s14 + $0x14] sm:$0xf0]  ;;  %v1298_v53 = vld [vmem:[%s1729_s14 + $0x120] sm:$0xf]  ;;  %v1386_v54 = vld [vmem:[%s1729_s14 + $0x124] sm:$0xf0]  ;;  %v1183_v59 = vor.u32 %v1355_v49, %v1180_v50 }
  0x73   : > { %859 = vmatpush.bf16.msra.mxu1 %v1251_v27  ;;  %v1226_v55 = vld [vmem:[%s1729_s14 + $0x90] sm:$0xf]  ;;  %v1368_v56 = vld [vmem:[%s1729_s14 + $0x94] sm:$0xf0]  ;;  %v1154_v57 = vld [vmem:[%s1729_s14] sm:$0xf]  ;;  %v1163_v60 = vor.u32 %v1352_v52, %v1162_v47  ;;  %v1299_v61 = vor.u32 %v1386_v54, %v1298_v53 }
  0x74   : > { %884 = vmatpush.bf16.msra.mxu3 %v1199_v33  ;;  %v1350_v58 = vld [vmem:[%s1729_s14 + $0x4] sm:$0xf0]  ;;  %v1353_v62 = vld [vmem:[%s1729_s14 + $0x24] sm:$0xf]  ;;  %v1172_v63 = vld [vmem:[%s1729_s14 + $0x28] sm:$0xf0]  ;;  %v1227_v1 = vor.u32 %v1368_v56, %v1226_v55 }
  0x75   : > { %v542_v0 = vld [vmem:[%s1711_s30] sm:$0xff]  ;;  %v1218_v2 = vld [vmem:[%s1729_s14 + $0x80] sm:$0xf]  ;;  %v1384_v4 = vld [vmem:[%s1729_s14 + $0x114] sm:$0xf0]  ;;  %v1175_v10 = vor.u32 %v1353_v62, %v1172_v63  ;;  %v1155_v12 = vor.u32 %v1350_v58, %v1154_v57  ;;  %p1344_p0 = scmp.ne.s32.totalorder %s1495_s17, 5 }
  0x76   : > { %847 = vmatpush.bf16.msra.mxu0 %v1179_v34  ;;  %872 = vmatpush.bf16.msra.mxu2 %v1315_v36  ;;  %v1290_v3 = vld [vmem:[%s1729_s14 + $0x110] sm:$0xf]  ;;  %v1366_v5 = vld [vmem:[%s1729_s14 + $0x84] sm:$0xf0]  ;;  %v1379_v6 = vld [vmem:[%s1729_s14 + $0xf4] sm:$0xf]  ;;  %v594_v11 = vunpack.c.l.b16 %v542_v0  ;;  %v595_v14 = vunpack.c.h.b16 %v542_v0 }
  0x77   : > { %860 = vmatpush.bf16.msra.mxu1 %v1243_v39  ;;  %v1276_v7 = vld [vmem:[%s1729_s14 + $0xf8] sm:$0xf0]  ;;  %v1395_v8 = vld [vmem:[%s1729_s14 + $0x174] sm:$0xf]  ;;  %v1291_v13 = vor.u32 %v1384_v4, %v1290_v3  ;;  %v543_v17 = vld [vmem:[%s1711_s30 + $0x8] sm:$0xf]  ;;  %v1219_v18 = vor.u32 %v1366_v5, %v1218_v2 }
  0x78   : > { %885 = vmatpush.bf16.msra.mxu3 %v1191_v45  ;;  %v1340_v9 = vld [vmem:[%s1729_s14 + $0x178] sm:$0xf0]  ;;  %v1351_v15 = vld [vmem:[%s1729_s14 + $0x14] sm:$0xf]  ;;  %v1279_v19 = vor.u32 %v1379_v6, %v1276_v7  ;;  %v1282_v20 = vld [vmem:[%s1729_s14 + $0x100] sm:$0xf]  ;;  %v597_v27 = vpack.c.b16 %v594_v11, %v594_v11  ;;  %v596_v29 = vunpack.c.l.b16 %v543_v17  ;;  %v1807_v30 = vpack.c.b16 %v595_v14, %v595_v14 }
  0x79   : > { %v1164_v16 = vld [vmem:[%s1729_s14 + $0x18] sm:$0xf0]  ;;  %v1382_v21 = vld [vmem:[%s1729_s14 + $0x104] sm:$0xf0]  ;;  %v1343_v22 = vor.u32 %v1395_v8, %v1340_v9  ;;  %v1377_v23 = vld [vmem:[%s1729_s14 + $0xe4] sm:$0xf] }
  0x7a   : > { %848 = vmatpush.bf16.msra.mxu0 %v1171_v46  ;;  %873 = vmatpush.bf16.msra.mxu2 %v1307_v48  ;;  %v1268_v24 = vld [vmem:[%s1729_s14 + $0xe8] sm:$0xf0]  ;;  %v1393_v25 = vld [vmem:[%s1729_s14 + $0x164] sm:$0xf]  ;;  %v1167_v28 = vor.u32 %v1351_v15, %v1164_v16  ;;  %v1283_v31 = vor.u32 %v1382_v21, %v1282_v20  ;;  %v1375_v36 = vld [vmem:[%s1729_s14 + $0xd4] sm:$0xf]  ;;  %v599_v40 = vpack.c.b16 %v596_v29, %v596_v29 }
  0x7b   : > { %861 = vmatpush.bf16.msra.mxu1 %v1235_v51  ;;  %v1332_v26 = vld [vmem:[%s1729_s14 + $0x168] sm:$0xf0]  ;;  %v1349_v32 = vld [vmem:[%s1729_s14 + $0x4] sm:$0xf]  ;;  %v1271_v34 = vor.u32 %v1377_v23, %v1268_v24  ;;  %v1260_v37 = vld [vmem:[%s1729_s14 + $0xd8] sm:$0xf0] }
  0x7c   : > { %886 = vmatpush.bf16.msra.mxu3 %v1183_v59  ;;  %v1156_v33 = vld [vmem:[%s1729_s14 + $0x8] sm:$0xf0]  ;;  %v1335_v35 = vor.u32 %v1393_v25, %v1332_v26  ;;  %v1391_v38 = vld [vmem:[%s1729_s14 + $0x154] sm:$0xf]  ;;  %v1324_v39 = vld [vmem:[%s1729_s14 + $0x158] sm:$0xf0]  ;;  %v1263_v42 = vor.u32 %v1375_v36, %v1260_v37 }
  0x7d   : > { %v1159_v41 = vor.u32 %v1349_v32, %v1156_v33  ;;  %v1327_v43 = vor.u32 %v1391_v38, %v1324_v39  ;;  %v1373_v44 = vld [vmem:[%s1729_s14 + $0xc4] sm:$0xf]  ;;  %v1252_v45 = vld [vmem:[%s1729_s14 + $0xc8] sm:$0xf0]  ;;  %v1371_v50 = vld [vmem:[%s1729_s14 + $0xb4] sm:$0xf] }
  0x7e   : > { %849 = vmatpush.bf16.msra.mxu0 %v1163_v60  ;;  %874 = vmatpush.bf16.msra.mxu2 %v1299_v61  ;;  %v1389_v46 = vld [vmem:[%s1729_s14 + $0x144] sm:$0xf]  ;;  %v1316_v47 = vld [vmem:[%s1729_s14 + $0x148] sm:$0xf0]  ;;  %v1255_v48 = vor.u32 %v1373_v44, %v1252_v45  ;;  %v1244_v51 = vld [vmem:[%s1729_s14 + $0xb8] sm:$0xf0] }
  0x7f   : > { %862 = vmatpush.bf16.msra.mxu1 %v1227_v1  ;;  %v1319_v49 = vor.u32 %v1389_v46, %v1316_v47  ;;  %v1387_v52 = vld [vmem:[%s1729_s14 + $0x134] sm:$0xf]  ;;  %v1308_v53 = vld [vmem:[%s1729_s14 + $0x138] sm:$0xf0]  ;;  %v1247_v54 = vor.u32 %v1371_v50, %v1244_v51  ;;  %v1369_v56 = vld [vmem:[%s1729_s14 + $0xa4] sm:$0xf] }
  0x80   : > { %887 = vmatpush.bf16.msra.mxu3 %v1175_v10  ;;  %v1311_v55 = vor.u32 %v1387_v52, %v1308_v53  ;;  %v1236_v57 = vld [vmem:[%s1729_s14 + $0xa8] sm:$0xf0]  ;;  %v1385_v58 = vld [vmem:[%s1729_s14 + $0x124] sm:$0xf]  ;;  %v1367_v62 = vld [vmem:[%s1729_s14 + $0x94] sm:$0xf] }
  0x81   : > { %v1300_v59 = vld [vmem:[%s1729_s14 + $0x128] sm:$0xf0]  ;;  %v1239_v60 = vor.u32 %v1369_v56, %v1236_v57  ;;  %v1228_v63 = vld [vmem:[%s1729_s14 + $0x98] sm:$0xf0]  ;;  %v1383_v0 = vld [vmem:[%s1729_s14 + $0x114] sm:$0xf] }
  0x82   : > { %850 = vmatpush.bf16.msra.mxu0 %v1155_v12  ;;  %875 = vmatpush.bf16.msra.mxu2 %v1291_v13  ;;  %v1303_v61 = vor.u32 %v1385_v58, %v1300_v59  ;;  %v1292_v1 = vld [vmem:[%s1729_s14 + $0x118] sm:$0xf0]  ;;  %v1231_v2 = vor.u32 %v1367_v62, %v1228_v63  ;;  %v1365_v4 = vld [vmem:[%s1729_s14 + $0x84] sm:$0xf]  ;;  %v1220_v5 = vld [vmem:[%s1729_s14 + $0x88] sm:$0xf0] }
  0x83   : > { %863 = vmatpush.bf16.msra.mxu1 %v1219_v18  ;;  %v1295_v3 = vor.u32 %v1383_v0, %v1292_v1  ;;  %v1381_v6 = vld [vmem:[%s1729_s14 + $0x104] sm:$0xf]  ;;  %v1284_v7 = vld [vmem:[%s1729_s14 + $0x108] sm:$0xf0]  ;;  %v1223_v8 = vor.u32 %v1365_v4, %v1220_v5  ;;  %v540_v15 = vld [vmem:[#allocation2] sm:$0xff] }
  0x84   : > { %888 = vmatpush.bf16.msra.mxu3 %v1167_v28  ;;  %v1287_v9 = vor.u32 %v1381_v6, %v1284_v7  ;;  %v541_v25 = vld [vmem:[#allocation2 + $0x8] sm:$0xff] }
  0x85   : > { %851 = vmatmul.bf16.vlgmr.msra.gmra.mxu0 %v597_v27 }
  0x86   : > { %895 = vmatpush.bf16.msrb.mxu0 %v1279_v19  ;;  %864 = vmatmul.bf16.vlgmr.msra.gmra.mxu1 %v1807_v30 }
  0x87   : > { %908 = vmatpush.bf16.msrb.mxu1 %v1343_v22  ;;  %876 = vmatpush.bf16.msra.mxu2 %v1283_v31 }
  0x88   : > { %889 = vmatpush.bf16.msra.mxu3 %v1159_v41 }
  0x8a   : > { %896 = vmatpush.bf16.msrb.mxu0 %v1271_v34  ;;  %877 = vmatmul.bf16.vlgmr.msra.gmra.mxu2 %v599_v40 }
  0x8b   : > { %909 = vmatpush.bf16.msrb.mxu1 %v1335_v35  ;;  %890 = vmatmul.bf16.vlgmr.msra.gmra.mxu3 %v597_v27 }
  0x8e   : > { %897 = vmatpush.bf16.msrb.mxu0 %v1263_v42 }
  0x8f   : > { %910 = vmatpush.bf16.msrb.mxu1 %v1327_v43 }
  0x92   : > { %898 = vmatpush.bf16.msrb.mxu0 %v1255_v48 }
  0x93   : > { %911 = vmatpush.bf16.msrb.mxu1 %v1319_v49 }
  0x96   : > { %899 = vmatpush.bf16.msrb.mxu0 %v1247_v54 }
  0x97   : > { %912 = vmatpush.bf16.msrb.mxu1 %v1311_v55 }
  0x9a   : > { %900 = vmatpush.bf16.msrb.mxu0 %v1239_v60 }
  0x9b   : > { %913 = vmatpush.bf16.msrb.mxu1 %v1303_v61 }
  0x9e   : > { %901 = vmatpush.bf16.msrb.mxu0 %v1231_v2 }
  0x9f   : > { %914 = vmatpush.bf16.msrb.mxu1 %v1295_v3 }
  0xa2   : > { %902 = vmatpush.bf16.msrb.mxu0 %v1223_v8 }
  0xa3   : > { %915 = vmatpush.bf16.msrb.mxu1 %v1287_v9 }
  0xa5   : > { %903 = vmatmul.bf16.vlgmr.msrb.gmra.mxu0 %v1807_v30 }
  0xa6   : > { %916 = vmatmul.bf16.vlgmr.msrb.gmra.mxu1 %v599_v40 }
 0x102   : > { %v852_v10 = vpop.f32.mrf.mxu0 }
 0x103   : > { %v865_v11 = vpop.f32.mrf.mxu1 }
 0x104   : > { %v866_v12 = vadd.f32 %v865_v11, %v852_v10 }
 0x10a   : > { %v854_v13 = vpop.f32.mrf.mxu0 }
 0x10b   : > { %v867_v14 = vpop.f32.mrf.mxu1 }
 0x10d   : > { %v878_v16 = vpop.f32.mrf.mxu2 }
 0x10e   : > { %v879_v17 = vadd.f32 %v878_v16, %v866_v12  ;;  %v891_v19 = vpop.f32.mrf.mxu3 }
 0x110   : > { %v921_v18 = vadd.f32 %v879_v17, %v540_v15 }
 0x112   : > { %923 = vst [vmem:[#allocation2] sm:$0xff] %v921_v18 }
 0x115   : > { %v880_v20 = vpop.f32.mrf.mxu2 }
 0x116   : > { %v893_v21 = vpop.f32.mrf.mxu3 }
 0x122   : > { %v904_v22 = vpop.f32.mrf.mxu0 }
 0x123   : > { %v905_v23 = vadd.f32 %v904_v22, %v891_v19  ;;  %v917_v24 = vpop.f32.mrf.mxu1 }
 0x125   : > { %v918_v26 = vadd.f32 %v917_v24, %v905_v23 }
 0x127   : > { %v922_v27 = vadd.f32 %v918_v26, %v541_v25  ;;  %928 = sbr.rel (%p1344_p0) target bundleno = 328 (0x148), region = 82 }
 0x129   : > { %924 = vst [vmem:[#allocation2 + $0x8] sm:$0xff] %v922_v27 }
 0x12a   : > { %v906_v28 = vpop.f32.mrf.mxu0 }
 0x12b   : > { %v919_v29 = vpop.f32.mrf.mxu1 }
 0x12c   : > { %v929_v30 = vld [vmem:[#allocation2] sm:$0xff]  ;;  %vm967_vm0 = vcmask 1040384   ;;  %vm974_vm1 = vcmask 1041408  }
 0x12d   : > { %v931_v31 = vld [vmem:[%s510_s6] sm:$0x3] }
 0x12e   : > { %v933_v33 = vperm.slane %v931_v31, 0  ;;  %v934_v34 = vperm.slane %v931_v31, 1  ;;  %v970_v1 = vld [vmem:[%s1727_s13] sm:$0xf] }
 0x130   : > { %v930_v32 = vld [vmem:[#allocation2 + $0x8] sm:$0xff]  ;;  %v937_v35 = vadd.f32 %v933_v33, %v929_v30 }
 0x131   : > { %v938_v36 = vadd.f32 %v934_v34, %v930_v32 }
 0x132   : > { %939 = vst [vmem:[%s1722_s10] sm:$0xff] %v937_v35  ;;  %v941_v39 = vmul.f32 %v937_v35, %v937_v35  ;;  %v943_v40 = vrot.slane %v937_v35, 4 }
 0x133   : > { %v942_v37 = vmul.f32 %v938_v36, %v938_v36  ;;  %v949_v38 = vrot.slane %v938_v36, 4  ;;  %940 = vst [vmem:[%s1722_s10 + $0x8] sm:$0xff] %v938_v36 }
 0x134   : > { %v944_v43 = vadd.f32 %v943_v40, %v937_v35  ;;  %v955_v44 = vrot.slane %v941_v39, 4 }
 0x135   : > { %v950_v41 = vadd.f32 %v949_v38, %v938_v36  ;;  %v961_v42 = vrot.slane %v942_v37, 4 }
 0x136   : > { %v945_v45 = vrot.slane %v944_v43, 2  ;;  %v956_v47 = vadd.f32 %v955_v44, %v941_v39 }
 0x137   : > { %v951_v46 = vrot.slane %v950_v41, 2  ;;  %v962_v48 = vadd.f32 %v961_v42, %v942_v37 }
 0x138   : > { %v946_v49 = vadd.f32 %v945_v45, %v944_v43  ;;  %v957_v51 = vrot.slane %v956_v47, 2 }
 0x139   : > { %v952_v50 = vadd.f32 %v951_v46, %v950_v41  ;;  %v963_v52 = vrot.slane %v962_v48, 2 }
 0x13a   : > { %v947_v53 = vrot.slane %v946_v49, 1  ;;  %v958_v55 = vadd.f32 %v957_v51, %v956_v47 }
 0x13b   : > { %v953_v54 = vrot.slane %v952_v50, 1  ;;  %v964_v56 = vadd.f32 %v963_v52, %v962_v48 }
 0x13c   : > { %v948_v57 = vadd.f32 %v947_v53, %v946_v49  ;;  %v959_v59 = vrot.slane %v958_v55, 1 }
 0x13d   : > { %v954_v58 = vadd.f32 %v953_v54, %v952_v50  ;;  %v965_v60 = vrot.slane %v964_v56, 1 }
 0x13e   : > { %v960_v61 = vadd.f32 %v959_v59, %v958_v55 }
 0x13f   : > { %v966_v62 = vadd.f32 %v965_v60, %v964_v56 }
 0x140   : > { %v968_v63 = vsel %vm967_vm0, %v948_v57, %v960_v61 }
 0x141   : > { %v969_v0 = vsel %vm967_vm0, %v954_v58, %v966_v62 }
 0x142   : > { %v973_v2 = vrot.slane %v969_v0, 6 }
 0x144   : > { %v975_v3 = vsel %vm974_vm1, %v968_v63, %v973_v2 }
 0x145   : > { %v977_v4 = vadd.f32 %v975_v3, %v970_v1 }
 0x147   : > { %978 = vst [vmem:[%s1727_s13] sm:$0xf] %v977_v4 }
 0x148 PF: > { %s15_s21 = sadd.s32 1, %s1511_s21   ;;  %s1873_s15 = smov %s1491_s16 }
 0x149   : > { %p12_p1 = scmp.ge.s32.totalorder %s15_s21, 14   ;;  %s1874_s16 = smov %s1591_s28 }
 0x14a   : > { %s1875_s17 = smov %s1503_s19  ;;  %s1876_s18 = smov %s1507_s20 }
 0x14b   : > { %s1877_s19 = smov %s1880_s22  ;;  %s1878_s20 = smov %s1884_s23 }
 0x14c   :  { %14 = sbr.rel (!%p12_p1) target bundleno = 4 (0x4), region = 135 }

// kernel: forward.29
= control target key start
LH: loop header
LB: loop body
LE: loop exit
PB: predicated region body
PF: predicated region fallthrough
CT: control target
= control target key end

     0   :  { %v115_v14 = vmov 857870592   ;;  %vm55_vm3 = vcmask 1040384   ;;  %vm57_vm4 = vcmask 1042434   ;;  %vm59_vm5 = vcmask 1041408   ;;  %s168_s1 = inlined_call_operand.vmem [shape: f32[2,512], index: 1, kind: input, shape index: {}]   ;;  %s169_s2 = inlined_call_operand.vmem [shape: f32[1,512], index: 2, kind: input, shape index: {}]   ;;  %s170_s0 = inlined_call_operand.vmem [shape: f32[8,512], index: 0, kind: input, shape index: {}]   ;;  %s171_s3 = inlined_call_operand.vmem [shape: f32[1,512], index: 3, kind: input, shape index: {}]   ;;  %s172_s4 = inlined_call_operand.vmem [shape: bf16[8,512], index: 4, kind: output, shape index: {}]  }
   0x1   :  { %v17_v0 = vld [vmem:[%s168_s1] sm:$0xff]  ;;  %v46_v15 = vunpack.c.l.s4 %v115_v14  ;;  %v64_v33 = vld [vmem:[%s170_s0 + $0x8] sm:$0xff]  ;;  %v65_v34 = vld [vmem:[%s170_s0 + $0x10] sm:$0xff] }
   0x2   :  { %v18_v1 = vmul.f32 0.125, %v17_v0  ;;  %v25_v16 = vld [vmem:[%s169_s2] sm:$0xf]  ;;  %v66_v35 = vld [vmem:[%s170_s0 + $0x18] sm:$0xff] }
   0x3   :  { %v47_v17 = vunpack.c.0.s8 %v46_v15  ;;  %v63_v25 = vld [vmem:[%s170_s0] sm:$0xff] }
   0x4   :  { %v19_v2 = vmul.f32 %v18_v1, %v18_v1  ;;  %v43_v26 = vld [vmem:[%s171_s3] sm:$0xf] }
   0x6   :  { %v21_v3 = vrot.slane %v19_v2, 7 }
   0x8   :  { %v23_v4 = vsub.f32 %v18_v1, %v21_v3 }
   0xa   :  { %v24_v5 = vmax.f32 %v23_v4, 0.0 }
   0xc   :  { %v26_v6 = vadd.f32 1e-05, %v24_v5 }
   0xe   :  { %113 = vrsqrt.f32 %v26_v6  ;;  %vm33_vm0 = vweird.f32 %v26_v6 }
  0x14   :  { %v114_v7 = vpop.eup %113 }
  0x15   :  { %v28_v8 = vmul.f32 %v114_v7, %v26_v6  ;;  %vm34_vm1 = vweird.f32 %v114_v7 }
  0x16   :  { %vm35_vm2 = vmor %vm33_vm0, %vm34_vm1 }
  0x17   :  { %v29_v9 = vmul.f32 %v114_v7, %v28_v8 }
  0x19   :  { %v30_v10 = vmul.f32 0.5, %v29_v9 }
  0x1b   :  { %v31_v11 = vsub.f32 1.5, %v30_v10 }
  0x1d   :  { %v32_v12 = vmul.f32 %v114_v7, %v31_v11 }
  0x1f   :  { %v36_v13 = vsel %vm35_vm2, %v114_v7, %v32_v12 }
  0x20   :  { %38 = vst [vmem:[#allocation1] sm:$0xff] %v36_v13 }
  0x27   :  { %v40_v18 = vld [vmem:[#allocation1 + $0x1] ss:$2 sm:$0xff] }
  0x28   :  { %v42_v19 = vmul.f32 %v40_v18, %v25_v16 }
  0x2a   :  { %v48_v20 = vperm.slane %v42_v19, %v47_v17  ;;  %v67_v27 = vperm.slane %v42_v19, 0  ;;  %v68_v28 = vperm.slane %v42_v19, 1  ;;  %v69_v29 = vperm.slane %v42_v19, 2 }
  0x2b   :  { %v70_v30 = vperm.slane %v42_v19, 3 }
  0x2c   :  { %v50_v21 = vmul.f32 %v48_v20, %v18_v1  ;;  %v75_v38 = vmul.f32 %v67_v27, %v63_v25  ;;  %v76_v39 = vmul.f32 %v68_v28, %v64_v33  ;;  %v77_v40 = vmul.f32 %v69_v29, %v65_v34 }
  0x2d   :  { %v78_v41 = vmul.f32 %v70_v30, %v66_v35 }
  0x2e   :  { %v52_v22 = vrot.slane %v50_v21, 1  ;;  %v53_v23 = vrot.slane %v50_v21, 2  ;;  %v54_v24 = vrot.slane %v50_v21, 3 }
  0x30   :  { %v56_v31 = vsel %vm55_vm3, %v50_v21, %v52_v22  ;;  %v58_v32 = vsel %vm57_vm4, %v53_v23, %v54_v24 }
  0x31   :  { %v60_v36 = vsel %vm59_vm5, %v56_v31, %v58_v32 }
  0x32   :  { %v62_v37 = vsub.f32 %v43_v26, %v60_v36 }
  0x34   :  { %v80_v42 = vperm.slane %v62_v37, 0  ;;  %v81_v43 = vperm.slane %v62_v37, 1  ;;  %v82_v44 = vperm.slane %v62_v37, 2  ;;  %v83_v45 = vperm.slane %v62_v37, 3 }
  0x36   :  { %v88_v46 = vadd.f32 %v80_v42, %v75_v38  ;;  %v89_v47 = vadd.f32 %v81_v43, %v76_v39  ;;  %v90_v48 = vadd.f32 %v82_v44, %v77_v40  ;;  %v91_v49 = vadd.f32 %v83_v45, %v78_v41 }
  0x38   :  { %vm92_vm6 = vcmp.gt.f32.partialorder %v88_v46, 0.0  ;;  %vm93_vm7 = vcmp.gt.f32.partialorder %v89_v47, 0.0  ;;  %v96_v50 = vmul.f32 0.2, %v88_v46  ;;  %v97_v51 = vmul.f32 0.2, %v89_v47 }
  0x39   :  { %vm94_vm8 = vcmp.gt.f32.partialorder %v90_v48, 0.0  ;;  %vm95_vm9 = vcmp.gt.f32.partialorder %v91_v49, 0.0  ;;  %v98_v52 = vmul.f32 0.2, %v90_v48  ;;  %v99_v53 = vmul.f32 0.2, %v91_v49 }
  0x3a   :  { %v100_v54 = vsel %vm92_vm6, %v88_v46, %v96_v50  ;;  %v101_v55 = vsel %vm93_vm7, %v89_v47, %v97_v51 }
  0x3b   :  { %v104_v56 = vpack.c.bf16 %v101_v55, %v100_v54  ;;  %v102_v57 = vsel %vm94_vm8, %v90_v48, %v98_v52  ;;  %v103_v58 = vsel %vm95_vm9, %v91_v49, %v99_v53 }
  0x3c   :  { %v105_v59 = vpack.c.bf16 %v103_v58, %v102_v57 }
  0x3d   :  { %106 = vst [vmem:[%s172_s4] sm:$0xff] %v104_v56 }
  0x3e   :  { %107 = vst [vmem:[%s172_s4 + $0x8] sm:$0xff] %v105_v59 }

// kernel: forward.31
= control target key start
LH: loop header
LB: loop body
LE: loop exit
PB: predicated region body
PF: predicated region fallthrough
CT: control target
= control target key end

     0   :  { %v115_v14 = vmov 857870592   ;;  %vm55_vm3 = vcmask 1040384   ;;  %vm57_vm4 = vcmask 1042434   ;;  %vm59_vm5 = vcmask 1041408   ;;  %s168_s1 = inlined_call_operand.vmem [shape: f32[2,512], index: 1, kind: input, shape index: {}]   ;;  %s169_s2 = inlined_call_operand.vmem [shape: f32[1,512], index: 2, kind: input, shape index: {}]   ;;  %s170_s0 = inlined_call_operand.vmem [shape: f32[8,512], index: 0, kind: input, shape index: {}]   ;;  %s171_s3 = inlined_call_operand.vmem [shape: f32[1,512], index: 3, kind: input, shape index: {}]   ;;  %s172_s4 = inlined_call_operand.vmem [shape: bf16[8,512], index: 4, kind: output, shape index: {}]  }
   0x1   :  { %v17_v0 = vld [vmem:[%s168_s1] sm:$0xff]  ;;  %v46_v15 = vunpack.c.l.s4 %v115_v14  ;;  %v64_v33 = vld [vmem:[%s170_s0 + $0x8] sm:$0xff]  ;;  %v65_v34 = vld [vmem:[%s170_s0 + $0x10] sm:$0xff] }
   0x2   :  { %v18_v1 = vmul.f32 0.5, %v17_v0  ;;  %v25_v16 = vld [vmem:[%s169_s2] sm:$0xf]  ;;  %v66_v35 = vld [vmem:[%s170_s0 + $0x18] sm:$0xff] }
   0x3   :  { %v47_v17 = vunpack.c.0.s8 %v46_v15  ;;  %v63_v25 = vld [vmem:[%s170_s0] sm:$0xff] }
   0x4   :  { %v19_v2 = vmul.f32 %v18_v1, %v18_v1  ;;  %v43_v26 = vld [vmem:[%s171_s3] sm:$0xf] }
   0x6   :  { %v21_v3 = vrot.slane %v19_v2, 7 }
   0x8   :  { %v23_v4 = vsub.f32 %v18_v1, %v21_v3 }
   0xa   :  { %v24_v5 = vmax.f32 %v23_v4, 0.0 }
   0xc   :  { %v26_v6 = vadd.f32 1e-05, %v24_v5 }
   0xe   :  { %113 = vrsqrt.f32 %v26_v6  ;;  %vm33_vm0 = vweird.f32 %v26_v6 }
  0x14   :  { %v114_v7 = vpop.eup %113 }
  0x15   :  { %v28_v8 = vmul.f32 %v114_v7, %v26_v6  ;;  %vm34_vm1 = vweird.f32 %v114_v7 }
  0x16   :  { %vm35_vm2 = vmor %vm33_vm0, %vm34_vm1 }
  0x17   :  { %v29_v9 = vmul.f32 %v114_v7, %v28_v8 }
  0x19   :  { %v30_v10 = vmul.f32 0.5, %v29_v9 }
  0x1b   :  { %v31_v11 = vsub.f32 1.5, %v30_v10 }
  0x1d   :  { %v32_v12 = vmul.f32 %v114_v7, %v31_v11 }
  0x1f   :  { %v36_v13 = vsel %vm35_vm2, %v114_v7, %v32_v12 }
  0x20   :  { %38 = vst [vmem:[#allocation1] sm:$0xff] %v36_v13 }
  0x27   :  { %v40_v18 = vld [vmem:[#allocation1 + $0x1] ss:$2 sm:$0xff] }
  0x28   :  { %v42_v19 = vmul.f32 %v40_v18, %v25_v16 }
  0x2a   :  { %v48_v20 = vperm.slane %v42_v19, %v47_v17  ;;  %v67_v27 = vperm.slane %v42_v19, 0  ;;  %v68_v28 = vperm.slane %v42_v19, 1  ;;  %v69_v29 = vperm.slane %v42_v19, 2 }
  0x2b   :  { %v70_v30 = vperm.slane %v42_v19, 3 }
  0x2c   :  { %v50_v21 = vmul.f32 %v48_v20, %v18_v1  ;;  %v75_v38 = vmul.f32 %v67_v27, %v63_v25  ;;  %v76_v39 = vmul.f32 %v68_v28, %v64_v33  ;;  %v77_v40 = vmul.f32 %v69_v29, %v65_v34 }
  0x2d   :  { %v78_v41 = vmul.f32 %v70_v30, %v66_v35 }
  0x2e   :  { %v52_v22 = vrot.slane %v50_v21, 1  ;;  %v53_v23 = vrot.slane %v50_v21, 2  ;;  %v54_v24 = vrot.slane %v50_v21, 3 }
  0x30   :  { %v56_v31 = vsel %vm55_vm3, %v50_v21, %v52_v22  ;;  %v58_v32 = vsel %vm57_vm4, %v53_v23, %v54_v24 }
  0x31   :  { %v60_v36 = vsel %vm59_vm5, %v56_v31, %v58_v32 }
  0x32   :  { %v62_v37 = vsub.f32 %v43_v26, %v60_v36 }
  0x34   :  { %v80_v42 = vperm.slane %v62_v37, 0  ;;  %v81_v43 = vperm.slane %v62_v37, 1  ;;  %v82_v44 = vperm.slane %v62_v37, 2  ;;  %v83_v45 = vperm.slane %v62_v37, 3 }
  0x36   :  { %v88_v46 = vadd.f32 %v80_v42, %v75_v38  ;;  %v89_v47 = vadd.f32 %v81_v43, %v76_v39  ;;  %v90_v48 = vadd.f32 %v82_v44, %v77_v40  ;;  %v91_v49 = vadd.f32 %v83_v45, %v78_v41 }
  0x38   :  { %vm92_vm6 = vcmp.gt.f32.partialorder %v88_v46, 0.0  ;;  %vm93_vm7 = vcmp.gt.f32.partialorder %v89_v47, 0.0  ;;  %v96_v50 = vmul.f32 0.2, %v88_v46  ;;  %v97_v51 = vmul.f32 0.2, %v89_v47 }
  0x39   :  { %vm94_vm8 = vcmp.gt.f32.partialorder %v90_v48, 0.0  ;;  %vm95_vm9 = vcmp.gt.f32.partialorder %v91_v49, 0.0  ;;  %v98_v52 = vmul.f32 0.2, %v90_v48  ;;  %v99_v53 = vmul.f32 0.2, %v91_v49 }
  0x3a   :  { %v100_v54 = vsel %vm92_vm6, %v88_v46, %v96_v50  ;;  %v101_v55 = vsel %vm93_vm7, %v89_v47, %v97_v51 }
  0x3b   :  { %v104_v56 = vpack.c.bf16 %v101_v55, %v100_v54  ;;  %v102_v57 = vsel %vm94_vm8, %v90_v48, %v98_v52  ;;  %v103_v58 = vsel %vm95_vm9, %v91_v49, %v99_v53 }
  0x3c   :  { %v105_v59 = vpack.c.bf16 %v103_v58, %v102_v57 }
  0x3d   :  { %106 = vst [vmem:[%s172_s4] sm:$0xff] %v104_v56 }
  0x3e   :  { %107 = vst [vmem:[%s172_s4 + $0x8] sm:$0xff] %v105_v59 }

// kernel: forward.30
= control target key start
LH: loop header
LB: loop body
LE: loop exit
PB: predicated region body
PF: predicated region fallthrough
CT: control target
= control target key end

     0   :  { %s1821_s15 = smov 0   ;;  %s1823_s16 = smov 0   ;;  %s2225_s0 = inlined_call_operand.vmem [shape: bf16[8,4608], index: 0, kind: input, shape index: {}]   ;;  %s2226_s1 = inlined_call_operand.vmem [shape: bf16[4608,512], index: 1, kind: input, shape index: {}]   ;;  %s2227_s2 = inlined_call_operand.vmem [shape: f32[1,512], index: 2, kind: input, shape index: {}]   ;;  %s2228_s3 = inlined_call_operand.vmem [shape: f32[8,512], index: 3, kind: output, shape index: {0}]   ;;  %s2229_s4 = inlined_call_operand.vmem [shape: f32[2,512], index: 4, kind: output, shape index: {1}]  }
   0x1   :  { %s1825_s17 = smov 0   ;;  %s1827_s18 = smov 0  }
   0x2   :  { %s1829_s19 = smov 0   ;;  %s1831_s20 = smov 0  }
   0x3   :  { %s1833_s21 = smov 0  }
   0x4 LB: > { %s27_s22 = sadd.s32 1, %s1784_s19  ;;  %s34_s23 = sadd.s32 1, %s1788_s20  ;;  %s1792_s21 = sphi %s1833_s21, %s15_s21   ;;  %s1788_s20 = sphi %s1831_s20, %s2235_s20   ;;  %s1784_s19 = sphi %s1829_s19, %s2234_s19   ;;  %s1780_s18 = sphi %s1827_s18, %s2233_s18   ;;  %s1776_s17 = sphi %s1825_s17, %s2232_s17   ;;  %s1772_s16 = sphi %s1823_s16, %s2231_s16   ;;  %s1768_s15 = sphi %s1821_s15, %s2230_s15  }
   0x5   : > { %p28_p0 = scmp.ge.s32.totalorder %s27_s22, 9  ;;  %p78_p1 = scmp.ne.s32.totalorder %s1772_s16, %s1768_s15 }
   0x6   : > { %p79_p2 = scmp.eq.s32.totalorder %s1792_s21, 0  ;;  %s71_s27 = sadd.s32 1, %s1772_s16 }
   0x7   : > { %s2237_s22 = smov (%p28_p0, %s27_s22), 0  ;;  %s2239_s23 = smov (!%p28_p0, %s34_s23), %s1788_s20 }
   0x8   : > { %p80_p3 = por %p79_p2, %p78_p1  ;;  %p36_p4 = scmp.ge.s32.totalorder %s2239_s23, 2 }
   0x9   : > { %s66_s24 = ssub.s32 %s1784_s19, %s2237_s22  ;;  %p1338_p6 = scmp.ge.s32.totalorder %s1792_s21, 18 }
   0xa   : > { %s2241_s23 = smov (%p36_p4, %s2239_s23), 0 }
   0xb   : > { %s67_s25 = ssub.s32 %s1788_s20, %s2241_s23  ;;  %184 = sbr.rel (%p1338_p6) target bundleno = 87 (0x57), region = 16 }
   0xc   : > { %s68_s26 = sor.u32 %s67_s25, %s66_s24 }
   0xd   : > { %p69_p5 = scmp.eq.s32.totalorder %s68_s26, 0 }
   0xf   : > { %s1872_s28 = scalar_select %p69_p5, %s1772_s16, %s71_s27  }
  0x10   : > { %200 = sbr.rel (!%p80_p3) target bundleno = 87 (0x57), region = 24  ;;  %s202_s29 = sand.u32 (%p80_p3), 1, %s1772_s16  }
  0x11   : > { %s1341_s30 = sshll.u32 (%p80_p3), %s1788_s20, 1  ;;  %s1339_s5 = sshll.u32 (%p80_p3), %s202_s29, 9 }
  0x12   : > { %s1614_s6 = sshll.u32 (%p80_p3), %s1784_s19, 8  ;;  %s1886_s12 = scalar_lea.vmem (%p80_p3), [#allocation3], %s1339_s5 }
  0x13   : > { %s208_s7 = sadd.s32 (%p80_p3), %s1614_s6, %s1341_s30 }
  0x14   : > { %s1343_s8 = sshll.u32 (%p80_p3), %s208_s7, 2 }
  0x15   : > { %s1881_s11 = scalar_lea.vmem %s2226_s1, %s1343_s8 }
  0x16   : > { %v365_v0 = vld [vmem:[%s1881_s11] sm:$0xff]  ;;  %v367_v1 = vld [vmem:[%s1881_s11 + $0x10] sm:$0xff] }
  0x17   : > { %v369_v2 = vld [vmem:[%s1881_s11 + $0x20] sm:$0xff]  ;;  %366 = vst [vmem:[%s1886_s12] sm:$0xff] %v365_v0  ;;  %v371_v3 = vld [vmem:[%s1881_s11 + $0x30] sm:$0xff] }
  0x18   : > { %368 = vst [vmem:[%s1886_s12 + $0x8] sm:$0xff] %v367_v1  ;;  %v373_v4 = vld [vmem:[%s1881_s11 + $0x40] sm:$0xff]  ;;  %v375_v5 = vld [vmem:[%s1881_s11 + $0x50] sm:$0xff] }
  0x19   : > { %370 = vst [vmem:[%s1886_s12 + $0x10] sm:$0xff] %v369_v2  ;;  %v377_v6 = vld [vmem:[%s1881_s11 + $0x60] sm:$0xff]  ;;  %v379_v7 = vld [vmem:[%s1881_s11 + $0x70] sm:$0xff] }
  0x1a   : > { %372 = vst [vmem:[%s1886_s12 + $0x18] sm:$0xff] %v371_v3  ;;  %v381_v8 = vld [vmem:[%s1881_s11 + $0x80] sm:$0xff]  ;;  %v383_v9 = vld [vmem:[%s1881_s11 + $0x90] sm:$0xff] }
  0x1b   : > { %374 = vst [vmem:[%s1886_s12 + $0x20] sm:$0xff] %v373_v4  ;;  %v385_v10 = vld [vmem:[%s1881_s11 + $0xa0] sm:$0xff]  ;;  %v387_v11 = vld [vmem:[%s1881_s11 + $0xb0] sm:$0xff] }
  0x1c   : > { %376 = vst [vmem:[%s1886_s12 + $0x28] sm:$0xff] %v375_v5  ;;  %v389_v12 = vld [vmem:[%s1881_s11 + $0xc0] sm:$0xff]  ;;  %v391_v13 = vld [vmem:[%s1881_s11 + $0xd0] sm:$0xff] }
  0x1d   : > { %378 = vst [vmem:[%s1886_s12 + $0x30] sm:$0xff] %v377_v6  ;;  %v393_v14 = vld [vmem:[%s1881_s11 + $0xe0] sm:$0xff]  ;;  %v395_v15 = vld [vmem:[%s1881_s11 + $0xf0] sm:$0xff] }
  0x1e   : > { %380 = vst [vmem:[%s1886_s12 + $0x38] sm:$0xff] %v379_v7  ;;  %v397_v16 = vld [vmem:[%s1881_s11 + $0x100] sm:$0xff]  ;;  %v399_v17 = vld [vmem:[%s1881_s11 + $0x110] sm:$0xff] }
  0x1f   : > { %382 = vst [vmem:[%s1886_s12 + $0x40] sm:$0xff] %v381_v8  ;;  %v401_v18 = vld [vmem:[%s1881_s11 + $0x120] sm:$0xff]  ;;  %v403_v19 = vld [vmem:[%s1881_s11 + $0x130] sm:$0xff] }
  0x20   : > { %384 = vst [vmem:[%s1886_s12 + $0x48] sm:$0xff] %v383_v9  ;;  %v405_v20 = vld [vmem:[%s1881_s11 + $0x140] sm:$0xff]  ;;  %v407_v21 = vld [vmem:[%s1881_s11 + $0x150] sm:$0xff] }
  0x21   : > { %386 = vst [vmem:[%s1886_s12 + $0x50] sm:$0xff] %v385_v10  ;;  %v409_v22 = vld [vmem:[%s1881_s11 + $0x160] sm:$0xff]  ;;  %v411_v23 = vld [vmem:[%s1881_s11 + $0x170] sm:$0xff] }
  0x22   : > { %388 = vst [vmem:[%s1886_s12 + $0x58] sm:$0xff] %v387_v11  ;;  %v413_v24 = vld [vmem:[%s1881_s11 + $0x180] sm:$0xff]  ;;  %v415_v25 = vld [vmem:[%s1881_s11 + $0x190] sm:$0xff] }
  0x23   : > { %390 = vst [vmem:[%s1886_s12 + $0x60] sm:$0xff] %v389_v12  ;;  %v417_v26 = vld [vmem:[%s1881_s11 + $0x1a0] sm:$0xff]  ;;  %v419_v27 = vld [vmem:[%s1881_s11 + $0x1b0] sm:$0xff] }
  0x24   : > { %392 = vst [vmem:[%s1886_s12 + $0x68] sm:$0xff] %v391_v13  ;;  %v421_v28 = vld [vmem:[%s1881_s11 + $0x1c0] sm:$0xff]  ;;  %v423_v29 = vld [vmem:[%s1881_s11 + $0x1d0] sm:$0xff] }
  0x25   : > { %394 = vst [vmem:[%s1886_s12 + $0x70] sm:$0xff] %v393_v14  ;;  %v425_v30 = vld [vmem:[%s1881_s11 + $0x1e0] sm:$0xff]  ;;  %v427_v31 = vld [vmem:[%s1881_s11 + $0x1f0] sm:$0xff] }
  0x26   : > { %396 = vst [vmem:[%s1886_s12 + $0x78] sm:$0xff] %v395_v15  ;;  %v429_v32 = vld [vmem:[%s1881_s11 + $0x200] sm:$0xff]  ;;  %v431_v33 = vld [vmem:[%s1881_s11 + $0x210] sm:$0xff] }
  0x27   : > { %398 = vst [vmem:[%s1886_s12 + $0x80] sm:$0xff] %v397_v16  ;;  %v433_v34 = vld [vmem:[%s1881_s11 + $0x220] sm:$0xff]  ;;  %v435_v35 = vld [vmem:[%s1881_s11 + $0x230] sm:$0xff] }
  0x28   : > { %400 = vst [vmem:[%s1886_s12 + $0x88] sm:$0xff] %v399_v17  ;;  %v437_v36 = vld [vmem:[%s1881_s11 + $0x240] sm:$0xff]  ;;  %v439_v37 = vld [vmem:[%s1881_s11 + $0x250] sm:$0xff] }
  0x29   : > { %402 = vst [vmem:[%s1886_s12 + $0x90] sm:$0xff] %v401_v18  ;;  %v441_v38 = vld [vmem:[%s1881_s11 + $0x260] sm:$0xff]  ;;  %v443_v39 = vld [vmem:[%s1881_s11 + $0x270] sm:$0xff] }
  0x2a   : > { %404 = vst [vmem:[%s1886_s12 + $0x98] sm:$0xff] %v403_v19  ;;  %v445_v40 = vld [vmem:[%s1881_s11 + $0x280] sm:$0xff]  ;;  %v447_v41 = vld [vmem:[%s1881_s11 + $0x290] sm:$0xff] }
  0x2b   : > { %406 = vst [vmem:[%s1886_s12 + $0xa0] sm:$0xff] %v405_v20  ;;  %v449_v42 = vld [vmem:[%s1881_s11 + $0x2a0] sm:$0xff]  ;;  %v451_v43 = vld [vmem:[%s1881_s11 + $0x2b0] sm:$0xff] }
  0x2c   : > { %408 = vst [vmem:[%s1886_s12 + $0xa8] sm:$0xff] %v407_v21  ;;  %v453_v44 = vld [vmem:[%s1881_s11 + $0x2c0] sm:$0xff]  ;;  %v455_v45 = vld [vmem:[%s1881_s11 + $0x2d0] sm:$0xff] }
  0x2d   : > { %410 = vst [vmem:[%s1886_s12 + $0xb0] sm:$0xff] %v409_v22  ;;  %v457_v46 = vld [vmem:[%s1881_s11 + $0x2e0] sm:$0xff]  ;;  %v459_v47 = vld [vmem:[%s1881_s11 + $0x2f0] sm:$0xff] }
  0x2e   : > { %412 = vst [vmem:[%s1886_s12 + $0xb8] sm:$0xff] %v411_v23  ;;  %v461_v48 = vld [vmem:[%s1881_s11 + $0x300] sm:$0xff]  ;;  %v463_v49 = vld [vmem:[%s1881_s11 + $0x310] sm:$0xff] }
  0x2f   : > { %414 = vst [vmem:[%s1886_s12 + $0xc0] sm:$0xff] %v413_v24  ;;  %v465_v50 = vld [vmem:[%s1881_s11 + $0x320] sm:$0xff]  ;;  %v467_v51 = vld [vmem:[%s1881_s11 + $0x330] sm:$0xff] }
  0x30   : > { %416 = vst [vmem:[%s1886_s12 + $0xc8] sm:$0xff] %v415_v25  ;;  %v469_v52 = vld [vmem:[%s1881_s11 + $0x340] sm:$0xff]  ;;  %v471_v53 = vld [vmem:[%s1881_s11 + $0x350] sm:$0xff] }
  0x31   : > { %418 = vst [vmem:[%s1886_s12 + $0xd0] sm:$0xff] %v417_v26  ;;  %v473_v54 = vld [vmem:[%s1881_s11 + $0x360] sm:$0xff]  ;;  %v475_v55 = vld [vmem:[%s1881_s11 + $0x370] sm:$0xff] }
  0x32   : > { %420 = vst [vmem:[%s1886_s12 + $0xd8] sm:$0xff] %v419_v27  ;;  %v477_v56 = vld [vmem:[%s1881_s11 + $0x380] sm:$0xff]  ;;  %v479_v57 = vld [vmem:[%s1881_s11 + $0x390] sm:$0xff] }
  0x33   : > { %422 = vst [vmem:[%s1886_s12 + $0xe0] sm:$0xff] %v421_v28  ;;  %v481_v58 = vld [vmem:[%s1881_s11 + $0x3a0] sm:$0xff]  ;;  %v483_v59 = vld [vmem:[%s1881_s11 + $0x3b0] sm:$0xff] }
  0x34   : > { %424 = vst [vmem:[%s1886_s12 + $0xe8] sm:$0xff] %v423_v29  ;;  %v485_v60 = vld [vmem:[%s1881_s11 + $0x3c0] sm:$0xff]  ;;  %v487_v61 = vld [vmem:[%s1881_s11 + $0x3d0] sm:$0xff] }
  0x35   : > { %426 = vst [vmem:[%s1886_s12 + $0xf0] sm:$0xff] %v425_v30  ;;  %v489_v62 = vld [vmem:[%s1881_s11 + $0x3e0] sm:$0xff]  ;;  %v491_v63 = vld [vmem:[%s1881_s11 + $0x3f0] sm:$0xff] }
  0x36   : > { %428 = vst [vmem:[%s1886_s12 + $0xf8] sm:$0xff] %v427_v31 }
  0x37   : > { %430 = vst [vmem:[%s1886_s12 + $0x100] sm:$0xff] %v429_v32 }
  0x38   : > { %432 = vst [vmem:[%s1886_s12 + $0x108] sm:$0xff] %v431_v33 }
  0x39   : > { %434 = vst [vmem:[%s1886_s12 + $0x110] sm:$0xff] %v433_v34 }
  0x3a   : > { %436 = vst [vmem:[%s1886_s12 + $0x118] sm:$0xff] %v435_v35 }
  0x3b   : > { %438 = vst [vmem:[%s1886_s12 + $0x120] sm:$0xff] %v437_v36 }
  0x3c   : > { %440 = vst [vmem:[%s1886_s12 + $0x128] sm:$0xff] %v439_v37 }
  0x3d   : > { %442 = vst [vmem:[%s1886_s12 + $0x130] sm:$0xff] %v441_v38 }
  0x3e   : > { %444 = vst [vmem:[%s1886_s12 + $0x138] sm:$0xff] %v443_v39 }
  0x3f   : > { %446 = vst [vmem:[%s1886_s12 + $0x140] sm:$0xff] %v445_v40 }
  0x40   : > { %448 = vst [vmem:[%s1886_s12 + $0x148] sm:$0xff] %v447_v41 }
  0x41   : > { %450 = vst [vmem:[%s1886_s12 + $0x150] sm:$0xff] %v449_v42 }
  0x42   : > { %452 = vst [vmem:[%s1886_s12 + $0x158] sm:$0xff] %v451_v43 }
  0x43   : > { %454 = vst [vmem:[%s1886_s12 + $0x160] sm:$0xff] %v453_v44 }
  0x44   : > { %456 = vst [vmem:[%s1886_s12 + $0x168] sm:$0xff] %v455_v45 }
  0x45   : > { %458 = vst [vmem:[%s1886_s12 + $0x170] sm:$0xff] %v457_v46 }
  0x46   : > { %460 = vst [vmem:[%s1886_s12 + $0x178] sm:$0xff] %v459_v47 }
  0x47   : > { %462 = vst [vmem:[%s1886_s12 + $0x180] sm:$0xff] %v461_v48 }
  0x48   : > { %464 = vst [vmem:[%s1886_s12 + $0x188] sm:$0xff] %v463_v49 }
  0x49   : > { %466 = vst [vmem:[%s1886_s12 + $0x190] sm:$0xff] %v465_v50 }
  0x4a   : > { %468 = vst [vmem:[%s1886_s12 + $0x198] sm:$0xff] %v467_v51 }
  0x4b   : > { %470 = vst [vmem:[%s1886_s12 + $0x1a0] sm:$0xff] %v469_v52 }
  0x4c   : > { %472 = vst [vmem:[%s1886_s12 + $0x1a8] sm:$0xff] %v471_v53 }
  0x4d   : > { %474 = vst [vmem:[%s1886_s12 + $0x1b0] sm:$0xff] %v473_v54 }
  0x4e   : > { %476 = vst [vmem:[%s1886_s12 + $0x1b8] sm:$0xff] %v475_v55 }
  0x4f   : > { %478 = vst [vmem:[%s1886_s12 + $0x1c0] sm:$0xff] %v477_v56 }
  0x50   : > { %480 = vst [vmem:[%s1886_s12 + $0x1c8] sm:$0xff] %v479_v57 }
  0x51   : > { %482 = vst [vmem:[%s1886_s12 + $0x1d0] sm:$0xff] %v481_v58 }
  0x52   : > { %484 = vst [vmem:[%s1886_s12 + $0x1d8] sm:$0xff] %v483_v59 }
  0x53   : > { %486 = vst [vmem:[%s1886_s12 + $0x1e0] sm:$0xff] %v485_v60 }
  0x54   : > { %488 = vst [vmem:[%s1886_s12 + $0x1e8] sm:$0xff] %v487_v61 }
  0x55   : > { %490 = vst [vmem:[%s1886_s12 + $0x1f0] sm:$0xff] %v489_v62 }
  0x56   : > { %492 = vst [vmem:[%s1886_s12 + $0x1f8] sm:$0xff] %v491_v63 }
  0x57 PF: > { %p1344_p7 = scmp.ge.s32.totalorder %s1792_s21, 1  ;;  %p505_p8 = scmp.lt.s32.totalorder %s1792_s21, 19 }
  0x59   : > { %p506_p9 = pnand %p1344_p7, %p505_p8 }
  0x5a   : > { %s512_s13 = sand.u32 (!%p506_p9), 1, %s1768_s15   ;;  %s1346_s14 = sshll.u32 (!%p506_p9), %s1776_s17, 2 }
  0x5b   : > { %509 = sbr.rel (%p506_p9) target bundleno = 352 (0x160), region = 66  ;;  %s1345_s24 = sshll.u32 (!%p506_p9), %s512_s13, 9 }
  0x5c   : > { %p562_p10 = scmp.lt.s32.totalorder (!%p506_p9), %s1346_s14, 35  ;;  %s1348_s25 = sshll.u32 (!%p506_p9), %s1780_s18, 1 }
  0x5d   : > { %p572_p11 = scmp.lt.s32.totalorder (!%p506_p9), %s1348_s25, 3  ;;  %p592_p12 = scmp.eq.s32.totalorder (!%p506_p9), %s1776_s17, 0 }
  0x5e   : > { %p1353_p13 = scmp.ne.s32.totalorder (!%p506_p9), %s1776_s17, 0 }
  0x60   : > { %s2243_s14 = smov (!%p562_p10, %s1346_s14), 35  ;;  %s2245_s25 = smov (!%p572_p11, %s1348_s25), 3 }
  0x61   : > { %s1347_s26 = sshll.u32 %s2243_s14, 2  ;;  %s574_s15 = scalar_lea.vmem %s2227_s2, %s2245_s25 }
  0x62   : > { %s2022_s30 = scalar_lea.vmem %s2225_s0, %s1347_s26  ;;  %s1350_s7 = sshll.u32 %s2245_s25, 3 }
  0x63   : > { %s2034_s9 = scalar_lea.vmem %s2228_s3, %s1350_s7  ;;  %s1352_s10 = sshll.u32 %s2245_s25, 1 }
  0x64   : > { %s2040_s13 = scalar_lea.vmem %s2229_s4, %s1352_s10  ;;  %s2042_s14 = scalar_lea.vmem [#allocation3], %s1345_s24 }
  0x65   : > { %595 = sbr.rel (%p1353_p13) target bundleno = 109 (0x6d), region = 74 }
  0x6a   : > { %v1794_v0 = vmov 0.0  }
  0x6b   : > { %596 = vst [vmem:[#allocation2] sm:$0xff] %v1794_v0 }
  0x6c   : > { %597 = vst [vmem:[#allocation2 + $0x8] sm:$0xff] %v1794_v0 }
  0x6d PF: > { %602 = sbr.rel (!%p592_p12) target bundleno = 114 (0x72), region = 78  ;;  %v1795_v1 = vmov (%p592_p12), 0.0  }
  0x6e   : > { %603 = vst [vmem:[%s2040_s13] sm:$0xf] (%p592_p12), %v1795_v1 }
  0x72 PF: > { %v1413_v2 = vld [vmem:[%s2042_s14 + $0x70] sm:$0xf]  ;;  %v1631_v3 = vld [vmem:[%s2042_s14 + $0x74] sm:$0xf0]  ;;  %v1405_v13 = vld [vmem:[%s2042_s14 + $0x60] sm:$0xf] }
  0x73   : > { %v1477_v4 = vld [vmem:[%s2042_s14 + $0xf0] sm:$0xf]  ;;  %v1414_v5 = vor.u32 %v1631_v3, %v1413_v2  ;;  %v1647_v6 = vld [vmem:[%s2042_s14 + $0xf4] sm:$0xf0]  ;;  %v1629_v15 = vld [vmem:[%s2042_s14 + $0x64] sm:$0xf0] }
  0x74   : > { %v1541_v7 = vld [vmem:[%s2042_s14 + $0x170] sm:$0xf]  ;;  %v1663_v8 = vld [vmem:[%s2042_s14 + $0x174] sm:$0xf0]  ;;  %v1478_v9 = vor.u32 %v1647_v6, %v1477_v4  ;;  %v1469_v16 = vld [vmem:[%s2042_s14 + $0xe0] sm:$0xf]  ;;  %v1406_v18 = vor.u32 %v1629_v15, %v1405_v13 }
  0x75   : > { %v1542_v10 = vor.u32 %v1663_v8, %v1541_v7  ;;  %v1605_v11 = vld [vmem:[%s2042_s14 + $0x1f0] sm:$0xf]  ;;  %v1679_v12 = vld [vmem:[%s2042_s14 + $0x1f4] sm:$0xf0]  ;;  %1006 = vmatpush.bf16.msra.mxu0 %v1414_v5  ;;  %v1645_v17 = vld [vmem:[%s2042_s14 + $0xe4] sm:$0xf0] }
  0x76   : > { %v1606_v14 = vor.u32 %v1679_v12, %v1605_v11  ;;  %1019 = vmatpush.bf16.msra.mxu1 %v1478_v9  ;;  %v1470_v19 = vor.u32 %v1645_v17, %v1469_v16  ;;  %v1533_v20 = vld [vmem:[%s2042_s14 + $0x160] sm:$0xf]  ;;  %v1661_v21 = vld [vmem:[%s2042_s14 + $0x164] sm:$0xf0]  ;;  %v1397_v25 = vld [vmem:[%s2042_s14 + $0x50] sm:$0xf] }
  0x77   : > { %1032 = vmatpush.bf16.msra.mxu2 %v1542_v10  ;;  %v1597_v22 = vld [vmem:[%s2042_s14 + $0x1e0] sm:$0xf]  ;;  %v1534_v23 = vor.u32 %v1661_v21, %v1533_v20  ;;  %v1677_v24 = vld [vmem:[%s2042_s14 + $0x1e4] sm:$0xf0]  ;;  %v1627_v26 = vld [vmem:[%s2042_s14 + $0x54] sm:$0xf0] }
  0x78   : > { %1045 = vmatpush.bf16.msra.mxu3 %v1606_v14  ;;  %v1598_v27 = vor.u32 %v1677_v24, %v1597_v22  ;;  %v1461_v28 = vld [vmem:[%s2042_s14 + $0xd0] sm:$0xf]  ;;  %v1643_v29 = vld [vmem:[%s2042_s14 + $0xd4] sm:$0xf0]  ;;  %v1398_v31 = vor.u32 %v1627_v26, %v1397_v25  ;;  %v1389_v37 = vld [vmem:[%s2042_s14 + $0x40] sm:$0xf] }
  0x79   : > { %v1525_v30 = vld [vmem:[%s2042_s14 + $0x150] sm:$0xf]  ;;  %1007 = vmatpush.bf16.msra.mxu0 %v1406_v18  ;;  %v1659_v32 = vld [vmem:[%s2042_s14 + $0x154] sm:$0xf0]  ;;  %v1462_v35 = vor.u32 %v1643_v29, %v1461_v28  ;;  %v1625_v38 = vld [vmem:[%s2042_s14 + $0x44] sm:$0xf0] }
  0x7a   : > { %v1589_v33 = vld [vmem:[%s2042_s14 + $0x1d0] sm:$0xf]  ;;  %v1675_v34 = vld [vmem:[%s2042_s14 + $0x1d4] sm:$0xf0]  ;;  %1020 = vmatpush.bf16.msra.mxu1 %v1470_v19  ;;  %v1526_v36 = vor.u32 %v1659_v32, %v1525_v30  ;;  %v1453_v39 = vld [vmem:[%s2042_s14 + $0xc0] sm:$0xf]  ;;  %v1390_v46 = vor.u32 %v1625_v38, %v1389_v37 }
  0x7b   : > { %1033 = vmatpush.bf16.msra.mxu2 %v1534_v23  ;;  %v1590_v40 = vor.u32 %v1675_v34, %v1589_v33  ;;  %v1641_v41 = vld [vmem:[%s2042_s14 + $0xc4] sm:$0xf0]  ;;  %v1517_v42 = vld [vmem:[%s2042_s14 + $0x140] sm:$0xf]  ;;  %v1381_v49 = vld [vmem:[%s2042_s14 + $0x30] sm:$0xf] }
  0x7c   : > { %1046 = vmatpush.bf16.msra.mxu3 %v1598_v27  ;;  %v1657_v43 = vld [vmem:[%s2042_s14 + $0x144] sm:$0xf0]  ;;  %v1581_v44 = vld [vmem:[%s2042_s14 + $0x1c0] sm:$0xf]  ;;  %v1454_v47 = vor.u32 %v1641_v41, %v1453_v39  ;;  %v1623_v50 = vld [vmem:[%s2042_s14 + $0x34] sm:$0xf0] }
  0x7d   : > { %v1673_v45 = vld [vmem:[%s2042_s14 + $0x1c4] sm:$0xf0]  ;;  %1008 = vmatpush.bf16.msra.mxu0 %v1398_v31  ;;  %v1518_v48 = vor.u32 %v1657_v43, %v1517_v42  ;;  %v1445_v51 = vld [vmem:[%s2042_s14 + $0xb0] sm:$0xf]  ;;  %v1639_v53 = vld [vmem:[%s2042_s14 + $0xb4] sm:$0xf0]  ;;  %v1382_v58 = vor.u32 %v1623_v50, %v1381_v49 }
  0x7e   : > { %1021 = vmatpush.bf16.msra.mxu1 %v1462_v35  ;;  %v1582_v52 = vor.u32 %v1673_v45, %v1581_v44  ;;  %v1509_v54 = vld [vmem:[%s2042_s14 + $0x130] sm:$0xf]  ;;  %v1655_v55 = vld [vmem:[%s2042_s14 + $0x134] sm:$0xf0]  ;;  %v1446_v59 = vor.u32 %v1639_v53, %v1445_v51  ;;  %v1373_v61 = vld [vmem:[%s2042_s14 + $0x20] sm:$0xf] }
  0x7f   : > { %1034 = vmatpush.bf16.msra.mxu2 %v1526_v36  ;;  %v1573_v56 = vld [vmem:[%s2042_s14 + $0x1b0] sm:$0xf]  ;;  %v1671_v57 = vld [vmem:[%s2042_s14 + $0x1b4] sm:$0xf0]  ;;  %v1510_v60 = vor.u32 %v1655_v55, %v1509_v54  ;;  %v1621_v62 = vld [vmem:[%s2042_s14 + $0x24] sm:$0xf0] }
  0x80   : > { %1047 = vmatpush.bf16.msra.mxu3 %v1590_v40  ;;  %v1437_v63 = vld [vmem:[%s2042_s14 + $0xa0] sm:$0xf]  ;;  %v1574_v0 = vor.u32 %v1671_v57, %v1573_v56  ;;  %v1637_v1 = vld [vmem:[%s2042_s14 + $0xa4] sm:$0xf0]  ;;  %v1374_v6 = vor.u32 %v1621_v62, %v1373_v61  ;;  %v1365_v9 = vld [vmem:[%s2042_s14 + $0x10] sm:$0xf] }
  0x81   : > { %1009 = vmatpush.bf16.msra.mxu0 %v1390_v46  ;;  %v1501_v2 = vld [vmem:[%s2042_s14 + $0x120] sm:$0xf]  ;;  %v1653_v3 = vld [vmem:[%s2042_s14 + $0x124] sm:$0xf0]  ;;  %v1438_v7 = vor.u32 %v1637_v1, %v1437_v63  ;;  %v1619_v10 = vld [vmem:[%s2042_s14 + $0x14] sm:$0xf0] }
  0x82   : > { %1022 = vmatpush.bf16.msra.mxu1 %v1454_v47  ;;  %v1565_v4 = vld [vmem:[%s2042_s14 + $0x1a0] sm:$0xf]  ;;  %v1669_v5 = vld [vmem:[%s2042_s14 + $0x1a4] sm:$0xf0]  ;;  %v1502_v8 = vor.u32 %v1653_v3, %v1501_v2  ;;  %v1429_v11 = vld [vmem:[%s2042_s14 + $0x90] sm:$0xf]  ;;  %v1366_v18 = vor.u32 %v1619_v10, %v1365_v9 }
  0x83   : > { %1035 = vmatpush.bf16.msra.mxu2 %v1518_v48  ;;  %v1566_v12 = vor.u32 %v1669_v5, %v1565_v4  ;;  %v1635_v13 = vld [vmem:[%s2042_s14 + $0x94] sm:$0xf0]  ;;  %v1493_v14 = vld [vmem:[%s2042_s14 + $0x110] sm:$0xf]  ;;  %v1357_v19 = vld [vmem:[%s2042_s14] sm:$0xf] }
  0x84   : > { %1048 = vmatpush.bf16.msra.mxu3 %v1582_v52  ;;  %v1651_v15 = vld [vmem:[%s2042_s14 + $0x114] sm:$0xf0]  ;;  %v1557_v16 = vld [vmem:[%s2042_s14 + $0x190] sm:$0xf]  ;;  %v1617_v20 = vld [vmem:[%s2042_s14 + $0x4] sm:$0xf0]  ;;  %v1430_v22 = vor.u32 %v1635_v13, %v1429_v11 }
  0x85   : > { %1010 = vmatpush.bf16.msra.mxu0 %v1382_v58  ;;  %v1667_v17 = vld [vmem:[%s2042_s14 + $0x194] sm:$0xf0]  ;;  %v1421_v21 = vld [vmem:[%s2042_s14 + $0x80] sm:$0xf]  ;;  %v1494_v23 = vor.u32 %v1651_v15, %v1493_v14  ;;  %v1633_v24 = vld [vmem:[%s2042_s14 + $0x84] sm:$0xf0]  ;;  %v1358_v34 = vor.u32 %v1617_v20, %v1357_v19 }
  0x86   : > { %1023 = vmatpush.bf16.msra.mxu1 %v1446_v59  ;;  %v1485_v25 = vld [vmem:[%s2042_s14 + $0x100] sm:$0xf]  ;;  %v1649_v26 = vld [vmem:[%s2042_s14 + $0x104] sm:$0xf0]  ;;  %v1558_v27 = vor.u32 %v1667_v17, %v1557_v16  ;;  %v1630_v30 = vld [vmem:[%s2042_s14 + $0x74] sm:$0xf]  ;;  %v1422_v39 = vor.u32 %v1633_v24, %v1421_v21 }
  0x87   : > { %1036 = vmatpush.bf16.msra.mxu2 %v1510_v60  ;;  %v1549_v28 = vld [vmem:[%s2042_s14 + $0x180] sm:$0xf]  ;;  %v1665_v29 = vld [vmem:[%s2042_s14 + $0x184] sm:$0xf0]  ;;  %v1415_v31 = vld [vmem:[%s2042_s14 + $0x78] sm:$0xf0]  ;;  %v1486_v40 = vor.u32 %v1649_v26, %v1485_v25 }
  0x88   : > { %1049 = vmatpush.bf16.msra.mxu3 %v1574_v0  ;;  %v1646_v32 = vld [vmem:[%s2042_s14 + $0xf4] sm:$0xf]  ;;  %v607_v33 = vld [vmem:[%s2022_s30 + $0x8] sm:$0xff]  ;;  %v1550_v44 = vor.u32 %v1665_v29, %v1549_v28  ;;  %v1418_v45 = vor.u32 %v1630_v30, %v1415_v31  ;;  %v1628_v49 = vld [vmem:[%s2042_s14 + $0x64] sm:$0xf]  ;;  %p1611_p0 = scmp.ne.s32.totalorder %s1776_s17, 8 }
  0x89   : > { %1011 = vmatpush.bf16.msra.mxu0 %v1374_v6  ;;  %v1479_v35 = vld [vmem:[%s2042_s14 + $0xf8] sm:$0xf0]  ;;  %v1662_v36 = vld [vmem:[%s2042_s14 + $0x174] sm:$0xf]  ;;  %v676_v38 = vunpack.c.l.b16 %v607_v33  ;;  %v677_v43 = vunpack.c.h.b16 %v607_v33  ;;  %v1407_v50 = vld [vmem:[%s2042_s14 + $0x68] sm:$0xf0] }
  0x8a   : > { %1024 = vmatpush.bf16.msra.mxu1 %v1438_v7  ;;  %v1543_v37 = vld [vmem:[%s2042_s14 + $0x178] sm:$0xf0]  ;;  %v1678_v41 = vld [vmem:[%s2042_s14 + $0x1f4] sm:$0xf]  ;;  %v1482_v47 = vor.u32 %v1646_v32, %v1479_v35  ;;  %v1644_v51 = vld [vmem:[%s2042_s14 + $0xe4] sm:$0xf]  ;;  %v1410_v63 = vor.u32 %v1628_v49, %v1407_v50 }
  0x8b   : > { %1037 = vmatpush.bf16.msra.mxu2 %v1502_v8  ;;  %v1607_v42 = vld [vmem:[%s2042_s14 + $0x1f8] sm:$0xf0]  ;;  %v606_v46 = vld [vmem:[%s2022_s30] sm:$0xff]  ;;  %v1546_v48 = vor.u32 %v1662_v36, %v1543_v37  ;;  %v1471_v55 = vld [vmem:[%s2042_s14 + $0xe8] sm:$0xf0]  ;;  %v2128_v58 = vpack.c.b16 %v676_v38, %v676_v38  ;;  %v2132_v61 = vpack.c.b16 %v677_v43, %v677_v43 }
  0x8c   : > { %1050 = vmatpush.bf16.msra.mxu3 %v1566_v12  ;;  %v674_v52 = vunpack.c.l.b16 %v606_v46  ;;  %v675_v53 = vunpack.c.h.b16 %v606_v46  ;;  %v1610_v54 = vor.u32 %v1678_v41, %v1607_v42  ;;  %v1660_v56 = vld [vmem:[%s2042_s14 + $0x164] sm:$0xf]  ;;  %v1535_v57 = vld [vmem:[%s2042_s14 + $0x168] sm:$0xf0]  ;;  %v1474_v1 = vor.u32 %v1644_v51, %v1471_v55  ;;  %v1626_v3 = vld [vmem:[%s2042_s14 + $0x54] sm:$0xf] }
  0x8d   : > { %1012 = vmatpush.bf16.msra.mxu0 %v1366_v18  ;;  %v1676_v59 = vld [vmem:[%s2042_s14 + $0x1e4] sm:$0xf]  ;;  %v1599_v60 = vld [vmem:[%s2042_s14 + $0x1e8] sm:$0xf0]  ;;  %v1538_v2 = vor.u32 %v1660_v56, %v1535_v57  ;;  %v1399_v4 = vld [vmem:[%s2042_s14 + $0x58] sm:$0xf0] }
  0x8e   : > { %1025 = vmatpush.bf16.msra.mxu1 %v1430_v22  ;;  %v2134_v62 = vpack.c.b16 %v674_v52, %v674_v52  ;;  %v2136_v0 = vpack.c.b16 %v675_v53, %v675_v53  ;;  %v1642_v5 = vld [vmem:[%s2042_s14 + $0xd4] sm:$0xf]  ;;  %v1602_v6 = vor.u32 %v1676_v59, %v1599_v60  ;;  %v1463_v7 = vld [vmem:[%s2042_s14 + $0xd8] sm:$0xf0]  ;;  %v1402_v12 = vor.u32 %v1626_v3, %v1399_v4  ;;  %v1624_v15 = vld [vmem:[%s2042_s14 + $0x44] sm:$0xf] }
  0x8f   : > { %1038 = vmatpush.bf16.msra.mxu2 %v1494_v23  ;;  %v1658_v8 = vld [vmem:[%s2042_s14 + $0x154] sm:$0xf]  ;;  %v1527_v9 = vld [vmem:[%s2042_s14 + $0x158] sm:$0xf0]  ;;  %v1466_v13 = vor.u32 %v1642_v5, %v1463_v7  ;;  %v1391_v16 = vld [vmem:[%s2042_s14 + $0x48] sm:$0xf0] }
  0x90   : > { %1051 = vmatpush.bf16.msra.mxu3 %v1558_v27  ;;  %v1674_v10 = vld [vmem:[%s2042_s14 + $0x1d4] sm:$0xf]  ;;  %v1591_v11 = vld [vmem:[%s2042_s14 + $0x1d8] sm:$0xf0]  ;;  %v1530_v14 = vor.u32 %v1658_v8, %v1527_v9  ;;  %v1640_v17 = vld [vmem:[%s2042_s14 + $0xc4] sm:$0xf]  ;;  %v1394_v24 = vor.u32 %v1624_v15, %v1391_v16 }
  0x91   : > { %1013 = vmatpush.bf16.msra.mxu0 %v1358_v34  ;;  %v1594_v18 = vor.u32 %v1674_v10, %v1591_v11  ;;  %v1455_v19 = vld [vmem:[%s2042_s14 + $0xc8] sm:$0xf0]  ;;  %v1656_v20 = vld [vmem:[%s2042_s14 + $0x144] sm:$0xf]  ;;  %v1622_v27 = vld [vmem:[%s2042_s14 + $0x34] sm:$0xf] }
  0x92   : > { %1026 = vmatpush.bf16.msra.mxu1 %v1422_v39  ;;  %v1519_v21 = vld [vmem:[%s2042_s14 + $0x148] sm:$0xf0]  ;;  %v1672_v22 = vld [vmem:[%s2042_s14 + $0x1c4] sm:$0xf]  ;;  %v1458_v25 = vor.u32 %v1640_v17, %v1455_v19  ;;  %v1383_v28 = vld [vmem:[%s2042_s14 + $0x38] sm:$0xf0] }
  0x93   : > { %1039 = vmatpush.bf16.msra.mxu2 %v1486_v40  ;;  %v1583_v23 = vld [vmem:[%s2042_s14 + $0x1c8] sm:$0xf0]  ;;  %v1522_v26 = vor.u32 %v1656_v20, %v1519_v21  ;;  %v1638_v29 = vld [vmem:[%s2042_s14 + $0xb4] sm:$0xf]  ;;  %v1447_v31 = vld [vmem:[%s2042_s14 + $0xb8] sm:$0xf0]  ;;  %v1386_v36 = vor.u32 %v1622_v27, %v1383_v28 }
  0x94   : > { %1052 = vmatpush.bf16.msra.mxu3 %v1550_v44  ;;  %1014 = vmatmul.bf16.vlgmr.msra.gmra.mxu0 %v2134_v62  ;;  %v1586_v30 = vor.u32 %v1672_v22, %v1583_v23  ;;  %v1654_v32 = vld [vmem:[%s2042_s14 + $0x134] sm:$0xf]  ;;  %v1511_v33 = vld [vmem:[%s2042_s14 + $0x138] sm:$0xf0]  ;;  %v1450_v37 = vor.u32 %v1638_v29, %v1447_v31  ;;  %v1620_v39 = vld [vmem:[%s2042_s14 + $0x24] sm:$0xf] }
  0x95   : > { %1058 = vmatpush.bf16.msrb.mxu0 %v1418_v45  ;;  %1027 = vmatmul.bf16.vlgmr.msra.gmra.mxu1 %v2136_v0  ;;  %v1670_v34 = vld [vmem:[%s2042_s14 + $0x1b4] sm:$0xf]  ;;  %v1575_v35 = vld [vmem:[%s2042_s14 + $0x1b8] sm:$0xf0]  ;;  %v1514_v38 = vor.u32 %v1654_v32, %v1511_v33  ;;  %v1375_v40 = vld [vmem:[%s2042_s14 + $0x28] sm:$0xf0] }
  0x96   : > { %1071 = vmatpush.bf16.msrb.mxu1 %v1482_v47  ;;  %1040 = vmatmul.bf16.vlgmr.msra.gmra.mxu2 %v2128_v58  ;;  %v1636_v41 = vld [vmem:[%s2042_s14 + $0xa4] sm:$0xf]  ;;  %v1578_v42 = vor.u32 %v1670_v34, %v1575_v35  ;;  %v1439_v43 = vld [vmem:[%s2042_s14 + $0xa8] sm:$0xf0]  ;;  %v1618_v51 = vld [vmem:[%s2042_s14 + $0x14] sm:$0xf] }
  0x97   : > { %1084 = vmatpush.bf16.msrb.mxu2 %v1546_v48  ;;  %1053 = vmatmul.bf16.vlgmr.msra.gmra.mxu3 %v2132_v61  ;;  %v1652_v44 = vld [vmem:[%s2042_s14 + $0x124] sm:$0xf]  ;;  %v1503_v45 = vld [vmem:[%s2042_s14 + $0x128] sm:$0xf0]  ;;  %v1378_v48 = vor.u32 %v1620_v39, %v1375_v40  ;;  %v1442_v49 = vor.u32 %v1636_v41, %v1439_v43  ;;  %v1367_v52 = vld [vmem:[%s2042_s14 + $0x18] sm:$0xf0] }
  0x98   : > { %1097 = vmatpush.bf16.msrb.mxu3 %v1610_v54  ;;  %v1668_v46 = vld [vmem:[%s2042_s14 + $0x1a4] sm:$0xf]  ;;  %v1567_v47 = vld [vmem:[%s2042_s14 + $0x1a8] sm:$0xf0]  ;;  %v1506_v50 = vor.u32 %v1652_v44, %v1503_v45  ;;  %v1634_v53 = vld [vmem:[%s2042_s14 + $0x94] sm:$0xf] }
  0x99   : > { %1059 = vmatpush.bf16.msrb.mxu0 %v1410_v63  ;;  %v1570_v54 = vor.u32 %v1668_v46, %v1567_v47  ;;  %v1431_v55 = vld [vmem:[%s2042_s14 + $0x98] sm:$0xf0]  ;;  %v1650_v56 = vld [vmem:[%s2042_s14 + $0x114] sm:$0xf]  ;;  %v1370_v63 = vor.u32 %v1618_v51, %v1367_v52  ;;  %v1616_v3 = vld [vmem:[%s2042_s14 + $0x4] sm:$0xf] }
  0x9a   : > { %1072 = vmatpush.bf16.msrb.mxu1 %v1474_v1  ;;  %v1495_v57 = vld [vmem:[%s2042_s14 + $0x118] sm:$0xf0]  ;;  %v1666_v59 = vld [vmem:[%s2042_s14 + $0x194] sm:$0xf]  ;;  %v1434_v1 = vor.u32 %v1634_v53, %v1431_v55  ;;  %v1359_v4 = vld [vmem:[%s2042_s14 + $0x8] sm:$0xf0] }
  0x9b   : > { %1085 = vmatpush.bf16.msrb.mxu2 %v1538_v2  ;;  %v1559_v60 = vld [vmem:[%s2042_s14 + $0x198] sm:$0xf0]  ;;  %v1498_v2 = vor.u32 %v1650_v56, %v1495_v57  ;;  %v1632_v5 = vld [vmem:[%s2042_s14 + $0x84] sm:$0xf]  ;;  %v1423_v7 = vld [vmem:[%s2042_s14 + $0x88] sm:$0xf0] }
  0x9c   : > { %1098 = vmatpush.bf16.msrb.mxu3 %v1602_v6  ;;  %v1562_v6 = vor.u32 %v1666_v59, %v1559_v60  ;;  %v1648_v8 = vld [vmem:[%s2042_s14 + $0x104] sm:$0xf]  ;;  %v1487_v9 = vld [vmem:[%s2042_s14 + $0x108] sm:$0xf0]  ;;  %v604_v22 = vld [vmem:[#allocation2] sm:$0xff] }
  0x9d   : > { %1060 = vmatpush.bf16.msrb.mxu0 %v1402_v12  ;;  %v1664_v10 = vld [vmem:[%s2042_s14 + $0x184] sm:$0xf]  ;;  %v1551_v11 = vld [vmem:[%s2042_s14 + $0x188] sm:$0xf0]  ;;  %v1362_v12 = vor.u32 %v1616_v3, %v1359_v4  ;;  %v605_v32 = vld [vmem:[#allocation2 + $0x8] sm:$0xff] }
  0x9e   : > { %1073 = vmatpush.bf16.msrb.mxu1 %v1466_v13  ;;  %v1426_v13 = vor.u32 %v1632_v5, %v1423_v7  ;;  %v1554_v15 = vor.u32 %v1664_v10, %v1551_v11 }
  0x9f   : > { %1086 = vmatpush.bf16.msrb.mxu2 %v1530_v14  ;;  %v1490_v14 = vor.u32 %v1648_v8, %v1487_v9 }
  0xa0   : > { %1099 = vmatpush.bf16.msrb.mxu3 %v1594_v18 }
  0xa1   : > { %1061 = vmatpush.bf16.msrb.mxu0 %v1394_v24 }
  0xa2   : > { %1074 = vmatpush.bf16.msrb.mxu1 %v1458_v25 }
  0xa3   : > { %1087 = vmatpush.bf16.msrb.mxu2 %v1522_v26 }
  0xa4   : > { %1100 = vmatpush.bf16.msrb.mxu3 %v1586_v30 }
  0xa5   : > { %1062 = vmatpush.bf16.msrb.mxu0 %v1386_v36 }
  0xa6   : > { %1075 = vmatpush.bf16.msrb.mxu1 %v1450_v37 }
  0xa7   : > { %1088 = vmatpush.bf16.msrb.mxu2 %v1514_v38 }
  0xa8   : > { %1101 = vmatpush.bf16.msrb.mxu3 %v1578_v42 }
  0xa9   : > { %1063 = vmatpush.bf16.msrb.mxu0 %v1378_v48 }
  0xaa   : > { %1076 = vmatpush.bf16.msrb.mxu1 %v1442_v49 }
  0xab   : > { %1089 = vmatpush.bf16.msrb.mxu2 %v1506_v50 }
  0xac   : > { %1102 = vmatpush.bf16.msrb.mxu3 %v1570_v54 }
  0xad   : > { %1064 = vmatpush.bf16.msrb.mxu0 %v1370_v63 }
  0xae   : > { %1077 = vmatpush.bf16.msrb.mxu1 %v1434_v1 }
  0xaf   : > { %1090 = vmatpush.bf16.msrb.mxu2 %v1498_v2 }
  0xb0   : > { %1103 = vmatpush.bf16.msrb.mxu3 %v1562_v6 }
  0xb1   : > { %1065 = vmatpush.bf16.msrb.mxu0 %v1362_v12 }
  0xb2   : > { %1078 = vmatpush.bf16.msrb.mxu1 %v1426_v13 }
  0xb3   : > { %1091 = vmatpush.bf16.msrb.mxu2 %v1490_v14 }
  0xb4   : > { %1104 = vmatpush.bf16.msrb.mxu3 %v1554_v15  ;;  %1066 = vmatmul.bf16.vlgmr.msrb.gmra.mxu0 %v2134_v62 }
  0xb5   : > { %1079 = vmatmul.bf16.vlgmr.msrb.gmra.mxu1 %v2136_v0 }
  0xb6   : > { %1092 = vmatmul.bf16.vlgmr.msrb.gmra.mxu2 %v2128_v58 }
  0xb7   : > { %1105 = vmatmul.bf16.vlgmr.msrb.gmra.mxu3 %v2132_v61 }
 0x111   : > { %v1015_v16 = vpop.f32.mrf.mxu0 }
 0x112   : > { %v1028_v17 = vpop.f32.mrf.mxu1 }
 0x113   : > { %v1029_v18 = vadd.f32 %v1028_v17, %v1015_v16 }
 0x119   : > { %v1041_v19 = vpop.f32.mrf.mxu2  ;;  %v1017_v24 = vpop.f32.mrf.mxu0 }
 0x11a   : > { %v1042_v20 = vadd.f32 %v1041_v19, %v1029_v18  ;;  %v1054_v21 = vpop.f32.mrf.mxu3  ;;  %v1030_v25 = vpop.f32.mrf.mxu1 }
 0x11c   : > { %v1055_v23 = vadd.f32 %v1054_v21, %v1042_v20 }
 0x11e   : > { %v1110_v26 = vadd.f32 %v1055_v23, %v604_v22 }
 0x120   : > { %1112 = vst [vmem:[#allocation2] sm:$0xff] %v1110_v26 }
 0x121   : > { %v1043_v27 = vpop.f32.mrf.mxu2 }
 0x122   : > { %v1056_v62 = vpop.f32.mrf.mxu3 }
 0x131   : > { %v1067_v28 = vpop.f32.mrf.mxu0 }
 0x132   : > { %v1080_v0 = vpop.f32.mrf.mxu1 }
 0x133   : > { %v1081_v29 = vadd.f32 %v1080_v0, %v1067_v28 }
 0x139   : > { %v1093_v58 = vpop.f32.mrf.mxu2  ;;  %v1069_v31 = vpop.f32.mrf.mxu0 }
 0x13a   : > { %v1094_v30 = vadd.f32 %v1093_v58, %v1081_v29  ;;  %v1106_v61 = vpop.f32.mrf.mxu3  ;;  %v1082_v33 = vpop.f32.mrf.mxu1 }
 0x13c   : > { %v1107_v34 = vadd.f32 %v1106_v61, %v1094_v30 }
 0x13e   : > { %v1111_v35 = vadd.f32 %v1107_v34, %v605_v32  ;;  %1117 = sbr.rel (%p1611_p0) target bundleno = 352 (0x160), region = 82 }
 0x140   : > { %1113 = vst [vmem:[#allocation2 + $0x8] sm:$0xff] %v1111_v35 }
 0x141   : > { %v1095_v36 = vpop.f32.mrf.mxu2 }
 0x142   : > { %v1108_v37 = vpop.f32.mrf.mxu3 }
 0x143   : > { %v1118_v38 = vld [vmem:[#allocation2] sm:$0xff]  ;;  %v1130_v40 = vlaneseq  ;;  %vm1166_vm1 = vcmask 1040384   ;;  %vm1173_vm2 = vcmask 1041408  }
 0x144   : > { %v1120_v39 = vld [vmem:[%s574_s15] sm:$0x3] }
 0x145   : > { %v1122_v42 = vperm.slane %v1120_v39, 0  ;;  %v1123_v43 = vperm.slane %v1120_v39, 1  ;;  %v1131_v44 = vshrl.u32 %v1130_v40, 7  ;;  %v1169_v19 = vld [vmem:[%s2040_s13] sm:$0xf] }
 0x147   : > { %v1119_v41 = vld [vmem:[#allocation2 + $0x8] sm:$0xff]  ;;  %v1126_v45 = vadd.f32 %v1122_v42, %v1118_v38  ;;  %vm1135_vm0 = vcmp.lt.s32.totalorder %v1131_v44, 2 }
 0x148   : > { %v1127_v46 = vadd.f32 %v1123_v43, %v1119_v41 }
 0x149   : > { %1128 = vst [vmem:[%s2034_s9] sm:$0xff] %v1126_v45  ;;  %v1136_v47 = vsel %vm1135_vm0, %v1126_v45, 0.0  ;;  %v1138_v48 = vmul.f32 %v1126_v45, %v1126_v45 }
 0x14a   : > { %v1137_v49 = vsel %vm1135_vm0, %v1127_v46, 0.0  ;;  %v1139_v50 = vmul.f32 %v1127_v46, %v1127_v46  ;;  %v1142_v51 = vrot.slane %v1136_v47, 4  ;;  %1129 = vst [vmem:[%s2034_s9 + $0x8] sm:$0xff] %v1127_v46 }
 0x14b   : > { %v1148_v52 = vrot.slane %v1137_v49, 4  ;;  %v1140_v53 = vsel %vm1135_vm0, %v1138_v48, 0.0 }
 0x14c   : > { %v1141_v54 = vsel %vm1135_vm0, %v1139_v50, 0.0  ;;  %v1143_v55 = vadd.f32 %v1142_v51, %v1136_v47  ;;  %v1154_v56 = vrot.slane %v1140_v53, 4 }
 0x14d   : > { %v1149_v57 = vadd.f32 %v1148_v52, %v1137_v49  ;;  %v1160_v59 = vrot.slane %v1141_v54, 4 }
 0x14e   : > { %v1144_v60 = vrot.slane %v1143_v55, 2  ;;  %v1155_v63 = vadd.f32 %v1154_v56, %v1140_v53 }
 0x14f   : > { %v1150_v1 = vrot.slane %v1149_v57, 2  ;;  %v1161_v2 = vadd.f32 %v1160_v59, %v1141_v54 }
 0x150   : > { %v1145_v5 = vadd.f32 %v1144_v60, %v1143_v55  ;;  %v1156_v6 = vrot.slane %v1155_v63, 2 }
 0x151   : > { %v1151_v3 = vadd.f32 %v1150_v1, %v1149_v57  ;;  %v1162_v4 = vrot.slane %v1161_v2, 2 }
 0x152   : > { %v1146_v9 = vrot.slane %v1145_v5, 1  ;;  %v1157_v10 = vadd.f32 %v1156_v6, %v1155_v63 }
 0x153   : > { %v1152_v7 = vrot.slane %v1151_v3, 1  ;;  %v1163_v8 = vadd.f32 %v1162_v4, %v1161_v2 }
 0x154   : > { %v1147_v11 = vadd.f32 %v1146_v9, %v1145_v5  ;;  %v1158_v13 = vrot.slane %v1157_v10, 1 }
 0x155   : > { %v1153_v12 = vadd.f32 %v1152_v7, %v1151_v3  ;;  %v1164_v14 = vrot.slane %v1163_v8, 1 }
 0x156   : > { %v1159_v15 = vadd.f32 %v1158_v13, %v1157_v10 }
 0x157   : > { %v1165_v16 = vadd.f32 %v1164_v14, %v1163_v8 }
 0x158   : > { %v1167_v17 = vsel %vm1166_vm1, %v1147_v11, %v1159_v15 }
 0x159   : > { %v1168_v18 = vsel %vm1166_vm1, %v1153_v12, %v1165_v16 }
 0x15a   : > { %v1172_v20 = vrot.slane %v1168_v18, 6 }
 0x15c   : > { %v1174_v21 = vsel %vm1173_vm2, %v1167_v17, %v1172_v20 }
 0x15d   : > { %v1176_v22 = vadd.f32 %v1174_v21, %v1169_v19 }
 0x15f   : > { %1177 = vst [vmem:[%s2040_s13] sm:$0xf] %v1176_v22 }
 0x160 PF: > { %s15_s21 = sadd.s32 1, %s1792_s21   ;;  %s2230_s15 = smov %s1772_s16 }
 0x161   : > { %p12_p1 = scmp.ge.s32.totalorder %s15_s21, 20   ;;  %s2231_s16 = smov %s1872_s28 }
 0x162   : > { %s2232_s17 = smov %s1784_s19  ;;  %s2233_s18 = smov %s1788_s20 }
 0x163   : > { %s2234_s19 = smov %s2237_s22  ;;  %s2235_s20 = smov %s2241_s23 }
 0x164   :  { %14 = sbr.rel (!%p12_p1) target bundleno = 4 (0x4), region = 135 }

// kernel: forward.32
= control target key start
LH: loop header
LB: loop body
LE: loop exit
PB: predicated region body
PF: predicated region fallthrough
CT: control target
= control target key end

     0   :  { %s1647_s12 = smov 0   ;;  %s1649_s13 = smov 0   ;;  %s1999_s0 = inlined_call_operand.vmem [shape: bf16[8,512], index: 0, kind: input, shape index: {}]   ;;  %s2000_s1 = inlined_call_operand.vmem [shape: bf16[512,1024], index: 1, kind: input, shape index: {}]   ;;  %s2001_s2 = inlined_call_operand.vmem [shape: f32[1,1024], index: 2, kind: input, shape index: {}]   ;;  %s2002_s3 = inlined_call_operand.vmem [shape: bf16[8,1024], index: 3, kind: output, shape index: {}]  }
   0x1   :  { %s1651_s14 = smov 0   ;;  %s1653_s15 = smov 0  }
   0x2   :  { %s1655_s16 = smov 0  }
   0x3 LB: > { %s32_s17 = sadd.s32 1, %s1621_s15  ;;  %p76_p1 = scmp.ne.s32.totalorder %s1613_s13, %s1609_s12  ;;  %s1625_s16 = sphi %s1655_s16, %s13_s16   ;;  %s1621_s15 = sphi %s1653_s15, %s2006_s15   ;;  %s1617_s14 = sphi %s1651_s14, %s2005_s14   ;;  %s1613_s13 = sphi %s1649_s13, %s2004_s13   ;;  %s1609_s12 = sphi %s1647_s12, %s2003_s12  }
   0x4   : > { %p34_p0 = scmp.ge.s32.totalorder %s32_s17, 4  ;;  %p77_p2 = scmp.eq.s32.totalorder %s1625_s16, 0 }
   0x5   : > { %s69_s19 = sadd.s32 1, %s1613_s13  ;;  %p1215_p5 = scmp.ge.s32.totalorder %s1625_s16, 4 }
   0x6   : > { %s2008_s17 = smov (%p34_p0, %s32_s17), 0  ;;  %p78_p3 = por %p77_p2, %p76_p1 }
   0x7   : > { %s65_s18 = ssub.s32 %s1621_s15, %s2008_s17  ;;  %169 = sbr.rel (%p1215_p5) target bundleno = 80 (0x50), region = 20 }
   0x8   : > { %p67_p4 = scmp.eq.s32.totalorder %s65_s18, 0 }
   0xa   : > { %s1682_s20 = scalar_select %p67_p4, %s1613_s13, %s69_s19  }
   0xc   : > { %172 = sbr.rel (!%p78_p3) target bundleno = 80 (0x50), region = 24  ;;  %s174_s21 = sand.u32 (%p78_p3), 1, %s1613_s13  }
   0xd   : > { %s1482_s22 = sshll.u32 (%p78_p3), %s1621_s15, 3  ;;  %s1216_s23 = sshll.u32 (%p78_p3), %s174_s21, 9 }
   0xe   : > { %s1690_s26 = scalar_lea.vmem (%p78_p3), %s2000_s1, %s1482_s22  ;;  %s1695_s27 = scalar_lea.vmem (%p78_p3), [#allocation3], %s1216_s23 }
   0xf   : > { %v337_v0 = vld [vmem:[%s1690_s26] sm:$0xff] (%p78_p3) }
  0x10   : > { %v339_v1 = vld [vmem:[%s1690_s26 + $0x20] sm:$0xff] (%p78_p3)  ;;  %338 = vst [vmem:[%s1695_s27] sm:$0xff] (%p78_p3), %v337_v0 }
  0x11   : > { %v341_v2 = vld [vmem:[%s1690_s26 + $0x40] sm:$0xff]  ;;  %340 = vst [vmem:[%s1695_s27 + $0x8] sm:$0xff] %v339_v1 }
  0x12   : > { %v343_v3 = vld [vmem:[%s1690_s26 + $0x60] sm:$0xff]  ;;  %342 = vst [vmem:[%s1695_s27 + $0x10] sm:$0xff] %v341_v2 }
  0x13   : > { %v345_v4 = vld [vmem:[%s1690_s26 + $0x80] sm:$0xff]  ;;  %344 = vst [vmem:[%s1695_s27 + $0x18] sm:$0xff] %v343_v3 }
  0x14   : > { %v347_v5 = vld [vmem:[%s1690_s26 + $0xa0] sm:$0xff]  ;;  %346 = vst [vmem:[%s1695_s27 + $0x20] sm:$0xff] %v345_v4 }
  0x15   : > { %v349_v6 = vld [vmem:[%s1690_s26 + $0xc0] sm:$0xff]  ;;  %348 = vst [vmem:[%s1695_s27 + $0x28] sm:$0xff] %v347_v5 }
  0x16   : > { %v351_v7 = vld [vmem:[%s1690_s26 + $0xe0] sm:$0xff]  ;;  %350 = vst [vmem:[%s1695_s27 + $0x30] sm:$0xff] %v349_v6 }
  0x17   : > { %v353_v8 = vld [vmem:[%s1690_s26 + $0x100] sm:$0xff]  ;;  %352 = vst [vmem:[%s1695_s27 + $0x38] sm:$0xff] %v351_v7 }
  0x18   : > { %v355_v9 = vld [vmem:[%s1690_s26 + $0x120] sm:$0xff]  ;;  %354 = vst [vmem:[%s1695_s27 + $0x40] sm:$0xff] %v353_v8 }
  0x19   : > { %v357_v10 = vld [vmem:[%s1690_s26 + $0x140] sm:$0xff]  ;;  %356 = vst [vmem:[%s1695_s27 + $0x48] sm:$0xff] %v355_v9 }
  0x1a   : > { %v359_v11 = vld [vmem:[%s1690_s26 + $0x160] sm:$0xff]  ;;  %358 = vst [vmem:[%s1695_s27 + $0x50] sm:$0xff] %v357_v10 }
  0x1b   : > { %v361_v12 = vld [vmem:[%s1690_s26 + $0x180] sm:$0xff]  ;;  %360 = vst [vmem:[%s1695_s27 + $0x58] sm:$0xff] %v359_v11 }
  0x1c   : > { %v363_v13 = vld [vmem:[%s1690_s26 + $0x1a0] sm:$0xff]  ;;  %362 = vst [vmem:[%s1695_s27 + $0x60] sm:$0xff] %v361_v12 }
  0x1d   : > { %v365_v14 = vld [vmem:[%s1690_s26 + $0x1c0] sm:$0xff]  ;;  %364 = vst [vmem:[%s1695_s27 + $0x68] sm:$0xff] %v363_v13 }
  0x1e   : > { %v367_v15 = vld [vmem:[%s1690_s26 + $0x1e0] sm:$0xff]  ;;  %366 = vst [vmem:[%s1695_s27 + $0x70] sm:$0xff] %v365_v14 }
  0x1f   : > { %v369_v16 = vld [vmem:[%s1690_s26 + $0x200] sm:$0xff]  ;;  %368 = vst [vmem:[%s1695_s27 + $0x78] sm:$0xff] %v367_v15 }
  0x20   : > { %v371_v17 = vld [vmem:[%s1690_s26 + $0x220] sm:$0xff]  ;;  %370 = vst [vmem:[%s1695_s27 + $0x80] sm:$0xff] %v369_v16 }
  0x21   : > { %v373_v18 = vld [vmem:[%s1690_s26 + $0x240] sm:$0xff]  ;;  %372 = vst [vmem:[%s1695_s27 + $0x88] sm:$0xff] %v371_v17 }
  0x22   : > { %v375_v19 = vld [vmem:[%s1690_s26 + $0x260] sm:$0xff]  ;;  %374 = vst [vmem:[%s1695_s27 + $0x90] sm:$0xff] %v373_v18 }
  0x23   : > { %v377_v20 = vld [vmem:[%s1690_s26 + $0x280] sm:$0xff]  ;;  %376 = vst [vmem:[%s1695_s27 + $0x98] sm:$0xff] %v375_v19 }
  0x24   : > { %v379_v21 = vld [vmem:[%s1690_s26 + $0x2a0] sm:$0xff]  ;;  %378 = vst [vmem:[%s1695_s27 + $0xa0] sm:$0xff] %v377_v20 }
  0x25   : > { %v381_v22 = vld [vmem:[%s1690_s26 + $0x2c0] sm:$0xff]  ;;  %380 = vst [vmem:[%s1695_s27 + $0xa8] sm:$0xff] %v379_v21 }
  0x26   : > { %v383_v23 = vld [vmem:[%s1690_s26 + $0x2e0] sm:$0xff]  ;;  %382 = vst [vmem:[%s1695_s27 + $0xb0] sm:$0xff] %v381_v22 }
  0x27   : > { %v385_v24 = vld [vmem:[%s1690_s26 + $0x300] sm:$0xff]  ;;  %384 = vst [vmem:[%s1695_s27 + $0xb8] sm:$0xff] %v383_v23 }
  0x28   : > { %v387_v25 = vld [vmem:[%s1690_s26 + $0x320] sm:$0xff]  ;;  %386 = vst [vmem:[%s1695_s27 + $0xc0] sm:$0xff] %v385_v24 }
  0x29   : > { %v389_v26 = vld [vmem:[%s1690_s26 + $0x340] sm:$0xff]  ;;  %388 = vst [vmem:[%s1695_s27 + $0xc8] sm:$0xff] %v387_v25 }
  0x2a   : > { %v391_v27 = vld [vmem:[%s1690_s26 + $0x360] sm:$0xff]  ;;  %390 = vst [vmem:[%s1695_s27 + $0xd0] sm:$0xff] %v389_v26 }
  0x2b   : > { %v393_v28 = vld [vmem:[%s1690_s26 + $0x380] sm:$0xff]  ;;  %392 = vst [vmem:[%s1695_s27 + $0xd8] sm:$0xff] %v391_v27 }
  0x2c   : > { %v395_v29 = vld [vmem:[%s1690_s26 + $0x3a0] sm:$0xff]  ;;  %394 = vst [vmem:[%s1695_s27 + $0xe0] sm:$0xff] %v393_v28 }
  0x2d   : > { %v397_v30 = vld [vmem:[%s1690_s26 + $0x3c0] sm:$0xff]  ;;  %396 = vst [vmem:[%s1695_s27 + $0xe8] sm:$0xff] %v395_v29 }
  0x2e   : > { %v399_v31 = vld [vmem:[%s1690_s26 + $0x3e0] sm:$0xff]  ;;  %398 = vst [vmem:[%s1695_s27 + $0xf0] sm:$0xff] %v397_v30 }
  0x2f   : > { %v401_v32 = vld [vmem:[%s1690_s26 + $0x400] sm:$0xff]  ;;  %400 = vst [vmem:[%s1695_s27 + $0xf8] sm:$0xff] %v399_v31 }
  0x30   : > { %v403_v33 = vld [vmem:[%s1690_s26 + $0x420] sm:$0xff]  ;;  %402 = vst [vmem:[%s1695_s27 + $0x100] sm:$0xff] %v401_v32 }
  0x31   : > { %v405_v34 = vld [vmem:[%s1690_s26 + $0x440] sm:$0xff]  ;;  %404 = vst [vmem:[%s1695_s27 + $0x108] sm:$0xff] %v403_v33 }
  0x32   : > { %v407_v35 = vld [vmem:[%s1690_s26 + $0x460] sm:$0xff]  ;;  %406 = vst [vmem:[%s1695_s27 + $0x110] sm:$0xff] %v405_v34 }
  0x33   : > { %v409_v36 = vld [vmem:[%s1690_s26 + $0x480] sm:$0xff]  ;;  %408 = vst [vmem:[%s1695_s27 + $0x118] sm:$0xff] %v407_v35 }
  0x34   : > { %v411_v37 = vld [vmem:[%s1690_s26 + $0x4a0] sm:$0xff]  ;;  %410 = vst [vmem:[%s1695_s27 + $0x120] sm:$0xff] %v409_v36 }
  0x35   : > { %v413_v38 = vld [vmem:[%s1690_s26 + $0x4c0] sm:$0xff]  ;;  %412 = vst [vmem:[%s1695_s27 + $0x128] sm:$0xff] %v411_v37 }
  0x36   : > { %v415_v39 = vld [vmem:[%s1690_s26 + $0x4e0] sm:$0xff]  ;;  %414 = vst [vmem:[%s1695_s27 + $0x130] sm:$0xff] %v413_v38 }
  0x37   : > { %v417_v40 = vld [vmem:[%s1690_s26 + $0x500] sm:$0xff]  ;;  %416 = vst [vmem:[%s1695_s27 + $0x138] sm:$0xff] %v415_v39 }
  0x38   : > { %v419_v41 = vld [vmem:[%s1690_s26 + $0x520] sm:$0xff]  ;;  %418 = vst [vmem:[%s1695_s27 + $0x140] sm:$0xff] %v417_v40 }
  0x39   : > { %v421_v42 = vld [vmem:[%s1690_s26 + $0x540] sm:$0xff]  ;;  %420 = vst [vmem:[%s1695_s27 + $0x148] sm:$0xff] %v419_v41 }
  0x3a   : > { %v423_v43 = vld [vmem:[%s1690_s26 + $0x560] sm:$0xff]  ;;  %422 = vst [vmem:[%s1695_s27 + $0x150] sm:$0xff] %v421_v42 }
  0x3b   : > { %v425_v44 = vld [vmem:[%s1690_s26 + $0x580] sm:$0xff]  ;;  %424 = vst [vmem:[%s1695_s27 + $0x158] sm:$0xff] %v423_v43 }
  0x3c   : > { %v427_v45 = vld [vmem:[%s1690_s26 + $0x5a0] sm:$0xff]  ;;  %426 = vst [vmem:[%s1695_s27 + $0x160] sm:$0xff] %v425_v44 }
  0x3d   : > { %v429_v46 = vld [vmem:[%s1690_s26 + $0x5c0] sm:$0xff]  ;;  %428 = vst [vmem:[%s1695_s27 + $0x168] sm:$0xff] %v427_v45 }
  0x3e   : > { %v431_v47 = vld [vmem:[%s1690_s26 + $0x5e0] sm:$0xff]  ;;  %430 = vst [vmem:[%s1695_s27 + $0x170] sm:$0xff] %v429_v46 }
  0x3f   : > { %v433_v48 = vld [vmem:[%s1690_s26 + $0x600] sm:$0xff]  ;;  %432 = vst [vmem:[%s1695_s27 + $0x178] sm:$0xff] %v431_v47 }
  0x40   : > { %v435_v49 = vld [vmem:[%s1690_s26 + $0x620] sm:$0xff]  ;;  %434 = vst [vmem:[%s1695_s27 + $0x180] sm:$0xff] %v433_v48 }
  0x41   : > { %v437_v50 = vld [vmem:[%s1690_s26 + $0x640] sm:$0xff]  ;;  %436 = vst [vmem:[%s1695_s27 + $0x188] sm:$0xff] %v435_v49 }
  0x42   : > { %v439_v51 = vld [vmem:[%s1690_s26 + $0x660] sm:$0xff]  ;;  %438 = vst [vmem:[%s1695_s27 + $0x190] sm:$0xff] %v437_v50 }
  0x43   : > { %v441_v52 = vld [vmem:[%s1690_s26 + $0x680] sm:$0xff]  ;;  %440 = vst [vmem:[%s1695_s27 + $0x198] sm:$0xff] %v439_v51 }
  0x44   : > { %v443_v53 = vld [vmem:[%s1690_s26 + $0x6a0] sm:$0xff]  ;;  %442 = vst [vmem:[%s1695_s27 + $0x1a0] sm:$0xff] %v441_v52 }
  0x45   : > { %v445_v54 = vld [vmem:[%s1690_s26 + $0x6c0] sm:$0xff]  ;;  %444 = vst [vmem:[%s1695_s27 + $0x1a8] sm:$0xff] %v443_v53 }
  0x46   : > { %v447_v55 = vld [vmem:[%s1690_s26 + $0x6e0] sm:$0xff]  ;;  %446 = vst [vmem:[%s1695_s27 + $0x1b0] sm:$0xff] %v445_v54 }
  0x47   : > { %v449_v56 = vld [vmem:[%s1690_s26 + $0x700] sm:$0xff]  ;;  %448 = vst [vmem:[%s1695_s27 + $0x1b8] sm:$0xff] %v447_v55 }
  0x48   : > { %v451_v57 = vld [vmem:[%s1690_s26 + $0x720] sm:$0xff]  ;;  %450 = vst [vmem:[%s1695_s27 + $0x1c0] sm:$0xff] %v449_v56 }
  0x49   : > { %v453_v58 = vld [vmem:[%s1690_s26 + $0x740] sm:$0xff]  ;;  %452 = vst [vmem:[%s1695_s27 + $0x1c8] sm:$0xff] %v451_v57 }
  0x4a   : > { %v455_v59 = vld [vmem:[%s1690_s26 + $0x760] sm:$0xff]  ;;  %454 = vst [vmem:[%s1695_s27 + $0x1d0] sm:$0xff] %v453_v58 }
  0x4b   : > { %v457_v60 = vld [vmem:[%s1690_s26 + $0x780] sm:$0xff]  ;;  %456 = vst [vmem:[%s1695_s27 + $0x1d8] sm:$0xff] %v455_v59 }
  0x4c   : > { %v459_v61 = vld [vmem:[%s1690_s26 + $0x7a0] sm:$0xff]  ;;  %458 = vst [vmem:[%s1695_s27 + $0x1e0] sm:$0xff] %v457_v60 }
  0x4d   : > { %v461_v62 = vld [vmem:[%s1690_s26 + $0x7c0] sm:$0xff]  ;;  %460 = vst [vmem:[%s1695_s27 + $0x1e8] sm:$0xff] %v459_v61 }
  0x4e   : > { %v463_v63 = vld [vmem:[%s1690_s26 + $0x7e0] sm:$0xff]  ;;  %462 = vst [vmem:[%s1695_s27 + $0x1f0] sm:$0xff] %v461_v62 }
  0x4f   : > { %464 = vst [vmem:[%s1695_s27 + $0x1f8] sm:$0xff] %v463_v63 }
  0x50 PF: > { %p1219_p6 = scmp.ge.s32.totalorder %s1625_s16, 1  ;;  %p477_p7 = scmp.lt.s32.totalorder %s1625_s16, 5 }
  0x52   : > { %p478_p8 = pnand %p1219_p6, %p477_p7 }
  0x53   : > { %s484_s28 = sand.u32 (!%p478_p8), 1, %s1609_s12   ;;  %s1221_s8 = sshll.u32 (!%p478_p8), %s1617_s14, 1 }
  0x54   : > { %481 = sbr.rel (%p478_p8) target bundleno = 301 (0x12d), region = 66  ;;  %s1220_s29 = sshll.u32 (!%p478_p8), %s484_s28, 9 }
  0x55   : > { %s1825_s30 = scalar_lea.vmem (!%p478_p8), [#allocation3], %s1220_s29  ;;  %p537_p9 = scmp.lt.s32.totalorder (!%p478_p8), %s1221_s8, 7 }
  0x59   : > { %v1282_v0 = vld [vmem:[%s1825_s30 + $0x70] sm:$0xf]  ;;  %v1498_v1 = vld [vmem:[%s1825_s30 + $0x74] sm:$0xf0]  ;;  %v1274_v11 = vld [vmem:[%s1825_s30 + $0x60] sm:$0xf] }
  0x5a   : > { %v1346_v2 = vld [vmem:[%s1825_s30 + $0xf0] sm:$0xf]  ;;  %v1283_v3 = vor.u32 %v1498_v1, %v1282_v0  ;;  %v1514_v4 = vld [vmem:[%s1825_s30 + $0xf4] sm:$0xf0]  ;;  %v1496_v13 = vld [vmem:[%s1825_s30 + $0x64] sm:$0xf0] }
  0x5b   : > { %v1410_v5 = vld [vmem:[%s1825_s30 + $0x170] sm:$0xf]  ;;  %v1530_v6 = vld [vmem:[%s1825_s30 + $0x174] sm:$0xf0]  ;;  %v1347_v7 = vor.u32 %v1514_v4, %v1346_v2  ;;  %v1338_v14 = vld [vmem:[%s1825_s30 + $0xe0] sm:$0xf]  ;;  %v1275_v16 = vor.u32 %v1496_v13, %v1274_v11 }
  0x5c   : > { %v1411_v8 = vor.u32 %v1530_v6, %v1410_v5  ;;  %v1474_v9 = vld [vmem:[%s1825_s30 + $0x1f0] sm:$0xf]  ;;  %v1546_v10 = vld [vmem:[%s1825_s30 + $0x1f4] sm:$0xf0]  ;;  %959 = vmatpush.bf16.msra.mxu0 %v1283_v3  ;;  %v1512_v15 = vld [vmem:[%s1825_s30 + $0xe4] sm:$0xf0] }
  0x5d   : > { %v1475_v12 = vor.u32 %v1546_v10, %v1474_v9  ;;  %972 = vmatpush.bf16.msra.mxu1 %v1347_v7  ;;  %v1339_v17 = vor.u32 %v1512_v15, %v1338_v14  ;;  %v1402_v18 = vld [vmem:[%s1825_s30 + $0x160] sm:$0xf]  ;;  %v1528_v19 = vld [vmem:[%s1825_s30 + $0x164] sm:$0xf0]  ;;  %v1266_v23 = vld [vmem:[%s1825_s30 + $0x50] sm:$0xf] }
  0x5e   : > { %985 = vmatpush.bf16.msra.mxu2 %v1411_v8  ;;  %v1466_v20 = vld [vmem:[%s1825_s30 + $0x1e0] sm:$0xf]  ;;  %v1403_v21 = vor.u32 %v1528_v19, %v1402_v18  ;;  %v1544_v22 = vld [vmem:[%s1825_s30 + $0x1e4] sm:$0xf0]  ;;  %v1494_v24 = vld [vmem:[%s1825_s30 + $0x54] sm:$0xf0] }
  0x5f   : > { %998 = vmatpush.bf16.msra.mxu3 %v1475_v12  ;;  %v1467_v25 = vor.u32 %v1544_v22, %v1466_v20  ;;  %v1330_v26 = vld [vmem:[%s1825_s30 + $0xd0] sm:$0xf]  ;;  %v1510_v27 = vld [vmem:[%s1825_s30 + $0xd4] sm:$0xf0]  ;;  %v1267_v29 = vor.u32 %v1494_v24, %v1266_v23  ;;  %v1258_v35 = vld [vmem:[%s1825_s30 + $0x40] sm:$0xf] }
  0x60   : > { %v1394_v28 = vld [vmem:[%s1825_s30 + $0x150] sm:$0xf]  ;;  %960 = vmatpush.bf16.msra.mxu0 %v1275_v16  ;;  %v1526_v30 = vld [vmem:[%s1825_s30 + $0x154] sm:$0xf0]  ;;  %v1331_v33 = vor.u32 %v1510_v27, %v1330_v26  ;;  %v1492_v36 = vld [vmem:[%s1825_s30 + $0x44] sm:$0xf0] }
  0x61   : > { %v1458_v31 = vld [vmem:[%s1825_s30 + $0x1d0] sm:$0xf]  ;;  %v1542_v32 = vld [vmem:[%s1825_s30 + $0x1d4] sm:$0xf0]  ;;  %973 = vmatpush.bf16.msra.mxu1 %v1339_v17  ;;  %v1395_v34 = vor.u32 %v1526_v30, %v1394_v28  ;;  %v1322_v37 = vld [vmem:[%s1825_s30 + $0xc0] sm:$0xf]  ;;  %v1259_v44 = vor.u32 %v1492_v36, %v1258_v35 }
  0x62   : > { %986 = vmatpush.bf16.msra.mxu2 %v1403_v21  ;;  %v1459_v38 = vor.u32 %v1542_v32, %v1458_v31  ;;  %v1508_v39 = vld [vmem:[%s1825_s30 + $0xc4] sm:$0xf0]  ;;  %v1386_v40 = vld [vmem:[%s1825_s30 + $0x140] sm:$0xf]  ;;  %v1250_v47 = vld [vmem:[%s1825_s30 + $0x30] sm:$0xf] }
  0x63   : > { %999 = vmatpush.bf16.msra.mxu3 %v1467_v25  ;;  %v1524_v41 = vld [vmem:[%s1825_s30 + $0x144] sm:$0xf0]  ;;  %v1450_v42 = vld [vmem:[%s1825_s30 + $0x1c0] sm:$0xf]  ;;  %v1323_v45 = vor.u32 %v1508_v39, %v1322_v37  ;;  %v1490_v48 = vld [vmem:[%s1825_s30 + $0x34] sm:$0xf0] }
  0x64   : > { %v1540_v43 = vld [vmem:[%s1825_s30 + $0x1c4] sm:$0xf0]  ;;  %961 = vmatpush.bf16.msra.mxu0 %v1267_v29  ;;  %v1387_v46 = vor.u32 %v1524_v41, %v1386_v40  ;;  %v1314_v49 = vld [vmem:[%s1825_s30 + $0xb0] sm:$0xf]  ;;  %v1506_v51 = vld [vmem:[%s1825_s30 + $0xb4] sm:$0xf0]  ;;  %v1251_v56 = vor.u32 %v1490_v48, %v1250_v47 }
  0x65   : > { %974 = vmatpush.bf16.msra.mxu1 %v1331_v33  ;;  %v1451_v50 = vor.u32 %v1540_v43, %v1450_v42  ;;  %v1378_v52 = vld [vmem:[%s1825_s30 + $0x130] sm:$0xf]  ;;  %v1522_v53 = vld [vmem:[%s1825_s30 + $0x134] sm:$0xf0]  ;;  %v1315_v57 = vor.u32 %v1506_v51, %v1314_v49  ;;  %v1242_v59 = vld [vmem:[%s1825_s30 + $0x20] sm:$0xf] }
  0x66   : > { %987 = vmatpush.bf16.msra.mxu2 %v1395_v34  ;;  %v1442_v54 = vld [vmem:[%s1825_s30 + $0x1b0] sm:$0xf]  ;;  %v1538_v55 = vld [vmem:[%s1825_s30 + $0x1b4] sm:$0xf0]  ;;  %v1379_v58 = vor.u32 %v1522_v53, %v1378_v52  ;;  %v1488_v60 = vld [vmem:[%s1825_s30 + $0x24] sm:$0xf0] }
  0x67   : > { %1000 = vmatpush.bf16.msra.mxu3 %v1459_v38  ;;  %v1306_v61 = vld [vmem:[%s1825_s30 + $0xa0] sm:$0xf]  ;;  %v1443_v62 = vor.u32 %v1538_v55, %v1442_v54  ;;  %v1504_v63 = vld [vmem:[%s1825_s30 + $0xa4] sm:$0xf0]  ;;  %v1243_v4 = vor.u32 %v1488_v60, %v1242_v59  ;;  %v1234_v7 = vld [vmem:[%s1825_s30 + $0x10] sm:$0xf] }
  0x68   : > { %962 = vmatpush.bf16.msra.mxu0 %v1259_v44  ;;  %v1370_v0 = vld [vmem:[%s1825_s30 + $0x120] sm:$0xf]  ;;  %v1520_v1 = vld [vmem:[%s1825_s30 + $0x124] sm:$0xf0]  ;;  %v1307_v5 = vor.u32 %v1504_v63, %v1306_v61  ;;  %v1486_v8 = vld [vmem:[%s1825_s30 + $0x14] sm:$0xf0] }
  0x69   : > { %975 = vmatpush.bf16.msra.mxu1 %v1323_v45  ;;  %v1434_v2 = vld [vmem:[%s1825_s30 + $0x1a0] sm:$0xf]  ;;  %v1536_v3 = vld [vmem:[%s1825_s30 + $0x1a4] sm:$0xf0]  ;;  %v1371_v6 = vor.u32 %v1520_v1, %v1370_v0  ;;  %v1298_v9 = vld [vmem:[%s1825_s30 + $0x90] sm:$0xf]  ;;  %v1235_v16 = vor.u32 %v1486_v8, %v1234_v7 }
  0x6a   : > { %988 = vmatpush.bf16.msra.mxu2 %v1387_v46  ;;  %v1435_v10 = vor.u32 %v1536_v3, %v1434_v2  ;;  %v1502_v11 = vld [vmem:[%s1825_s30 + $0x94] sm:$0xf0]  ;;  %v1362_v12 = vld [vmem:[%s1825_s30 + $0x110] sm:$0xf]  ;;  %v1226_v17 = vld [vmem:[%s1825_s30] sm:$0xf] }
  0x6b   : > { %1001 = vmatpush.bf16.msra.mxu3 %v1451_v50  ;;  %v1518_v13 = vld [vmem:[%s1825_s30 + $0x114] sm:$0xf0]  ;;  %v1426_v14 = vld [vmem:[%s1825_s30 + $0x190] sm:$0xf]  ;;  %v1484_v18 = vld [vmem:[%s1825_s30 + $0x4] sm:$0xf0]  ;;  %v1299_v20 = vor.u32 %v1502_v11, %v1298_v9 }
  0x6c   : > { %963 = vmatpush.bf16.msra.mxu0 %v1251_v56  ;;  %v1534_v15 = vld [vmem:[%s1825_s30 + $0x194] sm:$0xf0]  ;;  %v1290_v19 = vld [vmem:[%s1825_s30 + $0x80] sm:$0xf]  ;;  %v1363_v21 = vor.u32 %v1518_v13, %v1362_v12  ;;  %v1500_v22 = vld [vmem:[%s1825_s30 + $0x84] sm:$0xf0]  ;;  %v1227_v32 = vor.u32 %v1484_v18, %v1226_v17 }
  0x6d   : > { %976 = vmatpush.bf16.msra.mxu1 %v1315_v57  ;;  %v1354_v23 = vld [vmem:[%s1825_s30 + $0x100] sm:$0xf]  ;;  %v1516_v24 = vld [vmem:[%s1825_s30 + $0x104] sm:$0xf0]  ;;  %v1427_v25 = vor.u32 %v1534_v15, %v1426_v14  ;;  %v1497_v28 = vld [vmem:[%s1825_s30 + $0x74] sm:$0xf]  ;;  %v1291_v37 = vor.u32 %v1500_v22, %v1290_v19 }
  0x6e   : > { %989 = vmatpush.bf16.msra.mxu2 %v1379_v58  ;;  %v1418_v26 = vld [vmem:[%s1825_s30 + $0x180] sm:$0xf]  ;;  %v1532_v27 = vld [vmem:[%s1825_s30 + $0x184] sm:$0xf0]  ;;  %v1284_v29 = vld [vmem:[%s1825_s30 + $0x78] sm:$0xf0]  ;;  %v1355_v38 = vor.u32 %v1516_v24, %v1354_v23 }
  0x6f   : > { %1002 = vmatpush.bf16.msra.mxu3 %v1443_v62  ;;  %v1513_v30 = vld [vmem:[%s1825_s30 + $0xf4] sm:$0xf]  ;;  %v560_v31 = vld [vmem:[%s1999_s0 + $0x8] sm:$0xff]  ;;  %v1348_v33 = vld [vmem:[%s1825_s30 + $0xf8] sm:$0xf0]  ;;  %v1419_v42 = vor.u32 %v1532_v27, %v1418_v26  ;;  %v1287_v43 = vor.u32 %v1497_v28, %v1284_v29  ;;  %s2010_s8 = smov (!%p537_p9, %s1221_s8), 7 }
  0x70   : > { %964 = vmatpush.bf16.msra.mxu0 %v1243_v4  ;;  %v1529_v34 = vld [vmem:[%s1825_s30 + $0x174] sm:$0xf]  ;;  %v1412_v35 = vld [vmem:[%s1825_s30 + $0x178] sm:$0xf0]  ;;  %v629_v36 = vunpack.c.l.b16 %v560_v31  ;;  %v630_v41 = vunpack.c.h.b16 %v560_v31  ;;  %v559_v44 = vld [vmem:[%s1999_s0] sm:$0xff]  ;;  %v1351_v45 = vor.u32 %v1513_v30, %v1348_v33  ;;  %s539_s11 = scalar_lea.vmem %s2001_s2, %s2010_s8  ;;  %s1223_s12 = sshll.u32 %s2010_s8, 2 }
  0x71   : > { %977 = vmatpush.bf16.msra.mxu1 %v1307_v5  ;;  %v1545_v39 = vld [vmem:[%s1825_s30 + $0x1f4] sm:$0xf]  ;;  %v1476_v40 = vld [vmem:[%s1825_s30 + $0x1f8] sm:$0xf0]  ;;  %v1415_v46 = vor.u32 %v1529_v34, %v1412_v35  ;;  %v1495_v47 = vld [vmem:[%s1825_s30 + $0x64] sm:$0xf]  ;;  %v627_v50 = vunpack.c.l.b16 %v559_v44  ;;  %v628_v51 = vunpack.c.h.b16 %v559_v44  ;;  %s549_s19 = scalar_lea.vmem %s2002_s3, %s1223_s12 }
  0x72   : > { %990 = vmatpush.bf16.msra.mxu2 %v1371_v6  ;;  %v1276_v48 = vld [vmem:[%s1825_s30 + $0x68] sm:$0xf0]  ;;  %v1511_v49 = vld [vmem:[%s1825_s30 + $0xe4] sm:$0xf]  ;;  %v1479_v52 = vor.u32 %v1545_v39, %v1476_v40  ;;  %v1911_v56 = vpack.c.b16 %v629_v36, %v629_v36  ;;  %v1915_v59 = vpack.c.b16 %v630_v41, %v630_v41  ;;  %v1493_v1 = vld [vmem:[%s1825_s30 + $0x54] sm:$0xf] }
  0x73   : > { %1003 = vmatpush.bf16.msra.mxu3 %v1435_v10  ;;  %v1340_v53 = vld [vmem:[%s1825_s30 + $0xe8] sm:$0xf0]  ;;  %v1527_v54 = vld [vmem:[%s1825_s30 + $0x164] sm:$0xf]  ;;  %v1917_v60 = vpack.c.b16 %v627_v50, %v627_v50  ;;  %v1279_v61 = vor.u32 %v1495_v47, %v1276_v48  ;;  %v1919_v62 = vpack.c.b16 %v628_v51, %v628_v51  ;;  %v1268_v2 = vld [vmem:[%s1825_s30 + $0x58] sm:$0xf0] }
  0x74   : > { %965 = vmatpush.bf16.msra.mxu0 %v1235_v16  ;;  %v1404_v55 = vld [vmem:[%s1825_s30 + $0x168] sm:$0xf0]  ;;  %v1543_v57 = vld [vmem:[%s1825_s30 + $0x1e4] sm:$0xf]  ;;  %v1343_v63 = vor.u32 %v1511_v49, %v1340_v53  ;;  %v1509_v3 = vld [vmem:[%s1825_s30 + $0xd4] sm:$0xf]  ;;  %v1271_v10 = vor.u32 %v1493_v1, %v1268_v2 }
  0x75   : > { %978 = vmatpush.bf16.msra.mxu1 %v1299_v20  ;;  %v1468_v58 = vld [vmem:[%s1825_s30 + $0x1e8] sm:$0xf0]  ;;  %v1407_v0 = vor.u32 %v1527_v54, %v1404_v55  ;;  %v1332_v5 = vld [vmem:[%s1825_s30 + $0xd8] sm:$0xf0]  ;;  %v1525_v6 = vld [vmem:[%s1825_s30 + $0x154] sm:$0xf] }
  0x76   : > { %991 = vmatpush.bf16.msra.mxu2 %v1363_v21  ;;  %v1471_v4 = vor.u32 %v1543_v57, %v1468_v58  ;;  %v1396_v7 = vld [vmem:[%s1825_s30 + $0x158] sm:$0xf0]  ;;  %v1541_v8 = vld [vmem:[%s1825_s30 + $0x1d4] sm:$0xf]  ;;  %v1335_v11 = vor.u32 %v1509_v3, %v1332_v5  ;;  %v1491_v13 = vld [vmem:[%s1825_s30 + $0x44] sm:$0xf] }
  0x77   : > { %1004 = vmatpush.bf16.msra.mxu3 %v1427_v25  ;;  %v1460_v9 = vld [vmem:[%s1825_s30 + $0x1d8] sm:$0xf0]  ;;  %v1399_v12 = vor.u32 %v1525_v6, %v1396_v7  ;;  %v1260_v14 = vld [vmem:[%s1825_s30 + $0x48] sm:$0xf0]  ;;  %v1507_v15 = vld [vmem:[%s1825_s30 + $0xc4] sm:$0xf] }
  0x78   : > { %966 = vmatpush.bf16.msra.mxu0 %v1227_v32  ;;  %v1463_v16 = vor.u32 %v1541_v8, %v1460_v9  ;;  %v1324_v17 = vld [vmem:[%s1825_s30 + $0xc8] sm:$0xf0]  ;;  %v1523_v18 = vld [vmem:[%s1825_s30 + $0x144] sm:$0xf]  ;;  %v1263_v22 = vor.u32 %v1491_v13, %v1260_v14  ;;  %v1489_v25 = vld [vmem:[%s1825_s30 + $0x34] sm:$0xf] }
  0x79   : > { %979 = vmatpush.bf16.msra.mxu1 %v1291_v37  ;;  %v1388_v19 = vld [vmem:[%s1825_s30 + $0x148] sm:$0xf0]  ;;  %v1539_v20 = vld [vmem:[%s1825_s30 + $0x1c4] sm:$0xf]  ;;  %v1327_v23 = vor.u32 %v1507_v15, %v1324_v17  ;;  %v1252_v26 = vld [vmem:[%s1825_s30 + $0x38] sm:$0xf0] }
  0x7a   : > { %992 = vmatpush.bf16.msra.mxu2 %v1355_v38  ;;  %v1452_v21 = vld [vmem:[%s1825_s30 + $0x1c8] sm:$0xf0]  ;;  %v1391_v24 = vor.u32 %v1523_v18, %v1388_v19  ;;  %v1505_v27 = vld [vmem:[%s1825_s30 + $0xb4] sm:$0xf]  ;;  %v1316_v29 = vld [vmem:[%s1825_s30 + $0xb8] sm:$0xf0]  ;;  %v1255_v34 = vor.u32 %v1489_v25, %v1252_v26 }
  0x7b   : > { %1005 = vmatpush.bf16.msra.mxu3 %v1419_v42  ;;  %967 = vmatmul.bf16.vlgmr.msra.gmra.mxu0 %v1917_v60  ;;  %v1455_v28 = vor.u32 %v1539_v20, %v1452_v21  ;;  %v1521_v30 = vld [vmem:[%s1825_s30 + $0x134] sm:$0xf]  ;;  %v1380_v31 = vld [vmem:[%s1825_s30 + $0x138] sm:$0xf0]  ;;  %v1319_v35 = vor.u32 %v1505_v27, %v1316_v29  ;;  %v1487_v37 = vld [vmem:[%s1825_s30 + $0x24] sm:$0xf] }
  0x7c   : > { %1011 = vmatpush.bf16.msrb.mxu0 %v1287_v43  ;;  %980 = vmatmul.bf16.vlgmr.msra.gmra.mxu1 %v1919_v62  ;;  %v1537_v32 = vld [vmem:[%s1825_s30 + $0x1b4] sm:$0xf]  ;;  %v1444_v33 = vld [vmem:[%s1825_s30 + $0x1b8] sm:$0xf0]  ;;  %v1383_v36 = vor.u32 %v1521_v30, %v1380_v31  ;;  %v1244_v38 = vld [vmem:[%s1825_s30 + $0x28] sm:$0xf0] }
  0x7d   : > { %1024 = vmatpush.bf16.msrb.mxu1 %v1351_v45  ;;  %993 = vmatmul.bf16.vlgmr.msra.gmra.mxu2 %v1911_v56  ;;  %v1503_v39 = vld [vmem:[%s1825_s30 + $0xa4] sm:$0xf]  ;;  %v1447_v40 = vor.u32 %v1537_v32, %v1444_v33  ;;  %v1308_v41 = vld [vmem:[%s1825_s30 + $0xa8] sm:$0xf0]  ;;  %v1485_v49 = vld [vmem:[%s1825_s30 + $0x14] sm:$0xf] }
  0x7e   : > { %1037 = vmatpush.bf16.msrb.mxu2 %v1415_v46  ;;  %1006 = vmatmul.bf16.vlgmr.msra.gmra.mxu3 %v1915_v59  ;;  %v1519_v42 = vld [vmem:[%s1825_s30 + $0x124] sm:$0xf]  ;;  %v1372_v43 = vld [vmem:[%s1825_s30 + $0x128] sm:$0xf0]  ;;  %v1247_v46 = vor.u32 %v1487_v37, %v1244_v38  ;;  %v1311_v47 = vor.u32 %v1503_v39, %v1308_v41  ;;  %v1236_v50 = vld [vmem:[%s1825_s30 + $0x18] sm:$0xf0] }
  0x7f   : > { %1050 = vmatpush.bf16.msrb.mxu3 %v1479_v52  ;;  %v1535_v44 = vld [vmem:[%s1825_s30 + $0x1a4] sm:$0xf]  ;;  %v1436_v45 = vld [vmem:[%s1825_s30 + $0x1a8] sm:$0xf0]  ;;  %v1375_v48 = vor.u32 %v1519_v42, %v1372_v43  ;;  %v1501_v51 = vld [vmem:[%s1825_s30 + $0x94] sm:$0xf] }
  0x80   : > { %1012 = vmatpush.bf16.msrb.mxu0 %v1279_v61  ;;  %v1439_v52 = vor.u32 %v1535_v44, %v1436_v45  ;;  %v1300_v53 = vld [vmem:[%s1825_s30 + $0x98] sm:$0xf0]  ;;  %v1517_v54 = vld [vmem:[%s1825_s30 + $0x114] sm:$0xf]  ;;  %v1239_v61 = vor.u32 %v1485_v49, %v1236_v50  ;;  %v1483_v1 = vld [vmem:[%s1825_s30 + $0x4] sm:$0xf] }
  0x81   : > { %1025 = vmatpush.bf16.msrb.mxu1 %v1343_v63  ;;  %v1364_v55 = vld [vmem:[%s1825_s30 + $0x118] sm:$0xf0]  ;;  %v1533_v57 = vld [vmem:[%s1825_s30 + $0x194] sm:$0xf]  ;;  %v1303_v63 = vor.u32 %v1501_v51, %v1300_v53  ;;  %v1228_v2 = vld [vmem:[%s1825_s30 + $0x8] sm:$0xf0] }
  0x82   : > { %1038 = vmatpush.bf16.msrb.mxu2 %v1407_v0  ;;  %v1428_v58 = vld [vmem:[%s1825_s30 + $0x198] sm:$0xf0]  ;;  %v1367_v0 = vor.u32 %v1517_v54, %v1364_v55  ;;  %v1499_v3 = vld [vmem:[%s1825_s30 + $0x84] sm:$0xf]  ;;  %v1292_v5 = vld [vmem:[%s1825_s30 + $0x88] sm:$0xf0] }
  0x83   : > { %1051 = vmatpush.bf16.msrb.mxu3 %v1471_v4  ;;  %v1431_v4 = vor.u32 %v1533_v57, %v1428_v58  ;;  %v1515_v6 = vld [vmem:[%s1825_s30 + $0x104] sm:$0xf]  ;;  %v1356_v7 = vld [vmem:[%s1825_s30 + $0x108] sm:$0xf0] }
  0x84   : > { %1013 = vmatpush.bf16.msrb.mxu0 %v1271_v10  ;;  %v1531_v8 = vld [vmem:[%s1825_s30 + $0x184] sm:$0xf]  ;;  %v1420_v9 = vld [vmem:[%s1825_s30 + $0x188] sm:$0xf0]  ;;  %v1231_v10 = vor.u32 %v1483_v1, %v1228_v2 }
  0x85   : > { %1026 = vmatpush.bf16.msrb.mxu1 %v1335_v11  ;;  %v1295_v11 = vor.u32 %v1499_v3, %v1292_v5  ;;  %v1423_v13 = vor.u32 %v1531_v8, %v1420_v9 }
  0x86   : > { %1039 = vmatpush.bf16.msrb.mxu2 %v1399_v12  ;;  %v1359_v12 = vor.u32 %v1515_v6, %v1356_v7 }
  0x87   : > { %1052 = vmatpush.bf16.msrb.mxu3 %v1463_v16 }
  0x88   : > { %1014 = vmatpush.bf16.msrb.mxu0 %v1263_v22 }
  0x89   : > { %1027 = vmatpush.bf16.msrb.mxu1 %v1327_v23 }
  0x8a   : > { %1040 = vmatpush.bf16.msrb.mxu2 %v1391_v24 }
  0x8b   : > { %1053 = vmatpush.bf16.msrb.mxu3 %v1455_v28 }
  0x8c   : > { %1015 = vmatpush.bf16.msrb.mxu0 %v1255_v34 }
  0x8d   : > { %1028 = vmatpush.bf16.msrb.mxu1 %v1319_v35 }
  0x8e   : > { %1041 = vmatpush.bf16.msrb.mxu2 %v1383_v36 }
  0x8f   : > { %1054 = vmatpush.bf16.msrb.mxu3 %v1447_v40 }
  0x90   : > { %1016 = vmatpush.bf16.msrb.mxu0 %v1247_v46 }
  0x91   : > { %1029 = vmatpush.bf16.msrb.mxu1 %v1311_v47 }
  0x92   : > { %1042 = vmatpush.bf16.msrb.mxu2 %v1375_v48 }
  0x93   : > { %1055 = vmatpush.bf16.msrb.mxu3 %v1439_v52 }
  0x94   : > { %1017 = vmatpush.bf16.msrb.mxu0 %v1239_v61 }
  0x95   : > { %1030 = vmatpush.bf16.msrb.mxu1 %v1303_v63 }
  0x96   : > { %1043 = vmatpush.bf16.msrb.mxu2 %v1367_v0 }
  0x97   : > { %1056 = vmatpush.bf16.msrb.mxu3 %v1431_v4 }
  0x98   : > { %1018 = vmatpush.bf16.msrb.mxu0 %v1231_v10 }
  0x99   : > { %1031 = vmatpush.bf16.msrb.mxu1 %v1295_v11 }
  0x9a   : > { %1044 = vmatpush.bf16.msrb.mxu2 %v1359_v12 }
  0x9b   : > { %1057 = vmatpush.bf16.msrb.mxu3 %v1423_v13  ;;  %1019 = vmatmul.bf16.vlgmr.msrb.gmra.mxu0 %v1917_v60 }
  0x9c   : > { %1032 = vmatmul.bf16.vlgmr.msrb.gmra.mxu1 %v1919_v62  ;;  %v1072_v62 = vld [vmem:[%s539_s11] sm:$0x3] }
  0x9d   : > { %1045 = vmatmul.bf16.vlgmr.msrb.gmra.mxu2 %v1911_v56  ;;  %v1074_v24 = vperm.slane %v1072_v62, 0  ;;  %v1075_v30 = vperm.slane %v1072_v62, 1 }
  0x9e   : > { %1058 = vmatmul.bf16.vlgmr.msrb.gmra.mxu3 %v1915_v59 }
  0xf8   : > { %v968_v14 = vpop.f32.mrf.mxu0 }
  0xf9   : > { %v981_v15 = vpop.f32.mrf.mxu1 }
  0xfa   : > { %v982_v22 = vadd.f32 %v981_v15, %v968_v14 }
 0x100   : > { %v994_v16 = vpop.f32.mrf.mxu2  ;;  %v970_v18 = vpop.f32.mrf.mxu0 }
 0x101   : > { %v1007_v17 = vpop.f32.mrf.mxu3  ;;  %v983_v19 = vpop.f32.mrf.mxu1  ;;  %v995_v60 = vadd.f32 %v994_v16, %v982_v22 }
 0x103   : > { %v1008_v23 = vadd.f32 %v1007_v17, %v995_v60 }
 0x105   : > { %v1078_v27 = vadd.f32 %v1074_v24, %v1008_v23 }
 0x107   : > { %v1082_v34 = vmul.f32 0.2, %v1078_v27  ;;  %vm1080_vm0 = vcmp.gt.f32.partialorder %v1078_v27, 0.0 }
 0x108   : > { %v996_v20 = vpop.f32.mrf.mxu2 }
 0x109   : > { %v1009_v21 = vpop.f32.mrf.mxu3  ;;  %v1084_v38 = vsel %vm1080_vm0, %v1078_v27, %v1082_v34 }
 0x118   : > { %v1020_v56 = vpop.f32.mrf.mxu0 }
 0x119   : > { %v1033_v59 = vpop.f32.mrf.mxu1 }
 0x11a   : > { %v1034_v25 = vadd.f32 %v1033_v59, %v1020_v56 }
 0x120   : > { %v1046_v26 = vpop.f32.mrf.mxu2  ;;  %v1022_v31 = vpop.f32.mrf.mxu0 }
 0x121   : > { %v1047_v28 = vadd.f32 %v1046_v26, %v1034_v25  ;;  %v1059_v29 = vpop.f32.mrf.mxu3  ;;  %v1035_v32 = vpop.f32.mrf.mxu1 }
 0x123   : > { %v1060_v33 = vadd.f32 %v1059_v29, %v1047_v28 }
 0x125   : > { %v1079_v35 = vadd.f32 %v1075_v30, %v1060_v33 }
 0x127   : > { %vm1081_vm1 = vcmp.gt.f32.partialorder %v1079_v35, 0.0  ;;  %v1083_v36 = vmul.f32 0.2, %v1079_v35 }
 0x128   : > { %v1048_v37 = vpop.f32.mrf.mxu2 }
 0x129   : > { %v1085_v39 = vsel %vm1081_vm1, %v1079_v35, %v1083_v36  ;;  %v1061_v40 = vpop.f32.mrf.mxu3 }
 0x12a   : > { %v1086_v41 = vpack.c.bf16 %v1085_v39, %v1084_v38 }
 0x12c   : > { %1087 = vst [vmem:[%s549_s19] sm:$0xff] %v1086_v41 }
 0x12d PF: > { %s13_s16 = sadd.s32 1, %s1625_s16   ;;  %s2003_s12 = smov %s1613_s13 }
 0x12e   : > { %p10_p10 = scmp.ge.s32.totalorder %s13_s16, 6   ;;  %s2004_s13 = smov %s1682_s20 }
 0x12f   : > { %s2005_s14 = smov %s1621_s15  ;;  %s2006_s15 = smov %s2008_s17 }
 0x130   :  { %12 = sbr.rel (!%p10_p10) target bundleno = 3 (0x3), region = 119 }

// kernel: forward.33
= control target key start
LH: loop header
LB: loop body
LE: loop exit
PB: predicated region body
PF: predicated region fallthrough
CT: control target
= control target key end

     0   :  { %s1258_s1 = inlined_call_operand.vmem [shape: bf16[1024,128], index: 1, kind: input, shape index: {}]   ;;  %s1259_s0 = inlined_call_operand.vmem [shape: bf16[8,1024], index: 0, kind: input, shape index: {}]   ;;  %s1260_s2 = inlined_call_operand.vmem [shape: f32[1,128], index: 2, kind: input, shape index: {}]   ;;  %s1261_s3 = inlined_call_operand.vmem [shape: f32[8,128], index: 3, kind: output, shape index: {}]  }
   0x1   :  { %v966_v0 = vld [vmem:[%s1258_s1 + $0x38] sm:$0xff]  ;;  %v965_v4 = vld [vmem:[%s1258_s1 + $0x30] sm:$0xff]  ;;  %v964_v8 = vld [vmem:[%s1258_s1 + $0x28] sm:$0xff] }
   0x2   :  { %v974_v1 = vld [vmem:[%s1258_s1 + $0x78] sm:$0xff]  ;;  %564 = vmatpush.bf16.msra.mxu0 %v966_v0  ;;  %v973_v5 = vld [vmem:[%s1258_s1 + $0x70] sm:$0xff]  ;;  %v972_v9 = vld [vmem:[%s1258_s1 + $0x68] sm:$0xff] }
   0x3   :  { %v982_v2 = vld [vmem:[%s1258_s1 + $0xb8] sm:$0xff]  ;;  %577 = vmatpush.bf16.msra.mxu1 %v974_v1  ;;  %v981_v6 = vld [vmem:[%s1258_s1 + $0xb0] sm:$0xff]  ;;  %v980_v10 = vld [vmem:[%s1258_s1 + $0xa8] sm:$0xff] }
   0x4   :  { %v990_v3 = vld [vmem:[%s1258_s1 + $0xf8] sm:$0xff]  ;;  %590 = vmatpush.bf16.msra.mxu2 %v982_v2  ;;  %v989_v7 = vld [vmem:[%s1258_s1 + $0xf0] sm:$0xff]  ;;  %v988_v11 = vld [vmem:[%s1258_s1 + $0xe8] sm:$0xff] }
   0x5   :  { %603 = vmatpush.bf16.msra.mxu3 %v990_v3  ;;  %v963_v12 = vld [vmem:[%s1258_s1 + $0x20] sm:$0xff]  ;;  %v962_v16 = vld [vmem:[%s1258_s1 + $0x18] sm:$0xff]  ;;  %v961_v20 = vld [vmem:[%s1258_s1 + $0x10] sm:$0xff] }
   0x6   :  { %565 = vmatpush.bf16.msra.mxu0 %v965_v4  ;;  %v971_v13 = vld [vmem:[%s1258_s1 + $0x60] sm:$0xff]  ;;  %v970_v17 = vld [vmem:[%s1258_s1 + $0x58] sm:$0xff]  ;;  %v969_v21 = vld [vmem:[%s1258_s1 + $0x50] sm:$0xff] }
   0x7   :  { %578 = vmatpush.bf16.msra.mxu1 %v973_v5  ;;  %v979_v14 = vld [vmem:[%s1258_s1 + $0xa0] sm:$0xff]  ;;  %v978_v18 = vld [vmem:[%s1258_s1 + $0x98] sm:$0xff]  ;;  %v977_v22 = vld [vmem:[%s1258_s1 + $0x90] sm:$0xff] }
   0x8   :  { %591 = vmatpush.bf16.msra.mxu2 %v981_v6  ;;  %v987_v15 = vld [vmem:[%s1258_s1 + $0xe0] sm:$0xff]  ;;  %v986_v19 = vld [vmem:[%s1258_s1 + $0xd8] sm:$0xff]  ;;  %v985_v23 = vld [vmem:[%s1258_s1 + $0xd0] sm:$0xff] }
   0x9   :  { %604 = vmatpush.bf16.msra.mxu3 %v989_v7  ;;  %v960_v24 = vld [vmem:[%s1258_s1 + $0x8] sm:$0xff]  ;;  %v20_v29 = vld [vmem:[%s1259_s0] sm:$0xff]  ;;  %v998_v38 = vld [vmem:[%s1258_s1 + $0x138] sm:$0xff] }
   0xa   :  { %566 = vmatpush.bf16.msra.mxu0 %v964_v8  ;;  %v968_v25 = vld [vmem:[%s1258_s1 + $0x48] sm:$0xff]  ;;  %v959_v30 = vld [vmem:[%s1258_s1] sm:$0xff]  ;;  %v156_v33 = vunpack.c.l.b16 %v20_v29  ;;  %v157_v37 = vunpack.c.h.b16 %v20_v29  ;;  %v1006_v39 = vld [vmem:[%s1258_s1 + $0x178] sm:$0xff] }
   0xb   :  { %579 = vmatpush.bf16.msra.mxu1 %v972_v9  ;;  %v976_v26 = vld [vmem:[%s1258_s1 + $0x88] sm:$0xff]  ;;  %v967_v31 = vld [vmem:[%s1258_s1 + $0x40] sm:$0xff]  ;;  %v1014_v40 = vld [vmem:[%s1258_s1 + $0x1b8] sm:$0xff] }
   0xc   :  { %592 = vmatpush.bf16.msra.mxu2 %v980_v10  ;;  %v984_v27 = vld [vmem:[%s1258_s1 + $0xc8] sm:$0xff]  ;;  %v975_v34 = vld [vmem:[%s1258_s1 + $0x80] sm:$0xff]  ;;  %v1022_v41 = vld [vmem:[%s1258_s1 + $0x1f8] sm:$0xff]  ;;  %v164_v43 = vpack.c.b16 %v156_v33, %v156_v33  ;;  %v165_v45 = vpack.c.b16 %v157_v37, %v157_v37 }
   0xd   :  { %605 = vmatpush.bf16.msra.mxu3 %v988_v11  ;;  %v21_v28 = vld [vmem:[%s1259_s0 + $0x8] sm:$0xff]  ;;  %v983_v35 = vld [vmem:[%s1258_s1 + $0xc0] sm:$0xff]  ;;  %v997_v46 = vld [vmem:[%s1258_s1 + $0x130] sm:$0xff] }
   0xe   :  { %567 = vmatpush.bf16.msra.mxu0 %v963_v12  ;;  %v158_v32 = vunpack.c.l.b16 %v21_v28  ;;  %v159_v36 = vunpack.c.h.b16 %v21_v28  ;;  %v1005_v47 = vld [vmem:[%s1258_s1 + $0x170] sm:$0xff]  ;;  %v996_v50 = vld [vmem:[%s1258_s1 + $0x128] sm:$0xff]  ;;  %v995_v54 = vld [vmem:[%s1258_s1 + $0x120] sm:$0xff] }
   0xf   :  { %580 = vmatpush.bf16.msra.mxu1 %v971_v13  ;;  %v1013_v48 = vld [vmem:[%s1258_s1 + $0x1b0] sm:$0xff]  ;;  %v1004_v51 = vld [vmem:[%s1258_s1 + $0x168] sm:$0xff]  ;;  %v1003_v55 = vld [vmem:[%s1258_s1 + $0x160] sm:$0xff] }
  0x10   :  { %593 = vmatpush.bf16.msra.mxu2 %v979_v14  ;;  %v166_v42 = vpack.c.b16 %v158_v32, %v158_v32  ;;  %v167_v44 = vpack.c.b16 %v159_v36, %v159_v36  ;;  %v1021_v49 = vld [vmem:[%s1258_s1 + $0x1f0] sm:$0xff]  ;;  %v1012_v52 = vld [vmem:[%s1258_s1 + $0x1a8] sm:$0xff]  ;;  %v1011_v56 = vld [vmem:[%s1258_s1 + $0x1a0] sm:$0xff] }
  0x11   :  { %606 = vmatpush.bf16.msra.mxu3 %v987_v15  ;;  %v1020_v53 = vld [vmem:[%s1258_s1 + $0x1e8] sm:$0xff]  ;;  %v1019_v57 = vld [vmem:[%s1258_s1 + $0x1e0] sm:$0xff]  ;;  %v994_v58 = vld [vmem:[%s1258_s1 + $0x118] sm:$0xff] }
  0x12   :  { %568 = vmatpush.bf16.msra.mxu0 %v962_v16  ;;  %v1002_v59 = vld [vmem:[%s1258_s1 + $0x158] sm:$0xff]  ;;  %v993_v62 = vld [vmem:[%s1258_s1 + $0x110] sm:$0xff]  ;;  %v992_v2 = vld [vmem:[%s1258_s1 + $0x108] sm:$0xff] }
  0x13   :  { %581 = vmatpush.bf16.msra.mxu1 %v970_v17  ;;  %v1010_v60 = vld [vmem:[%s1258_s1 + $0x198] sm:$0xff]  ;;  %v1001_v63 = vld [vmem:[%s1258_s1 + $0x150] sm:$0xff]  ;;  %v1000_v3 = vld [vmem:[%s1258_s1 + $0x148] sm:$0xff] }
  0x14   :  { %594 = vmatpush.bf16.msra.mxu2 %v978_v18  ;;  %v1018_v61 = vld [vmem:[%s1258_s1 + $0x1d8] sm:$0xff]  ;;  %v1009_v0 = vld [vmem:[%s1258_s1 + $0x190] sm:$0xff]  ;;  %v1008_v5 = vld [vmem:[%s1258_s1 + $0x188] sm:$0xff] }
  0x15   :  { %607 = vmatpush.bf16.msra.mxu3 %v986_v19  ;;  %v1017_v1 = vld [vmem:[%s1258_s1 + $0x1d0] sm:$0xff]  ;;  %v1016_v6 = vld [vmem:[%s1258_s1 + $0x1c8] sm:$0xff]  ;;  %v23_v7 = vld [vmem:[%s1259_s0 + $0x18] sm:$0xff] }
  0x16   :  { %569 = vmatpush.bf16.msra.mxu0 %v961_v20  ;;  %v22_v4 = vld [vmem:[%s1259_s0 + $0x10] sm:$0xff]  ;;  %v991_v10 = vld [vmem:[%s1258_s1 + $0x100] sm:$0xff]  ;;  %v162_v12 = vunpack.c.l.b16 %v23_v7  ;;  %v163_v13 = vunpack.c.h.b16 %v23_v7 }
  0x17   :  { %582 = vmatpush.bf16.msra.mxu1 %v969_v21  ;;  %v160_v8 = vunpack.c.l.b16 %v22_v4  ;;  %v161_v9 = vunpack.c.h.b16 %v22_v4  ;;  %v999_v11 = vld [vmem:[%s1258_s1 + $0x140] sm:$0xff] }
  0x18   :  { %595 = vmatpush.bf16.msra.mxu2 %v977_v22  ;;  %v1007_v14 = vld [vmem:[%s1258_s1 + $0x180] sm:$0xff]  ;;  %v170_v18 = vpack.c.b16 %v162_v12, %v162_v12  ;;  %v171_v19 = vpack.c.b16 %v163_v13, %v163_v13 }
  0x19   :  { %608 = vmatpush.bf16.msra.mxu3 %v985_v23  ;;  %v1015_v15 = vld [vmem:[%s1258_s1 + $0x1c0] sm:$0xff]  ;;  %v168_v16 = vpack.c.b16 %v160_v8, %v160_v8  ;;  %v169_v17 = vpack.c.b16 %v161_v9, %v161_v9 }
  0x1a   :  { %570 = vmatpush.bf16.msra.mxu0 %v960_v24 }
  0x1b   :  { %583 = vmatpush.bf16.msra.mxu1 %v968_v25 }
  0x1c   :  { %596 = vmatpush.bf16.msra.mxu2 %v976_v26 }
  0x1d   :  { %609 = vmatpush.bf16.msra.mxu3 %v984_v27 }
  0x1e   :  { %571 = vmatpush.bf16.msra.mxu0 %v959_v30 }
  0x1f   :  { %584 = vmatpush.bf16.msra.mxu1 %v967_v31 }
  0x20   :  { %597 = vmatpush.bf16.msra.mxu2 %v975_v34 }
  0x21   :  { %610 = vmatpush.bf16.msra.mxu3 %v983_v35  ;;  %572 = vmatmul.bf16.vlgmr.msra.gmra.mxu0 %v164_v43 }
  0x22   :  { %616 = vmatpush.bf16.msrb.mxu0 %v998_v38  ;;  %585 = vmatmul.bf16.vlgmr.msra.gmra.mxu1 %v165_v45  ;;  %v1023_v38 = vld [vmem:[%s1260_s2] ss:$0 sm:$0xff] }
  0x23   :  { %629 = vmatpush.bf16.msrb.mxu1 %v1006_v39  ;;  %598 = vmatmul.bf16.vlgmr.msra.gmra.mxu2 %v166_v42 }
  0x24   :  { %642 = vmatpush.bf16.msrb.mxu2 %v1014_v40  ;;  %611 = vmatmul.bf16.vlgmr.msra.gmra.mxu3 %v167_v44 }
  0x25   :  { %655 = vmatpush.bf16.msrb.mxu3 %v1022_v41 }
  0x26   :  { %617 = vmatpush.bf16.msrb.mxu0 %v997_v46 }
  0x27   :  { %630 = vmatpush.bf16.msrb.mxu1 %v1005_v47 }
  0x28   :  { %643 = vmatpush.bf16.msrb.mxu2 %v1013_v48 }
  0x29   :  { %656 = vmatpush.bf16.msrb.mxu3 %v1021_v49 }
  0x2a   :  { %618 = vmatpush.bf16.msrb.mxu0 %v996_v50 }
  0x2b   :  { %631 = vmatpush.bf16.msrb.mxu1 %v1004_v51 }
  0x2c   :  { %644 = vmatpush.bf16.msrb.mxu2 %v1012_v52 }
  0x2d   :  { %657 = vmatpush.bf16.msrb.mxu3 %v1020_v53 }
  0x2e   :  { %619 = vmatpush.bf16.msrb.mxu0 %v995_v54 }
  0x2f   :  { %632 = vmatpush.bf16.msrb.mxu1 %v1003_v55 }
  0x30   :  { %645 = vmatpush.bf16.msrb.mxu2 %v1011_v56 }
  0x31   :  { %658 = vmatpush.bf16.msrb.mxu3 %v1019_v57 }
  0x32   :  { %620 = vmatpush.bf16.msrb.mxu0 %v994_v58 }
  0x33   :  { %633 = vmatpush.bf16.msrb.mxu1 %v1002_v59 }
  0x34   :  { %646 = vmatpush.bf16.msrb.mxu2 %v1010_v60 }
  0x35   :  { %659 = vmatpush.bf16.msrb.mxu3 %v1018_v61 }
  0x36   :  { %621 = vmatpush.bf16.msrb.mxu0 %v993_v62 }
  0x37   :  { %634 = vmatpush.bf16.msrb.mxu1 %v1001_v63 }
  0x38   :  { %647 = vmatpush.bf16.msrb.mxu2 %v1009_v0 }
  0x39   :  { %660 = vmatpush.bf16.msrb.mxu3 %v1017_v1 }
  0x3a   :  { %622 = vmatpush.bf16.msrb.mxu0 %v992_v2 }
  0x3b   :  { %635 = vmatpush.bf16.msrb.mxu1 %v1000_v3 }
  0x3c   :  { %648 = vmatpush.bf16.msrb.mxu2 %v1008_v5 }
  0x3d   :  { %661 = vmatpush.bf16.msrb.mxu3 %v1016_v6 }
  0x3e   :  { %623 = vmatpush.bf16.msrb.mxu0 %v991_v10 }
  0x3f   :  { %636 = vmatpush.bf16.msrb.mxu1 %v999_v11 }
  0x40   :  { %649 = vmatpush.bf16.msrb.mxu2 %v1007_v14 }
  0x41   :  { %662 = vmatpush.bf16.msrb.mxu3 %v1015_v15  ;;  %624 = vmatmul.bf16.vlgmr.msrb.gmra.mxu0 %v168_v16 }
  0x42   :  { %637 = vmatmul.bf16.vlgmr.msrb.gmra.mxu1 %v169_v17 }
  0x43   :  { %650 = vmatmul.bf16.vlgmr.msrb.gmra.mxu2 %v170_v18 }
  0x44   :  { %663 = vmatmul.bf16.vlgmr.msrb.gmra.mxu3 %v171_v19 }
  0x9e   :  { %v573_v20 = vpop.f32.mrf.mxu0 }
  0x9f   :  { %v586_v21 = vpop.f32.mrf.mxu1 }
  0xa0   :  { %v587_v28 = vadd.f32 %v586_v21, %v573_v20 }
  0xa6   :  { %v599_v22 = vpop.f32.mrf.mxu2  ;;  %v575_v24 = vpop.f32.mrf.mxu0 }
  0xa7   :  { %v612_v23 = vpop.f32.mrf.mxu3  ;;  %v588_v25 = vpop.f32.mrf.mxu1  ;;  %v600_v29 = vadd.f32 %v599_v22, %v587_v28 }
  0xa9   :  { %v613_v30 = vadd.f32 %v612_v23, %v600_v29 }
  0xae   :  { %v601_v26 = vpop.f32.mrf.mxu2 }
  0xaf   :  { %v614_v27 = vpop.f32.mrf.mxu3 }
  0xbe   :  { %v625_v31 = vpop.f32.mrf.mxu0 }
  0xbf   :  { %v638_v32 = vpop.f32.mrf.mxu1  ;;  %v626_v33 = vadd.f32 %v625_v31, %v613_v30 }
  0xc1   :  { %v639_v34 = vadd.f32 %v638_v32, %v626_v33 }
  0xc6   :  { %v651_v35 = vpop.f32.mrf.mxu2  ;;  %v627_v39 = vpop.f32.mrf.mxu0 }
  0xc7   :  { %v664_v36 = vpop.f32.mrf.mxu3  ;;  %v652_v37 = vadd.f32 %v651_v35, %v639_v34  ;;  %v640_v40 = vpop.f32.mrf.mxu1 }
  0xc9   :  { %v665_v41 = vadd.f32 %v664_v36, %v652_v37 }
  0xcb   :  { %v678_v42 = vadd.f32 %v1023_v38, %v665_v41 }
  0xcd   :  { %v679_v43 = vsub.f32 0.0, %v678_v42 }
  0xce   :  { %v653_v44 = vpop.f32.mrf.mxu2 }
  0xcf   :  { %v666_v45 = vpop.f32.mrf.mxu3  ;;  %v680_v46 = vmul.f32 1.442695, %v679_v43 }
  0xd1   :  { %1024 = vpow2.f32 %v680_v46 }
  0xd7   :  { %v1025_v47 = vpop.eup %1024 }
  0xd8   :  { %v682_v48 = vadd.f32 1.0, %v1025_v47 }
  0xda   :  { %1026 = vrcp.f32 %v682_v48  ;;  %v694_v52 = vand.u32 2147483648, %v682_v48  ;;  %v692_v54 = vand.u32 2147483647, %v682_v48  ;;  %vm688_vm1 = vweird.f32 %v682_v48 }
  0xdc   :  { %v695_v56 = vor.u32 1.1754944e-38, %v694_v52  ;;  %vm693_vm3 = vcmp.eq.f32.partialorder %v692_v54, 8.507059e+37 }
  0xe0   :  { %v1027_v49 = vpop.eup %1026 }
  0xe1   :  { %v684_v50 = vmul.f32 %v1027_v49, %v682_v48  ;;  %vm689_vm0 = vweird.f32 %v1027_v49 }
  0xe2   :  { %vm690_vm2 = vmor %vm688_vm1, %vm689_vm0 }
  0xe3   :  { %v685_v51 = vsub.f32 1.0, %v684_v50 }
  0xe5   :  { %v686_v53 = vmul.f32 %v1027_v49, %v685_v51 }
  0xe7   :  { %v687_v55 = vadd.f32 %v1027_v49, %v686_v53 }
  0xe9   :  { %v691_v57 = vsel %vm690_vm2, %v1027_v49, %v687_v55 }
  0xea   :  { %v696_v58 = vsel %vm693_vm3, %v695_v56, %v691_v57 }
  0xeb   :  { %698 = vst [vmem:[%s1261_s3] sm:$0xff] %v696_v58 }

</bundles_post_ra>
